<compile_context>
chip_gen: v7x
topology: tpu7x:2x2x1
jax: 0.10.0
libtpu: 0.0.40
codegen_flags: <defaults>
</compile_context>

<pallas_src>
import numpy as np

import jax
import jax.numpy as jnp
from jax.experimental import pallas as pl
from jax.experimental.pallas import tpu as pltpu


# ----------------------------- static sizes --------------------------------
B, H, W = 2, 7, 7
C1, C2 = 32, 64
HID, OUT = 1000, 10

NPIX = B * H * W          # 98 output pixels (rows, channel-last)
MPAD = 104                # 98 padded to a multiple of 8 (sublane)
C2_PAD = 128              # conv2 out channels padded to a full lane
MB = 8                    # fc batch rows padded to a sublane multiple
HID_PAD = 1024            # fc1 hidden padded to a multiple of the N tile
OUT_PAD = 128             # fc2 logits padded to a full lane
TN = 512                  # fc1 N tile (streams the bf16 weight in 3.2 MB chunks)
K_FC1 = H * W * C2        # 3136


# ---------------------------------------------------------------------------
# Kernel 1: conv1 + ReLU + conv2 + ReLU, fully VMEM resident.
#   conv2(y1)[r, :] = sum_k (shift_k @ y1) @ W2_k   (k = 3x3 tap, shift_k is a static
#   98x98 select/mask matrix padded to 104x104 -> pure matmuls, no reshapes/rolls).
# ---------------------------------------------------------------------------
def _conv_kernel(p1_ref, w1_ref, b1_ref, shift_ref, w2_ref, b2_ref, o_ref):
    # conv1 + relu (im2col'd input @ flattened weight)
    y1 = jnp.dot(p1_ref[...], w1_ref[...], preferred_element_type=jnp.float32)
    y1 = jnp.maximum(y1 + b1_ref[...], 0.0)                       # (MPAD, 32)

    # conv2 + relu via 9 shifted matmuls
    acc = jnp.zeros((MPAD, C2_PAD), jnp.float32)
    for k in range(9):
        patch = jnp.dot(shift_ref[k], y1, preferred_element_type=jnp.float32)   # (MPAD, 32)
        acc = acc + jnp.dot(patch, w2_ref[k], preferred_element_type=jnp.float32)
    o_ref[...] = jnp.maximum(acc + b2_ref[...], 0.0).astype(o_ref.dtype)        # (MPAD, 128) bf16


def conv_forward(p1, w1, b1, shift, w2, b2):
    flops = 2 * MPAD * 9 * C1 + 9 * (2 * MPAD * MPAD * C1 + 2 * MPAD * C1 * C2_PAD)
    bytes_accessed = (MPAD * 9 * 4 + 9 * C1 * 4 + 9 * MPAD * MPAD * 4
                      + 9 * C1 * C2_PAD * 4 + (C1 + C2_PAD) * 4 + MPAD * C2_PAD * 2)
    return pl.pallas_call(
        _conv_kernel,
        out_shape=jax.ShapeDtypeStruct((MPAD, C2_PAD), jnp.bfloat16),
        grid=(1,),
        in_specs=[
            pl.BlockSpec((MPAD, 9), lambda i: (0, 0)),
            pl.BlockSpec((9, C1), lambda i: (0, 0)),
            pl.BlockSpec((1, C1), lambda i: (0, 0)),
            pl.BlockSpec((9, MPAD, MPAD), lambda i: (0, 0, 0)),
            pl.BlockSpec((9, C1, C2_PAD), lambda i: (0, 0, 0)),
            pl.BlockSpec((1, C2_PAD), lambda i: (0, 0)),
        ],
        out_specs=pl.BlockSpec((MPAD, C2_PAD), lambda i: (0, 0)),
        compiler_params=pltpu.CompilerParams(dimension_semantics=("arbitrary",)),
        cost_estimate=pl.CostEstimate(
            flops=int(flops), transcendentals=0, bytes_accessed=int(bytes_accessed)),
    )(p1, w1, b1, shift, w2, b2)


# ---------------------------------------------------------------------------
# Kernel 2: fc1 + ReLU + fc2 + bias.
#   Grid tiles fc1's output dim (1024 -> 2 x 512); the bf16 fc1 weight streams tile by
#   tile (pipelined DMA), fc2's contribution is accumulated into the resident output.
# ---------------------------------------------------------------------------
def _fc_kernel(x_ref, w1_ref, b1_ref, w2_ref, b2_ref, o_ref):
    j = pl.program_id(0)
    h = jnp.dot(x_ref[...], w1_ref[...], preferred_element_type=jnp.float32)  # (MB, TN) f32
    h = jnp.maximum(h + b1_ref[...], 0.0).astype(jnp.bfloat16)
    part = jnp.dot(h, w2_ref[...], preferred_element_type=jnp.float32)        # (MB, OUT_PAD)

    @pl.when(j == 0)
    def _():
        o_ref[...] = jnp.broadcast_to(b2_ref[...], o_ref.shape)

    o_ref[...] += part


def fc_forward(x_bf16, w1, b1, w2, b2):
    n_tiles = HID_PAD // TN
    flops = 2 * MB * K_FC1 * HID_PAD + 2 * MB * HID_PAD * OUT_PAD
    bytes_accessed = (K_FC1 * HID_PAD * 2        # fc1 weight (bf16) -- dominant
                      + HID_PAD * OUT_PAD * 2    # fc2 weight (bf16)
                      + MB * K_FC1 * 2           # activations
                      + (HID_PAD + OUT_PAD) * 4  # biases
                      + MB * OUT_PAD * 4)        # output
    return pl.pallas_call(
        _fc_kernel,
        out_shape=jax.ShapeDtypeStruct((MB, OUT_PAD), jnp.float32),
        grid=(n_tiles,),
        in_specs=[
            pl.BlockSpec((MB, K_FC1), lambda j: (0, 0)),     # activations (resident)
            pl.BlockSpec((K_FC1, TN), lambda j: (0, j)),     # fc1 weight tile (streamed)
            pl.BlockSpec((1, TN), lambda j: (0, j)),         # fc1 bias tile
            pl.BlockSpec((TN, OUT_PAD), lambda j: (j, 0)),   # fc2 weight tile
            pl.BlockSpec((1, OUT_PAD), lambda j: (0, 0)),    # fc2 bias (resident)
        ],
        out_specs=pl.BlockSpec((MB, OUT_PAD), lambda j: (0, 0)),
        compiler_params=pltpu.CompilerParams(
            dimension_semantics=("arbitrary",),
            vmem_limit_bytes=16 << 20,
        ),
        cost_estimate=pl.CostEstimate(
            flops=int(flops), transcendentals=0, bytes_accessed=int(bytes_accessed)),
    )(x_bf16, w1, b1, w2, b2)


# ---------------------------------------------------------------------------
# One-time host-side preparation (weights pre-transposed / permuted / padded).
# ---------------------------------------------------------------------------
def _build_shift_mats():
    """shift[k] @ y gathers, for every output pixel row, the input pixel of 3x3 tap k
    (zero at image borders / padded rows). Static, built once."""
    m = np.zeros((9, MPAD, MPAD), np.float32)
    for kh in range(3):
        for kw in range(3):
            t = kh * 3 + kw
            for b in range(B):
                for i in range(H):
                    for j in range(W):
                        ii, jj = i + kh - 1, j + kw - 1
                        if 0 <= ii < H and 0 <= jj < W:
                            m[t, b * H * W + i * W + j, b * H * W + ii * W + jj] = 1.0
    return jnp.asarray(m)


def init_params(key):
    ks = jax.random.split(key, 8)

    def rnd(k, shape, scale=0.05):
        return jax.random.normal(k, shape, jnp.float32) * scale

    return {
        "conv1_w": rnd(ks[0], (C1, 1, 3, 3)),
        "conv1_b": rnd(ks[1], (C1,)),
        "conv2_w": rnd(ks[2], (C2, C1, 3, 3)),
        "conv2_b": rnd(ks[3], (C2,)),
        "fc1_w": rnd(ks[4], (HID, K_FC1)),
        "fc1_b": rnd(ks[5], (HID,)),
        "fc2_w": rnd(ks[6], (OUT, HID)),
        "fc2_b": rnd(ks[7], (OUT,)),
    }


def prepare_params(p):
    """Pre-transpose/permute/pad all weights once (not per forward)."""
    w1 = p["conv1_w"].reshape(C1, 9).T                                    # (9, 32)
    b1 = p["conv1_b"].reshape(1, C1)

    w2 = p["conv2_w"].transpose(2, 3, 1, 0).reshape(9, C1, C2)            # tap-major
    w2 = jnp.pad(w2, ((0, 0), (0, 0), (0, C2_PAD - C2)))                  # (9, 32, 128)
    b2 = jnp.pad(p["conv2_b"].reshape(1, C2), ((0, 0), (0, C2_PAD - C2)))

    # Fold PyTorch's NCHW .view(-1, 7*7*64) flatten into fc1's rows so activations
    # can stay channel-last ((i, j, c) order) with no activation transposes.
    w3 = p["fc1_w"].reshape(HID, C2, H, W).transpose(2, 3, 1, 0).reshape(K_FC1, HID)
    w3 = jnp.pad(w3, ((0, 0), (0, HID_PAD - HID))).astype(jnp.bfloat16)   # (3136, 1024) bf16
    b3 = jnp.pad(p["fc1_b"].reshape(1, HID), ((0, 0), (0, HID_PAD - HID)))

    w4 = jnp.pad(p["fc2_w"].T, ((0, HID_PAD - HID), (0, OUT_PAD - OUT)))  # (1024, 128)
    w4 = w4.astype(jnp.bfloat16)
    b4 = jnp.pad(p["fc2_b"].reshape(1, OUT), ((0, 0), (0, OUT_PAD - OUT)))

    return {"w1": w1, "b1": b1, "w2": w2, "b2": b2,
            "w3": w3, "b3": b3, "w4": w4, "b4": b4,
            "shift": _build_shift_mats()}


# im2col only for conv1 (tiny (2,1,7,7) input); column order matches PyTorch's
# (Cin, kh, kw) weight flatten. conv2's im2col happens inside the kernel via shift mats.
def im2col(x_nchw, k=3, pad=1):
    Bn, C, Hn, Wn = x_nchw.shape
    xp = jnp.pad(x_nchw, ((0, 0), (0, 0), (pad, pad), (pad, pad)))
    cols = [xp[:, :, kh:kh + Hn, kw:kw + Wn] for kh in range(k) for kw in range(k)]
    patches = jnp.stack(cols, axis=2)            # (B, C, 9, H, W)
    patches = patches.transpose(0, 3, 4, 1, 2)   # (B, H, W, C, 9)
    return patches.reshape(Bn * Hn * Wn, C * k * k)


# ---------------------------------------------------------------------------
# Forward pass (matches PyTorch Net.forward semantics).
# ---------------------------------------------------------------------------
@jax.jit
def net_forward(pp, x):
    # x: (B, 1, 7, 7) NCHW float32
    p1 = im2col(x)                                       # (98, 9)
    p1 = jnp.pad(p1, ((0, MPAD - NPIX), (0, 0)))         # (104, 9), sublane aligned

    y2 = conv_forward(p1, pp["w1"], pp["b1"], pp["shift"], pp["w2"], pp["b2"])

    # channel-last flatten (the NCHW order is already folded into pp["w3"]); bf16 already
    flat = y2[:NPIX, :C2].reshape(B, K_FC1)              # (2, 3136) bf16
    flat = jnp.pad(flat, ((0, MB - B), (0, 0)))

    out = fc_forward(flat, pp["w3"], pp["b3"], pp["w4"], pp["b4"])
    return out[:B, :OUT]


# ---------------------------------------------------------------------------
# Pure-JAX reference (correctness check only).
# ---------------------------------------------------------------------------
def ref_forward(params, x):
    def conv(h, w, b):
        y = jax.lax.conv_general_dilated(
            h, w, window_strides=(1, 1), padding=((1, 1), (1, 1)),
            dimension_numbers=("NCHW", "OIHW", "NCHW"))
        return y + b[None, :, None, None]

    y = jax.nn.relu(conv(x, params["conv1_w"], params["conv1_b"]))
    y = jax.nn.relu(conv(y, params["conv2_w"], params["conv2_b"]))
    y = y.reshape(y.shape[0], -1)
    y = jax.nn.relu(y @ params["fc1_w"].T + params["fc1_b"])
    return y @ params["fc2_w"].T + params["fc2_b"]


if __name__ == "__main__":
    key = jax.random.PRNGKey(0)
    kp, kx = jax.random.split(key)
    params = init_params(kp)
    pp = prepare_params(params)                          # one-time weight packing
    x = jax.random.normal(kx, (B, 1, H, W), jnp.float32)

    out = jax.block_until_ready(net_forward(pp, x))
    assert out.shape == (B, OUT)

    ref = ref_forward(params, x)
    np.testing.assert_allclose(np.asarray(out), np.asarray(ref), rtol=5e-2, atol=5e-2)

    print("KERNEL_OK")
</pallas_src>

<mosaic_0001>
module attributes {stable_mosaic.version = 11 : i64} {
  func.func @_conv_kernel(%arg0: i32, %arg1: memref<104x9xf32, #tpu.memory_space<vmem>>, %arg2: memref<9x32xf32, #tpu.memory_space<vmem>>, %arg3: memref<1x32xf32, #tpu.memory_space<vmem>>, %arg4: memref<9x104x104xf32, #tpu.memory_space<vmem>>, %arg5: memref<9x32x128xf32, #tpu.memory_space<vmem>>, %arg6: memref<1x128xf32, #tpu.memory_space<vmem>>, %arg7: memref<104x128xbf16, #tpu.memory_space<vmem>>) attributes {dimension_semantics = [#tpu.dimension_semantics<arbitrary>], iteration_bounds = array<i64: 1>, scalar_prefetch = 0 : i64, scratch_operands = 0 : i64, tpu.core_type = #tpu.core_type<tc>, window_params = [{pipeline_mode = #tpu.pipeline_mode<synchronous>, transform_indices = @transform_0, window_bounds = array<i64: 104, 9>}, {pipeline_mode = #tpu.pipeline_mode<synchronous>, transform_indices = @transform_1, window_bounds = array<i64: 9, 32>}, {pipeline_mode = #tpu.pipeline_mode<synchronous>, transform_indices = @transform_2, window_bounds = array<i64: 1, 32>}, {pipeline_mode = #tpu.pipeline_mode<synchronous>, transform_indices = @transform_3, window_bounds = array<i64: 9, 104, 104>}, {pipeline_mode = #tpu.pipeline_mode<synchronous>, transform_indices = @transform_4, window_bounds = array<i64: 9, 32, 128>}, {pipeline_mode = #tpu.pipeline_mode<synchronous>, transform_indices = @transform_5, window_bounds = array<i64: 1, 128>}, {pipeline_mode = #tpu.pipeline_mode<synchronous>, transform_indices = @transform_6, window_bounds = array<i64: 104, 128>}]} {
    %c0 = arith.constant 0 : index
    %c0_0 = arith.constant 0 : index
    %0 = vector.load %arg1[%c0, %c0_0] : memref<104x9xf32, #tpu.memory_space<vmem>>, vector<104x9xf32>
    %c0_1 = arith.constant 0 : index
    %c0_2 = arith.constant 0 : index
    %1 = vector.load %arg2[%c0_1, %c0_2] : memref<9x32xf32, #tpu.memory_space<vmem>>, vector<9x32xf32>
    %cst = arith.constant dense<0.000000e+00> : vector<104x32xf32>
    %2 = tpu.matmul %0, %1, %cst {dimension_numbers = #tpu.dot_dimension_numbers<[1], [0], [0], [1], [0, 0, 1, 1], [], []>} : vector<104x9xf32>, vector<9x32xf32>, vector<104x32xf32> -> vector<104x32xf32>
    %c0_3 = arith.constant 0 : index
    %c0_4 = arith.constant 0 : index
    %3 = vector.load %arg3[%c0_3, %c0_4] : memref<1x32xf32, #tpu.memory_space<vmem>>, vector<1x32xf32>
    %4 = vector.broadcast %3 : vector<1x32xf32> to vector<104x32xf32>
    %5 = arith.addf %2, %4 : vector<104x32xf32>
    %cst_5 = arith.constant 0.000000e+00 : f32
    %6 = vector.broadcast %cst_5 : f32 to vector<104x32xf32>
    %7 = arith.maximumf %5, %6 : vector<104x32xf32>
    %cst_6 = arith.constant 0.000000e+00 : f32
    %8 = vector.broadcast %cst_6 : f32 to vector<104x128xf32>
    %c0_7 = arith.constant 0 : index
    %c0_8 = arith.constant 0 : index
    %c0_9 = arith.constant 0 : index
    %9 = vector.load %arg4[%c0_7, %c0_8, %c0_9] : memref<9x104x104xf32, #tpu.memory_space<vmem>>, vector<1x104x104xf32>
    %10 = vector.shape_cast %9 : vector<1x104x104xf32> to vector<104x104xf32>
    %cst_10 = arith.constant dense<0.000000e+00> : vector<104x32xf32>
    %11 = tpu.matmul %10, %7, %cst_10 {dimension_numbers = #tpu.dot_dimension_numbers<[1], [0], [0], [1], [0, 0, 1, 1], [], []>} : vector<104x104xf32>, vector<104x32xf32>, vector<104x32xf32> -> vector<104x32xf32>
    %c0_11 = arith.constant 0 : index
    %c0_12 = arith.constant 0 : index
    %c0_13 = arith.constant 0 : index
    %12 = vector.load %arg5[%c0_11, %c0_12, %c0_13] : memref<9x32x128xf32, #tpu.memory_space<vmem>>, vector<1x32x128xf32>
    %13 = vector.shape_cast %12 : vector<1x32x128xf32> to vector<32x128xf32>
    %cst_14 = arith.constant dense<0.000000e+00> : vector<104x128xf32>
    %14 = tpu.matmul %11, %13, %cst_14 {dimension_numbers = #tpu.dot_dimension_numbers<[1], [0], [0], [1], [0, 0, 1, 1], [], []>} : vector<104x32xf32>, vector<32x128xf32>, vector<104x128xf32> -> vector<104x128xf32>
    %15 = arith.addf %8, %14 : vector<104x128xf32>
    %c1 = arith.constant 1 : index
    %c0_15 = arith.constant 0 : index
    %c0_16 = arith.constant 0 : index
    %16 = vector.load %arg4[%c1, %c0_15, %c0_16] : memref<9x104x104xf32, #tpu.memory_space<vmem>>, vector<1x104x104xf32>
    %17 = vector.shape_cast %16 : vector<1x104x104xf32> to vector<104x104xf32>
    %cst_17 = arith.constant dense<0.000000e+00> : vector<104x32xf32>
    %18 = tpu.matmul %17, %7, %cst_17 {dimension_numbers = #tpu.dot_dimension_numbers<[1], [0], [0], [1], [0, 0, 1, 1], [], []>} : vector<104x104xf32>, vector<104x32xf32>, vector<104x32xf32> -> vector<104x32xf32>
    %c1_18 = arith.constant 1 : index
    %c0_19 = arith.constant 0 : index
    %c0_20 = arith.constant 0 : index
    %19 = vector.load %arg5[%c1_18, %c0_19, %c0_20] : memref<9x32x128xf32, #tpu.memory_space<vmem>>, vector<1x32x128xf32>
    %20 = vector.shape_cast %19 : vector<1x32x128xf32> to vector<32x128xf32>
    %cst_21 = arith.constant dense<0.000000e+00> : vector<104x128xf32>
    %21 = tpu.matmul %18, %20, %cst_21 {dimension_numbers = #tpu.dot_dimension_numbers<[1], [0], [0], [1], [0, 0, 1, 1], [], []>} : vector<104x32xf32>, vector<32x128xf32>, vector<104x128xf32> -> vector<104x128xf32>
    %22 = arith.addf %15, %21 : vector<104x128xf32>
    %c2 = arith.constant 2 : index
    %c0_22 = arith.constant 0 : index
    %c0_23 = arith.constant 0 : index
    %23 = vector.load %arg4[%c2, %c0_22, %c0_23] : memref<9x104x104xf32, #tpu.memory_space<vmem>>, vector<1x104x104xf32>
    %24 = vector.shape_cast %23 : vector<1x104x104xf32> to vector<104x104xf32>
    %cst_24 = arith.constant dense<0.000000e+00> : vector<104x32xf32>
    %25 = tpu.matmul %24, %7, %cst_24 {dimension_numbers = #tpu.dot_dimension_numbers<[1], [0], [0], [1], [0, 0, 1, 1], [], []>} : vector<104x104xf32>, vector<104x32xf32>, vector<104x32xf32> -> vector<104x32xf32>
    %c2_25 = arith.constant 2 : index
    %c0_26 = arith.constant 0 : index
    %c0_27 = arith.constant 0 : index
    %26 = vector.load %arg5[%c2_25, %c0_26, %c0_27] : memref<9x32x128xf32, #tpu.memory_space<vmem>>, vector<1x32x128xf32>
    %27 = vector.shape_cast %26 : vector<1x32x128xf32> to vector<32x128xf32>
    %cst_28 = arith.constant dense<0.000000e+00> : vector<104x128xf32>
    %28 = tpu.matmul %25, %27, %cst_28 {dimension_numbers = #tpu.dot_dimension_numbers<[1], [0], [0], [1], [0, 0, 1, 1], [], []>} : vector<104x32xf32>, vector<32x128xf32>, vector<104x128xf32> -> vector<104x128xf32>
    %29 = arith.addf %22, %28 : vector<104x128xf32>
    %c3 = arith.constant 3 : index
    %c0_29 = arith.constant 0 : index
    %c0_30 = arith.constant 0 : index
    %30 = vector.load %arg4[%c3, %c0_29, %c0_30] : memref<9x104x104xf32, #tpu.memory_space<vmem>>, vector<1x104x104xf32>
    %31 = vector.shape_cast %30 : vector<1x104x104xf32> to vector<104x104xf32>
    %cst_31 = arith.constant dense<0.000000e+00> : vector<104x32xf32>
    %32 = tpu.matmul %31, %7, %cst_31 {dimension_numbers = #tpu.dot_dimension_numbers<[1], [0], [0], [1], [0, 0, 1, 1], [], []>} : vector<104x104xf32>, vector<104x32xf32>, vector<104x32xf32> -> vector<104x32xf32>
    %c3_32 = arith.constant 3 : index
    %c0_33 = arith.constant 0 : index
    %c0_34 = arith.constant 0 : index
    %33 = vector.load %arg5[%c3_32, %c0_33, %c0_34] : memref<9x32x128xf32, #tpu.memory_space<vmem>>, vector<1x32x128xf32>
    %34 = vector.shape_cast %33 : vector<1x32x128xf32> to vector<32x128xf32>
    %cst_35 = arith.constant dense<0.000000e+00> : vector<104x128xf32>
    %35 = tpu.matmul %32, %34, %cst_35 {dimension_numbers = #tpu.dot_dimension_numbers<[1], [0], [0], [1], [0, 0, 1, 1], [], []>} : vector<104x32xf32>, vector<32x128xf32>, vector<104x128xf32> -> vector<104x128xf32>
    %36 = arith.addf %29, %35 : vector<104x128xf32>
    %c4 = arith.constant 4 : index
    %c0_36 = arith.constant 0 : index
    %c0_37 = arith.constant 0 : index
    %37 = vector.load %arg4[%c4, %c0_36, %c0_37] : memref<9x104x104xf32, #tpu.memory_space<vmem>>, vector<1x104x104xf32>
    %38 = vector.shape_cast %37 : vector<1x104x104xf32> to vector<104x104xf32>
    %cst_38 = arith.constant dense<0.000000e+00> : vector<104x32xf32>
    %39 = tpu.matmul %38, %7, %cst_38 {dimension_numbers = #tpu.dot_dimension_numbers<[1], [0], [0], [1], [0, 0, 1, 1], [], []>} : vector<104x104xf32>, vector<104x32xf32>, vector<104x32xf32> -> vector<104x32xf32>
    %c4_39 = arith.constant 4 : index
    %c0_40 = arith.constant 0 : index
    %c0_41 = arith.constant 0 : index
    %40 = vector.load %arg5[%c4_39, %c0_40, %c0_41] : memref<9x32x128xf32, #tpu.memory_space<vmem>>, vector<1x32x128xf32>
    %41 = vector.shape_cast %40 : vector<1x32x128xf32> to vector<32x128xf32>
    %cst_42 = arith.constant dense<0.000000e+00> : vector<104x128xf32>
    %42 = tpu.matmul %39, %41, %cst_42 {dimension_numbers = #tpu.dot_dimension_numbers<[1], [0], [0], [1], [0, 0, 1, 1], [], []>} : vector<104x32xf32>, vector<32x128xf32>, vector<104x128xf32> -> vector<104x128xf32>
    %43 = arith.addf %36, %42 : vector<104x128xf32>
    %c5 = arith.constant 5 : index
    %c0_43 = arith.constant 0 : index
    %c0_44 = arith.constant 0 : index
    %44 = vector.load %arg4[%c5, %c0_43, %c0_44] : memref<9x104x104xf32, #tpu.memory_space<vmem>>, vector<1x104x104xf32>
    %45 = vector.shape_cast %44 : vector<1x104x104xf32> to vector<104x104xf32>
    %cst_45 = arith.constant dense<0.000000e+00> : vector<104x32xf32>
    %46 = tpu.matmul %45, %7, %cst_45 {dimension_numbers = #tpu.dot_dimension_numbers<[1], [0], [0], [1], [0, 0, 1, 1], [], []>} : vector<104x104xf32>, vector<104x32xf32>, vector<104x32xf32> -> vector<104x32xf32>
    %c5_46 = arith.constant 5 : index
    %c0_47 = arith.constant 0 : index
    %c0_48 = arith.constant 0 : index
    %47 = vector.load %arg5[%c5_46, %c0_47, %c0_48] : memref<9x32x128xf32, #tpu.memory_space<vmem>>, vector<1x32x128xf32>
    %48 = vector.shape_cast %47 : vector<1x32x128xf32> to vector<32x128xf32>
    %cst_49 = arith.constant dense<0.000000e+00> : vector<104x128xf32>
    %49 = tpu.matmul %46, %48, %cst_49 {dimension_numbers = #tpu.dot_dimension_numbers<[1], [0], [0], [1], [0, 0, 1, 1], [], []>} : vector<104x32xf32>, vector<32x128xf32>, vector<104x128xf32> -> vector<104x128xf32>
    %50 = arith.addf %43, %49 : vector<104x128xf32>
    %c6 = arith.constant 6 : index
    %c0_50 = arith.constant 0 : index
    %c0_51 = arith.constant 0 : index
    %51 = vector.load %arg4[%c6, %c0_50, %c0_51] : memref<9x104x104xf32, #tpu.memory_space<vmem>>, vector<1x104x104xf32>
    %52 = vector.shape_cast %51 : vector<1x104x104xf32> to vector<104x104xf32>
    %cst_52 = arith.constant dense<0.000000e+00> : vector<104x32xf32>
    %53 = tpu.matmul %52, %7, %cst_52 {dimension_numbers = #tpu.dot_dimension_numbers<[1], [0], [0], [1], [0, 0, 1, 1], [], []>} : vector<104x104xf32>, vector<104x32xf32>, vector<104x32xf32> -> vector<104x32xf32>
    %c6_53 = arith.constant 6 : index
    %c0_54 = arith.constant 0 : index
    %c0_55 = arith.constant 0 : index
    %54 = vector.load %arg5[%c6_53, %c0_54, %c0_55] : memref<9x32x128xf32, #tpu.memory_space<vmem>>, vector<1x32x128xf32>
    %55 = vector.shape_cast %54 : vector<1x32x128xf32> to vector<32x128xf32>
    %cst_56 = arith.constant dense<0.000000e+00> : vector<104x128xf32>
    %56 = tpu.matmul %53, %55, %cst_56 {dimension_numbers = #tpu.dot_dimension_numbers<[1], [0], [0], [1], [0, 0, 1, 1], [], []>} : vector<104x32xf32>, vector<32x128xf32>, vector<104x128xf32> -> vector<104x128xf32>
    %57 = arith.addf %50, %56 : vector<104x128xf32>
    %c7 = arith.constant 7 : index
    %c0_57 = arith.constant 0 : index
    %c0_58 = arith.constant 0 : index
    %58 = vector.load %arg4[%c7, %c0_57, %c0_58] : memref<9x104x104xf32, #tpu.memory_space<vmem>>, vector<1x104x104xf32>
    %59 = vector.shape_cast %58 : vector<1x104x104xf32> to vector<104x104xf32>
    %cst_59 = arith.constant dense<0.000000e+00> : vector<104x32xf32>
    %60 = tpu.matmul %59, %7, %cst_59 {dimension_numbers = #tpu.dot_dimension_numbers<[1], [0], [0], [1], [0, 0, 1, 1], [], []>} : vector<104x104xf32>, vector<104x32xf32>, vector<104x32xf32> -> vector<104x32xf32>
    %c7_60 = arith.constant 7 : index
    %c0_61 = arith.constant 0 : index
    %c0_62 = arith.constant 0 : index
    %61 = vector.load %arg5[%c7_60, %c0_61, %c0_62] : memref<9x32x128xf32, #tpu.memory_space<vmem>>, vector<1x32x128xf32>
    %62 = vector.shape_cast %61 : vector<1x32x128xf32> to vector<32x128xf32>
    %cst_63 = arith.constant dense<0.000000e+00> : vector<104x128xf32>
    %63 = tpu.matmul %60, %62, %cst_63 {dimension_numbers = #tpu.dot_dimension_numbers<[1], [0], [0], [1], [0, 0, 1, 1], [], []>} : vector<104x32xf32>, vector<32x128xf32>, vector<104x128xf32> -> vector<104x128xf32>
    %64 = arith.addf %57, %63 : vector<104x128xf32>
    %c8 = arith.constant 8 : index
    %c0_64 = arith.constant 0 : index
    %c0_65 = arith.constant 0 : index
    %65 = vector.load %arg4[%c8, %c0_64, %c0_65] : memref<9x104x104xf32, #tpu.memory_space<vmem>>, vector<1x104x104xf32>
    %66 = vector.shape_cast %65 : vector<1x104x104xf32> to vector<104x104xf32>
    %cst_66 = arith.constant dense<0.000000e+00> : vector<104x32xf32>
    %67 = tpu.matmul %66, %7, %cst_66 {dimension_numbers = #tpu.dot_dimension_numbers<[1], [0], [0], [1], [0, 0, 1, 1], [], []>} : vector<104x104xf32>, vector<104x32xf32>, vector<104x32xf32> -> vector<104x32xf32>
    %c8_67 = arith.constant 8 : index
    %c0_68 = arith.constant 0 : index
    %c0_69 = arith.constant 0 : index
    %68 = vector.load %arg5[%c8_67, %c0_68, %c0_69] : memref<9x32x128xf32, #tpu.memory_space<vmem>>, vector<1x32x128xf32>
    %69 = vector.shape_cast %68 : vector<1x32x128xf32> to vector<32x128xf32>
    %cst_70 = arith.constant dense<0.000000e+00> : vector<104x128xf32>
    %70 = tpu.matmul %67, %69, %cst_70 {dimension_numbers = #tpu.dot_dimension_numbers<[1], [0], [0], [1], [0, 0, 1, 1], [], []>} : vector<104x32xf32>, vector<32x128xf32>, vector<104x128xf32> -> vector<104x128xf32>
    %71 = arith.addf %64, %70 : vector<104x128xf32>
    %c0_71 = arith.constant 0 : index
    %c0_72 = arith.constant 0 : index
    %72 = vector.load %arg6[%c0_71, %c0_72] : memref<1x128xf32, #tpu.memory_space<vmem>>, vector<1x128xf32>
    %73 = vector.broadcast %72 : vector<1x128xf32> to vector<104x128xf32>
    %74 = arith.addf %71, %73 : vector<104x128xf32>
    %cst_73 = arith.constant 0.000000e+00 : f32
    %75 = vector.broadcast %cst_73 : f32 to vector<104x128xf32>
    %76 = arith.maximumf %74, %75 : vector<104x128xf32>
    %77 = arith.truncf %76 : vector<104x128xf32> to vector<104x128xbf16>
    %c0_74 = arith.constant 0 : index
    %c0_75 = arith.constant 0 : index
    %78 = vector.load %arg7[%c0_74, %c0_75] : memref<104x128xbf16, #tpu.memory_space<vmem>>, vector<104x128xbf16>
    tpu.vector_store %arg7[%c0_74, %c0_75], %77 {strides = array<i32>} : memref<104x128xbf16, #tpu.memory_space<vmem>>, vector<104x128xbf16>,
    return
  }
  func.func @transform_0(%arg0: i32) -> (i32, i32) {
    %c0_i32 = arith.constant 0 : i32
    %c0_i32_0 = arith.constant 0 : i32
    %c0_i32_1 = arith.constant 0 : i32
    return %c0_i32, %c0_i32_0 : i32, i32
  }
  func.func @transform_1(%arg0: i32) -> (i32, i32) {
    %c0_i32 = arith.constant 0 : i32
    %c0_i32_0 = arith.constant 0 : i32
    %c0_i32_1 = arith.constant 0 : i32
    return %c0_i32, %c0_i32_0 : i32, i32
  }
  func.func @transform_2(%arg0: i32) -> (i32, i32) {
    %c0_i32 = arith.constant 0 : i32
    %c0_i32_0 = arith.constant 0 : i32
    %c0_i32_1 = arith.constant 0 : i32
    return %c0_i32, %c0_i32_0 : i32, i32
  }
  func.func @transform_3(%arg0: i32) -> (i32, i32, i32) {
    %c0_i32 = arith.constant 0 : i32
    %c0_i32_0 = arith.constant 0 : i32
    %c0_i32_1 = arith.constant 0 : i32
    %c0_i32_2 = arith.constant 0 : i32
    return %c0_i32, %c0_i32_0, %c0_i32_1 : i32, i32, i32
  }
  func.func @transform_4(%arg0: i32) -> (i32, i32, i32) {
    %c0_i32 = arith.constant 0 : i32
    %c0_i32_0 = arith.constant 0 : i32
    %c0_i32_1 = arith.constant 0 : i32
    %c0_i32_2 = arith.constant 0 : i32
    return %c0_i32, %c0_i32_0, %c0_i32_1 : i32, i32, i32
  }
  func.func @transform_5(%arg0: i32) -> (i32, i32) {
    %c0_i32 = arith.constant 0 : i32
    %c0_i32_0 = arith.constant 0 : i32
    %c0_i32_1 = arith.constant 0 : i32
    return %c0_i32, %c0_i32_0 : i32, i32
  }
  func.func @transform_6(%arg0: i32) -> (i32, i32) {
    %c0_i32 = arith.constant 0 : i32
    %c0_i32_0 = arith.constant 0 : i32
    %c0_i32_1 = arith.constant 0 : i32
    return %c0_i32, %c0_i32_0 : i32, i32
  }
}

module attributes {stable_mosaic.version = 11 : i64} {
  func.func @_fc_kernel(%arg0: i32, %arg1: memref<8x3136xbf16, #tpu.memory_space<vmem>>, %arg2: memref<3136x512xbf16, #tpu.memory_space<vmem>>, %arg3: memref<1x512xf32, #tpu.memory_space<vmem>>, %arg4: memref<512x128xbf16, #tpu.memory_space<vmem>>, %arg5: memref<1x128xf32, #tpu.memory_space<vmem>>, %arg6: memref<8x128xf32, #tpu.memory_space<vmem>>) attributes {dimension_semantics = [#tpu.dimension_semantics<arbitrary>], iteration_bounds = array<i64: 2>, scalar_prefetch = 0 : i64, scratch_operands = 0 : i64, tpu.core_type = #tpu.core_type<tc>, window_params = [{pipeline_mode = #tpu.pipeline_mode<synchronous>, transform_indices = @transform_0, window_bounds = array<i64: 8, 3136>}, {transform_indices = @transform_1, window_bounds = array<i64: 3136, 512>}, {transform_indices = @transform_2, window_bounds = array<i64: 1, 512>}, {transform_indices = @transform_3, window_bounds = array<i64: 512, 128>}, {pipeline_mode = #tpu.pipeline_mode<synchronous>, transform_indices = @transform_4, window_bounds = array<i64: 1, 128>}, {pipeline_mode = #tpu.pipeline_mode<synchronous>, transform_indices = @transform_5, window_bounds = array<i64: 8, 128>}]} {
    %c0 = arith.constant 0 : index
    %c0_0 = arith.constant 0 : index
    %0 = vector.load %arg1[%c0, %c0_0] : memref<8x3136xbf16, #tpu.memory_space<vmem>>, vector<8x3136xbf16>
    %c0_1 = arith.constant 0 : index
    %c0_2 = arith.constant 0 : index
    %1 = vector.load %arg2[%c0_1, %c0_2] : memref<3136x512xbf16, #tpu.memory_space<vmem>>, vector<3136x512xbf16>
    %cst = arith.constant dense<0.000000e+00> : vector<8x512xf32>
    %2 = tpu.matmul %0, %1, %cst {dimension_numbers = #tpu.dot_dimension_numbers<[1], [0], [0], [1], [0, 0, 1, 1], [], []>} : vector<8x3136xbf16>, vector<3136x512xbf16>, vector<8x512xf32> -> vector<8x512xf32>
    %c0_3 = arith.constant 0 : index
    %c0_4 = arith.constant 0 : index
    %3 = vector.load %arg3[%c0_3, %c0_4] : memref<1x512xf32, #tpu.memory_space<vmem>>, vector<1x512xf32>
    %4 = vector.broadcast %3 : vector<1x512xf32> to vector<8x512xf32>
    %5 = arith.addf %2, %4 : vector<8x512xf32>
    %cst_5 = arith.constant 0.000000e+00 : f32
    %6 = vector.broadcast %cst_5 : f32 to vector<8x512xf32>
    %7 = arith.maximumf %5, %6 : vector<8x512xf32>
    %8 = arith.truncf %7 : vector<8x512xf32> to vector<8x512xbf16>
    %c0_6 = arith.constant 0 : index
    %c0_7 = arith.constant 0 : index
    %9 = vector.load %arg4[%c0_6, %c0_7] : memref<512x128xbf16, #tpu.memory_space<vmem>>, vector<512x128xbf16>
    %cst_8 = arith.constant dense<0.000000e+00> : vector<8x128xf32>
    %10 = tpu.matmul %8, %9, %cst_8 {dimension_numbers = #tpu.dot_dimension_numbers<[1], [0], [0], [1], [0, 0, 1, 1], [], []>} : vector<8x512xbf16>, vector<512x128xbf16>, vector<8x128xf32> -> vector<8x128xf32>
    %c0_i32 = arith.constant 0 : i32
    %11 = arith.cmpi eq, %arg0, %c0_i32 : i32
    %12 = arith.extui %11 : i1 to i32
    %c0_i32_9 = arith.constant 0 : i32
    %13 = arith.cmpi ne, %12, %c0_i32_9 : i32
    scf.if %13 {
      %c0_14 = arith.constant 0 : index
      %c0_15 = arith.constant 0 : index
      %17 = vector.load %arg5[%c0_14, %c0_15] : memref<1x128xf32, #tpu.memory_space<vmem>>, vector<1x128xf32>
      %18 = vector.shape_cast %17 : vector<1x128xf32> to vector<1x128xf32>
      %19 = vector.broadcast %18 : vector<1x128xf32> to vector<8x128xf32>
      %c0_16 = arith.constant 0 : index
      %c0_17 = arith.constant 0 : index
      %20 = vector.load %arg6[%c0_16, %c0_17] : memref<8x128xf32, #tpu.memory_space<vmem>>, vector<8x128xf32>
      tpu.vector_store %arg6[%c0_16, %c0_17], %19 {strides = array<i32>} : memref<8x128xf32, #tpu.memory_space<vmem>>, vector<8x128xf32>,
    } else {
    }
    %c0_10 = arith.constant 0 : index
    %c0_11 = arith.constant 0 : index
    %14 = vector.load %arg6[%c0_10, %c0_11] : memref<8x128xf32, #tpu.memory_space<vmem>>, vector<8x128xf32>
    %15 = arith.addf %14, %10 : vector<8x128xf32>
    %c0_12 = arith.constant 0 : index
    %c0_13 = arith.constant 0 : index
    %16 = vector.load %arg6[%c0_12, %c0_13] : memref<8x128xf32, #tpu.memory_space<vmem>>, vector<8x128xf32>
    tpu.vector_store %arg6[%c0_12, %c0_13], %15 {strides = array<i32>} : memref<8x128xf32, #tpu.memory_space<vmem>>, vector<8x128xf32>,
    return
  }
  func.func @transform_0(%arg0: i32) -> (i32, i32) {
    %c0_i32 = arith.constant 0 : i32
    %c0_i32_0 = arith.constant 0 : i32
    %c0_i32_1 = arith.constant 0 : i32
    return %c0_i32, %c0_i32_0 : i32, i32
  }
  func.func @transform_1(%arg0: i32) -> (i32, i32) {
    %c0_i32 = arith.constant 0 : i32
    %c0_i32_0 = arith.constant 0 : i32
    return %c0_i32, %arg0 : i32, i32
  }
  func.func @transform_2(%arg0: i32) -> (i32, i32) {
    %c0_i32 = arith.constant 0 : i32
    %c0_i32_0 = arith.constant 0 : i32
    return %c0_i32, %arg0 : i32, i32
  }
  func.func @transform_3(%arg0: i32) -> (i32, i32) {
    %c0_i32 = arith.constant 0 : i32
    %c0_i32_0 = arith.constant 0 : i32
    return %arg0, %c0_i32 : i32, i32
  }
  func.func @transform_4(%arg0: i32) -> (i32, i32) {
    %c0_i32 = arith.constant 0 : i32
    %c0_i32_0 = arith.constant 0 : i32
    %c0_i32_1 = arith.constant 0 : i32
    return %c0_i32, %c0_i32_0 : i32, i32
  }
  func.func @transform_5(%arg0: i32) -> (i32, i32) {
    %c0_i32 = arith.constant 0 : i32
    %c0_i32_0 = arith.constant 0 : i32
    %c0_i32_1 = arith.constant 0 : i32
    return %c0_i32, %c0_i32_0 : i32, i32
  }
}

</mosaic_0001>

<bundles_post_ra>
// kernel: net_forward.2
= control target key start
LH: loop header
LB: loop body
LE: loop exit
PB: predicated region body
PF: predicated region fallthrough
CT: control target
= control target key end

     0   :  { %11 = vsyncpa [#allocation3], 0  ;;  %s7072_s0 = inlined_call_operand.vmem [shape: f32[104,9], index: 0, kind: input, shape index: {}]   ;;  %s7073_s1 = inlined_call_operand.hbm [shape: f32[9,32], index: 1, kind: input, shape index: {}]   ;;  %s7074_s2 = inlined_call_operand.hbm [shape: f32[1,32], index: 2, kind: input, shape index: {}]   ;;  %s7075_s3 = inlined_call_operand.hbm [shape: f32[9,104,104], index: 3, kind: input, shape index: {}]   ;;  %s7076_s4 = inlined_call_operand.hbm [shape: f32[9,32,128], index: 4, kind: input, shape index: {}]   ;;  %s7077_s5 = inlined_call_operand.hbm [shape: f32[1,128], index: 5, kind: input, shape index: {}]   ;;  %s7078_s6 = inlined_call_operand.vmem [shape: bf16[104,128], index: 6, kind: output, shape index: {}]  }
   0x1   :  { %12 = vsyncpa [#allocation5], 0 }
   0x2   :  { %13 = vsyncpa [#allocation8], 0  ;;  %s5819_s21 = smov [#allocation4]   ;;  %s5703_s25 = scalar_lea.hbm %s7074_s2, 16 }
   0x3   :  { %s34_s22 = sshll.u32 %s5819_s21, 4  ;;  %p5704_p0 = scmp.ne.s32.totalorder %s7074_s2, %s5703_s25  ;;  %s35_s22 = int_to_ptr.vmem [resolvable:$true] %s34_s22 }
   0x4   :  { %p5707_p1 = scmp.lt.u32.totalorder %s5703_s25, %s7074_s2 }
   0x6   :  { %p5709_p2 = pnand %p5707_p1, %p5704_p0 }
   0x8   :  { %5712 = shalt.err (!%p5709_p2)
}
   0x9   :  { %s5713_s30 = scalar_lea.vmem %s35_s22, 16  ;;  %s5717_s7 = scalar_lea.vmem %s35_s22, 32 }
   0xa   :  { %p5714_p3 = scmp.ne.s32.totalorder %s35_s22, %s5713_s30  ;;  %p5718_p4 = scmp.lt.s32.totalorder %s35_s22, %s35_s22 }
   0xb   :  { %p5719_p5 = scmp.lt.s32.totalorder %s5717_s7, %s5713_s30 }
   0xd   :  { %p5720_p6 = por %p5719_p5, %p5718_p4 }
   0xf   :  { %p5721_p7 = pnand %p5720_p6, %p5714_p3 }
  0x11   :  { %5724 = shalt.err (!%p5721_p7)
}
  0x12   :  { %37 = dma.hbm_to_vmem [thread:$0]  %s7074_s2, 16, %s35_s22, [#allocation5]  }
  0x13   :  { %s5820_s10 = smov [#allocation7]   ;;  %s5821_s12 = smov [#allocation2]  }
  0x14   :  { %s55_s11 = sshll.u32 %s5820_s10, 4  ;;  %s21_s13 = sshll.u32 %s5821_s12, 4  ;;  %s56_s11 = int_to_ptr.vmem [resolvable:$true] %s55_s11  ;;  %s22_s13 = int_to_ptr.vmem [resolvable:$true] %s21_s13 }
  0x15   :  { %s5725_s16 = scalar_lea.hbm %s7076_s4, 4608 }
  0x16   :  { %p5726_p8 = scmp.ne.s32.totalorder %s7076_s4, %s5725_s16  ;;  %p5729_p9 = scmp.lt.u32.totalorder %s5725_s16, %s7076_s4 }
  0x18   :  { %p5731_p10 = pnand %p5729_p9, %p5726_p8 }
  0x1a   :  { %5734 = shalt.err (!%p5731_p10)
}
  0x1b   :  { %s5735_s2 = scalar_lea.vmem %s56_s11, 4608  ;;  %p5740_p12 = scmp.lt.s32.totalorder %s56_s11, %s56_s11 }
  0x1c   :  { %p5736_p11 = scmp.ne.s32.totalorder %s56_s11, %s5735_s2  ;;  %p5741_p13 = scmp.lt.s32.totalorder %s5735_s2, %s5735_s2 }
  0x1e   :  { %p5742_p0 = por %p5741_p13, %p5740_p12 }
  0x20   :  { %p5743_p1 = pnand %p5742_p0, %p5736_p11 }
  0x22   :  { %5746 = shalt.err (!%p5743_p1)
}
  0x23   :  { %s5822_s21 = smov 128   ;;  %s5823_s22 = smov 8  }
  0x24   :  { %61 = dma.hbm_to_vmem [thread:$0]  %s7076_s4, 4608, %s56_s11, [#allocation8], %s5822_s21, %s5822_s21, %s5823_s22  }
  0x25   :  { %s5747_s27 = scalar_lea.hbm %s7073_s1, 256 }
  0x26   :  { %p5748_p2 = scmp.ne.s32.totalorder %s7073_s1, %s5747_s27  ;;  %p5751_p3 = scmp.lt.u32.totalorder %s5747_s27, %s7073_s1 }
  0x28   :  { %p5753_p4 = pnand %p5751_p3, %p5748_p2 }
  0x2a   :  { %5756 = shalt.err (!%p5753_p4)
}
  0x2b   :  { %s5757_s8 = scalar_lea.vmem %s22_s13, 256  ;;  %p5762_p6 = scmp.lt.s32.totalorder %s22_s13, %s22_s13 }
  0x2c   :  { %p5758_p5 = scmp.ne.s32.totalorder %s22_s13, %s5757_s8  ;;  %p5763_p7 = scmp.lt.s32.totalorder %s5757_s8, %s5757_s8 }
  0x2e   :  { %p5764_p8 = por %p5763_p7, %p5762_p6 }
  0x30   :  { %p5765_p9 = pnand %p5764_p8, %p5758_p5 }
  0x32   :  { %5768 = shalt.err (!%p5765_p9)
}
  0x33   :  { %27 = dma.hbm_to_vmem [thread:$0]  %s7073_s1, 256, %s22_s13, [#allocation3], %s5822_s21, %s5822_s21, %s5823_s22  }
  0x34   :  { %s5824_s10 = smov [#allocation6]   ;;  %s5825_s12 = smov [#allocation9]  }
  0x35   :  { %s43_s11 = sshll.u32 %s5824_s10, 4  ;;  %s68_s14 = sshll.u32 %s5825_s12, 4  ;;  %s44_s11 = int_to_ptr.vmem [resolvable:$true] %s43_s11  ;;  %s69_s14 = int_to_ptr.vmem [resolvable:$true] %s68_s14 }
  0x36   :  { %s5769_s17 = scalar_lea.hbm %s7075_s3, 14976 }
  0x37   :  { %p5770_p10 = scmp.ne.s32.totalorder %s7075_s3, %s5769_s17  ;;  %p5773_p11 = scmp.lt.u32.totalorder %s5769_s17, %s7075_s3 }
  0x39   :  { %p5775_p12 = pnand %p5773_p11, %p5770_p10 }
  0x3b   :  { %5778 = shalt.err (!%p5775_p12)
}
  0x3c   :  { %s5779_s1 = scalar_lea.vmem %s44_s11, 14976  ;;  %p5784_p0 = scmp.lt.s32.totalorder %s44_s11, %s44_s11 }
  0x3d   :  { %p5780_p13 = scmp.ne.s32.totalorder %s44_s11, %s5779_s1  ;;  %p5785_p1 = scmp.lt.s32.totalorder %s5779_s1, %s5779_s1 }
  0x3f   :  { %p5786_p2 = por %p5785_p1, %p5784_p0 }
  0x41   :  { %p5787_p3 = pnand %p5786_p2, %p5780_p13 }
  0x43   :  { %5790 = shalt.err (!%p5787_p3)
}
  0x44   :  { %49 = dma.hbm_to_vmem [thread:$0]  %s7075_s3, 14976, %s44_s11, [#allocation5], %s5822_s21, %s5822_s21, %s5823_s22  }
  0x45   :  { %s5791_s26 = scalar_lea.hbm %s7077_s5, 16 }
  0x46   :  { %p5792_p4 = scmp.ne.s32.totalorder %s7077_s5, %s5791_s26  ;;  %p5795_p5 = scmp.lt.u32.totalorder %s5791_s26, %s7077_s5 }
  0x48   :  { %p5797_p6 = pnand %p5795_p5, %p5792_p4 }
  0x4a   :  { %5800 = shalt.err (!%p5797_p6)
}
  0x4b   :  { %s5801_s7 = scalar_lea.vmem %s69_s14, 16  ;;  %s5805_s8 = scalar_lea.vmem %s69_s14, 32 }
  0x4c   :  { %p5802_p7 = scmp.ne.s32.totalorder %s69_s14, %s5801_s7  ;;  %p5806_p8 = scmp.lt.s32.totalorder %s69_s14, %s69_s14 }
  0x4d   :  { %p5807_p9 = scmp.lt.s32.totalorder %s5805_s8, %s5801_s7 }
  0x4f   :  { %p5808_p10 = por %p5807_p9, %p5806_p8 }
  0x51   :  { %p5809_p11 = pnand %p5808_p10, %p5802_p7 }
  0x53   :  { %5812 = shalt.err (!%p5809_p11)
}
  0x54   :  { %71 = dma.hbm_to_vmem [thread:$0]  %s7077_s5, 16, %s69_s14, [#allocation8]  }
  0x55   :  { %5813 = dma.done.wait [#allocation3], 256  }
  0x56   :  { %5814 = vsyncadd [#allocation3], 4294967040 }
  0x57   :  { %5815 = dma.done.wait [#allocation5], 14992  }
  0x58   :  { %5816 = vsyncadd [#allocation5], 4294952304 }
  0x59   :  { %5817 = dma.done.wait [#allocation8], 4624  }
  0x5a   :  { %5818 = vsyncadd [#allocation8], 4294962672  ;;  %v5826_v0 = vmov 0.0|0.0   ;;  %vm5827_vm0 = vmmov 0   ;;  %v5828_v1 = vmov 0.0   ;;  %vm149_vm1 = vcmask 1040384  }
  0x5b   :  { %5470 = vmatprep.subr.bf16.mxu0 %v5826_v0  ;;  %5690 = vmatprep.subr.bf16.mxu1 %v5826_v0  ;;  %v100_v2 = vld [vmem:[#allocation2] sm:$0xff]  ;;  %v101_v3 = vld [vmem:[#allocation2 + $0x8] sm:$0x1]  ;;  %vm5829_vm2 = vmmov 1   ;;  %vm109_vm4 = vcmask 72704   ;;  %v94_v6 = vld [vmem:[%s7072_s0 + $0x38] sm:$0xff] }
  0x5c   :  { %4423 = vmatprep.mubr.msk.f32.mxu0 %vm5827_vm0, %v5828_v1  ;;  %4444 = vmatprep.mubr.msk.f32.mxu1 %vm5827_vm0, %v5828_v1  ;;  %vm5472_vm3 = vmpackc.low %vm149_vm1, %vm5829_vm2  ;;  %v5471_v4 = vpack.c.bf16 %v101_v3, %v100_v2  ;;  %v87_v5 = vld [vmem:[%s7072_s0] sm:$0xff]  ;;  %v88_v7 = vld [vmem:[%s7072_s0 + $0x8] sm:$0xff]  ;;  %vm309_vm5 = vcmask 850944   ;;  %vm671_vm6 = vcmask 261120  }
  0x5d   :  { %v95_v8 = vld [vmem:[%s7072_s0 + $0x40] sm:$0xff]  ;;  %v89_v9 = vld [vmem:[%s7072_s0 + $0x10] sm:$0xff]  ;;  %v96_v10 = vld [vmem:[%s7072_s0 + $0x48] sm:$0xff] }
  0x5e   :  { %5473 = vmatpush3.bf16.msk.msra.mxu0 %vm5472_vm3, %v5471_v4  ;;  %5691 = vmatpush3.bf16.msk.msra.mxu1 %vm5472_vm3, %v5471_v4  ;;  %v90_v11 = vld [vmem:[%s7072_s0 + $0x18] sm:$0xff]  ;;  %v97_v12 = vld [vmem:[%s7072_s0 + $0x50] sm:$0xff]  ;;  %v91_v13 = vld [vmem:[%s7072_s0 + $0x20] sm:$0xff] }
  0x5f   :  { %5474 = vmatprep.subr.bf16.mxu1 %v5826_v0  ;;  %5492 = vmatprep.subr.bf16.mxu0 %v5826_v0  ;;  %v98_v14 = vld [vmem:[%s7072_s0 + $0x58] sm:$0xff]  ;;  %v92_v15 = vld [vmem:[%s7072_s0 + $0x28] sm:$0xff]  ;;  %v99_v16 = vld [vmem:[%s7072_s0 + $0x60] sm:$0xff] }
  0x60   :  { %v93_v17 = vld [vmem:[%s7072_s0 + $0x30] sm:$0xff] }
  0x61   :  { %4424 = vmatmul.mubr.msk.f32.vlgmr.msra.gmra.mrb[0].mxu0 %vm109_vm4, %v87_v5  ;;  %4445 = vmatmul.mubr.msk.f32.vlgmr.msra.gmra.mrb[0].mxu1 %vm109_vm4, %v94_v6  ;;  %v6020_v18 = vld [vmem:[#allocation4] ss:$0 sm:$0xff] }
  0x62   :  { %4426 = vmatprep.mubr.msk.f32.mxu0 %vm5827_vm0, %v5828_v1  ;;  %4447 = vmatprep.mubr.msk.f32.mxu1 %vm5827_vm0, %v5828_v1 }
  0x65   :  { %4427 = vmatmul.mubr.msk.f32.gmra.mrb[2].mxu0 %vm109_vm4, %v88_v7  ;;  %4448 = vmatmul.mubr.msk.f32.gmra.mrb[2].mxu1 %vm109_vm4, %v95_v8 }
  0x66   :  { %4429 = vmatprep.mubr.msk.f32.mxu0 %vm5827_vm0, %v5828_v1  ;;  %4450 = vmatprep.mubr.msk.f32.mxu1 %vm5827_vm0, %v5828_v1 }
  0x69   :  { %4430 = vmatmul.mubr.msk.f32.gmra.mrb[4].mxu0 %vm109_vm4, %v89_v9  ;;  %4451 = vmatmul.mubr.msk.f32.gmra.mrb[4].mxu1 %vm109_vm4, %v96_v10 }
  0x6a   :  { %4432 = vmatprep.mubr.msk.f32.mxu0 %vm5827_vm0, %v5828_v1  ;;  %4453 = vmatprep.mubr.msk.f32.mxu1 %vm5827_vm0, %v5828_v1 }
  0x6d   :  { %4433 = vmatmul.mubr.msk.f32.gmra.mrb[6].mxu0 %vm109_vm4, %v90_v11  ;;  %4454 = vmatmul.mubr.msk.f32.gmra.mrb[6].mxu1 %vm109_vm4, %v97_v12 }
  0x6e   :  { %4435 = vmatprep.mubr.msk.f32.mxu0 %vm5827_vm0, %v5828_v1  ;;  %4456 = vmatprep.mubr.msk.f32.mxu1 %vm5827_vm0, %v5828_v1 }
  0x71   :  { %4436 = vmatmul.mubr.msk.f32.gmra.mrb[8].mxu0 %vm109_vm4, %v91_v13  ;;  %4457 = vmatmul.mubr.msk.f32.gmra.mrb[8].mxu1 %vm109_vm4, %v98_v14 }
  0x72   :  { %4438 = vmatprep.mubr.msk.f32.mxu0 %vm5827_vm0, %v5828_v1  ;;  %4459 = vmatprep.mubr.msk.f32.mxu1 %vm5827_vm0, %v5828_v1 }
  0x75   :  { %4439 = vmatmul.mubr.msk.f32.gmra.mrb[10].mxu0 %vm109_vm4, %v92_v15  ;;  %4460 = vmatmul.mubr.msk.f32.gmra.mrb[10].mxu1 %vm109_vm4, %v99_v16  ;;  %v667_v15 = vld [vmem:[#allocation7 + $0x20] sm:$0xff]  ;;  %v668_v16 = vld [vmem:[#allocation7 + $0x28] sm:$0xff] }
  0x76   :  { %4441 = vmatprep.mubr.msk.f32.mxu0 %vm5827_vm0, %v5828_v1  ;;  %4488 = vmatprep.mubr.msk.f32.mxu1 %vm5827_vm0, %v5828_v1 }
  0x79   :  { %4442 = vmatmul.mubr.msk.f32.gmra.mrb[12].mxu0 %vm109_vm4, %v93_v17  ;;  %v479_v17 = vld [vmem:[#allocation7] sm:$0xff] }
  0x7a   :  { %4553 = vmatprep.mubr.msk.f32.mxu0 %vm5827_vm0, %v5828_v1 }
 0x134   :  { %v219_v19 = vpop.f32.mrb[0].mxu0  ;;  %v254_v20 = vpop.f32.mrb[0].mxu1 }
 0x135   :  { %v4425_v21 = vpop.f32.mrb[1].mxu0  ;;  %v4446_v22 = vpop.f32.mrb[1].mxu1  ;;  %v220_v23 = vadd.f32 %v6020_v18, %v219_v19  ;;  %v255_v3 = vadd.f32 %v6020_v18, %v254_v20  ;;  %v480_v19 = vld [vmem:[#allocation7 + $0x8] sm:$0xff]  ;;  %v296_v20 = vld [vmem:[#allocation6] sm:$0xff] }
 0x136   :  { %v5511_v21 = vpack.c.bf16 %v668_v16, %v667_v15  ;;  %v5517_v22 = vpack.c.bf16 %v480_v19, %v479_v17 }
 0x137   :  { %v283_v30 = vmax.f32 %v220_v23, 0.0  ;;  %v290_v10 = vmax.f32 %v255_v3, 0.0  ;;  %v669_v23 = vld [vmem:[#allocation7 + $0x30] sm:$0xff] }
 0x138   :  { %v224_v24 = vpop.f32.mrb[2].mxu0  ;;  %v259_v25 = vpop.f32.mrb[2].mxu1 }
 0x139   :  { %v225_v26 = vadd.f32 %v6020_v18, %v224_v24  ;;  %v4428_v27 = vpop.f32.mrb[3].mxu0  ;;  %v260_v28 = vadd.f32 %v6020_v18, %v259_v25  ;;  %v4449_v29 = vpop.f32.mrb[3].mxu1  ;;  %v670_v24 = vld [vmem:[#allocation7 + $0x38] sm:$0xff]  ;;  %v485_v25 = vld [vmem:[#allocation6 + $0x70] sm:$0xff] }
 0x13a   :  { %v5514_v27 = vpack.c.bf16 %v670_v24, %v669_v23  ;;  %v298_v29 = vld [vmem:[#allocation6 + $0x10] sm:$0xff] }
 0x13b   :  { %v284_v31 = vmax.f32 %v225_v26, 0.0  ;;  %v291_v36 = vmax.f32 %v260_v28, 0.0  ;;  %v297_v26 = vld [vmem:[#allocation6 + $0x8] sm:$0xff]  ;;  %v486_v28 = vld [vmem:[#allocation6 + $0x78] sm:$0xff] }
 0x13c   :  { %v229_v32 = vpop.f32.mrb[4].mxu0  ;;  %v264_v33 = vpop.f32.mrb[4].mxu1 }
 0x13d   :  { %v6025_v34 = vpack.c.bf16 %v284_v31, %v283_v30  ;;  %v4431_v35 = vpop.f32.mrb[5].mxu0  ;;  %v265_v37 = vadd.f32 %v6020_v18, %v264_v33  ;;  %v4452_v38 = vpop.f32.mrb[5].mxu1  ;;  %v230_v39 = vadd.f32 %v6020_v18, %v229_v32  ;;  %v487_v30 = vld [vmem:[#allocation6 + $0x80] sm:$0xff]  ;;  %v299_v31 = vld [vmem:[#allocation6 + $0x18] sm:$0xff]  ;;  %v488_v32 = vld [vmem:[#allocation6 + $0x88] sm:$0xff] }
 0x13e   :  { %v300_v33 = vld [vmem:[#allocation6 + $0x20] sm:$0xff]  ;;  %v489_v35 = vld [vmem:[#allocation6 + $0x90] sm:$0xff] }
 0x13f   :  { %5476 = vmatpush3.bf16.msra.mxu1 %v6025_v34  ;;  %5494 = vmatpush3.bf16.msra.mxu0 %v6025_v34  ;;  %v292_v40 = vmax.f32 %v265_v37, 0.0  ;;  %v285_v48 = vmax.f32 %v230_v39, 0.0  ;;  %v490_v37 = vld [vmem:[#allocation6 + $0x98] sm:$0xff]  ;;  %v302_v38 = vld [vmem:[#allocation6 + $0x30] sm:$0xff]  ;;  %v491_v39 = vld [vmem:[#allocation6 + $0xa0] sm:$0xff] }
 0x140   :  { %v234_v41 = vpop.f32.mrb[6].mxu0  ;;  %5477 = vmatprep.subr.bf16.mxu1 %v5826_v0  ;;  %5495 = vmatprep.subr.bf16.mxu0 %v5826_v0  ;;  %v269_v42 = vpop.f32.mrb[6].mxu1 }
 0x141   :  { %v235_v43 = vadd.f32 %v6020_v18, %v234_v41  ;;  %v4434_v44 = vpop.f32.mrb[7].mxu0  ;;  %v6034_v45 = vpack.c.bf16 %v292_v40, %v291_v36  ;;  %v270_v46 = vadd.f32 %v6020_v18, %v269_v42  ;;  %v4455_v47 = vpop.f32.mrb[7].mxu1  ;;  %v301_v36 = vld [vmem:[#allocation6 + $0x28] sm:$0xff]  ;;  %v303_v40 = vld [vmem:[#allocation6 + $0x38] sm:$0xff]  ;;  %v304_v42 = vld [vmem:[#allocation6 + $0x40] sm:$0xff] }
 0x142   :  { %v492_v41 = vld [vmem:[#allocation6 + $0xa8] sm:$0xff]  ;;  %v306_v47 = vld [vmem:[#allocation6 + $0x50] sm:$0xff] }
 0x143   :  { %v286_v49 = vmax.f32 %v235_v43, 0.0  ;;  %v293_v54 = vmax.f32 %v270_v46, 0.0  ;;  %v493_v43 = vld [vmem:[#allocation6 + $0xb0] sm:$0xff]  ;;  %v305_v44 = vld [vmem:[#allocation6 + $0x48] sm:$0xff]  ;;  %v494_v46 = vld [vmem:[#allocation6 + $0xb8] sm:$0xff] }
 0x144   :  { %v239_v50 = vpop.f32.mrb[8].mxu0  ;;  %v274_v51 = vpop.f32.mrb[8].mxu1 }
 0x145   :  { %v6037_v52 = vpack.c.bf16 %v286_v49, %v285_v48  ;;  %v4437_v53 = vpop.f32.mrb[9].mxu0  ;;  %v275_v55 = vadd.f32 %v6020_v18, %v274_v51  ;;  %v4458_v56 = vpop.f32.mrb[9].mxu1  ;;  %v240_v57 = vadd.f32 %v6020_v18, %v239_v50  ;;  %v495_v48 = vld [vmem:[#allocation6 + $0xc0] sm:$0xff]  ;;  %v307_v49 = vld [vmem:[#allocation6 + $0x58] sm:$0xff]  ;;  %v496_v50 = vld [vmem:[#allocation6 + $0xc8] sm:$0xff] }
 0x146   :  { %v308_v51 = vld [vmem:[#allocation6 + $0x60] sm:$0xff]  ;;  %v481_v53 = vld [vmem:[#allocation7 + $0x10] sm:$0xff] }
 0x147   :  { %5479 = vmatpush3.bf16.msra.mxu1 %v6037_v52  ;;  %5497 = vmatpush3.bf16.msra.mxu0 %v6037_v52  ;;  %v294_v58 = vmax.f32 %v275_v55, 0.0  ;;  %v287_v4 = vmax.f32 %v240_v57, 0.0 }
 0x148   :  { %v244_v59 = vpop.f32.mrb[10].mxu0  ;;  %5480 = vmatprep.subr.bf16.mxu1 %v5826_v0  ;;  %5498 = vmatprep.subr.bf16.mxu0 %v5826_v0  ;;  %v279_v60 = vpop.f32.mrb[10].mxu1 }
 0x149   :  { %v245_v61 = vadd.f32 %v6020_v18, %v244_v59  ;;  %v4440_v62 = vpop.f32.mrb[11].mxu0  ;;  %v6046_v63 = vpack.c.bf16 %v294_v58, %v293_v54  ;;  %v4461_v2 = vpop.f32.mrb[11].mxu1  ;;  %v280_v13 = vadd.f32 %v6020_v18, %v279_v60  ;;  %v482_v54 = vld [vmem:[#allocation7 + $0x18] sm:$0xff] }
 0x14a   :  { %v5520_v55 = vpack.c.bf16 %v482_v54, %v481_v53  ;;  %v1011_v53 = vld [vmem:[#allocation6 + $0xd0] sm:$0xff]  ;;  %v1012_v54 = vld [vmem:[#allocation6 + $0xd8] sm:$0xff] }
 0x14b   :  { %v288_v5 = vmax.f32 %v245_v61, 0.0  ;;  %v6067_v14 = vmax.f32 %v280_v13, 0.0 }
 0x14c   :  { %v249_v6 = vpop.f32.mrb[12].mxu0 }
 0x14d   :  { %v6049_v7 = vpack.c.bf16 %v288_v5, %v287_v4  ;;  %v250_v8 = vadd.f32 %v6020_v18, %v249_v6  ;;  %v4443_v9 = vpop.f32.mrb[13].mxu0  ;;  %v484_v18 = vld [vmem:[#allocation6 + $0x68] sm:$0xff] }
 0x14f   :  { %v289_v11 = vmax.f32 %v250_v8, 0.0  ;;  %5482 = vmatpush3.bf16.msra.mxu1 %v6049_v7  ;;  %5500 = vmatpush3.bf16.msra.mxu0 %v6049_v7 }
 0x150   :  { %5483 = vmatprep.subr.bf16.mxu1 %v5826_v0  ;;  %5501 = vmatprep.subr.bf16.mxu0 %v5826_v0 }
 0x151   :  { %v6056_v12 = vpack.c.bf16 %v290_v10, %v289_v11 }
 0x153   :  { %5485 = vmatpush3.bf16.msra.mxu1 %v6056_v12  ;;  %5503 = vmatpush3.bf16.msra.mxu0 %v6056_v12 }
 0x154   :  { %5486 = vmatprep.subr.bf16.mxu1 %v5826_v0  ;;  %5504 = vmatprep.subr.bf16.mxu0 %v5826_v0 }
 0x157   :  { %5488 = vmatpush3.bf16.msra.mxu1 %v6034_v45  ;;  %5506 = vmatpush3.bf16.msra.mxu0 %v6034_v45 }
 0x158   :  { %5489 = vmatprep.subr.bf16.mxu1 %v5826_v0  ;;  %5507 = vmatprep.subr.bf16.mxu0 %v5826_v0 }
 0x15b   :  { %5491 = vmatpush3.bf16.msra.mxu1 %v6046_v63  ;;  %5509 = vmatpush3.bf16.msra.mxu0 %v6046_v63 }
 0x15c   :  { %4486 = vmatprep.subr.mxu1 %v5828_v1  ;;  %4551 = vmatprep.subr.mxu0 %v5828_v1 }
 0x15f   :  { %4487 = vmatpush3.msra.mxu1 %v6067_v14  ;;  %4552 = vmatpush3.msra.mxu0 %v6067_v14 }
 0x160   :  { %4554 = vmatmul.mubr.msk.f32.vlgmr.msra.gmra.mrb[14].mxu0 %vm309_vm5, %v484_v18  ;;  %4489 = vmatmul.mubr.msk.f32.vlgmr.msra.gmra.mrb[12].mxu1 %vm309_vm5, %v296_v20 }
 0x161   :  { %4556 = vmatprep.mubr.msk.f32.mxu0 %vm5827_vm0, %v5828_v1  ;;  %4491 = vmatprep.mubr.msk.f32.mxu1 %vm5827_vm0, %v5828_v1 }
 0x162   :  { %5510 = vmatprep.subr.bf16.mxu1 %v5826_v0  ;;  %5516 = vmatprep.subr.bf16.mxu0 %v5826_v0 }
 0x163   :  { %5512 = vmatpush3.bf16.msra.mxu1 %v5511_v21  ;;  %5518 = vmatpush3.bf16.msra.mxu0 %v5517_v22 }
 0x164   :  { %4557 = vmatmul.mubr.msk.f32.gmra.mrb[16].mxu0 %vm309_vm5, %v485_v25  ;;  %4492 = vmatmul.mubr.msk.f32.gmra.mrb[14].mxu1 %vm309_vm5, %v297_v26 }
 0x165   :  { %4559 = vmatprep.mubr.msk.f32.mxu0 %vm5827_vm0, %v5828_v1  ;;  %4494 = vmatprep.mubr.msk.f32.mxu1 %vm5827_vm0, %v5828_v1 }
 0x166   :  { %5513 = vmatprep.subr.bf16.mxu1 %v5826_v0  ;;  %5519 = vmatprep.subr.bf16.mxu0 %v5826_v0 }
 0x167   :  { %5515 = vmatpush3.bf16.msra.mxu1 %v5514_v27  ;;  %5521 = vmatpush3.bf16.msra.mxu0 %v5520_v55  ;;  %v1013_v55 = vld [vmem:[#allocation6 + $0xe0] sm:$0xff] }
 0x168   :  { %4560 = vmatmul.mubr.msk.f32.gmra.mrb[18].mxu0 %vm309_vm5, %v486_v28  ;;  %4495 = vmatmul.mubr.msk.f32.gmra.mrb[16].mxu1 %vm309_vm5, %v298_v29 }
 0x169   :  { %4562 = vmatprep.mubr.msk.f32.mxu0 %vm5827_vm0, %v5828_v1  ;;  %4497 = vmatprep.mubr.msk.f32.mxu1 %vm5827_vm0, %v5828_v1 }
 0x16a   :  { %5522 = vmatprep.subr.bf16.mxu1 %v5826_v0  ;;  %5540 = vmatprep.subr.bf16.mxu0 %v5826_v0 }
 0x16c   :  { %4563 = vmatmul.mubr.msk.f32.gmra.mrb[20].mxu0 %vm309_vm5, %v487_v30  ;;  %4498 = vmatmul.mubr.msk.f32.gmra.mrb[18].mxu1 %vm309_vm5, %v299_v31 }
 0x16d   :  { %4565 = vmatprep.mubr.msk.f32.mxu0 %vm5827_vm0, %v5828_v1  ;;  %4500 = vmatprep.mubr.msk.f32.mxu1 %vm5827_vm0, %v5828_v1 }
 0x170   :  { %4566 = vmatmul.mubr.msk.f32.gmra.mrb[22].mxu0 %vm309_vm5, %v488_v32  ;;  %4501 = vmatmul.mubr.msk.f32.gmra.mrb[20].mxu1 %vm309_vm5, %v300_v33 }
 0x171   :  { %4568 = vmatprep.mubr.msk.f32.mxu0 %vm5827_vm0, %v5828_v1  ;;  %4503 = vmatprep.mubr.msk.f32.mxu1 %vm5827_vm0, %v5828_v1 }
 0x174   :  { %4569 = vmatmul.mubr.msk.f32.gmra.mrb[24].mxu0 %vm309_vm5, %v489_v35  ;;  %4504 = vmatmul.mubr.msk.f32.gmra.mrb[22].mxu1 %vm309_vm5, %v301_v36 }
 0x175   :  { %4571 = vmatprep.mubr.msk.f32.mxu0 %vm5827_vm0, %v5828_v1  ;;  %4506 = vmatprep.mubr.msk.f32.mxu1 %vm5827_vm0, %v5828_v1 }
 0x178   :  { %4572 = vmatmul.mubr.msk.f32.gmra.mrb[26].mxu0 %vm309_vm5, %v490_v37  ;;  %4507 = vmatmul.mubr.msk.f32.gmra.mrb[24].mxu1 %vm309_vm5, %v302_v38 }
 0x179   :  { %4574 = vmatprep.mubr.msk.f32.mxu0 %vm5827_vm0, %v5828_v1  ;;  %4509 = vmatprep.mubr.msk.f32.mxu1 %vm5827_vm0, %v5828_v1 }
 0x17c   :  { %4575 = vmatmul.mubr.msk.f32.gmra.mrb[28].mxu0 %vm309_vm5, %v491_v39  ;;  %4510 = vmatmul.mubr.msk.f32.gmra.mrb[26].mxu1 %vm309_vm5, %v303_v40 }
 0x17d   :  { %4577 = vmatprep.mubr.msk.f32.mxu0 %vm5827_vm0, %v5828_v1  ;;  %4512 = vmatprep.mubr.msk.f32.mxu1 %vm5827_vm0, %v5828_v1 }
 0x180   :  { %4578 = vmatmul.mubr.msk.f32.gmra.mrb[30].mxu0 %vm309_vm5, %v492_v41  ;;  %4513 = vmatmul.mubr.msk.f32.gmra.mrb[28].mxu1 %vm309_vm5, %v304_v42 }
 0x181   :  { %4580 = vmatprep.mubr.msk.f32.mxu0 %vm5827_vm0, %v5828_v1  ;;  %4515 = vmatprep.mubr.msk.f32.mxu1 %vm5827_vm0, %v5828_v1 }
 0x184   :  { %4581 = vmatmul.mubr.msk.f32.gmra.mrb[32].mxu0 %vm309_vm5, %v493_v43  ;;  %4516 = vmatmul.mubr.msk.f32.gmra.mrb[30].mxu1 %vm309_vm5, %v305_v44 }
 0x185   :  { %4583 = vmatprep.mubr.msk.f32.mxu0 %vm5827_vm0, %v5828_v1  ;;  %4518 = vmatprep.mubr.msk.f32.mxu1 %vm5827_vm0, %v5828_v1 }
 0x188   :  { %4584 = vmatmul.mubr.msk.f32.gmra.mrb[34].mxu0 %vm309_vm5, %v494_v46  ;;  %4519 = vmatmul.mubr.msk.f32.gmra.mrb[32].mxu1 %vm309_vm5, %v306_v47 }
 0x189   :  { %4586 = vmatprep.mubr.msk.f32.mxu0 %vm5827_vm0, %v5828_v1  ;;  %4521 = vmatprep.mubr.msk.f32.mxu1 %vm5827_vm0, %v5828_v1 }
 0x18c   :  { %4587 = vmatmul.mubr.msk.f32.gmra.mrb[36].mxu0 %vm309_vm5, %v495_v48  ;;  %4522 = vmatmul.mubr.msk.f32.gmra.mrb[34].mxu1 %vm309_vm5, %v307_v49 }
 0x18d   :  { %4589 = vmatprep.mubr.msk.f32.mxu0 %vm5827_vm0, %v5828_v1  ;;  %4524 = vmatprep.mubr.msk.f32.mxu1 %vm5827_vm0, %v5828_v1 }
 0x190   :  { %4590 = vmatmul.mubr.msk.f32.gmra.mrb[38].mxu0 %vm309_vm5, %v496_v50  ;;  %4525 = vmatmul.mubr.msk.f32.gmra.mrb[36].mxu1 %vm309_vm5, %v308_v51 }
 0x191   :  { %4600 = vmatprep.mubr.msk.f32.mxu1 %vm5827_vm0, %v5828_v1  ;;  %4647 = vmatprep.mubr.msk.f32.mxu0 %vm5827_vm0, %v5828_v1 }
 0x233   :  { %v602_v56 = vpop.f32.mrb[14].mxu0  ;;  %v415_v57 = vpop.f32.mrb[12].mxu1 }
 0x234   :  { %4601 = vmatmul.mubr.msk.f32.vlgmr.msra.gmra.mrb[38].mxu1 %vm671_vm6, %v602_v56  ;;  %v4555_v58 = vpop.f32.mrb[15].mxu0  ;;  %4648 = vmatmul.mubr.msk.f32.vlgmr.msra.gmra.mrb[40].mxu0 %vm671_vm6, %v415_v57  ;;  %v4490_v59 = vpop.f32.mrb[13].mxu1  ;;  %v1014_v56 = vld [vmem:[#allocation6 + $0xe8] sm:$0xff]  ;;  %v1015_v57 = vld [vmem:[#allocation6 + $0xf0] sm:$0xff] }
 0x235   :  { %5524 = vmatpush3.bf16.msra.mxu1 %v6025_v34  ;;  %4603 = vmatprep.mubr.msk.f32.mxu1 %vm5827_vm0, %v5828_v1  ;;  %v1016_v58 = vld [vmem:[#allocation6 + $0xf8] sm:$0xff]  ;;  %v1017_v59 = vld [vmem:[#allocation6 + $0x100] sm:$0xff] }
 0x236   :  { %5525 = vmatprep.subr.bf16.mxu1 %v5826_v0  ;;  %4650 = vmatprep.mubr.msk.f32.mxu0 %vm5827_vm0, %v5828_v1 }
 0x237   :  { %v607_v60 = vpop.f32.mrb[16].mxu0  ;;  %v420_v61 = vpop.f32.mrb[14].mxu1 }
 0x238   :  { %4604 = vmatmul.mubr.msk.f32.gmra.mrb[40].mxu1 %vm671_vm6, %v607_v60  ;;  %v4558_v62 = vpop.f32.mrb[17].mxu0  ;;  %4651 = vmatmul.mubr.msk.f32.gmra.mrb[42].mxu0 %vm671_vm6, %v420_v61  ;;  %v4493_v2 = vpop.f32.mrb[15].mxu1  ;;  %v1018_v60 = vld [vmem:[#allocation6 + $0x108] sm:$0xff]  ;;  %v1019_v61 = vld [vmem:[#allocation6 + $0x110] sm:$0xff] }
 0x239   :  { %5527 = vmatpush3.bf16.msra.mxu1 %v6037_v52  ;;  %4606 = vmatprep.mubr.msk.f32.mxu1 %vm5827_vm0, %v5828_v1  ;;  %v1020_v62 = vld [vmem:[#allocation6 + $0x118] sm:$0xff]  ;;  %v1194_v2 = vld [vmem:[#allocation7 + $0x40] sm:$0xff] }
 0x23a   :  { %5528 = vmatprep.subr.bf16.mxu1 %v5826_v0  ;;  %4653 = vmatprep.mubr.msk.f32.mxu0 %vm5827_vm0, %v5828_v1 }
 0x23b   :  { %v612_v3 = vpop.f32.mrb[18].mxu0  ;;  %v425_v4 = vpop.f32.mrb[16].mxu1 }
 0x23c   :  { %4607 = vmatmul.mubr.msk.f32.gmra.mrb[42].mxu1 %vm671_vm6, %v612_v3  ;;  %v4561_v5 = vpop.f32.mrb[19].mxu0  ;;  %4654 = vmatmul.mubr.msk.f32.gmra.mrb[44].mxu0 %vm671_vm6, %v425_v4  ;;  %v4496_v6 = vpop.f32.mrb[17].mxu1  ;;  %v1195_v3 = vld [vmem:[#allocation7 + $0x48] sm:$0xff] }
 0x23d   :  { %5530 = vmatpush3.bf16.msra.mxu1 %v6049_v7  ;;  %4609 = vmatprep.mubr.msk.f32.mxu1 %vm5827_vm0, %v5828_v1  ;;  %v5541_v4 = vpack.c.bf16 %v1195_v3, %v1194_v2  ;;  %v1021_v5 = vld [vmem:[#allocation6 + $0x120] sm:$0xff]  ;;  %v1022_v6 = vld [vmem:[#allocation6 + $0x128] sm:$0xff] }
 0x23e   :  { %5531 = vmatprep.subr.bf16.mxu1 %v5826_v0  ;;  %4656 = vmatprep.mubr.msk.f32.mxu0 %vm5827_vm0, %v5828_v1 }
 0x23f   :  { %v617_v8 = vpop.f32.mrb[20].mxu0  ;;  %v430_v9 = vpop.f32.mrb[18].mxu1  ;;  %5542 = vmatpush3.bf16.msra.mxu0 %v5541_v4 }
 0x240   :  { %4610 = vmatmul.mubr.msk.f32.gmra.mrb[44].mxu1 %vm671_vm6, %v617_v8  ;;  %v4564_v10 = vpop.f32.mrb[21].mxu0  ;;  %4657 = vmatmul.mubr.msk.f32.gmra.mrb[46].mxu0 %vm671_vm6, %v430_v9  ;;  %v4499_v11 = vpop.f32.mrb[19].mxu1  ;;  %v1023_v8 = vld [vmem:[#allocation6 + $0x130] sm:$0xff]  ;;  %v1381_v9 = vld [vmem:[#allocation6 + $0x138] sm:$0xff] }
 0x241   :  { %5533 = vmatpush3.bf16.msra.mxu1 %v6056_v12  ;;  %4612 = vmatprep.mubr.msk.f32.mxu1 %vm5827_vm0, %v5828_v1  ;;  %v1382_v10 = vld [vmem:[#allocation6 + $0x140] sm:$0xff]  ;;  %v1383_v11 = vld [vmem:[#allocation6 + $0x148] sm:$0xff] }
 0x242   :  { %5534 = vmatprep.subr.bf16.mxu1 %v5826_v0  ;;  %4659 = vmatprep.mubr.msk.f32.mxu0 %vm5827_vm0, %v5828_v1 }
 0x243   :  { %v622_v13 = vpop.f32.mrb[22].mxu0  ;;  %v435_v15 = vpop.f32.mrb[20].mxu1  ;;  %5543 = vmatprep.subr.bf16.mxu0 %v5826_v0 }
 0x244   :  { %4613 = vmatmul.mubr.msk.f32.gmra.mrb[46].mxu1 %vm671_vm6, %v622_v13  ;;  %v4567_v16 = vpop.f32.mrb[23].mxu0  ;;  %4660 = vmatmul.mubr.msk.f32.gmra.mrb[48].mxu0 %vm671_vm6, %v435_v15  ;;  %v4502_v17 = vpop.f32.mrb[21].mxu1  ;;  %v1196_v13 = vld [vmem:[#allocation7 + $0x50] sm:$0xff]  ;;  %v1197_v15 = vld [vmem:[#allocation7 + $0x58] sm:$0xff] }
 0x245   :  { %5536 = vmatpush3.bf16.msra.mxu1 %v6034_v45  ;;  %4615 = vmatprep.mubr.msk.f32.mxu1 %vm5827_vm0, %v5828_v1  ;;  %v1384_v16 = vld [vmem:[#allocation6 + $0x150] sm:$0xff]  ;;  %v5544_v17 = vpack.c.bf16 %v1197_v15, %v1196_v13 }
 0x246   :  { %5537 = vmatprep.subr.bf16.mxu1 %v5826_v0  ;;  %4662 = vmatprep.mubr.msk.f32.mxu0 %vm5827_vm0, %v5828_v1 }
 0x247   :  { %v627_v19 = vpop.f32.mrb[24].mxu0  ;;  %v440_v18 = vpop.f32.mrb[22].mxu1  ;;  %5545 = vmatpush3.bf16.msra.mxu0 %v5544_v17 }
 0x248   :  { %4616 = vmatmul.mubr.msk.f32.gmra.mrb[48].mxu1 %vm671_vm6, %v627_v19  ;;  %v4570_v20 = vpop.f32.mrb[25].mxu0  ;;  %4663 = vmatmul.mubr.msk.f32.gmra.mrb[50].mxu0 %vm671_vm6, %v440_v18  ;;  %v4505_v21 = vpop.f32.mrb[23].mxu1  ;;  %v1385_v19 = vld [vmem:[#allocation6 + $0x158] sm:$0xff]  ;;  %v1386_v18 = vld [vmem:[#allocation6 + $0x160] sm:$0xff] }
 0x249   :  { %5539 = vmatpush3.bf16.msra.mxu1 %v6046_v63  ;;  %4618 = vmatprep.mubr.msk.f32.mxu1 %vm5827_vm0, %v5828_v1  ;;  %v1387_v20 = vld [vmem:[#allocation6 + $0x168] sm:$0xff]  ;;  %v1388_v21 = vld [vmem:[#allocation6 + $0x170] sm:$0xff] }
 0x24a   :  { %4710 = vmatprep.subr.mxu1 %v5828_v1  ;;  %4665 = vmatprep.mubr.msk.f32.mxu0 %vm5827_vm0, %v5828_v1 }
 0x24b   :  { %v632_v22 = vpop.f32.mrb[26].mxu0  ;;  %v445_v23 = vpop.f32.mrb[24].mxu1  ;;  %5564 = vmatprep.subr.bf16.mxu0 %v5826_v0 }
 0x24c   :  { %4619 = vmatmul.mubr.msk.f32.gmra.mrb[50].mxu1 %vm671_vm6, %v632_v22  ;;  %v4573_v24 = vpop.f32.mrb[27].mxu0  ;;  %4666 = vmatmul.mubr.msk.f32.gmra.mrb[52].mxu0 %vm671_vm6, %v445_v23  ;;  %v4508_v25 = vpop.f32.mrb[25].mxu1  ;;  %v1389_v22 = vld [vmem:[#allocation6 + $0x178] sm:$0xff]  ;;  %v1390_v23 = vld [vmem:[#allocation6 + $0x180] sm:$0xff] }
 0x24d   :  { %4711 = vmatpush3.msra.mxu1 %v6067_v14  ;;  %4621 = vmatprep.mubr.msk.f32.mxu1 %vm5827_vm0, %v5828_v1  ;;  %v1391_v24 = vld [vmem:[#allocation6 + $0x188] sm:$0xff]  ;;  %v1392_v25 = vld [vmem:[#allocation6 + $0x190] sm:$0xff] }
 0x24e   :  { %4668 = vmatprep.mubr.msk.f32.mxu0 %vm5827_vm0, %v5828_v1  ;;  %5546 = vmatprep.subr.bf16.mxu1 %v5826_v0 }
 0x24f   :  { %v637_v26 = vpop.f32.mrb[28].mxu0  ;;  %v450_v27 = vpop.f32.mrb[26].mxu1 }
 0x250   :  { %4622 = vmatmul.mubr.msk.f32.gmra.mrb[52].mxu1 %vm671_vm6, %v637_v26  ;;  %v4576_v28 = vpop.f32.mrb[29].mxu0  ;;  %4669 = vmatmul.mubr.msk.f32.gmra.mrb[54].mxu0 %vm671_vm6, %v450_v27  ;;  %v4511_v29 = vpop.f32.mrb[27].mxu1  ;;  %v1393_v26 = vld [vmem:[#allocation6 + $0x198] sm:$0xff]  ;;  %v1751_v27 = vld [vmem:[#allocation6 + $0x1a0] sm:$0xff] }
 0x251   :  { %4624 = vmatprep.mubr.msk.f32.mxu1 %vm5827_vm0, %v5828_v1  ;;  %4671 = vmatprep.mubr.msk.f32.mxu0 %vm5827_vm0, %v5828_v1  ;;  %v1752_v28 = vld [vmem:[#allocation6 + $0x1a8] sm:$0xff]  ;;  %v1753_v29 = vld [vmem:[#allocation6 + $0x1b0] sm:$0xff] }
 0x253   :  { %v642_v30 = vpop.f32.mrb[30].mxu0  ;;  %v455_v31 = vpop.f32.mrb[28].mxu1 }
 0x254   :  { %4625 = vmatmul.mubr.msk.f32.gmra.mrb[54].mxu1 %vm671_vm6, %v642_v30  ;;  %v4579_v32 = vpop.f32.mrb[31].mxu0  ;;  %4672 = vmatmul.mubr.msk.f32.gmra.mrb[56].mxu0 %vm671_vm6, %v455_v31  ;;  %v4514_v33 = vpop.f32.mrb[29].mxu1  ;;  %v1754_v30 = vld [vmem:[#allocation6 + $0x1b8] sm:$0xff]  ;;  %v1755_v31 = vld [vmem:[#allocation6 + $0x1c0] sm:$0xff] }
 0x255   :  { %4627 = vmatprep.mubr.msk.f32.mxu1 %vm5827_vm0, %v5828_v1  ;;  %4674 = vmatprep.mubr.msk.f32.mxu0 %vm5827_vm0, %v5828_v1  ;;  %v1756_v32 = vld [vmem:[#allocation6 + $0x1c8] sm:$0xff]  ;;  %v1757_v33 = vld [vmem:[#allocation6 + $0x1d0] sm:$0xff] }
 0x257   :  { %v647_v35 = vpop.f32.mrb[32].mxu0  ;;  %v460_v36 = vpop.f32.mrb[30].mxu1 }
 0x258   :  { %4628 = vmatmul.mubr.msk.f32.gmra.mrb[56].mxu1 %vm671_vm6, %v647_v35  ;;  %v4582_v37 = vpop.f32.mrb[33].mxu0  ;;  %4675 = vmatmul.mubr.msk.f32.gmra.mrb[58].mxu0 %vm671_vm6, %v460_v36  ;;  %v4517_v38 = vpop.f32.mrb[31].mxu1  ;;  %v1758_v35 = vld [vmem:[#allocation6 + $0x1d8] sm:$0xff]  ;;  %v1759_v36 = vld [vmem:[#allocation6 + $0x1e0] sm:$0xff] }
 0x259   :  { %4630 = vmatprep.mubr.msk.f32.mxu1 %vm5827_vm0, %v5828_v1  ;;  %4677 = vmatprep.mubr.msk.f32.mxu0 %vm5827_vm0, %v5828_v1  ;;  %v1760_v37 = vld [vmem:[#allocation6 + $0x1e8] sm:$0xff]  ;;  %v1761_v38 = vld [vmem:[#allocation6 + $0x1f0] sm:$0xff] }
 0x25b   :  { %v652_v39 = vpop.f32.mrb[34].mxu0  ;;  %v465_v40 = vpop.f32.mrb[32].mxu1 }
 0x25c   :  { %4631 = vmatmul.mubr.msk.f32.gmra.mrb[58].mxu1 %vm671_vm6, %v652_v39  ;;  %v4585_v41 = vpop.f32.mrb[35].mxu0  ;;  %4678 = vmatmul.mubr.msk.f32.gmra.mrb[60].mxu0 %vm671_vm6, %v465_v40  ;;  %v4520_v42 = vpop.f32.mrb[33].mxu1  ;;  %v1762_v39 = vld [vmem:[#allocation6 + $0x1f8] sm:$0xff]  ;;  %v1763_v40 = vld [vmem:[#allocation6 + $0x200] sm:$0xff] }
 0x25d   :  { %4633 = vmatprep.mubr.msk.f32.mxu1 %vm5827_vm0, %v5828_v1  ;;  %4680 = vmatprep.mubr.msk.f32.mxu0 %vm5827_vm0, %v5828_v1  ;;  %v2121_v41 = vld [vmem:[#allocation6 + $0x208] sm:$0xff]  ;;  %v2122_v42 = vld [vmem:[#allocation6 + $0x210] sm:$0xff] }
 0x25f   :  { %v657_v43 = vpop.f32.mrb[36].mxu0  ;;  %v470_v44 = vpop.f32.mrb[34].mxu1 }
 0x260   :  { %4634 = vmatmul.mubr.msk.f32.gmra.mrb[60].mxu1 %vm671_vm6, %v657_v43  ;;  %v4588_v46 = vpop.f32.mrb[37].mxu0  ;;  %4681 = vmatmul.mubr.msk.f32.gmra.mrb[62].mxu0 %vm671_vm6, %v470_v44  ;;  %v4523_v47 = vpop.f32.mrb[35].mxu1 }
 0x261   :  { %4636 = vmatprep.mubr.msk.f32.mxu1 %vm5827_vm0, %v5828_v1  ;;  %4683 = vmatprep.mubr.msk.f32.mxu0 %vm5827_vm0, %v5828_v1 }
 0x263   :  { %v662_v48 = vpop.f32.mrb[38].mxu0  ;;  %v475_v49 = vpop.f32.mrb[36].mxu1 }
 0x264   :  { %4637 = vmatmul.mubr.msk.f32.gmra.mrb[62].mxu1 %vm671_vm6, %v662_v48  ;;  %v4591_v50 = vpop.f32.mrb[39].mxu0  ;;  %4684 = vmatmul.mubr.msk.f32.gmra.mrb[64].mxu0 %vm671_vm6, %v475_v49  ;;  %v4526_v51 = vpop.f32.mrb[37].mxu1  ;;  %v2123_v49 = vld [vmem:[#allocation6 + $0x218] sm:$0xff] }
 0x265   :  { %4712 = vmatprep.mubr.msk.f32.mxu1 %vm5827_vm0, %v5828_v1  ;;  %4759 = vmatprep.mubr.msk.f32.mxu0 %vm5827_vm0, %v5828_v1 }
 0x268   :  { %4713 = vmatmul.mubr.msk.f32.vlgmr.msra.gmra.mrb[64].mxu1 %vm309_vm5, %v1011_v53 }
 0x269   :  { %5548 = vmatpush3.bf16.msra.mxu1 %v6025_v34  ;;  %4715 = vmatprep.mubr.msk.f32.mxu1 %vm5827_vm0, %v5828_v1 }
 0x26a   :  { %5549 = vmatprep.subr.bf16.mxu1 %v5826_v0 }
 0x26c   :  { %4716 = vmatmul.mubr.msk.f32.gmra.mrb[66].mxu1 %vm309_vm5, %v1012_v54 }
 0x26d   :  { %5551 = vmatpush3.bf16.msra.mxu1 %v6037_v52  ;;  %4718 = vmatprep.mubr.msk.f32.mxu1 %vm5827_vm0, %v5828_v1 }
 0x26e   :  { %5552 = vmatprep.subr.bf16.mxu1 %v5826_v0 }
 0x270   :  { %4719 = vmatmul.mubr.msk.f32.gmra.mrb[68].mxu1 %vm309_vm5, %v1013_v55 }
 0x271   :  { %5554 = vmatpush3.bf16.msra.mxu1 %v6049_v7  ;;  %4721 = vmatprep.mubr.msk.f32.mxu1 %vm5827_vm0, %v5828_v1 }
 0x272   :  { %5555 = vmatprep.subr.bf16.mxu1 %v5826_v0 }
 0x274   :  { %4722 = vmatmul.mubr.msk.f32.gmra.mrb[70].mxu1 %vm309_vm5, %v1014_v56  ;;  %v2124_v56 = vld [vmem:[#allocation6 + $0x220] sm:$0xff] }
 0x275   :  { %5557 = vmatpush3.bf16.msra.mxu1 %v6056_v12  ;;  %4724 = vmatprep.mubr.msk.f32.mxu1 %vm5827_vm0, %v5828_v1 }
 0x276   :  { %5558 = vmatprep.subr.bf16.mxu1 %v5826_v0 }
 0x278   :  { %4725 = vmatmul.mubr.msk.f32.gmra.mrb[72].mxu1 %vm309_vm5, %v1015_v57 }
 0x279   :  { %5560 = vmatpush3.bf16.msra.mxu1 %v6034_v45  ;;  %4727 = vmatprep.mubr.msk.f32.mxu1 %vm5827_vm0, %v5828_v1 }
 0x27a   :  { %5561 = vmatprep.subr.bf16.mxu1 %v5826_v0 }
 0x27c   :  { %4728 = vmatmul.mubr.msk.f32.gmra.mrb[74].mxu1 %vm309_vm5, %v1016_v58 }
 0x27d   :  { %5563 = vmatpush3.bf16.msra.mxu1 %v6046_v63  ;;  %4730 = vmatprep.mubr.msk.f32.mxu1 %vm5827_vm0, %v5828_v1 }
 0x27e   :  { %4822 = vmatprep.subr.mxu1 %v5828_v1 }
 0x280   :  { %4731 = vmatmul.mubr.msk.f32.gmra.mrb[76].mxu1 %vm309_vm5, %v1017_v59 }
 0x281   :  { %4823 = vmatpush3.msra.mxu1 %v6067_v14  ;;  %4733 = vmatprep.mubr.msk.f32.mxu1 %vm5827_vm0, %v5828_v1 }
 0x282   :  { %5570 = vmatprep.subr.bf16.mxu1 %v5826_v0 }
 0x284   :  { %4734 = vmatmul.mubr.msk.f32.gmra.mrb[78].mxu1 %vm309_vm5, %v1018_v60 }
 0x285   :  { %4736 = vmatprep.mubr.msk.f32.mxu1 %vm5827_vm0, %v5828_v1 }
 0x288   :  { %4737 = vmatmul.mubr.msk.f32.gmra.mrb[80].mxu1 %vm309_vm5, %v1019_v61 }
 0x289   :  { %4739 = vmatprep.mubr.msk.f32.mxu1 %vm5827_vm0, %v5828_v1 }
 0x28c   :  { %4740 = vmatmul.mubr.msk.f32.gmra.mrb[82].mxu1 %vm309_vm5, %v1020_v62  ;;  %v2125_v62 = vld [vmem:[#allocation6 + $0x228] sm:$0xff] }
 0x28d   :  { %4742 = vmatprep.mubr.msk.f32.mxu1 %vm5827_vm0, %v5828_v1 }
 0x290   :  { %4743 = vmatmul.mubr.msk.f32.gmra.mrb[84].mxu1 %vm309_vm5, %v1021_v5 }
 0x291   :  { %4745 = vmatprep.mubr.msk.f32.mxu1 %vm5827_vm0, %v5828_v1 }
 0x294   :  { %4746 = vmatmul.mubr.msk.f32.gmra.mrb[86].mxu1 %vm309_vm5, %v1022_v6 }
 0x295   :  { %4748 = vmatprep.mubr.msk.f32.mxu1 %vm5827_vm0, %v5828_v1 }
 0x298   :  { %4749 = vmatmul.mubr.msk.f32.gmra.mrb[88].mxu1 %vm309_vm5, %v1023_v8  ;;  %v2126_v8 = vld [vmem:[#allocation6 + $0x230] sm:$0xff] }
 0x299   :  { %4824 = vmatprep.mubr.msk.f32.mxu1 %vm5827_vm0, %v5828_v1 }
 0x29c   :  { %4825 = vmatmul.mubr.msk.f32.vlgmr.msra.gmra.mrb[90].mxu1 %vm309_vm5, %v1381_v9 }
 0x29d   :  { %5572 = vmatpush3.bf16.msra.mxu1 %v6025_v34  ;;  %4827 = vmatprep.mubr.msk.f32.mxu1 %vm5827_vm0, %v5828_v1 }
 0x29e   :  { %5573 = vmatprep.subr.bf16.mxu1 %v5826_v0 }
 0x2a0   :  { %4828 = vmatmul.mubr.msk.f32.gmra.mrb[92].mxu1 %vm309_vm5, %v1382_v10 }
 0x2a1   :  { %5575 = vmatpush3.bf16.msra.mxu1 %v6037_v52  ;;  %4830 = vmatprep.mubr.msk.f32.mxu1 %vm5827_vm0, %v5828_v1 }
 0x2a2   :  { %5576 = vmatprep.subr.bf16.mxu1 %v5826_v0 }
 0x2a4   :  { %4831 = vmatmul.mubr.msk.f32.gmra.mrb[94].mxu1 %vm309_vm5, %v1383_v11 }
 0x2a5   :  { %5578 = vmatpush3.bf16.msra.mxu1 %v6049_v7  ;;  %4833 = vmatprep.mubr.msk.f32.mxu1 %vm5827_vm0, %v5828_v1 }
 0x2a6   :  { %5579 = vmatprep.subr.bf16.mxu1 %v5826_v0 }
 0x2a8   :  { %4834 = vmatmul.mubr.msk.f32.gmra.mrb[96].mxu1 %vm309_vm5, %v1384_v16  ;;  %v2127_v16 = vld [vmem:[#allocation6 + $0x238] sm:$0xff] }
 0x2a9   :  { %5581 = vmatpush3.bf16.msra.mxu1 %v6056_v12  ;;  %4836 = vmatprep.mubr.msk.f32.mxu1 %vm5827_vm0, %v5828_v1 }
 0x2aa   :  { %5582 = vmatprep.subr.bf16.mxu1 %v5826_v0 }
 0x2ac   :  { %4837 = vmatmul.mubr.msk.f32.gmra.mrb[98].mxu1 %vm309_vm5, %v1385_v19 }
 0x2ad   :  { %5584 = vmatpush3.bf16.msra.mxu1 %v6034_v45  ;;  %4839 = vmatprep.mubr.msk.f32.mxu1 %vm5827_vm0, %v5828_v1 }
 0x2ae   :  { %5585 = vmatprep.subr.bf16.mxu1 %v5826_v0 }
 0x2b0   :  { %4840 = vmatmul.mubr.msk.f32.gmra.mrb[100].mxu1 %vm309_vm5, %v1386_v18 }
 0x2b1   :  { %5587 = vmatpush3.bf16.msra.mxu1 %v6046_v63  ;;  %4842 = vmatprep.mubr.msk.f32.mxu1 %vm5827_vm0, %v5828_v1 }
 0x2b2   :  { %4934 = vmatprep.subr.mxu1 %v5828_v1 }
 0x2b4   :  { %4843 = vmatmul.mubr.msk.f32.gmra.mrb[102].mxu1 %vm309_vm5, %v1387_v20 }
 0x2b5   :  { %4935 = vmatpush3.msra.mxu1 %v6067_v14  ;;  %4845 = vmatprep.mubr.msk.f32.mxu1 %vm5827_vm0, %v5828_v1 }
 0x2b6   :  { %5594 = vmatprep.subr.bf16.mxu1 %v5826_v0 }
 0x2b8   :  { %4846 = vmatmul.mubr.msk.f32.gmra.mrb[104].mxu1 %vm309_vm5, %v1388_v21 }
 0x2b9   :  { %4848 = vmatprep.mubr.msk.f32.mxu1 %vm5827_vm0, %v5828_v1 }
 0x2bc   :  { %4849 = vmatmul.mubr.msk.f32.gmra.mrb[106].mxu1 %vm309_vm5, %v1389_v22  ;;  %v2128_v22 = vld [vmem:[#allocation6 + $0x240] sm:$0xff] }
 0x2bd   :  { %4851 = vmatprep.mubr.msk.f32.mxu1 %vm5827_vm0, %v5828_v1 }
 0x2c0   :  { %4852 = vmatmul.mubr.msk.f32.gmra.mrb[108].mxu1 %vm309_vm5, %v1390_v23 }
 0x2c1   :  { %4854 = vmatprep.mubr.msk.f32.mxu1 %vm5827_vm0, %v5828_v1 }
 0x2c4   :  { %4855 = vmatmul.mubr.msk.f32.gmra.mrb[110].mxu1 %vm309_vm5, %v1391_v24 }
 0x2c5   :  { %4857 = vmatprep.mubr.msk.f32.mxu1 %vm5827_vm0, %v5828_v1 }
 0x2c8   :  { %4858 = vmatmul.mubr.msk.f32.gmra.mrb[112].mxu1 %vm309_vm5, %v1392_v25 }
 0x2c9   :  { %4860 = vmatprep.mubr.msk.f32.mxu1 %vm5827_vm0, %v5828_v1 }
 0x2cc   :  { %4861 = vmatmul.mubr.msk.f32.gmra.mrb[114].mxu1 %vm309_vm5, %v1393_v26 }
 0x2cd   :  { %4936 = vmatprep.mubr.msk.f32.mxu1 %vm5827_vm0, %v5828_v1 }
 0x2d0   :  { %4937 = vmatmul.mubr.msk.f32.vlgmr.msra.gmra.mrb[116].mxu1 %vm309_vm5, %v1751_v27 }
 0x2d1   :  { %5596 = vmatpush3.bf16.msra.mxu1 %v6025_v34  ;;  %4939 = vmatprep.mubr.msk.f32.mxu1 %vm5827_vm0, %v5828_v1 }
 0x2d2   :  { %5597 = vmatprep.subr.bf16.mxu1 %v5826_v0 }
 0x2d4   :  { %4940 = vmatmul.mubr.msk.f32.gmra.mrb[118].mxu1 %vm309_vm5, %v1752_v28  ;;  %v2129_v28 = vld [vmem:[#allocation6 + $0x248] sm:$0xff] }
 0x2d5   :  { %5599 = vmatpush3.bf16.msra.mxu1 %v6037_v52  ;;  %4942 = vmatprep.mubr.msk.f32.mxu1 %vm5827_vm0, %v5828_v1 }
 0x2d6   :  { %5600 = vmatprep.subr.bf16.mxu1 %v5826_v0 }
 0x2d8   :  { %4943 = vmatmul.mubr.msk.f32.gmra.mrb[120].mxu1 %vm309_vm5, %v1753_v29 }
 0x2d9   :  { %5602 = vmatpush3.bf16.msra.mxu1 %v6049_v7  ;;  %4945 = vmatprep.mubr.msk.f32.mxu1 %vm5827_vm0, %v5828_v1 }
 0x2da   :  { %5603 = vmatprep.subr.bf16.mxu1 %v5826_v0 }
 0x2dc   :  { %4946 = vmatmul.mubr.msk.f32.gmra.mrb[122].mxu1 %vm309_vm5, %v1754_v30 }
 0x2dd   :  { %5605 = vmatpush3.bf16.msra.mxu1 %v6056_v12  ;;  %4948 = vmatprep.mubr.msk.f32.mxu1 %vm5827_vm0, %v5828_v1 }
 0x2de   :  { %5606 = vmatprep.subr.bf16.mxu1 %v5826_v0 }
 0x2e0   :  { %4949 = vmatmul.mubr.msk.f32.gmra.mrb[124].mxu1 %vm309_vm5, %v1755_v31 }
 0x2e1   :  { %5608 = vmatpush3.bf16.msra.mxu1 %v6034_v45  ;;  %4951 = vmatprep.mubr.msk.f32.mxu1 %vm5827_vm0, %v5828_v1 }
 0x2e2   :  { %5609 = vmatprep.subr.bf16.mxu1 %v5826_v0 }
 0x2e4   :  { %4952 = vmatmul.mubr.msk.f32.gmra.mrb[126].mxu1 %vm309_vm5, %v1756_v32 }
 0x2e5   :  { %5611 = vmatpush3.bf16.msra.mxu1 %v6046_v63  ;;  %4954 = vmatprep.mubr.msk.f32.mxu1 %vm5827_vm0, %v5828_v1 }
 0x2e6   :  { %5046 = vmatprep.subr.mxu1 %v5828_v1 }
 0x2e8   :  { %4955 = vmatmul.mubr.msk.f32.gmra.mrb[128].mxu1 %vm309_vm5, %v1757_v33 }
 0x2e9   :  { %5047 = vmatpush3.msra.mxu1 %v6067_v14  ;;  %4957 = vmatprep.mubr.msk.f32.mxu1 %vm5827_vm0, %v5828_v1 }
 0x2ea   :  { %5618 = vmatprep.subr.bf16.mxu1 %v5826_v0 }
 0x2ec   :  { %4958 = vmatmul.mubr.msk.f32.gmra.mrb[130].mxu1 %vm309_vm5, %v1758_v35  ;;  %v2130_v35 = vld [vmem:[#allocation6 + $0x250] sm:$0xff] }
 0x2ed   :  { %4960 = vmatprep.mubr.msk.f32.mxu1 %vm5827_vm0, %v5828_v1 }
 0x2f0   :  { %4961 = vmatmul.mubr.msk.f32.gmra.mrb[132].mxu1 %vm309_vm5, %v1759_v36 }
 0x2f1   :  { %4963 = vmatprep.mubr.msk.f32.mxu1 %vm5827_vm0, %v5828_v1 }
 0x2f4   :  { %4964 = vmatmul.mubr.msk.f32.gmra.mrb[134].mxu1 %vm309_vm5, %v1760_v37 }
 0x2f5   :  { %4966 = vmatprep.mubr.msk.f32.mxu1 %vm5827_vm0, %v5828_v1 }
 0x2f8   :  { %4967 = vmatmul.mubr.msk.f32.gmra.mrb[136].mxu1 %vm309_vm5, %v1761_v38 }
 0x2f9   :  { %4969 = vmatprep.mubr.msk.f32.mxu1 %vm5827_vm0, %v5828_v1 }
 0x2fc   :  { %4970 = vmatmul.mubr.msk.f32.gmra.mrb[138].mxu1 %vm309_vm5, %v1762_v39 }
 0x2fd   :  { %4972 = vmatprep.mubr.msk.f32.mxu1 %vm5827_vm0, %v5828_v1 }
 0x300   :  { %4973 = vmatmul.mubr.msk.f32.gmra.mrb[140].mxu1 %vm309_vm5, %v1763_v40 }
 0x301   :  { %5048 = vmatprep.mubr.msk.f32.mxu1 %vm5827_vm0, %v5828_v1 }
 0x304   :  { %5049 = vmatmul.mubr.msk.f32.vlgmr.msra.gmra.mrb[142].mxu1 %vm309_vm5, %v2121_v41  ;;  %v2131_v41 = vld [vmem:[#allocation6 + $0x258] sm:$0xff] }
 0x305   :  { %5620 = vmatpush3.bf16.msra.mxu1 %v6025_v34  ;;  %5051 = vmatprep.mubr.msk.f32.mxu1 %vm5827_vm0, %v5828_v1 }
 0x306   :  { %5621 = vmatprep.subr.bf16.mxu1 %v5826_v0 }
 0x307   :  { %v777_v43 = vpop.f32.mrb[38].mxu1  ;;  %v946_v44 = vpop.f32.mrb[40].mxu0 }
 0x308   :  { %5052 = vmatmul.mubr.msk.f32.gmra.mrb[144].mxu1 %vm309_vm5, %v2122_v42  ;;  %v4602_v46 = vpop.f32.mrb[39].mxu1  ;;  %v6418_v47 = vadd.f32 %v946_v44, %v777_v43  ;;  %v4649_v48 = vpop.f32.mrb[41].mxu0 }
 0x309   :  { %5623 = vmatpush3.bf16.msra.mxu1 %v6037_v52  ;;  %5054 = vmatprep.mubr.msk.f32.mxu1 %vm5827_vm0, %v5828_v1 }
 0x30a   :  { %5624 = vmatprep.subr.bf16.mxu1 %v5826_v0 }
 0x30b   :  { %v782_v50 = vpop.f32.mrb[40].mxu1  ;;  %v951_v51 = vpop.f32.mrb[42].mxu0 }
 0x30c   :  { %5055 = vmatmul.mubr.msk.f32.gmra.mrb[146].mxu1 %vm309_vm5, %v2123_v49  ;;  %v4605_v53 = vpop.f32.mrb[41].mxu1  ;;  %v6425_v54 = vadd.f32 %v951_v51, %v782_v50  ;;  %v4652_v55 = vpop.f32.mrb[43].mxu0  ;;  %v2132_v49 = vld [vmem:[#allocation6 + $0x260] sm:$0xff] }
 0x30d   :  { %5626 = vmatpush3.bf16.msra.mxu1 %v6049_v7  ;;  %5057 = vmatprep.mubr.msk.f32.mxu1 %vm5827_vm0, %v5828_v1 }
 0x30e   :  { %5627 = vmatprep.subr.bf16.mxu1 %v5826_v0 }
 0x30f   :  { %v787_v57 = vpop.f32.mrb[42].mxu1  ;;  %v956_v58 = vpop.f32.mrb[44].mxu0 }
 0x310   :  { %5058 = vmatmul.mubr.msk.f32.gmra.mrb[148].mxu1 %vm309_vm5, %v2124_v56  ;;  %v4608_v59 = vpop.f32.mrb[43].mxu1  ;;  %v6432_v60 = vadd.f32 %v956_v58, %v787_v57  ;;  %v4655_v61 = vpop.f32.mrb[45].mxu0  ;;  %v2133_v57 = vld [vmem:[#allocation6 + $0x268] sm:$0xff] }
 0x311   :  { %5629 = vmatpush3.bf16.msra.mxu1 %v6056_v12  ;;  %5060 = vmatprep.mubr.msk.f32.mxu1 %vm5827_vm0, %v5828_v1 }
 0x312   :  { %5630 = vmatprep.subr.bf16.mxu1 %v5826_v0 }
 0x313   :  { %v792_v2 = vpop.f32.mrb[44].mxu1  ;;  %v961_v3 = vpop.f32.mrb[46].mxu0 }
 0x314   :  { %5061 = vmatmul.mubr.msk.f32.gmra.mrb[150].mxu1 %vm309_vm5, %v2125_v62  ;;  %v4611_v4 = vpop.f32.mrb[45].mxu1  ;;  %v6439_v5 = vadd.f32 %v961_v3, %v792_v2  ;;  %v4658_v6 = vpop.f32.mrb[47].mxu0  ;;  %v2491_v3 = vld [vmem:[#allocation6 + $0x270] sm:$0xff] }
 0x315   :  { %5632 = vmatpush3.bf16.msra.mxu1 %v6034_v45  ;;  %5063 = vmatprep.mubr.msk.f32.mxu1 %vm5827_vm0, %v5828_v1 }
 0x316   :  { %5633 = vmatprep.subr.bf16.mxu1 %v5826_v0 }
 0x317   :  { %v797_v9 = vpop.f32.mrb[46].mxu1  ;;  %v966_v10 = vpop.f32.mrb[48].mxu0 }
 0x318   :  { %5064 = vmatmul.mubr.msk.f32.gmra.mrb[152].mxu1 %vm309_vm5, %v2126_v8  ;;  %v4614_v11 = vpop.f32.mrb[47].mxu1  ;;  %v6446_v13 = vadd.f32 %v966_v10, %v797_v9  ;;  %v4661_v15 = vpop.f32.mrb[49].mxu0  ;;  %v1564_v8 = vld [vmem:[#allocation7 + $0x60] sm:$0xff]  ;;  %v1565_v9 = vld [vmem:[#allocation7 + $0x68] sm:$0xff] }
 0x319   :  { %5635 = vmatpush3.bf16.msra.mxu1 %v6046_v63  ;;  %5066 = vmatprep.mubr.msk.f32.mxu1 %vm5827_vm0, %v5828_v1 }
 0x31a   :  { %5158 = vmatprep.subr.mxu1 %v5828_v1 }
 0x31b   :  { %v802_v17 = vpop.f32.mrb[48].mxu1  ;;  %v971_v19 = vpop.f32.mrb[50].mxu0 }
 0x31c   :  { %5067 = vmatmul.mubr.msk.f32.gmra.mrb[154].mxu1 %vm309_vm5, %v2127_v16  ;;  %v4617_v18 = vpop.f32.mrb[49].mxu1  ;;  %v6453_v20 = vadd.f32 %v971_v19, %v802_v17  ;;  %v4664_v21 = vpop.f32.mrb[51].mxu0  ;;  %v2492_v16 = vld [vmem:[#allocation6 + $0x278] sm:$0xff]  ;;  %v5565_v17 = vpack.c.bf16 %v1565_v9, %v1564_v8 }
 0x31d   :  { %5159 = vmatpush3.msra.mxu1 %v6067_v14  ;;  %5069 = vmatprep.mubr.msk.f32.mxu1 %vm5827_vm0, %v5828_v1  ;;  %v1566_v21 = vld [vmem:[#allocation7 + $0x70] sm:$0xff] }
 0x31e   :  { %5642 = vmatprep.subr.bf16.mxu1 %v5826_v0 }
 0x31f   :  { %v807_v23 = vpop.f32.mrb[50].mxu1  ;;  %v976_v24 = vpop.f32.mrb[52].mxu0 }
 0x320   :  { %5070 = vmatmul.mubr.msk.f32.gmra.mrb[156].mxu1 %vm309_vm5, %v2128_v22  ;;  %v4620_v25 = vpop.f32.mrb[51].mxu1  ;;  %v6460_v26 = vadd.f32 %v976_v24, %v807_v23  ;;  %v4667_v27 = vpop.f32.mrb[53].mxu0  ;;  %v1567_v22 = vld [vmem:[#allocation7 + $0x78] sm:$0xff] }
 0x321   :  { %5072 = vmatprep.mubr.msk.f32.mxu1 %vm5827_vm0, %v5828_v1  ;;  %v2493_v23 = vld [vmem:[#allocation6 + $0x280] sm:$0xff]  ;;  %v5568_v25 = vpack.c.bf16 %v1567_v22, %v1566_v21 }
 0x323   :  { %v812_v29 = vpop.f32.mrb[52].mxu1  ;;  %v981_v30 = vpop.f32.mrb[54].mxu0 }
 0x324   :  { %5073 = vmatmul.mubr.msk.f32.gmra.mrb[158].mxu1 %vm309_vm5, %v2129_v28  ;;  %v4623_v31 = vpop.f32.mrb[53].mxu1  ;;  %v6465_v32 = vadd.f32 %v981_v30, %v812_v29  ;;  %v4670_v33 = vpop.f32.mrb[55].mxu0  ;;  %v2494_v28 = vld [vmem:[#allocation6 + $0x288] sm:$0xff] }
 0x325   :  { %5075 = vmatprep.mubr.msk.f32.mxu1 %vm5827_vm0, %v5828_v1  ;;  %v2495_v31 = vld [vmem:[#allocation6 + $0x290] sm:$0xff] }
 0x327   :  { %v817_v36 = vpop.f32.mrb[54].mxu1  ;;  %v986_v37 = vpop.f32.mrb[56].mxu0 }
 0x328   :  { %5076 = vmatmul.mubr.msk.f32.gmra.mrb[160].mxu1 %vm309_vm5, %v2130_v35  ;;  %v4626_v38 = vpop.f32.mrb[55].mxu1  ;;  %v6470_v39 = vadd.f32 %v986_v37, %v817_v36  ;;  %v4673_v40 = vpop.f32.mrb[57].mxu0  ;;  %v2496_v36 = vld [vmem:[#allocation6 + $0x298] sm:$0xff] }
 0x329   :  { %5078 = vmatprep.mubr.msk.f32.mxu1 %vm5827_vm0, %v5828_v1  ;;  %v2497_v40 = vld [vmem:[#allocation6 + $0x2a0] sm:$0xff] }
 0x32b   :  { %v822_v42 = vpop.f32.mrb[56].mxu1  ;;  %v991_v43 = vpop.f32.mrb[58].mxu0 }
 0x32c   :  { %5079 = vmatmul.mubr.msk.f32.gmra.mrb[162].mxu1 %vm309_vm5, %v2131_v41  ;;  %v4629_v44 = vpop.f32.mrb[57].mxu1  ;;  %v6475_v46 = vadd.f32 %v991_v43, %v822_v42  ;;  %v4676_v48 = vpop.f32.mrb[59].mxu0  ;;  %v2498_v43 = vld [vmem:[#allocation6 + $0x2a8] sm:$0xff] }
 0x32d   :  { %5081 = vmatprep.mubr.msk.f32.mxu1 %vm5827_vm0, %v5828_v1 }
 0x32f   :  { %v827_v50 = vpop.f32.mrb[58].mxu1  ;;  %v996_v51 = vpop.f32.mrb[60].mxu0 }
 0x330   :  { %5082 = vmatmul.mubr.msk.f32.gmra.mrb[164].mxu1 %vm309_vm5, %v2132_v49  ;;  %v4632_v53 = vpop.f32.mrb[59].mxu1  ;;  %v6480_v55 = vadd.f32 %v996_v51, %v827_v50  ;;  %v4679_v56 = vpop.f32.mrb[61].mxu0  ;;  %v2499_v49 = vld [vmem:[#allocation6 + $0x2b0] sm:$0xff] }
 0x331   :  { %5084 = vmatprep.mubr.msk.f32.mxu1 %vm5827_vm0, %v5828_v1  ;;  %v2500_v53 = vld [vmem:[#allocation6 + $0x2b8] sm:$0xff] }
 0x333   :  { %v832_v58 = vpop.f32.mrb[60].mxu1  ;;  %v1001_v59 = vpop.f32.mrb[62].mxu0 }
 0x334   :  { %5085 = vmatmul.mubr.msk.f32.gmra.mrb[166].mxu1 %vm309_vm5, %v2133_v57  ;;  %v4635_v61 = vpop.f32.mrb[61].mxu1  ;;  %v6485_v62 = vadd.f32 %v1001_v59, %v832_v58  ;;  %v4682_v2 = vpop.f32.mrb[63].mxu0  ;;  %v2501_v58 = vld [vmem:[#allocation6 + $0x2c0] sm:$0xff] }
 0x335   :  { %5160 = vmatprep.mubr.msk.f32.mxu1 %vm5827_vm0, %v5828_v1  ;;  %v2502_v2 = vld [vmem:[#allocation6 + $0x2c8] sm:$0xff] }
 0x337   :  { %v837_v4 = vpop.f32.mrb[62].mxu1  ;;  %v1006_v6 = vpop.f32.mrb[64].mxu0 }
 0x338   :  { %5161 = vmatmul.mubr.msk.f32.vlgmr.msra.gmra.mrb[168].mxu1 %vm309_vm5, %v2491_v3  ;;  %v4638_v10 = vpop.f32.mrb[63].mxu1  ;;  %v6490_v11 = vadd.f32 %v1006_v6, %v837_v4  ;;  %v4685_v15 = vpop.f32.mrb[65].mxu0  ;;  %v2503_v6 = vld [vmem:[#allocation6 + $0x2d0] sm:$0xff] }
 0x339   :  { %5644 = vmatpush3.bf16.msra.mxu1 %v6025_v34  ;;  %5163 = vmatprep.mubr.msk.f32.mxu1 %vm5827_vm0, %v5828_v1  ;;  %v2861_v10 = vld [vmem:[#allocation6 + $0x2d8] sm:$0xff] }
 0x33a   :  { %5645 = vmatprep.subr.bf16.mxu1 %v5826_v0 }
 0x33b   :  { %v1129_v19 = vpop.f32.mrb[64].mxu1 }
 0x33c   :  { %4760 = vmatmul.mubr.msk.f32.vlgmr.msra.gmra.mrb[66].mxu0 %vm671_vm6, %v1129_v19  ;;  %5164 = vmatmul.mubr.msk.f32.gmra.mrb[170].mxu1 %vm309_vm5, %v2492_v16  ;;  %v4714_v18 = vpop.f32.mrb[65].mxu1  ;;  %v1934_v16 = vld [vmem:[#allocation7 + $0x80] sm:$0xff] }
 0x33d   :  { %5647 = vmatpush3.bf16.msra.mxu1 %v6037_v52  ;;  %4762 = vmatprep.mubr.msk.f32.mxu0 %vm5827_vm0, %v5828_v1  ;;  %v2862_v18 = vld [vmem:[#allocation6 + $0x2e0] sm:$0xff] }
 0x33e   :  { %5566 = vmatpush3.bf16.msra.mxu0 %v5565_v17  ;;  %5166 = vmatprep.mubr.msk.f32.mxu1 %vm5827_vm0, %v5828_v1  ;;  %v1935_v17 = vld [vmem:[#allocation7 + $0x88] sm:$0xff] }
 0x33f   :  { %v1134_v24 = vpop.f32.mrb[66].mxu1  ;;  %5648 = vmatprep.subr.bf16.mxu1 %v5826_v0  ;;  %5567 = vmatprep.subr.bf16.mxu0 %v5826_v0  ;;  %v5589_v21 = vpack.c.bf16 %v1935_v17, %v1934_v16 }
 0x340   :  { %4763 = vmatmul.mubr.msk.f32.gmra.mrb[68].mxu0 %vm671_vm6, %v1134_v24  ;;  %5167 = vmatmul.mubr.msk.f32.gmra.mrb[172].mxu1 %vm309_vm5, %v2493_v23  ;;  %v4717_v27 = vpop.f32.mrb[67].mxu1  ;;  %v1936_v24 = vld [vmem:[#allocation7 + $0x90] sm:$0xff] }
 0x341   :  { %5650 = vmatpush3.bf16.msra.mxu1 %v6049_v7  ;;  %4765 = vmatprep.mubr.msk.f32.mxu0 %vm5827_vm0, %v5828_v1 }
 0x342   :  { %5169 = vmatprep.mubr.msk.f32.mxu1 %vm5827_vm0, %v5828_v1  ;;  %5651 = vmatprep.subr.bf16.mxu1 %v5826_v0 }
 0x343   :  { %v1139_v29 = vpop.f32.mrb[68].mxu1  ;;  %5569 = vmatpush3.bf16.msra.mxu0 %v5568_v25  ;;  %v1937_v25 = vld [vmem:[#allocation7 + $0x98] sm:$0xff] }
 0x344   :  { %4766 = vmatmul.mubr.msk.f32.gmra.mrb[70].mxu0 %vm671_vm6, %v1139_v29  ;;  %5170 = vmatmul.mubr.msk.f32.gmra.mrb[174].mxu1 %vm309_vm5, %v2494_v28  ;;  %v4720_v30 = vpop.f32.mrb[69].mxu1  ;;  %v5592_v28 = vpack.c.bf16 %v1937_v25, %v1936_v24 }
 0x345   :  { %5653 = vmatpush3.bf16.msra.mxu1 %v6056_v12  ;;  %4768 = vmatprep.mubr.msk.f32.mxu0 %vm5827_vm0, %v5828_v1 }
 0x346   :  { %5172 = vmatprep.mubr.msk.f32.mxu1 %vm5827_vm0, %v5828_v1  ;;  %5654 = vmatprep.subr.bf16.mxu1 %v5826_v0 }
 0x347   :  { %v1144_v33 = vpop.f32.mrb[70].mxu1  ;;  %5588 = vmatprep.subr.bf16.mxu0 %v5826_v0 }
 0x348   :  { %4769 = vmatmul.mubr.msk.f32.gmra.mrb[72].mxu0 %vm671_vm6, %v1144_v33  ;;  %5173 = vmatmul.mubr.msk.f32.gmra.mrb[176].mxu1 %vm309_vm5, %v2495_v31  ;;  %v4723_v35 = vpop.f32.mrb[71].mxu1 }
 0x349   :  { %5656 = vmatpush3.bf16.msra.mxu1 %v6034_v45  ;;  %4771 = vmatprep.mubr.msk.f32.mxu0 %vm5827_vm0, %v5828_v1 }
 0x34a   :  { %5175 = vmatprep.mubr.msk.f32.mxu1 %vm5827_vm0, %v5828_v1  ;;  %5657 = vmatprep.subr.bf16.mxu1 %v5826_v0 }
 0x34b   :  { %v1149_v37 = vpop.f32.mrb[72].mxu1 }
 0x34c   :  { %4772 = vmatmul.mubr.msk.f32.gmra.mrb[74].mxu0 %vm671_vm6, %v1149_v37  ;;  %5176 = vmatmul.mubr.msk.f32.gmra.mrb[178].mxu1 %vm309_vm5, %v2496_v36  ;;  %v4726_v38 = vpop.f32.mrb[73].mxu1 }
 0x34d   :  { %5659 = vmatpush3.bf16.msra.mxu1 %v6046_v63  ;;  %4774 = vmatprep.mubr.msk.f32.mxu0 %vm5827_vm0, %v5828_v1 }
 0x34e   :  { %5178 = vmatprep.mubr.msk.f32.mxu1 %vm5827_vm0, %v5828_v1  ;;  %5270 = vmatprep.subr.mxu1 %v5828_v1 }
 0x34f   :  { %v1154_v41 = vpop.f32.mrb[74].mxu1 }
 0x350   :  { %4775 = vmatmul.mubr.msk.f32.gmra.mrb[76].mxu0 %vm671_vm6, %v1154_v41  ;;  %5179 = vmatmul.mubr.msk.f32.gmra.mrb[180].mxu1 %vm309_vm5, %v2497_v40  ;;  %v4729_v42 = vpop.f32.mrb[75].mxu1 }
 0x351   :  { %5271 = vmatpush3.msra.mxu1 %v6067_v14  ;;  %4777 = vmatprep.mubr.msk.f32.mxu0 %vm5827_vm0, %v5828_v1 }
 0x352   :  { %5181 = vmatprep.mubr.msk.f32.mxu1 %vm5827_vm0, %v5828_v1  ;;  %5666 = vmatprep.subr.bf16.mxu1 %v5826_v0 }
 0x353   :  { %v1159_v44 = vpop.f32.mrb[76].mxu1 }
 0x354   :  { %4778 = vmatmul.mubr.msk.f32.gmra.mrb[78].mxu0 %vm671_vm6, %v1159_v44  ;;  %5182 = vmatmul.mubr.msk.f32.gmra.mrb[182].mxu1 %vm309_vm5, %v2498_v43  ;;  %v4732_v48 = vpop.f32.mrb[77].mxu1 }
 0x355   :  { %4780 = vmatprep.mubr.msk.f32.mxu0 %vm5827_vm0, %v5828_v1  ;;  %5184 = vmatprep.mubr.msk.f32.mxu1 %vm5827_vm0, %v5828_v1  ;;  %v2870_v48 = vld [vmem:[#allocation6 + $0x320] sm:$0xff] }
 0x357   :  { %v1164_v50 = vpop.f32.mrb[78].mxu1 }
 0x358   :  { %4781 = vmatmul.mubr.msk.f32.gmra.mrb[80].mxu0 %vm671_vm6, %v1164_v50  ;;  %5185 = vmatmul.mubr.msk.f32.gmra.mrb[184].mxu1 %vm309_vm5, %v2499_v49  ;;  %v4735_v51 = vpop.f32.mrb[79].mxu1 }
 0x359   :  { %4783 = vmatprep.mubr.msk.f32.mxu0 %vm5827_vm0, %v5828_v1  ;;  %5187 = vmatprep.mubr.msk.f32.mxu1 %vm5827_vm0, %v5828_v1  ;;  %v2871_v51 = vld [vmem:[#allocation6 + $0x328] sm:$0xff] }
 0x35b   :  { %v1169_v56 = vpop.f32.mrb[80].mxu1 }
 0x35c   :  { %4784 = vmatmul.mubr.msk.f32.gmra.mrb[82].mxu0 %vm671_vm6, %v1169_v56  ;;  %5188 = vmatmul.mubr.msk.f32.gmra.mrb[186].mxu1 %vm309_vm5, %v2500_v53  ;;  %v4738_v57 = vpop.f32.mrb[81].mxu1 }
 0x35d   :  { %4786 = vmatprep.mubr.msk.f32.mxu0 %vm5827_vm0, %v5828_v1  ;;  %5190 = vmatprep.mubr.msk.f32.mxu1 %vm5827_vm0, %v5828_v1  ;;  %v2872_v57 = vld [vmem:[#allocation6 + $0x330] sm:$0xff] }
 0x35f   :  { %v1174_v59 = vpop.f32.mrb[82].mxu1 }
 0x360   :  { %4787 = vmatmul.mubr.msk.f32.gmra.mrb[84].mxu0 %vm671_vm6, %v1174_v59  ;;  %5191 = vmatmul.mubr.msk.f32.gmra.mrb[188].mxu1 %vm309_vm5, %v2501_v58  ;;  %v4741_v61 = vpop.f32.mrb[83].mxu1 }
 0x361   :  { %4789 = vmatprep.mubr.msk.f32.mxu0 %vm5827_vm0, %v5828_v1  ;;  %5193 = vmatprep.mubr.msk.f32.mxu1 %vm5827_vm0, %v5828_v1  ;;  %v2873_v61 = vld [vmem:[#allocation6 + $0x338] sm:$0xff] }
 0x363   :  { %v1179_v3 = vpop.f32.mrb[84].mxu1 }
 0x364   :  { %4790 = vmatmul.mubr.msk.f32.gmra.mrb[86].mxu0 %vm671_vm6, %v1179_v3  ;;  %5194 = vmatmul.mubr.msk.f32.gmra.mrb[190].mxu1 %vm309_vm5, %v2502_v2  ;;  %v4744_v4 = vpop.f32.mrb[85].mxu1 }
 0x365   :  { %4792 = vmatprep.mubr.msk.f32.mxu0 %vm5827_vm0, %v5828_v1  ;;  %5196 = vmatprep.mubr.msk.f32.mxu1 %vm5827_vm0, %v5828_v1  ;;  %v3231_v4 = vld [vmem:[#allocation6 + $0x340] sm:$0xff] }
 0x367   :  { %v1184_v8 = vpop.f32.mrb[86].mxu1 }
 0x368   :  { %4793 = vmatmul.mubr.msk.f32.gmra.mrb[88].mxu0 %vm671_vm6, %v1184_v8  ;;  %5197 = vmatmul.mubr.msk.f32.gmra.mrb[192].mxu1 %vm309_vm5, %v2503_v6  ;;  %v4747_v9 = vpop.f32.mrb[87].mxu1  ;;  %v2304_v6 = vld [vmem:[#allocation7 + $0xa0] sm:$0xff]  ;;  %v2305_v8 = vld [vmem:[#allocation7 + $0xa8] sm:$0xff] }
 0x369   :  { %4795 = vmatprep.mubr.msk.f32.mxu0 %vm5827_vm0, %v5828_v1  ;;  %5272 = vmatprep.mubr.msk.f32.mxu1 %vm5827_vm0, %v5828_v1  ;;  %v5613_v16 = vpack.c.bf16 %v2305_v8, %v2304_v6  ;;  %v2676_v6 = vld [vmem:[#allocation7 + $0xd0] sm:$0xff]  ;;  %v2677_v8 = vld [vmem:[#allocation7 + $0xd8] sm:$0xff] }
 0x36b   :  { %v1189_v15 = vpop.f32.mrb[88].mxu1 }
 0x36c   :  { %4796 = vmatmul.mubr.msk.f32.gmra.mrb[90].mxu0 %vm671_vm6, %v1189_v15  ;;  %5273 = vmatmul.mubr.msk.f32.vlgmr.msra.gmra.mrb[194].mxu1 %vm309_vm5, %v2861_v10  ;;  %v4750_v19 = vpop.f32.mrb[89].mxu1  ;;  %v3232_v15 = vld [vmem:[#allocation6 + $0x348] sm:$0xff] }
 0x36d   :  { %5668 = vmatpush3.bf16.msra.mxu1 %v6025_v34  ;;  %4871 = vmatprep.mubr.msk.f32.mxu0 %vm5827_vm0, %v5828_v1  ;;  %v2863_v34 = vld [vmem:[#allocation6 + $0x2e8] sm:$0xff]  ;;  %v2306_v19 = vld [vmem:[#allocation7 + $0xb0] sm:$0xff] }
 0x36e   :  { %5275 = vmatprep.mubr.msk.f32.mxu1 %vm5827_vm0, %v5828_v1  ;;  %5669 = vmatprep.subr.bf16.mxu1 %v5826_v0 }
 0x36f   :  { %v1499_v22 = vpop.f32.mrb[90].mxu1 }
 0x370   :  { %4872 = vmatmul.mubr.msk.f32.vlgmr.msra.gmra.mrb[92].mxu0 %vm671_vm6, %v1499_v22  ;;  %5276 = vmatmul.mubr.msk.f32.gmra.mrb[196].mxu1 %vm309_vm5, %v2862_v18  ;;  %v4826_v23 = vpop.f32.mrb[91].mxu1  ;;  %v2307_v18 = vld [vmem:[#allocation7 + $0xb8] sm:$0xff]  ;;  %v3233_v22 = vld [vmem:[#allocation6 + $0x350] sm:$0xff] }
 0x371   :  { %5671 = vmatpush3.bf16.msra.mxu1 %v6037_v52  ;;  %4874 = vmatprep.mubr.msk.f32.mxu0 %vm5827_vm0, %v5828_v1  ;;  %v2864_v52 = vld [vmem:[#allocation6 + $0x2f0] sm:$0xff]  ;;  %v5616_v23 = vpack.c.bf16 %v2307_v18, %v2306_v19 }
 0x372   :  { %5590 = vmatpush3.bf16.msra.mxu0 %v5589_v21  ;;  %5278 = vmatprep.mubr.msk.f32.mxu1 %vm5827_vm0, %v5828_v1 }
 0x373   :  { %v1504_v27 = vpop.f32.mrb[92].mxu1  ;;  %5672 = vmatprep.subr.bf16.mxu1 %v5826_v0  ;;  %5591 = vmatprep.subr.bf16.mxu0 %v5826_v0 }
 0x374   :  { %4875 = vmatmul.mubr.msk.f32.gmra.mrb[94].mxu0 %vm671_vm6, %v1504_v27  ;;  %5279 = vmatmul.mubr.msk.f32.gmra.mrb[198].mxu1 %vm309_vm5, %v2863_v34  ;;  %v4829_v29 = vpop.f32.mrb[93].mxu1  ;;  %v3234_v34 = vld [vmem:[#allocation6 + $0x358] sm:$0xff] }
 0x375   :  { %5674 = vmatpush3.bf16.msra.mxu1 %v6049_v7  ;;  %4877 = vmatprep.mubr.msk.f32.mxu0 %vm5827_vm0, %v5828_v1  ;;  %v2865_v7 = vld [vmem:[#allocation6 + $0x2f8] sm:$0xff]  ;;  %v3235_v29 = vld [vmem:[#allocation6 + $0x360] sm:$0xff] }
 0x376   :  { %5281 = vmatprep.mubr.msk.f32.mxu1 %vm5827_vm0, %v5828_v1  ;;  %5675 = vmatprep.subr.bf16.mxu1 %v5826_v0 }
 0x377   :  { %v1509_v30 = vpop.f32.mrb[94].mxu1  ;;  %5593 = vmatpush3.bf16.msra.mxu0 %v5592_v28 }
 0x378   :  { %4878 = vmatmul.mubr.msk.f32.gmra.mrb[96].mxu0 %vm671_vm6, %v1509_v30  ;;  %5282 = vmatmul.mubr.msk.f32.gmra.mrb[200].mxu1 %vm309_vm5, %v2864_v52  ;;  %v4832_v31 = vpop.f32.mrb[95].mxu1 }
 0x379   :  { %5677 = vmatpush3.bf16.msra.mxu1 %v6056_v12  ;;  %4880 = vmatprep.mubr.msk.f32.mxu0 %vm5827_vm0, %v5828_v1  ;;  %v2866_v12 = vld [vmem:[#allocation6 + $0x300] sm:$0xff]  ;;  %v3236_v31 = vld [vmem:[#allocation6 + $0x368] sm:$0xff] }
 0x37a   :  { %5284 = vmatprep.mubr.msk.f32.mxu1 %vm5827_vm0, %v5828_v1  ;;  %5678 = vmatprep.subr.bf16.mxu1 %v5826_v0 }
 0x37b   :  { %v1514_v33 = vpop.f32.mrb[96].mxu1  ;;  %5612 = vmatprep.subr.bf16.mxu0 %v5826_v0 }
 0x37c   :  { %4881 = vmatmul.mubr.msk.f32.gmra.mrb[98].mxu0 %vm671_vm6, %v1514_v33  ;;  %5285 = vmatmul.mubr.msk.f32.gmra.mrb[202].mxu1 %vm309_vm5, %v2865_v7  ;;  %v4835_v35 = vpop.f32.mrb[97].mxu1 }
 0x37d   :  { %5680 = vmatpush3.bf16.msra.mxu1 %v6034_v45  ;;  %4883 = vmatprep.mubr.msk.f32.mxu0 %vm5827_vm0, %v5828_v1  ;;  %v2867_v45 = vld [vmem:[#allocation6 + $0x308] sm:$0xff]  ;;  %v3237_v35 = vld [vmem:[#allocation6 + $0x370] sm:$0xff] }
 0x37e   :  { %5287 = vmatprep.mubr.msk.f32.mxu1 %vm5827_vm0, %v5828_v1  ;;  %5681 = vmatprep.subr.bf16.mxu1 %v5826_v0 }
 0x37f   :  { %v1519_v36 = vpop.f32.mrb[98].mxu1 }
 0x380   :  { %4884 = vmatmul.mubr.msk.f32.gmra.mrb[100].mxu0 %vm671_vm6, %v1519_v36  ;;  %5288 = vmatmul.mubr.msk.f32.gmra.mrb[204].mxu1 %vm309_vm5, %v2866_v12  ;;  %v4838_v37 = vpop.f32.mrb[99].mxu1 }
 0x381   :  { %5683 = vmatpush3.bf16.msra.mxu1 %v6046_v63  ;;  %4886 = vmatprep.mubr.msk.f32.mxu0 %vm5827_vm0, %v5828_v1  ;;  %v2868_v63 = vld [vmem:[#allocation6 + $0x310] sm:$0xff]  ;;  %v3238_v37 = vld [vmem:[#allocation6 + $0x378] sm:$0xff] }
 0x382   :  { %5290 = vmatprep.mubr.msk.f32.mxu1 %vm5827_vm0, %v5828_v1  ;;  %5382 = vmatprep.subr.mxu1 %v5828_v1 }
 0x383   :  { %v1524_v38 = vpop.f32.mrb[100].mxu1 }
 0x384   :  { %4887 = vmatmul.mubr.msk.f32.gmra.mrb[102].mxu0 %vm671_vm6, %v1524_v38  ;;  %5291 = vmatmul.mubr.msk.f32.gmra.mrb[206].mxu1 %vm309_vm5, %v2867_v45  ;;  %v4841_v40 = vpop.f32.mrb[101].mxu1 }
 0x385   :  { %5383 = vmatpush3.msra.mxu1 %v6067_v14  ;;  %4889 = vmatprep.mubr.msk.f32.mxu0 %vm5827_vm0, %v5828_v1  ;;  %v2869_v14 = vld [vmem:[#allocation6 + $0x318] sm:$0xff]  ;;  %v3239_v40 = vld [vmem:[#allocation6 + $0x380] sm:$0xff] }
 0x386   :  { %5293 = vmatprep.mubr.msk.f32.mxu1 %vm5827_vm0, %v5828_v1 }
 0x387   :  { %v1529_v41 = vpop.f32.mrb[102].mxu1 }
 0x388   :  { %4890 = vmatmul.mubr.msk.f32.gmra.mrb[104].mxu0 %vm671_vm6, %v1529_v41  ;;  %5294 = vmatmul.mubr.msk.f32.gmra.mrb[208].mxu1 %vm309_vm5, %v2868_v63  ;;  %v4844_v42 = vpop.f32.mrb[103].mxu1 }
 0x389   :  { %4892 = vmatprep.mubr.msk.f32.mxu0 %vm5827_vm0, %v5828_v1  ;;  %5296 = vmatprep.mubr.msk.f32.mxu1 %vm5827_vm0, %v5828_v1  ;;  %v3240_v42 = vld [vmem:[#allocation6 + $0x388] sm:$0xff] }
 0x38b   :  { %v1534_v43 = vpop.f32.mrb[104].mxu1 }
 0x38c   :  { %4893 = vmatmul.mubr.msk.f32.gmra.mrb[106].mxu0 %vm671_vm6, %v1534_v43  ;;  %5297 = vmatmul.mubr.msk.f32.gmra.mrb[210].mxu1 %vm309_vm5, %v2869_v14  ;;  %v4847_v44 = vpop.f32.mrb[105].mxu1 }
 0x38d   :  { %4895 = vmatprep.mubr.msk.f32.mxu0 %vm5827_vm0, %v5828_v1  ;;  %5299 = vmatprep.mubr.msk.f32.mxu1 %vm5827_vm0, %v5828_v1  ;;  %v3241_v44 = vld [vmem:[#allocation6 + $0x390] sm:$0xff] }
 0x38f   :  { %v1539_v49 = vpop.f32.mrb[106].mxu1 }
 0x390   :  { %4896 = vmatmul.mubr.msk.f32.gmra.mrb[108].mxu0 %vm671_vm6, %v1539_v49  ;;  %5300 = vmatmul.mubr.msk.f32.gmra.mrb[212].mxu1 %vm309_vm5, %v2870_v48  ;;  %v4850_v50 = vpop.f32.mrb[107].mxu1 }
 0x391   :  { %4898 = vmatprep.mubr.msk.f32.mxu0 %vm5827_vm0, %v5828_v1  ;;  %5302 = vmatprep.mubr.msk.f32.mxu1 %vm5827_vm0, %v5828_v1  ;;  %v3242_v50 = vld [vmem:[#allocation6 + $0x398] sm:$0xff] }
 0x393   :  { %v1544_v53 = vpop.f32.mrb[108].mxu1 }
 0x394   :  { %4899 = vmatmul.mubr.msk.f32.gmra.mrb[110].mxu0 %vm671_vm6, %v1544_v53  ;;  %5303 = vmatmul.mubr.msk.f32.gmra.mrb[214].mxu1 %vm309_vm5, %v2871_v51  ;;  %v4853_v56 = vpop.f32.mrb[109].mxu1 }
 0x395   :  { %4901 = vmatprep.mubr.msk.f32.mxu0 %vm5827_vm0, %v5828_v1  ;;  %5305 = vmatprep.mubr.msk.f32.mxu1 %vm5827_vm0, %v5828_v1  ;;  %v3243_v56 = vld [vmem:[#allocation6 + $0x3a0] sm:$0xff] }
 0x397   :  { %v1549_v58 = vpop.f32.mrb[110].mxu1 }
 0x398   :  { %4902 = vmatmul.mubr.msk.f32.gmra.mrb[112].mxu0 %vm671_vm6, %v1549_v58  ;;  %5306 = vmatmul.mubr.msk.f32.gmra.mrb[216].mxu1 %vm309_vm5, %v2872_v57  ;;  %v4856_v59 = vpop.f32.mrb[111].mxu1 }
 0x399   :  { %4904 = vmatprep.mubr.msk.f32.mxu0 %vm5827_vm0, %v5828_v1  ;;  %5308 = vmatprep.mubr.msk.f32.mxu1 %vm5827_vm0, %v5828_v1  ;;  %v2674_v59 = vld [vmem:[#allocation7 + $0xc0] sm:$0xff] }
 0x39b   :  { %v1554_v2 = vpop.f32.mrb[112].mxu1 }
 0x39c   :  { %4905 = vmatmul.mubr.msk.f32.gmra.mrb[114].mxu0 %vm671_vm6, %v1554_v2  ;;  %5309 = vmatmul.mubr.msk.f32.gmra.mrb[218].mxu1 %vm309_vm5, %v2873_v61  ;;  %v4859_v3 = vpop.f32.mrb[113].mxu1  ;;  %v2675_v61 = vld [vmem:[#allocation7 + $0xc8] sm:$0xff] }
 0x39d   :  { %4907 = vmatprep.mubr.msk.f32.mxu0 %vm5827_vm0, %v5828_v1  ;;  %5384 = vmatprep.mubr.msk.f32.mxu1 %vm5827_vm0, %v5828_v1 }
 0x39f   :  { %v1559_v9 = vpop.f32.mrb[114].mxu1 }
 0x3a0   :  { %4908 = vmatmul.mubr.msk.f32.gmra.mrb[116].mxu0 %vm671_vm6, %v1559_v9  ;;  %5385 = vmatmul.mubr.msk.f32.vlgmr.msra.gmra.mrb[220].mxu1 %vm309_vm5, %v3231_v4  ;;  %v4862_v10 = vpop.f32.mrb[115].mxu1  ;;  %v5637_v4 = vpack.c.bf16 %v2675_v61, %v2674_v59 }
 0x3a1   :  { %4983 = vmatprep.mubr.msk.f32.mxu0 %vm5827_vm0, %v5828_v1  ;;  %5387 = vmatprep.mubr.msk.f32.mxu1 %vm5827_vm0, %v5828_v1 }
 0x3a3   :  { %v1869_v17 = vpop.f32.mrb[116].mxu1 }
 0x3a4   :  { %4984 = vmatmul.mubr.msk.f32.vlgmr.msra.gmra.mrb[118].mxu0 %vm671_vm6, %v1869_v17  ;;  %5388 = vmatmul.mubr.msk.f32.gmra.mrb[222].mxu1 %vm309_vm5, %v3232_v15  ;;  %v4938_v21 = vpop.f32.mrb[117].mxu1  ;;  %v5640_v15 = vpack.c.bf16 %v2677_v8, %v2676_v6 }
 0x3a5   :  { %4986 = vmatprep.mubr.msk.f32.mxu0 %vm5827_vm0, %v5828_v1  ;;  %5614 = vmatpush3.bf16.msra.mxu0 %v5613_v16 }
 0x3a6   :  { %5390 = vmatprep.mubr.msk.f32.mxu1 %vm5827_vm0, %v5828_v1  ;;  %5615 = vmatprep.subr.bf16.mxu0 %v5826_v0 }
 0x3a7   :  { %v1874_v24 = vpop.f32.mrb[118].mxu1 }
 0x3a8   :  { %4987 = vmatmul.mubr.msk.f32.gmra.mrb[120].mxu0 %vm671_vm6, %v1874_v24  ;;  %5391 = vmatmul.mubr.msk.f32.gmra.mrb[224].mxu1 %vm309_vm5, %v3233_v22  ;;  %v4941_v25 = vpop.f32.mrb[119].mxu1 }
 0x3a9   :  { %4989 = vmatprep.mubr.msk.f32.mxu0 %vm5827_vm0, %v5828_v1  ;;  %5393 = vmatprep.mubr.msk.f32.mxu1 %vm5827_vm0, %v5828_v1 }
 0x3aa   :  { %5617 = vmatpush3.bf16.msra.mxu0 %v5616_v23 }
 0x3ab   :  { %v1879_v27 = vpop.f32.mrb[120].mxu1  ;;  %5636 = vmatprep.subr.bf16.mxu0 %v5826_v0 }
 0x3ac   :  { %4990 = vmatmul.mubr.msk.f32.gmra.mrb[122].mxu0 %vm671_vm6, %v1879_v27  ;;  %5394 = vmatmul.mubr.msk.f32.gmra.mrb[226].mxu1 %vm309_vm5, %v3234_v34  ;;  %v4944_v28 = vpop.f32.mrb[121].mxu1 }
 0x3ad   :  { %4992 = vmatprep.mubr.msk.f32.mxu0 %vm5827_vm0, %v5828_v1  ;;  %5396 = vmatprep.mubr.msk.f32.mxu1 %vm5827_vm0, %v5828_v1 }
 0x3af   :  { %v1884_v52 = vpop.f32.mrb[122].mxu1 }
 0x3b0   :  { %4993 = vmatmul.mubr.msk.f32.gmra.mrb[124].mxu0 %vm671_vm6, %v1884_v52  ;;  %5397 = vmatmul.mubr.msk.f32.gmra.mrb[228].mxu1 %vm309_vm5, %v3235_v29  ;;  %v4947_v30 = vpop.f32.mrb[123].mxu1 }
 0x3b1   :  { %4995 = vmatprep.mubr.msk.f32.mxu0 %vm5827_vm0, %v5828_v1  ;;  %5399 = vmatprep.mubr.msk.f32.mxu1 %vm5827_vm0, %v5828_v1 }
 0x3b3   :  { %v1889_v7 = vpop.f32.mrb[124].mxu1 }
 0x3b4   :  { %4996 = vmatmul.mubr.msk.f32.gmra.mrb[126].mxu0 %vm671_vm6, %v1889_v7  ;;  %5400 = vmatmul.mubr.msk.f32.gmra.mrb[230].mxu1 %vm309_vm5, %v3236_v31  ;;  %v4950_v33 = vpop.f32.mrb[125].mxu1 }
 0x3b5   :  { %4998 = vmatprep.mubr.msk.f32.mxu0 %vm5827_vm0, %v5828_v1  ;;  %5402 = vmatprep.mubr.msk.f32.mxu1 %vm5827_vm0, %v5828_v1 }
 0x3b7   :  { %v1894_v12 = vpop.f32.mrb[126].mxu1 }
 0x3b8   :  { %4999 = vmatmul.mubr.msk.f32.gmra.mrb[128].mxu0 %vm671_vm6, %v1894_v12  ;;  %5403 = vmatmul.mubr.msk.f32.gmra.mrb[232].mxu1 %vm309_vm5, %v3237_v35  ;;  %v4953_v36 = vpop.f32.mrb[127].mxu1 }
 0x3b9   :  { %5001 = vmatprep.mubr.msk.f32.mxu0 %vm5827_vm0, %v5828_v1  ;;  %5405 = vmatprep.mubr.msk.f32.mxu1 %vm5827_vm0, %v5828_v1 }
 0x3bb   :  { %v1899_v45 = vpop.f32.mrb[128].mxu1 }
 0x3bc   :  { %5002 = vmatmul.mubr.msk.f32.gmra.mrb[130].mxu0 %vm671_vm6, %v1899_v45  ;;  %5406 = vmatmul.mubr.msk.f32.gmra.mrb[234].mxu1 %vm309_vm5, %v3238_v37  ;;  %v4956_v38 = vpop.f32.mrb[129].mxu1  ;;  %v3044_v45 = vld [vmem:[#allocation7 + $0xe0] sm:$0xff] }
 0x3bd   :  { %5004 = vmatprep.mubr.msk.f32.mxu0 %vm5827_vm0, %v5828_v1  ;;  %5408 = vmatprep.mubr.msk.f32.mxu1 %vm5827_vm0, %v5828_v1  ;;  %v3045_v38 = vld [vmem:[#allocation7 + $0xe8] sm:$0xff] }
 0x3bf   :  { %v1904_v63 = vpop.f32.mrb[130].mxu1 }
 0x3c0   :  { %5005 = vmatmul.mubr.msk.f32.gmra.mrb[132].mxu0 %vm671_vm6, %v1904_v63  ;;  %5409 = vmatmul.mubr.msk.f32.gmra.mrb[236].mxu1 %vm309_vm5, %v3239_v40  ;;  %v4959_v41 = vpop.f32.mrb[131].mxu1 }
 0x3c1   :  { %5007 = vmatprep.mubr.msk.f32.mxu0 %vm5827_vm0, %v5828_v1  ;;  %5411 = vmatprep.mubr.msk.f32.mxu1 %vm5827_vm0, %v5828_v1  ;;  %v5661_v41 = vpack.c.bf16 %v3045_v38, %v3044_v45 }
 0x3c3   :  { %v1909_v14 = vpop.f32.mrb[132].mxu1 }
 0x3c4   :  { %5008 = vmatmul.mubr.msk.f32.gmra.mrb[134].mxu0 %vm671_vm6, %v1909_v14  ;;  %5412 = vmatmul.mubr.msk.f32.gmra.mrb[238].mxu1 %vm309_vm5, %v3240_v42  ;;  %v4962_v43 = vpop.f32.mrb[133].mxu1  ;;  %v3046_v42 = vld [vmem:[#allocation7 + $0xf0] sm:$0xff]  ;;  %v3047_v14 = vld [vmem:[#allocation7 + $0xf8] sm:$0xff] }
 0x3c5   :  { %5010 = vmatprep.mubr.msk.f32.mxu0 %vm5827_vm0, %v5828_v1  ;;  %5414 = vmatprep.mubr.msk.f32.mxu1 %vm5827_vm0, %v5828_v1 }
 0x3c7   :  { %v1914_v48 = vpop.f32.mrb[134].mxu1 }
 0x3c8   :  { %5011 = vmatmul.mubr.msk.f32.gmra.mrb[136].mxu0 %vm671_vm6, %v1914_v48  ;;  %5415 = vmatmul.mubr.msk.f32.gmra.mrb[240].mxu1 %vm309_vm5, %v3241_v44  ;;  %v4965_v49 = vpop.f32.mrb[135].mxu1  ;;  %v5664_v48 = vpack.c.bf16 %v3047_v14, %v3046_v42 }
 0x3c9   :  { %5013 = vmatprep.mubr.msk.f32.mxu0 %vm5827_vm0, %v5828_v1  ;;  %5417 = vmatprep.mubr.msk.f32.mxu1 %vm5827_vm0, %v5828_v1 }
 0x3cb   :  { %v1919_v51 = vpop.f32.mrb[136].mxu1 }
 0x3cc   :  { %5014 = vmatmul.mubr.msk.f32.gmra.mrb[138].mxu0 %vm671_vm6, %v1919_v51  ;;  %5418 = vmatmul.mubr.msk.f32.gmra.mrb[242].mxu1 %vm309_vm5, %v3242_v50  ;;  %v4968_v53 = vpop.f32.mrb[137].mxu1 }
 0x3cd   :  { %5016 = vmatprep.mubr.msk.f32.mxu0 %vm5827_vm0, %v5828_v1  ;;  %5420 = vmatprep.mubr.msk.f32.mxu1 %vm5827_vm0, %v5828_v1 }
 0x3cf   :  { %v1924_v57 = vpop.f32.mrb[138].mxu1 }
 0x3d0   :  { %5017 = vmatmul.mubr.msk.f32.gmra.mrb[140].mxu0 %vm671_vm6, %v1924_v57  ;;  %5421 = vmatmul.mubr.msk.f32.gmra.mrb[244].mxu1 %vm309_vm5, %v3243_v56  ;;  %v4971_v58 = vpop.f32.mrb[139].mxu1 }
 0x3d1   :  { %5019 = vmatprep.mubr.msk.f32.mxu0 %vm5827_vm0, %v5828_v1 }
 0x3d3   :  { %v1929_v2 = vpop.f32.mrb[140].mxu1 }
 0x3d4   :  { %5020 = vmatmul.mubr.msk.f32.gmra.mrb[142].mxu0 %vm671_vm6, %v1929_v2  ;;  %v4974_v3 = vpop.f32.mrb[141].mxu1 }
 0x3d5   :  { %5095 = vmatprep.mubr.msk.f32.mxu0 %vm5827_vm0, %v5828_v1 }
 0x3d7   :  { %v2239_v9 = vpop.f32.mrb[142].mxu1 }
 0x3d8   :  { %5096 = vmatmul.mubr.msk.f32.vlgmr.msra.gmra.mrb[144].mxu0 %vm671_vm6, %v2239_v9  ;;  %v5050_v10 = vpop.f32.mrb[143].mxu1 }
 0x3d9   :  { %5098 = vmatprep.mubr.msk.f32.mxu0 %vm5827_vm0, %v5828_v1  ;;  %5638 = vmatpush3.bf16.msra.mxu0 %v5637_v4 }
 0x3da   :  { %5639 = vmatprep.subr.bf16.mxu0 %v5826_v0 }
 0x3db   :  { %v2244_v16 = vpop.f32.mrb[144].mxu1 }
 0x3dc   :  { %5099 = vmatmul.mubr.msk.f32.gmra.mrb[146].mxu0 %vm671_vm6, %v2244_v16  ;;  %v5053_v17 = vpop.f32.mrb[145].mxu1 }
 0x3dd   :  { %5101 = vmatprep.mubr.msk.f32.mxu0 %vm5827_vm0, %v5828_v1  ;;  %5641 = vmatpush3.bf16.msra.mxu0 %v5640_v15 }
 0x3de   :  { %5660 = vmatprep.subr.bf16.mxu0 %v5826_v0 }
 0x3df   :  { %v2249_v19 = vpop.f32.mrb[146].mxu1 }
 0x3e0   :  { %5102 = vmatmul.mubr.msk.f32.gmra.mrb[148].mxu0 %vm671_vm6, %v2249_v19  ;;  %v5056_v18 = vpop.f32.mrb[147].mxu1 }
 0x3e1   :  { %5104 = vmatprep.mubr.msk.f32.mxu0 %vm5827_vm0, %v5828_v1 }
 0x3e3   :  { %v2254_v21 = vpop.f32.mrb[148].mxu1 }
 0x3e4   :  { %5105 = vmatmul.mubr.msk.f32.gmra.mrb[150].mxu0 %vm671_vm6, %v2254_v21  ;;  %v5059_v22 = vpop.f32.mrb[149].mxu1 }
 0x3e5   :  { %5107 = vmatprep.mubr.msk.f32.mxu0 %vm5827_vm0, %v5828_v1 }
 0x3e7   :  { %v2259_v23 = vpop.f32.mrb[150].mxu1 }
 0x3e8   :  { %5108 = vmatmul.mubr.msk.f32.gmra.mrb[152].mxu0 %vm671_vm6, %v2259_v23  ;;  %v5062_v24 = vpop.f32.mrb[151].mxu1 }
 0x3e9   :  { %5110 = vmatprep.mubr.msk.f32.mxu0 %vm5827_vm0, %v5828_v1 }
 0x3eb   :  { %v2264_v25 = vpop.f32.mrb[152].mxu1 }
 0x3ec   :  { %5111 = vmatmul.mubr.msk.f32.gmra.mrb[154].mxu0 %vm671_vm6, %v2264_v25  ;;  %v5065_v34 = vpop.f32.mrb[153].mxu1 }
 0x3ed   :  { %5113 = vmatprep.mubr.msk.f32.mxu0 %vm5827_vm0, %v5828_v1 }
 0x3ef   :  { %v2269_v27 = vpop.f32.mrb[154].mxu1 }
 0x3f0   :  { %5114 = vmatmul.mubr.msk.f32.gmra.mrb[156].mxu0 %vm671_vm6, %v2269_v27  ;;  %v5068_v28 = vpop.f32.mrb[155].mxu1 }
 0x3f1   :  { %5116 = vmatprep.mubr.msk.f32.mxu0 %vm5827_vm0, %v5828_v1 }
 0x3f3   :  { %v2274_v29 = vpop.f32.mrb[156].mxu1 }
 0x3f4   :  { %5117 = vmatmul.mubr.msk.f32.gmra.mrb[158].mxu0 %vm671_vm6, %v2274_v29  ;;  %v5071_v52 = vpop.f32.mrb[157].mxu1 }
 0x3f5   :  { %5119 = vmatprep.mubr.msk.f32.mxu0 %vm5827_vm0, %v5828_v1 }
 0x3f7   :  { %v2279_v30 = vpop.f32.mrb[158].mxu1 }
 0x3f8   :  { %5120 = vmatmul.mubr.msk.f32.gmra.mrb[160].mxu0 %vm671_vm6, %v2279_v30  ;;  %v5074_v31 = vpop.f32.mrb[159].mxu1 }
 0x3f9   :  { %5122 = vmatprep.mubr.msk.f32.mxu0 %vm5827_vm0, %v5828_v1 }
 0x3fb   :  { %v2284_v7 = vpop.f32.mrb[160].mxu1 }
 0x3fc   :  { %5123 = vmatmul.mubr.msk.f32.gmra.mrb[162].mxu0 %vm671_vm6, %v2284_v7  ;;  %v5077_v33 = vpop.f32.mrb[161].mxu1 }
 0x3fd   :  { %5125 = vmatprep.mubr.msk.f32.mxu0 %vm5827_vm0, %v5828_v1 }
 0x3ff   :  { %v2289_v35 = vpop.f32.mrb[162].mxu1 }
 0x400   :  { %5126 = vmatmul.mubr.msk.f32.gmra.mrb[164].mxu0 %vm671_vm6, %v2289_v35  ;;  %v5080_v12 = vpop.f32.mrb[163].mxu1 }
 0x401   :  { %5128 = vmatprep.mubr.msk.f32.mxu0 %vm5827_vm0, %v5828_v1 }
 0x403   :  { %v2294_v36 = vpop.f32.mrb[164].mxu1 }
 0x404   :  { %5129 = vmatmul.mubr.msk.f32.gmra.mrb[166].mxu0 %vm671_vm6, %v2294_v36  ;;  %v5083_v37 = vpop.f32.mrb[165].mxu1 }
 0x405   :  { %5131 = vmatprep.mubr.msk.f32.mxu0 %vm5827_vm0, %v5828_v1 }
 0x407   :  { %v2299_v40 = vpop.f32.mrb[166].mxu1 }
 0x408   :  { %5132 = vmatmul.mubr.msk.f32.gmra.mrb[168].mxu0 %vm671_vm6, %v2299_v40  ;;  %v5086_v63 = vpop.f32.mrb[167].mxu1 }
 0x409   :  { %5207 = vmatprep.mubr.msk.f32.mxu0 %vm5827_vm0, %v5828_v1 }
 0x40b   :  { %v2609_v43 = vpop.f32.mrb[168].mxu1 }
 0x40c   :  { %5208 = vmatmul.mubr.msk.f32.vlgmr.msra.gmra.mrb[170].mxu0 %vm671_vm6, %v2609_v43  ;;  %v5162_v44 = vpop.f32.mrb[169].mxu1  ;;  %v3415_v43 = vld [vmem:[#allocation7 + $0x108] sm:$0xff] }
 0x40d   :  { %5210 = vmatprep.mubr.msk.f32.mxu0 %vm5827_vm0, %v5828_v1  ;;  %5662 = vmatpush3.bf16.msra.mxu0 %v5661_v41 }
 0x40e   :  { %5663 = vmatprep.subr.bf16.mxu0 %v5826_v0 }
 0x40f   :  { %v1303_v49 = vpop.f32.mrb[66].mxu0  ;;  %v2614_v50 = vpop.f32.mrb[170].mxu1 }
 0x410   :  { %v6802_v51 = vadd.f32 %v1303_v49, %v6418_v47  ;;  %5211 = vmatmul.mubr.msk.f32.gmra.mrb[172].mxu0 %vm671_vm6, %v2614_v50  ;;  %v4761_v53 = vpop.f32.mrb[67].mxu0  ;;  %v5165_v56 = vpop.f32.mrb[171].mxu1 }
 0x411   :  { %5213 = vmatprep.mubr.msk.f32.mxu0 %vm5827_vm0, %v5828_v1  ;;  %5665 = vmatpush3.bf16.msra.mxu0 %v5664_v48  ;;  %v3416_v56 = vld [vmem:[#allocation7 + $0x110] sm:$0xff] }
 0x412   :  { %5684 = vmatprep.subr.bf16.mxu0 %v5826_v0 }
 0x413   :  { %v1308_v57 = vpop.f32.mrb[68].mxu0  ;;  %v2619_v58 = vpop.f32.mrb[172].mxu1 }
 0x414   :  { %v6809_v59 = vadd.f32 %v1308_v57, %v6425_v54  ;;  %5214 = vmatmul.mubr.msk.f32.gmra.mrb[174].mxu0 %vm671_vm6, %v2619_v58  ;;  %v4764_v61 = vpop.f32.mrb[69].mxu0  ;;  %v5168_v47 = vpop.f32.mrb[173].mxu1  ;;  %v3417_v57 = vld [vmem:[#allocation7 + $0x118] sm:$0xff] }
 0x415   :  { %5216 = vmatprep.mubr.msk.f32.mxu0 %vm5827_vm0, %v5828_v1 }
 0x417   :  { %v1313_v2 = vpop.f32.mrb[70].mxu0  ;;  %v2624_v3 = vpop.f32.mrb[174].mxu1 }
 0x418   :  { %v6815_v4 = vadd.f32 %v1313_v2, %v6432_v60  ;;  %5217 = vmatmul.mubr.msk.f32.gmra.mrb[176].mxu0 %vm671_vm6, %v2624_v3  ;;  %v4767_v6 = vpop.f32.mrb[71].mxu0  ;;  %v5171_v8 = vpop.f32.mrb[175].mxu1  ;;  %v5688_v3 = vpack.c.bf16 %v3417_v57, %v3416_v56 }
 0x419   :  { %5219 = vmatprep.mubr.msk.f32.mxu0 %vm5827_vm0, %v5828_v1 }
 0x41b   :  { %v1318_v54 = vpop.f32.mrb[72].mxu0  ;;  %v2629_v9 = vpop.f32.mrb[176].mxu1 }
 0x41c   :  { %v6821_v10 = vadd.f32 %v1318_v54, %v6439_v5  ;;  %5220 = vmatmul.mubr.msk.f32.gmra.mrb[178].mxu0 %vm671_vm6, %v2629_v9  ;;  %v4770_v15 = vpop.f32.mrb[73].mxu0  ;;  %v5174_v16 = vpop.f32.mrb[177].mxu1 }
 0x41d   :  { %5222 = vmatprep.mubr.msk.f32.mxu0 %vm5827_vm0, %v5828_v1 }
 0x41f   :  { %v1323_v60 = vpop.f32.mrb[74].mxu0  ;;  %v2634_v17 = vpop.f32.mrb[178].mxu1 }
 0x420   :  { %v6827_v19 = vadd.f32 %v1323_v60, %v6446_v13  ;;  %5223 = vmatmul.mubr.msk.f32.gmra.mrb[180].mxu0 %vm671_vm6, %v2634_v17  ;;  %v4773_v18 = vpop.f32.mrb[75].mxu0  ;;  %v5177_v21 = vpop.f32.mrb[179].mxu1 }
 0x421   :  { %5225 = vmatprep.mubr.msk.f32.mxu0 %vm5827_vm0, %v5828_v1 }
 0x423   :  { %v1328_v5 = vpop.f32.mrb[76].mxu0  ;;  %v2639_v22 = vpop.f32.mrb[180].mxu1 }
 0x424   :  { %v6833_v23 = vadd.f32 %v1328_v5, %v6453_v20  ;;  %5226 = vmatmul.mubr.msk.f32.gmra.mrb[182].mxu0 %vm671_vm6, %v2639_v22  ;;  %v4776_v24 = vpop.f32.mrb[77].mxu0  ;;  %v5180_v25 = vpop.f32.mrb[181].mxu1 }
 0x425   :  { %5228 = vmatprep.mubr.msk.f32.mxu0 %vm5827_vm0, %v5828_v1 }
 0x427   :  { %v1333_v13 = vpop.f32.mrb[78].mxu0  ;;  %v2644_v34 = vpop.f32.mrb[182].mxu1 }
 0x428   :  { %v6839_v27 = vadd.f32 %v1333_v13, %v6460_v26  ;;  %5229 = vmatmul.mubr.msk.f32.gmra.mrb[184].mxu0 %vm671_vm6, %v2644_v34  ;;  %v4779_v28 = vpop.f32.mrb[79].mxu0  ;;  %v5183_v29 = vpop.f32.mrb[183].mxu1 }
 0x429   :  { %5231 = vmatprep.mubr.msk.f32.mxu0 %vm5827_vm0, %v5828_v1 }
 0x42b   :  { %v1338_v20 = vpop.f32.mrb[80].mxu0  ;;  %v2649_v52 = vpop.f32.mrb[184].mxu1 }
 0x42c   :  { %v6845_v30 = vadd.f32 %v1338_v20, %v6465_v32  ;;  %5232 = vmatmul.mubr.msk.f32.gmra.mrb[186].mxu0 %vm671_vm6, %v2649_v52  ;;  %v4782_v31 = vpop.f32.mrb[81].mxu0  ;;  %v5186_v7 = vpop.f32.mrb[185].mxu1 }
 0x42d   :  { %5234 = vmatprep.mubr.msk.f32.mxu0 %vm5827_vm0, %v5828_v1 }
 0x42f   :  { %v1343_v26 = vpop.f32.mrb[82].mxu0  ;;  %v2654_v33 = vpop.f32.mrb[186].mxu1 }
 0x430   :  { %v6851_v35 = vadd.f32 %v1343_v26, %v6470_v39  ;;  %5235 = vmatmul.mubr.msk.f32.gmra.mrb[188].mxu0 %vm671_vm6, %v2654_v33  ;;  %v4785_v12 = vpop.f32.mrb[83].mxu0  ;;  %v5189_v36 = vpop.f32.mrb[187].mxu1 }
 0x431   :  { %5237 = vmatprep.mubr.msk.f32.mxu0 %vm5827_vm0, %v5828_v1 }
 0x433   :  { %v1348_v32 = vpop.f32.mrb[84].mxu0  ;;  %v2659_v37 = vpop.f32.mrb[188].mxu1 }
 0x434   :  { %v6857_v45 = vadd.f32 %v1348_v32, %v6475_v46  ;;  %5238 = vmatmul.mubr.msk.f32.gmra.mrb[190].mxu0 %vm671_vm6, %v2659_v37  ;;  %v4788_v38 = vpop.f32.mrb[85].mxu0  ;;  %v5192_v40 = vpop.f32.mrb[189].mxu1  ;;  %v3414_v46 = vld [vmem:[#allocation7 + $0x100] sm:$0xff] }
 0x435   :  { %5240 = vmatprep.mubr.msk.f32.mxu0 %vm5827_vm0, %v5828_v1 }
 0x437   :  { %v1353_v39 = vpop.f32.mrb[86].mxu0  ;;  %v2664_v63 = vpop.f32.mrb[190].mxu1 }
 0x438   :  { %v6863_v41 = vadd.f32 %v1353_v39, %v6480_v55  ;;  %5241 = vmatmul.mubr.msk.f32.gmra.mrb[192].mxu0 %vm671_vm6, %v2664_v63  ;;  %v4791_v42 = vpop.f32.mrb[87].mxu0  ;;  %v5195_v14 = vpop.f32.mrb[191].mxu1  ;;  %v5685_v55 = vpack.c.bf16 %v3415_v43, %v3414_v46 }
 0x439   :  { %5243 = vmatprep.mubr.msk.f32.mxu0 %vm5827_vm0, %v5828_v1 }
 0x43b   :  { %v1358_v44 = vpop.f32.mrb[88].mxu0  ;;  %v2669_v48 = vpop.f32.mrb[192].mxu1 }
 0x43c   :  { %v6869_v49 = vadd.f32 %v1358_v44, %v6485_v62  ;;  %5244 = vmatmul.mubr.msk.f32.gmra.mrb[194].mxu0 %vm671_vm6, %v2669_v48  ;;  %v4794_v50 = vpop.f32.mrb[89].mxu0  ;;  %v5198_v53 = vpop.f32.mrb[193].mxu1 }
 0x43d   :  { %5319 = vmatprep.mubr.msk.f32.mxu0 %vm5827_vm0, %v5828_v1 }
 0x43f   :  { %v1363_v58 = vpop.f32.mrb[90].mxu0  ;;  %v2979_v61 = vpop.f32.mrb[194].mxu1 }
 0x440   :  { %v6875_v47 = vadd.f32 %v1363_v58, %v6490_v11  ;;  %5320 = vmatmul.mubr.msk.f32.vlgmr.msra.gmra.mrb[196].mxu0 %vm671_vm6, %v2979_v61  ;;  %v4797_v2 = vpop.f32.mrb[91].mxu0  ;;  %v5274_v62 = vpop.f32.mrb[195].mxu1 }
 0x441   :  { %5322 = vmatprep.mubr.msk.f32.mxu0 %vm5827_vm0, %v5828_v1  ;;  %5686 = vmatpush3.bf16.msra.mxu0 %v5685_v55 }
 0x442   :  { %5687 = vmatprep.subr.bf16.mxu0 %v5826_v0 }
 0x443   :  { %v1673_v6 = vpop.f32.mrb[92].mxu0  ;;  %v2984_v8 = vpop.f32.mrb[196].mxu1 }
 0x444   :  { %v6882_v54 = vadd.f32 %v1673_v6, %v6802_v51  ;;  %5323 = vmatmul.mubr.msk.f32.gmra.mrb[198].mxu0 %vm671_vm6, %v2984_v8  ;;  %v4873_v11 = vpop.f32.mrb[93].mxu0  ;;  %v5277_v9 = vpop.f32.mrb[197].mxu1 }
 0x445   :  { %5325 = vmatprep.mubr.msk.f32.mxu0 %vm5827_vm0, %v5828_v1  ;;  %5689 = vmatpush3.bf16.msra.mxu0 %v5688_v3 }
 0x447   :  { %v1678_v15 = vpop.f32.mrb[94].mxu0  ;;  %v2989_v16 = vpop.f32.mrb[198].mxu1 }
 0x448   :  { %v6888_v60 = vadd.f32 %v1678_v15, %v6809_v59  ;;  %5326 = vmatmul.mubr.msk.f32.gmra.mrb[200].mxu0 %vm671_vm6, %v2989_v16  ;;  %v4876_v0 = vpop.f32.mrb[95].mxu0  ;;  %v5280_v17 = vpop.f32.mrb[199].mxu1 }
 0x449   :  { %5328 = vmatprep.mubr.msk.f32.mxu0 %vm5827_vm0, %v5828_v1 }
 0x44b   :  { %v1683_v51 = vpop.f32.mrb[96].mxu0  ;;  %v2994_v18 = vpop.f32.mrb[200].mxu1 }
 0x44c   :  { %v6894_v21 = vadd.f32 %v1683_v51, %v6815_v4  ;;  %5329 = vmatmul.mubr.msk.f32.gmra.mrb[202].mxu0 %vm671_vm6, %v2994_v18  ;;  %v4879_v5 = vpop.f32.mrb[97].mxu0  ;;  %v5283_v22 = vpop.f32.mrb[201].mxu1 }
 0x44d   :  { %5331 = vmatprep.mubr.msk.f32.mxu0 %vm5827_vm0, %v5828_v1 }
 0x44f   :  { %v1688_v59 = vpop.f32.mrb[98].mxu0  ;;  %v2999_v24 = vpop.f32.mrb[202].mxu1 }
 0x450   :  { %v6900_v25 = vadd.f32 %v1688_v59, %v6821_v10  ;;  %5332 = vmatmul.mubr.msk.f32.gmra.mrb[204].mxu0 %vm671_vm6, %v2999_v24  ;;  %v4882_v13 = vpop.f32.mrb[99].mxu0  ;;  %v5286_v34 = vpop.f32.mrb[203].mxu1 }
 0x451   :  { %5334 = vmatprep.mubr.msk.f32.mxu0 %vm5827_vm0, %v5828_v1 }
 0x453   :  { %v1693_v4 = vpop.f32.mrb[100].mxu0  ;;  %v3004_v28 = vpop.f32.mrb[204].mxu1 }
 0x454   :  { %v6906_v29 = vadd.f32 %v1693_v4, %v6827_v19  ;;  %5335 = vmatmul.mubr.msk.f32.gmra.mrb[206].mxu0 %vm671_vm6, %v3004_v28  ;;  %v4885_v20 = vpop.f32.mrb[101].mxu0  ;;  %v5289_v52 = vpop.f32.mrb[205].mxu1 }
 0x455   :  { %5337 = vmatprep.mubr.msk.f32.mxu0 %vm5827_vm0, %v5828_v1 }
 0x457   :  { %v1698_v10 = vpop.f32.mrb[102].mxu0  ;;  %v3009_v31 = vpop.f32.mrb[206].mxu1 }
 0x458   :  { %v6912_v7 = vadd.f32 %v1698_v10, %v6833_v23  ;;  %5338 = vmatmul.mubr.msk.f32.gmra.mrb[208].mxu0 %vm671_vm6, %v3009_v31  ;;  %v4888_v26 = vpop.f32.mrb[103].mxu0  ;;  %v5292_v33 = vpop.f32.mrb[207].mxu1 }
 0x459   :  { %5340 = vmatprep.mubr.msk.f32.mxu0 %vm5827_vm0, %v5828_v1 }
 0x45b   :  { %v1703_v19 = vpop.f32.mrb[104].mxu0  ;;  %v3014_v12 = vpop.f32.mrb[208].mxu1 }
 0x45c   :  { %v6918_v36 = vadd.f32 %v1703_v19, %v6839_v27  ;;  %5341 = vmatmul.mubr.msk.f32.gmra.mrb[210].mxu0 %vm671_vm6, %v3014_v12  ;;  %v4891_v32 = vpop.f32.mrb[105].mxu0  ;;  %v5295_v37 = vpop.f32.mrb[209].mxu1 }
 0x45d   :  { %5343 = vmatprep.mubr.msk.f32.mxu0 %vm5827_vm0, %v5828_v1 }
 0x45f   :  { %v1708_v23 = vpop.f32.mrb[106].mxu0  ;;  %v3019_v38 = vpop.f32.mrb[210].mxu1 }
 0x460   :  { %v6924_v40 = vadd.f32 %v1708_v23, %v6845_v30  ;;  %5344 = vmatmul.mubr.msk.f32.gmra.mrb[212].mxu0 %vm671_vm6, %v3019_v38  ;;  %v4894_v39 = vpop.f32.mrb[107].mxu0  ;;  %v5298_v63 = vpop.f32.mrb[211].mxu1 }
 0x461   :  { %5346 = vmatprep.mubr.msk.f32.mxu0 %vm5827_vm0, %v5828_v1 }
 0x463   :  { %v1713_v27 = vpop.f32.mrb[108].mxu0  ;;  %v3024_v42 = vpop.f32.mrb[212].mxu1 }
 0x464   :  { %v6930_v14 = vadd.f32 %v1713_v27, %v6851_v35  ;;  %5347 = vmatmul.mubr.msk.f32.gmra.mrb[214].mxu0 %vm671_vm6, %v3024_v42  ;;  %v4897_v46 = vpop.f32.mrb[109].mxu0  ;;  %v5301_v43 = vpop.f32.mrb[213].mxu1 }
 0x465   :  { %5349 = vmatprep.mubr.msk.f32.mxu0 %vm5827_vm0, %v5828_v1 }
 0x467   :  { %v1718_v30 = vpop.f32.mrb[110].mxu0  ;;  %v3029_v44 = vpop.f32.mrb[214].mxu1 }
 0x468   :  { %v6936_v48 = vadd.f32 %v1718_v30, %v6857_v45  ;;  %5350 = vmatmul.mubr.msk.f32.gmra.mrb[216].mxu0 %vm671_vm6, %v3029_v44  ;;  %v4900_v50 = vpop.f32.mrb[111].mxu0  ;;  %v5304_v53 = vpop.f32.mrb[215].mxu1 }
 0x469   :  { %5352 = vmatprep.mubr.msk.f32.mxu0 %vm5827_vm0, %v5828_v1 }
 0x46b   :  { %v1723_v35 = vpop.f32.mrb[112].mxu0  ;;  %v3034_v55 = vpop.f32.mrb[216].mxu1 }
 0x46c   :  { %v6942_v56 = vadd.f32 %v1723_v35, %v6863_v41  ;;  %5353 = vmatmul.mubr.msk.f32.gmra.mrb[218].mxu0 %vm671_vm6, %v3034_v55  ;;  %v4903_v57 = vpop.f32.mrb[113].mxu0  ;;  %v5307_v58 = vpop.f32.mrb[217].mxu1 }
 0x46d   :  { %5355 = vmatprep.mubr.msk.f32.mxu0 %vm5827_vm0, %v5828_v1 }
 0x46f   :  { %v1728_v45 = vpop.f32.mrb[114].mxu0  ;;  %v3039_v61 = vpop.f32.mrb[218].mxu1 }
 0x470   :  { %v6948_v2 = vadd.f32 %v1728_v45, %v6869_v49  ;;  %5356 = vmatmul.mubr.msk.f32.gmra.mrb[220].mxu0 %vm671_vm6, %v3039_v61  ;;  %v4906_v62 = vpop.f32.mrb[115].mxu0  ;;  %v5310_v3 = vpop.f32.mrb[219].mxu1 }
 0x471   :  { %5431 = vmatprep.mubr.msk.f32.mxu0 %vm5827_vm0, %v5828_v1 }
 0x473   :  { %v1733_v41 = vpop.f32.mrb[116].mxu0  ;;  %v3349_v6 = vpop.f32.mrb[220].mxu1 }
 0x474   :  { %v6954_v8 = vadd.f32 %v1733_v41, %v6875_v47  ;;  %5432 = vmatmul.mubr.msk.f32.vlgmr.msra.gmra.mrb[222].mxu0 %vm671_vm6, %v3349_v6  ;;  %v4909_v11 = vpop.f32.mrb[117].mxu0  ;;  %v5386_v9 = vpop.f32.mrb[221].mxu1 }
 0x475   :  { %5434 = vmatprep.mubr.msk.f32.mxu0 %vm5827_vm0, %v5828_v1 }
 0x477   :  { %v2043_v49 = vpop.f32.mrb[118].mxu0  ;;  %v3354_v15 = vpop.f32.mrb[222].mxu1 }
 0x478   :  { %v6960_v16 = vadd.f32 %v2043_v49, %v6882_v54  ;;  %5435 = vmatmul.mubr.msk.f32.gmra.mrb[224].mxu0 %vm671_vm6, %v3354_v15  ;;  %v4985_v0 = vpop.f32.mrb[119].mxu0  ;;  %v5389_v17 = vpop.f32.mrb[223].mxu1 }
 0x479   :  { %5437 = vmatprep.mubr.msk.f32.mxu0 %vm5827_vm0, %v5828_v1 }
 0x47b   :  { %v2048_v47 = vpop.f32.mrb[120].mxu0  ;;  %v3359_v51 = vpop.f32.mrb[224].mxu1 }
 0x47c   :  { %v6966_v18 = vadd.f32 %v2048_v47, %v6888_v60  ;;  %5438 = vmatmul.mubr.msk.f32.gmra.mrb[226].mxu0 %vm671_vm6, %v3359_v51  ;;  %v4988_v5 = vpop.f32.mrb[121].mxu0  ;;  %v5392_v22 = vpop.f32.mrb[225].mxu1 }
 0x47d   :  { %5440 = vmatprep.mubr.msk.f32.mxu0 %vm5827_vm0, %v5828_v1 }
 0x47f   :  { %v2053_v54 = vpop.f32.mrb[122].mxu0  ;;  %v3364_v59 = vpop.f32.mrb[226].mxu1 }
 0x480   :  { %v6972_v24 = vadd.f32 %v2053_v54, %v6894_v21  ;;  %5441 = vmatmul.mubr.msk.f32.gmra.mrb[228].mxu0 %vm671_vm6, %v3364_v59  ;;  %v4991_v13 = vpop.f32.mrb[123].mxu0  ;;  %v5395_v34 = vpop.f32.mrb[227].mxu1 }
 0x481   :  { %5443 = vmatprep.mubr.msk.f32.mxu0 %vm5827_vm0, %v5828_v1 }
 0x483   :  { %v2058_v60 = vpop.f32.mrb[124].mxu0  ;;  %v3369_v4 = vpop.f32.mrb[228].mxu1 }
 0x484   :  { %v6978_v28 = vadd.f32 %v2058_v60, %v6900_v25  ;;  %5444 = vmatmul.mubr.msk.f32.gmra.mrb[230].mxu0 %vm671_vm6, %v3369_v4  ;;  %v4994_v20 = vpop.f32.mrb[125].mxu0  ;;  %v5398_v52 = vpop.f32.mrb[229].mxu1 }
 0x485   :  { %5446 = vmatprep.mubr.msk.f32.mxu0 %vm5827_vm0, %v5828_v1 }
 0x487   :  { %v2063_v21 = vpop.f32.mrb[126].mxu0  ;;  %v3374_v10 = vpop.f32.mrb[230].mxu1 }
 0x488   :  { %v6984_v31 = vadd.f32 %v2063_v21, %v6906_v29  ;;  %5447 = vmatmul.mubr.msk.f32.gmra.mrb[232].mxu0 %vm671_vm6, %v3374_v10  ;;  %v4997_v26 = vpop.f32.mrb[127].mxu0  ;;  %v5401_v33 = vpop.f32.mrb[231].mxu1 }
 0x489   :  { %5449 = vmatprep.mubr.msk.f32.mxu0 %vm5827_vm0, %v5828_v1 }
 0x48b   :  { %v2068_v25 = vpop.f32.mrb[128].mxu0  ;;  %v3379_v19 = vpop.f32.mrb[232].mxu1 }
 0x48c   :  { %v6990_v12 = vadd.f32 %v2068_v25, %v6912_v7  ;;  %5450 = vmatmul.mubr.msk.f32.gmra.mrb[234].mxu0 %vm671_vm6, %v3379_v19  ;;  %v5000_v32 = vpop.f32.mrb[129].mxu0  ;;  %v5404_v37 = vpop.f32.mrb[233].mxu1 }
 0x48d   :  { %5452 = vmatprep.mubr.msk.f32.mxu0 %vm5827_vm0, %v5828_v1 }
 0x48f   :  { %v2073_v29 = vpop.f32.mrb[130].mxu0  ;;  %v3384_v23 = vpop.f32.mrb[234].mxu1 }
 0x490   :  { %v2113_v38 = vadd.f32 %v2073_v29, %v6918_v36  ;;  %5453 = vmatmul.mubr.msk.f32.gmra.mrb[236].mxu0 %vm671_vm6, %v3384_v23  ;;  %v5003_v39 = vpop.f32.mrb[131].mxu0  ;;  %v5407_v63 = vpop.f32.mrb[235].mxu1 }
 0x491   :  { %5455 = vmatprep.mubr.msk.f32.mxu0 %vm5827_vm0, %v5828_v1 }
 0x493   :  { %v2078_v7 = vpop.f32.mrb[132].mxu0  ;;  %v3389_v27 = vpop.f32.mrb[236].mxu1 }
 0x494   :  { %v2114_v42 = vadd.f32 %v2078_v7, %v6924_v40  ;;  %5456 = vmatmul.mubr.msk.f32.gmra.mrb[238].mxu0 %vm671_vm6, %v3389_v27  ;;  %v5006_v46 = vpop.f32.mrb[133].mxu0  ;;  %v5410_v43 = vpop.f32.mrb[237].mxu1 }
 0x495   :  { %5458 = vmatprep.mubr.msk.f32.mxu0 %vm5827_vm0, %v5828_v1 }
 0x497   :  { %v2083_v30 = vpop.f32.mrb[134].mxu0  ;;  %v3394_v36 = vpop.f32.mrb[238].mxu1 }
 0x498   :  { %v2115_v44 = vadd.f32 %v2083_v30, %v6930_v14  ;;  %5459 = vmatmul.mubr.msk.f32.gmra.mrb[240].mxu0 %vm671_vm6, %v3394_v36  ;;  %v5009_v50 = vpop.f32.mrb[135].mxu0  ;;  %v5413_v53 = vpop.f32.mrb[239].mxu1 }
 0x499   :  { %5461 = vmatprep.mubr.msk.f32.mxu0 %vm5827_vm0, %v5828_v1 }
 0x49b   :  { %v2088_v35 = vpop.f32.mrb[136].mxu0  ;;  %v3399_v40 = vpop.f32.mrb[240].mxu1 }
 0x49c   :  { %v2116_v55 = vadd.f32 %v2088_v35, %v6936_v48  ;;  %5462 = vmatmul.mubr.msk.f32.gmra.mrb[242].mxu0 %vm671_vm6, %v3399_v40  ;;  %v5012_v57 = vpop.f32.mrb[137].mxu0  ;;  %v5416_v58 = vpop.f32.mrb[241].mxu1 }
 0x49d   :  { %5464 = vmatprep.mubr.msk.f32.mxu0 %vm5827_vm0, %v5828_v1 }
 0x49f   :  { %v2093_v45 = vpop.f32.mrb[138].mxu0  ;;  %v3404_v14 = vpop.f32.mrb[242].mxu1 }
 0x4a0   :  { %v2117_v61 = vadd.f32 %v2093_v45, %v6942_v56  ;;  %5465 = vmatmul.mubr.msk.f32.gmra.mrb[244].mxu0 %vm671_vm6, %v3404_v14  ;;  %v5015_v62 = vpop.f32.mrb[139].mxu0  ;;  %v5419_v3 = vpop.f32.mrb[243].mxu1 }
 0x4a1   :  { %5467 = vmatprep.mubr.msk.f32.mxu0 %vm5827_vm0, %v5828_v1 }
 0x4a3   :  { %v2098_v41 = vpop.f32.mrb[140].mxu0  ;;  %v3409_v48 = vpop.f32.mrb[244].mxu1 }
 0x4a4   :  { %v2118_v6 = vadd.f32 %v2098_v41, %v6948_v2  ;;  %5468 = vmatmul.mubr.msk.f32.gmra.mrb[246].mxu0 %vm671_vm6, %v3409_v48  ;;  %v5018_v11 = vpop.f32.mrb[141].mxu0  ;;  %v5422_v9 = vpop.f32.mrb[245].mxu1 }
 0x4a7   :  { %v2103_v49 = vpop.f32.mrb[142].mxu0 }
 0x4a8   :  { %v2119_v15 = vadd.f32 %v2103_v49, %v6954_v8  ;;  %v5021_v0 = vpop.f32.mrb[143].mxu0 }
 0x4ab   :  { %v2413_v56 = vpop.f32.mrb[144].mxu0 }
 0x4ac   :  { %v2477_v17 = vadd.f32 %v2413_v56, %v6960_v16  ;;  %v5097_v47 = vpop.f32.mrb[145].mxu0 }
 0x4af   :  { %v2418_v51 = vpop.f32.mrb[146].mxu0 }
 0x4b0   :  { %v2478_v5 = vadd.f32 %v2418_v51, %v6966_v18  ;;  %v5100_v1 = vpop.f32.mrb[147].mxu0 }
 0x4b3   :  { %v2423_v22 = vpop.f32.mrb[148].mxu0 }
 0x4b4   :  { %v2479_v54 = vadd.f32 %v2423_v22, %v6972_v24  ;;  %v5103_v2 = vpop.f32.mrb[149].mxu0 }
 0x4b7   :  { %v2428_v59 = vpop.f32.mrb[150].mxu0 }
 0x4b8   :  { %v2480_v13 = vadd.f32 %v2428_v59, %v6978_v28  ;;  %v5106_v34 = vpop.f32.mrb[151].mxu0 }
 0x4bb   :  { %v2433_v60 = vpop.f32.mrb[152].mxu0 }
 0x4bc   :  { %v2481_v8 = vadd.f32 %v2433_v60, %v6984_v31  ;;  %v5109_v4 = vpop.f32.mrb[153].mxu0 }
 0x4bf   :  { %v2438_v20 = vpop.f32.mrb[154].mxu0 }
 0x4c0   :  { %v2482_v16 = vadd.f32 %v2438_v20, %v6990_v12  ;;  %v5112_v52 = vpop.f32.mrb[155].mxu0 }
 0x4c3   :  { %v2443_v21 = vpop.f32.mrb[156].mxu0 }
 0x4c4   :  { %v2483_v10 = vadd.f32 %v2443_v21, %v2113_v38  ;;  %v5115_v18 = vpop.f32.mrb[157].mxu0 }
 0x4c7   :  { %v2448_v26 = vpop.f32.mrb[158].mxu0 }
 0x4c8   :  { %v2484_v33 = vadd.f32 %v2448_v26, %v2114_v42  ;;  %v5118_v25 = vpop.f32.mrb[159].mxu0 }
 0x4cb   :  { %v2453_v24 = vpop.f32.mrb[160].mxu0 }
 0x4cc   :  { %v2485_v19 = vadd.f32 %v2453_v24, %v2115_v44  ;;  %v5121_v32 = vpop.f32.mrb[161].mxu0 }
 0x4cf   :  { %v2458_v37 = vpop.f32.mrb[162].mxu0 }
 0x4d0   :  { %v2486_v28 = vadd.f32 %v2458_v37, %v2116_v55  ;;  %v5124_v29 = vpop.f32.mrb[163].mxu0 }
 0x4d3   :  { %v2463_v23 = vpop.f32.mrb[164].mxu0 }
 0x4d4   :  { %v2487_v39 = vadd.f32 %v2463_v23, %v2117_v61  ;;  %v5127_v31 = vpop.f32.mrb[165].mxu0 }
 0x4d7   :  { %v2468_v63 = vpop.f32.mrb[166].mxu0 }
 0x4d8   :  { %v2488_v7 = vadd.f32 %v2468_v63, %v2118_v6  ;;  %v5130_v27 = vpop.f32.mrb[167].mxu0 }
 0x4db   :  { %v2473_v12 = vpop.f32.mrb[168].mxu0 }
 0x4dc   :  { %v2489_v46 = vadd.f32 %v2473_v12, %v2119_v15  ;;  %v5133_v43 = vpop.f32.mrb[169].mxu0 }
 0x4df   :  { %v2783_v38 = vpop.f32.mrb[170].mxu0 }
 0x4e0   :  { %v2847_v30 = vadd.f32 %v2783_v38, %v2477_v17  ;;  %v5209_v36 = vpop.f32.mrb[171].mxu0 }
 0x4e3   :  { %v2788_v42 = vpop.f32.mrb[172].mxu0 }
 0x4e4   :  { %v2848_v50 = vadd.f32 %v2788_v42, %v2478_v5  ;;  %v5212_v53 = vpop.f32.mrb[173].mxu0 }
 0x4e7   :  { %v2793_v44 = vpop.f32.mrb[174].mxu0 }
 0x4e8   :  { %v2849_v35 = vadd.f32 %v2793_v44, %v2479_v54  ;;  %v5215_v40 = vpop.f32.mrb[175].mxu0 }
 0x4eb   :  { %v2798_v55 = vpop.f32.mrb[176].mxu0 }
 0x4ec   :  { %v2850_v57 = vadd.f32 %v2798_v55, %v2480_v13  ;;  %v5218_v58 = vpop.f32.mrb[177].mxu0 }
 0x4ef   :  { %v2803_v45 = vpop.f32.mrb[178].mxu0 }
 0x4f0   :  { %v2851_v14 = vadd.f32 %v2803_v45, %v2481_v8  ;;  %v5221_v61 = vpop.f32.mrb[179].mxu0 }
 0x4f3   :  { %v2808_v62 = vpop.f32.mrb[180].mxu0 }
 0x4f4   :  { %v2852_v3 = vadd.f32 %v2808_v62, %v2482_v16  ;;  %v5224_v41 = vpop.f32.mrb[181].mxu0 }
 0x4f5   :  { %v7032_v41 = vld [vmem:[#allocation9] ss:$0 sm:$0xff] }
 0x4f7   :  { %v2813_v48 = vpop.f32.mrb[182].mxu0 }
 0x4f8   :  { %v2853_v6 = vadd.f32 %v2813_v48, %v2483_v10  ;;  %v5227_v11 = vpop.f32.mrb[183].mxu0 }
 0x4fb   :  { %v2818_v9 = vpop.f32.mrb[184].mxu0 }
 0x4fc   :  { %v2854_v49 = vadd.f32 %v2818_v9, %v2484_v33  ;;  %v5230_v15 = vpop.f32.mrb[185].mxu0 }
 0x4ff   :  { %v2823_v0 = vpop.f32.mrb[186].mxu0 }
 0x500   :  { %v2855_v56 = vadd.f32 %v2823_v0, %v2485_v19  ;;  %v5233_v17 = vpop.f32.mrb[187].mxu0 }
 0x503   :  { %v2828_v47 = vpop.f32.mrb[188].mxu0 }
 0x504   :  { %v2856_v51 = vadd.f32 %v2828_v47, %v2486_v28  ;;  %v5236_v5 = vpop.f32.mrb[189].mxu0 }
 0x507   :  { %v2833_v1 = vpop.f32.mrb[190].mxu0 }
 0x508   :  { %v2857_v22 = vadd.f32 %v2833_v1, %v2487_v39  ;;  %v5239_v54 = vpop.f32.mrb[191].mxu0 }
 0x50b   :  { %v2838_v2 = vpop.f32.mrb[192].mxu0 }
 0x50c   :  { %v2858_v59 = vadd.f32 %v2838_v2, %v2488_v7  ;;  %v5242_v13 = vpop.f32.mrb[193].mxu0 }
 0x50f   :  { %v2843_v34 = vpop.f32.mrb[194].mxu0 }
 0x510   :  { %v2859_v60 = vadd.f32 %v2843_v34, %v2489_v46  ;;  %v5245_v8 = vpop.f32.mrb[195].mxu0 }
 0x513   :  { %v3153_v4 = vpop.f32.mrb[196].mxu0 }
 0x514   :  { %v3217_v20 = vadd.f32 %v3153_v4, %v2847_v30  ;;  %v5321_v16 = vpop.f32.mrb[197].mxu0 }
 0x517   :  { %v3158_v52 = vpop.f32.mrb[198].mxu0 }
 0x518   :  { %v3218_v21 = vadd.f32 %v3158_v52, %v2848_v50  ;;  %v5324_v10 = vpop.f32.mrb[199].mxu0 }
 0x51b   :  { %v3163_v18 = vpop.f32.mrb[200].mxu0 }
 0x51c   :  { %v3219_v26 = vadd.f32 %v3163_v18, %v2849_v35  ;;  %v5327_v33 = vpop.f32.mrb[201].mxu0 }
 0x51f   :  { %v3168_v25 = vpop.f32.mrb[202].mxu0 }
 0x520   :  { %v3220_v24 = vadd.f32 %v3168_v25, %v2850_v57  ;;  %v5330_v19 = vpop.f32.mrb[203].mxu0 }
 0x523   :  { %v3173_v32 = vpop.f32.mrb[204].mxu0 }
 0x524   :  { %v3221_v37 = vadd.f32 %v3173_v32, %v2851_v14  ;;  %v5333_v28 = vpop.f32.mrb[205].mxu0 }
 0x527   :  { %v3178_v29 = vpop.f32.mrb[206].mxu0 }
 0x528   :  { %v3222_v23 = vadd.f32 %v3178_v29, %v2852_v3  ;;  %v5336_v39 = vpop.f32.mrb[207].mxu0 }
 0x52b   :  { %v3183_v31 = vpop.f32.mrb[208].mxu0 }
 0x52c   :  { %v3223_v63 = vadd.f32 %v3183_v31, %v2853_v6  ;;  %v5339_v7 = vpop.f32.mrb[209].mxu0 }
 0x52f   :  { %v3188_v27 = vpop.f32.mrb[210].mxu0 }
 0x530   :  { %v3224_v12 = vadd.f32 %v3188_v27, %v2854_v49  ;;  %v5342_v46 = vpop.f32.mrb[211].mxu0 }
 0x533   :  { %v3193_v43 = vpop.f32.mrb[212].mxu0 }
 0x534   :  { %v3225_v38 = vadd.f32 %v3193_v43, %v2855_v56  ;;  %v5345_v30 = vpop.f32.mrb[213].mxu0 }
 0x537   :  { %v3198_v36 = vpop.f32.mrb[214].mxu0 }
 0x538   :  { %v7024_v42 = vadd.f32 %v3198_v36, %v2856_v51  ;;  %v5348_v50 = vpop.f32.mrb[215].mxu0 }
 0x53b   :  { %v3203_v53 = vpop.f32.mrb[216].mxu0 }
 0x53c   :  { %v7026_v44 = vadd.f32 %v3203_v53, %v2857_v22  ;;  %v5351_v35 = vpop.f32.mrb[217].mxu0 }
 0x53f   :  { %v3208_v40 = vpop.f32.mrb[218].mxu0 }
 0x540   :  { %v7028_v55 = vadd.f32 %v3208_v40, %v2858_v59  ;;  %v5354_v57 = vpop.f32.mrb[219].mxu0 }
 0x543   :  { %v3213_v58 = vpop.f32.mrb[220].mxu0 }
 0x544   :  { %v7030_v45 = vadd.f32 %v3213_v58, %v2859_v60  ;;  %v5357_v14 = vpop.f32.mrb[221].mxu0 }
 0x547   :  { %v3523_v61 = vpop.f32.mrb[222].mxu0 }
 0x548   :  { %v3587_v62 = vadd.f32 %v3523_v61, %v3217_v20  ;;  %v5433_v3 = vpop.f32.mrb[223].mxu0 }
 0x54a   :  { %v3607_v6 = vadd.f32 %v7032_v41, %v3587_v62 }
 0x54b   :  { %v3528_v48 = vpop.f32.mrb[224].mxu0 }
 0x54c   :  { %v3588_v11 = vadd.f32 %v3528_v48, %v3218_v21  ;;  %v5436_v9 = vpop.f32.mrb[225].mxu0  ;;  %v3620_v0 = vmax.f32 %v3607_v6, 0.0 }
 0x54e   :  { %v3608_v49 = vadd.f32 %v7032_v41, %v3588_v11 }
 0x54f   :  { %v3533_v15 = vpop.f32.mrb[226].mxu0 }
 0x550   :  { %v3621_v56 = vmax.f32 %v3608_v49, 0.0  ;;  %v3589_v17 = vadd.f32 %v3533_v15, %v3219_v26  ;;  %v5439_v47 = vpop.f32.mrb[227].mxu0 }
 0x552   :  { %v3985_v51 = vpack.c.bf16 %v3621_v56, %v3620_v0  ;;  %v3609_v1 = vadd.f32 %v7032_v41, %v3589_v17 }
 0x553   :  { %v3538_v5 = vpop.f32.mrb[228].mxu0 }
 0x554   :  { %3986 = vst [vmem:[%s7078_s6] sm:$0xff] %v3985_v51   ;;  %v3590_v22 = vadd.f32 %v3538_v5, %v3220_v24  ;;  %v5442_v54 = vpop.f32.mrb[229].mxu0  ;;  %v3622_v13 = vmax.f32 %v3609_v1, 0.0 }
 0x556   :  { %v3610_v2 = vadd.f32 %v7032_v41, %v3590_v22 }
 0x557   :  { %v3543_v59 = vpop.f32.mrb[230].mxu0 }
 0x558   :  { %v3623_v34 = vmax.f32 %v3610_v2, 0.0  ;;  %v3591_v60 = vadd.f32 %v3543_v59, %v3221_v37  ;;  %v5445_v8 = vpop.f32.mrb[231].mxu0 }
 0x55a   :  { %v3990_v4 = vpack.c.bf16 %v3623_v34, %v3622_v13  ;;  %v3611_v16 = vadd.f32 %v7032_v41, %v3591_v60 }
 0x55b   :  { %v3548_v20 = vpop.f32.mrb[232].mxu0 }
 0x55c   :  { %4012 = vst [vmem:[%s7078_s6 + $0x8] sm:$0xff] %v3990_v4   ;;  %v3592_v52 = vadd.f32 %v3548_v20, %v3222_v23  ;;  %v5448_v21 = vpop.f32.mrb[233].mxu0  ;;  %v3624_v26 = vmax.f32 %v3611_v16, 0.0 }
 0x55e   :  { %v3612_v10 = vadd.f32 %v7032_v41, %v3592_v52 }
 0x55f   :  { %v3553_v18 = vpop.f32.mrb[234].mxu0 }
 0x560   :  { %v3625_v33 = vmax.f32 %v3612_v10, 0.0  ;;  %v3593_v25 = vadd.f32 %v3553_v18, %v3223_v63  ;;  %v5451_v24 = vpop.f32.mrb[235].mxu0 }
 0x562   :  { %v3995_v19 = vpack.c.bf16 %v3625_v33, %v3624_v26  ;;  %v3613_v37 = vadd.f32 %v7032_v41, %v3593_v25 }
 0x563   :  { %v3558_v32 = vpop.f32.mrb[236].mxu0 }
 0x564   :  { %4013 = vst [vmem:[%s7078_s6 + $0x10] sm:$0xff] %v3995_v19   ;;  %v3594_v28 = vadd.f32 %v3558_v32, %v3224_v12  ;;  %v5454_v29 = vpop.f32.mrb[237].mxu0  ;;  %v3626_v31 = vmax.f32 %v3613_v37, 0.0 }
 0x566   :  { %v3614_v23 = vadd.f32 %v7032_v41, %v3594_v28 }
 0x567   :  { %v3563_v39 = vpop.f32.mrb[238].mxu0 }
 0x568   :  { %v3627_v7 = vmax.f32 %v3614_v23, 0.0  ;;  %v3595_v27 = vadd.f32 %v3563_v39, %v3225_v38  ;;  %v5457_v46 = vpop.f32.mrb[239].mxu0 }
 0x56a   :  { %v4000_v43 = vpack.c.bf16 %v3627_v7, %v3626_v31  ;;  %v3615_v30 = vadd.f32 %v7032_v41, %v3595_v27 }
 0x56b   :  { %v3568_v63 = vpop.f32.mrb[240].mxu0 }
 0x56c   :  { %4014 = vst [vmem:[%s7078_s6 + $0x18] sm:$0xff] %v4000_v43   ;;  %v3596_v36 = vadd.f32 %v3568_v63, %v7024_v42  ;;  %v5460_v50 = vpop.f32.mrb[241].mxu0  ;;  %v3628_v35 = vmax.f32 %v3615_v30, 0.0 }
 0x56e   :  { %v3616_v12 = vadd.f32 %v7032_v41, %v3596_v36 }
 0x56f   :  { %v3573_v53 = vpop.f32.mrb[242].mxu0 }
 0x570   :  { %v3629_v40 = vmax.f32 %v3616_v12, 0.0  ;;  %v3597_v57 = vadd.f32 %v3573_v53, %v7026_v44  ;;  %v5463_v38 = vpop.f32.mrb[243].mxu0 }
 0x572   :  { %v4005_v58 = vpack.c.bf16 %v3629_v40, %v3628_v35  ;;  %v3617_v61 = vadd.f32 %v7032_v41, %v3597_v57 }
 0x573   :  { %v3578_v14 = vpop.f32.mrb[244].mxu0 }
 0x574   :  { %4015 = vst [vmem:[%s7078_s6 + $0x20] sm:$0xff] %v4005_v58   ;;  %v3598_v62 = vadd.f32 %v3578_v14, %v7028_v55  ;;  %v5466_v42 = vpop.f32.mrb[245].mxu0  ;;  %v3630_v6 = vmax.f32 %v3617_v61, 0.0 }
 0x576   :  { %v3618_v3 = vadd.f32 %v7032_v41, %v3598_v62 }
 0x577   :  { %v3583_v48 = vpop.f32.mrb[246].mxu0 }
 0x578   :  { %v3631_v11 = vmax.f32 %v3618_v3, 0.0  ;;  %v3599_v9 = vadd.f32 %v3583_v48, %v7030_v45  ;;  %v5469_v44 = vpop.f32.mrb[247].mxu0 }
 0x57a   :  { %v4010_v49 = vpack.c.bf16 %v3631_v11, %v3630_v6  ;;  %v3619_v15 = vadd.f32 %v7032_v41, %v3599_v9 }
 0x57c   :  { %4016 = vst [vmem:[%s7078_s6 + $0x28] sm:$0xff] %v4010_v49   ;;  %v3632_v0 = vmax.f32 %v3619_v15, 0.0 }
 0x57e   :  { %v3981_v56 = vpack.c.bf16 %v3632_v0, %v3632_v0 }
 0x580   :  { %3698 = vst [vmem:[%s7078_s6 + $0x30] sm:$0xf] %v3981_v56 }
 0x581   :  { %3703 = vsyncpa [#allocation3], 1 }
 0x582   :  { %3704 = vsyncpa [#allocation5], 1 }
 0x583   :  { %3705 = vsyncpa [#allocation8], 1 }

// kernel: net_forward.3
= control target key start
LH: loop header
LB: loop body
LE: loop exit
PB: predicated region body
PF: predicated region fallthrough
CT: control target
= control target key end

     0   :  { %s10341_s0 = inlined_call_operand.vmem [shape: bf16[8,3136], index: 0, kind: input, shape index: {}]   ;;  %s10342_s1 = inlined_call_operand.hbm [shape: bf16[3136,1024], index: 1, kind: input, shape index: {}]   ;;  %s10343_s2 = inlined_call_operand.hbm [shape: f32[1,1024], index: 2, kind: input, shape index: {}]   ;;  %s10344_s3 = inlined_call_operand.hbm [shape: bf16[1024,128], index: 3, kind: input, shape index: {}]   ;;  %s10345_s4 = inlined_call_operand.hbm [shape: f32[1,128], index: 4, kind: input, shape index: {}]   ;;  %s10346_s5 = inlined_call_operand.vmem [shape: f32[8,128], index: 5, kind: output, shape index: {}]  }
   0x1   :  { %10354 = sst [smem:[#allocation12_spill]] %s10343_s2 }
   0x2   :  { %10 = vsyncpa [#allocation3], 0 }
   0x3   :  { %12 = vsyncpa [#allocation3 + $0x1], 0 }
   0x4   :  { %13 = vsyncpa [#allocation5], 0 }
   0x5   :  { %15 = vsyncpa [#allocation5 + $0x1], 0 }
   0x6   :  { %16 = vsyncpa [#allocation8], 0  ;;  %s9182_s18 = smov 0   ;;  %s9184_s19 = smov 0  }
   0x7   :  { %s9186_s20 = smov 0   ;;  %s9188_s21 = smov 0  }
   0x8 LB: > { %s9203_s22 = sadd.s32 1, %s9140_s21   ;;  %s50_s23 = sadd.s32 1, %s9136_s20  ;;  %s9140_s21 = sphi %s9188_s21, %s10372_s21   ;;  %s9136_s20 = sphi %s9186_s20, %s10371_s20   ;;  %s9132_s19 = sphi %s9184_s19, %s10370_s19   ;;  %s9128_s18 = sphi %s9182_s18, %s10369_s18  }
   0x9   : > { %s47_s24 = ssub.s32 %s9140_s21, %s9203_s22  ;;  %p57_p0 = scmp.ne.s32.totalorder %s9136_s20, %s9132_s19 }
   0xa   : > { %p48_p1 = scmp.eq.s32.totalorder %s47_s24, 0  ;;  %p58_p2 = scmp.eq.s32.totalorder %s9140_s21, 0 }
   0xb   : > { %p7706_p3 = scmp.lt.s32.totalorder %s9140_s21, 2  ;;  %s9216_s26 = sand.u32 1, %s9136_s20  }
   0xc   : > { %s9213_s25 = scalar_select %p48_p1, %s9136_s20, %s50_s23  }
   0xd   : > { %p59_p4 = por %p58_p2, %p57_p0  ;;  %s7679_s27 = smul.u32 6272, %s9216_s26 }
   0xe   : > { %s216_s28 = sand.u32 1, %s9140_s21   ;;  %s6675_s30 = sshll.u32 %s9216_s26, 2 }
   0xf   : > { %p9220_p5 = pnand %p7706_p3, %p59_p4  ;;  %s7533_s6 = sshll.u32 %s9140_s21, 6 }
  0x10   : > { %s10356_s2 = sld [smem:[#allocation12_spill]]  ;;  %s220_s10 = scalar_lea.vmem [#allocation4], %s6675_s30 }
  0x11   : > { %s10355_s29 = scalar_select %p9220_p5, 1, 0 }
  0x12   : > { %s228_s11 = sshll.u32 %s220_s10, 4  ;;  %s9234_s13 = scalar_lea.sflag [#allocation5], %s216_s28  ;;  %s9231_s11 = int_to_ptr.vmem [resolvable:$true] %s228_s11 }
  0x13   : > { %p9240_p7 = pneg %p9220_p5 }
  0x15   : > { %s10357_s15 = scalar_select %p9240_p7, 1, 0 }
  0x16   : > { %s9229_s9 = scalar_lea.hbm %s10356_s2, %s7533_s6  ;;  %s8985_s23 = scalar_lea.hbm %s10356_s2, 128 }
  0x17   : > { %s8980_s14 = scalar_lea.hbm %s9229_s9, 64  ;;  %p8986_p10 = scmp.lt.u32.totalorder %s9229_s9, %s10356_s2 }
  0x18   : > { %p8981_p6 = scmp.ne.s32.totalorder %s9229_s9, %s8980_s14  ;;  %p8987_p11 = scmp.lt.u32.totalorder %s8985_s23, %s8980_s14 }
  0x19   : > { %p8989_p13 = scmp.lt.u32.totalorder %s8980_s14, %s9229_s9 }
  0x1a   : > { %p8983_p8 = pnand %p9240_p7, %p8981_p6  ;;  %p8988_p12 = por %p8987_p11, %p8986_p10 }
  0x1c   : > { %p8984_p9 = pneg %p8983_p8  ;;  %p8990_p0 = por %p8989_p13, %p8988_p12 }
  0x1e   : > { %p8991_p1 = pnand %p8990_p0, %p8984_p9 }
  0x20   : > { %8994 = shalt.err (!%p8991_p1)
}
  0x21   : > { %s8995_s28 = scalar_lea.vmem %s9231_s11, 64  ;;  %s9142_s6 = smov [#allocation4]  }
  0x22   : > { %p8996_p2 = scmp.ne.s32.totalorder %s9231_s11, %s8995_s28  ;;  %s9000_s7 = sshll.u32 %s9142_s6, 4  ;;  %s9001_s7 = int_to_ptr.vmem [resolvable:$false] %s9000_s7 }
  0x23   : > { %s9002_s8 = scalar_lea.vmem %s9001_s7, 128  ;;  %p9003_p6 = scmp.lt.s32.totalorder %s9231_s11, %s9001_s7 }
  0x24   : > { %p8998_p3 = pnand %p8996_p2, %p9240_p7  ;;  %p9004_p8 = scmp.lt.s32.totalorder %s9002_s8, %s8995_s28 }
  0x26   : > { %p8999_p4 = pneg %p8998_p3  ;;  %p9005_p10 = por %p9004_p8, %p9003_p6 }
  0x28   : > { %p9006_p11 = pnand %p9005_p10, %p8999_p4 }
  0x2a   : > { %9009 = shalt.err (!%p9006_p11)
}
  0x2b   : > { %7701 = dma.hbm_to_vmem [thread:$0]  (!%p9220_p5), %s9229_s9, 64, %s9231_s11, %s9234_s13  }
  0x2c   : > { %s9265_s10 = sadd.s32 4294967295, %s9140_s21   ;;  %p63_p12 = scmp.ne.s32.totalorder %s9132_s19, %s9128_s18 }
  0x2d   : > { %p10347_p9 = scmp.eq.s32.totalorder %s9265_s10, 0  ;;  %p6670_p13 = scmp.ge.s32.totalorder %s9140_s21, 1 }
  0x2e   : > { %p168_p0 = scmp.lt.s32.totalorder %s9140_s21, 3  ;;  %s9143_s9 = smov [#allocation7]  }
  0x2f   : > { %p9275_p2 = por %p10347_p9, %p63_p12  ;;  %s184_s11 = sshll.u32 %s9143_s9, 4  ;;  %s185_s11 = int_to_ptr.vmem [resolvable:$true] %s184_s11 }
  0x30   : > { %p9279_p3 = pnand %p6670_p13, %p168_p0  ;;  %s7532_s17 = sshll.u32 %s9140_s21, 8 }
  0x31   : > { %s10358_s14 = scalar_select %p9275_p2, 1, 0 }
  0x32   : > { %s10359_s16 = scalar_select %p9279_p3, 1, 0 }
  0x33   : > { %p7691_p4 = pneg %p9279_p3  ;;  %s199_s18 = scalar_lea.vmem [#allocation2], %s7679_s27 }
  0x34   : > { %s206_s23 = sshll.u32 %s199_s18, 4  ;;  %s9297_s6 = scalar_lea.hbm %s10342_s1, %s7532_s17  ;;  %s9299_s23 = int_to_ptr.vmem [resolvable:$true] %s206_s23 }
  0x35   : > { %p9290_p6 = pnand %p7691_p4, %p10347_p9  ;;  %s9010_s9 = scalar_lea.hbm %s10345_s4, 16 }
  0x36   : > { %p9011_p8 = scmp.ne.s32.totalorder %s10345_s4, %s9010_s9  ;;  %p9017_p13 = scmp.lt.u32.totalorder %s9010_s9, %s10345_s4 }
  0x37   : > { %p9012_p10 = pneg %p9290_p6 }
  0x39   : > { %p9013_p11 = pnand %p9012_p10, %p9011_p8 }
  0x3b   : > { %p9014_p12 = pneg %p9013_p11 }
  0x3d   : > { %p9019_p0 = pnand %p9017_p13, %p9014_p12 }
  0x3f   : > { %9022 = shalt.err (!%p9019_p0)
}
  0x40   : > { %s9023_s17 = scalar_lea.vmem %s185_s11, 16  ;;  %s9030_s30 = scalar_lea.vmem %s185_s11, 32 }
  0x41   : > { %p9024_p4 = scmp.ne.s32.totalorder %s185_s11, %s9023_s17  ;;  %p9031_p2 = scmp.lt.s32.totalorder %s185_s11, %s185_s11 }
  0x42   : > { %p9032_p3 = scmp.lt.s32.totalorder %s9030_s30, %s9023_s17 }
  0x43   : > { %p9026_p1 = pnand %p9024_p4, %p9012_p10 }
  0x44   : > { %p9033_p5 = por %p9032_p3, %p9031_p2 }
  0x45   : > { %p9027_p9 = pneg %p9026_p1 }
  0x47   : > { %p9034_p7 = pnand %p9033_p5, %p9027_p9 }
  0x49   : > { %9037 = shalt.err (!%p9034_p7)
}
  0x4a   : > { %7694 = dma.hbm_to_vmem [thread:$0]  (!%p9290_p6), %s10345_s4, 16, %s185_s11, [#allocation8]  }
  0x4b   : > { %s196_s2 = scalar_lea.sflag [#allocation3], %s9216_s26  ;;  %s9038_s7 = scalar_lea.hbm %s9297_s6, 100352 }
  0x4c   : > { %p9039_p1 = scmp.ne.s32.totalorder %s9297_s6, %s9038_s7  ;;  %p10361_p8 = scmp.ne.s32.totalorder %s10357_s15, 0 }
  0x4d   : > { %s9043_s24 = scalar_lea.hbm %s10342_s1, 200704  ;;  %p9044_p5 = scmp.lt.u32.totalorder %s9297_s6, %s10342_s1 }
  0x4e   : > { %p9041_p10 = pnand %p9039_p1, %p10361_p8  ;;  %p9045_p7 = scmp.lt.u32.totalorder %s9043_s24, %s9038_s7 }
  0x4f   : > { %p9047_p3 = scmp.lt.u32.totalorder %s9038_s7, %s9297_s6 }
  0x50   : > { %p9042_p2 = pneg %p9041_p10  ;;  %p9046_p9 = por %p9045_p7, %p9044_p5 }
  0x52   : > { %p9048_p11 = por %p9047_p3, %p9046_p9 }
  0x54   : > { %p9049_p12 = pnand %p9048_p11, %p9042_p2 }
  0x56   : > { %9052 = shalt.err (!%p9049_p12)
}
  0x57   : > { %s9053_s11 = scalar_lea.vmem %s9299_s23, 100352  ;;  %s9144_s17 = smov [#allocation2]  }
  0x58   : > { %p9054_p6 = scmp.ne.s32.totalorder %s9299_s23, %s9053_s11  ;;  %s9058_s30 = sshll.u32 %s9144_s17, 4  ;;  %s9059_s30 = int_to_ptr.vmem [resolvable:$false] %s9058_s30 }
  0x59   : > { %s9060_s12 = scalar_lea.vmem %s9059_s30, 200704  ;;  %p9061_p4 = scmp.lt.s32.totalorder %s9299_s23, %s9059_s30 }
  0x5a   : > { %p9056_p13 = pnand %p9054_p6, %p10361_p8  ;;  %p9062_p1 = scmp.lt.s32.totalorder %s9060_s12, %s9053_s11 }
  0x5c   : > { %p9057_p0 = pneg %p9056_p13  ;;  %p9063_p10 = por %p9062_p1, %p9061_p4 }
  0x5e   : > { %p9064_p5 = pnand %p9063_p10, %p9057_p0 }
  0x60   : > { %9067 = shalt.err (!%p9064_p5)
}
  0x61   : > { %s9145_s28 = smov 512   ;;  %s9146_s7 = smov 256  }
  0x62   : > { %s9147_s8 = smov 16   ;;  %p10362_p2 = scmp.ne.s32.totalorder %s10355_s29, 0 }
  0x63   : > { %s7534_s9 = sshll.u32 %s9140_s21, 12  ;;  %s10363_s24 = sshll.u32 %s9216_s26, 8 }
  0x64   : > { %7698 = dma.hbm_to_vmem [thread:$0]  (!%p10362_p2), %s9297_s6, 100352, %s9299_s23, %s196_s2, %s9145_s28, %s9146_s7, %s9147_s8  }
  0x65   : > { %s239_s27 = scalar_lea.vmem [#allocation6], %s10363_s24  ;;  %s9347_s30 = scalar_lea.hbm %s10344_s3, %s7534_s9 }
  0x66   : > { %s246_s18 = sshll.u32 %s239_s27, 4  ;;  %s9068_s12 = scalar_lea.hbm %s9347_s30, 4096  ;;  %s9349_s18 = int_to_ptr.vmem [resolvable:$true] %s246_s18 }
  0x67   : > { %p9069_p7 = scmp.ne.s32.totalorder %s9347_s30, %s9068_s12  ;;  %s9073_s23 = scalar_lea.hbm %s10344_s3, 8192 }
  0x68   : > { %p9074_p11 = scmp.lt.u32.totalorder %s9347_s30, %s10344_s3  ;;  %p9075_p12 = scmp.lt.u32.totalorder %s9073_s23, %s9068_s12 }
  0x69   : > { %p9071_p9 = pnand %p9069_p7, %p10361_p8  ;;  %p9077_p13 = scmp.lt.u32.totalorder %s9068_s12, %s9347_s30 }
  0x6a   : > { %p9076_p6 = por %p9075_p12, %p9074_p11 }
  0x6b   : > { %p9072_p3 = pneg %p9071_p9 }
  0x6c   : > { %p9078_p0 = por %p9077_p13, %p9076_p6 }
  0x6e   : > { %p9079_p4 = pnand %p9078_p0, %p9072_p3 }
  0x70   : > { %9082 = shalt.err (!%p9079_p4)
}
  0x71   : > { %s9083_s28 = scalar_lea.vmem %s9349_s18, 4096  ;;  %s9148_s7 = smov [#allocation6]  }
  0x72   : > { %p9084_p1 = scmp.ne.s32.totalorder %s9349_s18, %s9083_s28  ;;  %s9088_s8 = sshll.u32 %s9148_s7, 4  ;;  %s9089_s8 = int_to_ptr.vmem [resolvable:$false] %s9088_s8 }
  0x73   : > { %s9090_s9 = scalar_lea.vmem %s9089_s8, 8192  ;;  %p9091_p7 = scmp.lt.s32.totalorder %s9349_s18, %s9089_s8 }
  0x74   : > { %p9086_p10 = pnand %p9084_p1, %p10361_p8  ;;  %p9092_p9 = scmp.lt.s32.totalorder %s9090_s9, %s9083_s28 }
  0x76   : > { %p9087_p5 = pneg %p9086_p10  ;;  %p9093_p11 = por %p9092_p9, %p9091_p7 }
  0x78   : > { %p9094_p12 = pnand %p9093_p11, %p9087_p5 }
  0x7a   : > { %9097 = shalt.err (!%p9094_p12)
}
  0x7b   : > { %s9149_s24 = smov 64   ;;  %s9150_s27 = smov 4  }
  0x7c   : > { %7704 = dma.hbm_to_vmem [thread:$0]  (!%p10362_p2), %s9347_s30, 4096, %s9349_s18, %s9234_s13, %s9149_s24, %s9149_s24, %s9150_s27  }
  0x7d   : > { %p10364_p8 = scmp.ne.s32.totalorder %s10359_s16, 0 }
  0x7e   : > { %s260_s15 = sand.u32 (!%p10364_p8), 1, %s9132_s19   ;;  %p10365_p3 = scmp.ne.s32.totalorder (!%p10364_p8), %s10358_s14, 0 }
  0x7f   : > { %258 = sbr.rel (%p10364_p8) target bundleno = 1366 (0x556), region = 40  ;;  %s261_s17 = scalar_lea.sflag (!%p10364_p8), [#allocation3], %s260_s15 }
  0x80   : > { %s7680_s11 = smul.u32 (!%p10364_p8), 6272, %s260_s15 }
  0x82   : > { %s9376_s12 = scalar_lea.vmem (!%p10364_p8), [#allocation2], %s7680_s11 }
  0x86   : > { %9115 = dma.done.wait (%p10365_p3), %s261_s17, 100352  }
  0x87   : > { %9117 = vsyncadd (%p10365_p3), %s261_s17, 4294866944  ;;  %s269_s21 = sand.u32 1, %s9265_s10   ;;  %s6682_s29 = sshll.u32 %s260_s15, 2 }
  0x88   : > { %s270_s13 = scalar_lea.sflag [#allocation5], %s269_s21  ;;  %s9383_s18 = scalar_lea.vmem [#allocation4], %s6682_s29 }
  0x89   : > { %9119 = dma.done.wait (%p10365_p3), %s270_s13, 4160  }
  0x8a   : > { %9121 = vsyncadd (%p10365_p3), %s270_s13, 4294963136  ;;  %s6683_s16 = sshll.u32 %s260_s15, 8  ;;  %p10366_p2 = scmp.eq.s32.totalorder %s9265_s10, 0 }
  0x8b   : > { %s9389_s30 = scalar_lea.vmem [#allocation6], %s6683_s16 }
  0x8c   : > { %9123 = dma.done.wait (%p10366_p2), [#allocation8], 16   ;;  %p10367_p6 = pmov %p10366_p2 }
  0x8d   : > { %v7747_v0 = vld [vmem:[%s9376_s12 + $0x4] ss:$16 sps:$4 sm:$0xff]   ;;  %v7749_v1 = vld [vmem:[%s9376_s12 + $0xc] ss:$16 sps:$4 sm:$0xff]   ;;  %v7751_v2 = vld [vmem:[%s9376_s12] ss:$16 sps:$4 sm:$0xff]  }
  0x8e   : > { %9125 = vsyncadd (%p10367_p6), [#allocation8], 4294967280  ;;  %5152 = vmatprep.subr.bf16.mxu0 %v7747_v0  ;;  %v7752_v3 = vld [vmem:[%s9376_s12 + $0x8] ss:$16 sps:$4 sm:$0xff]   ;;  %5685 = vmatprep.subr.bf16.mxu1 %v7749_v1  ;;  %v7753_v4 = vld [vmem:[%s9376_s12 + $0x24] ss:$16 sps:$4 sm:$0xff]  }
  0x8f   : > { %5153 = vmatpush1.bf16.msra.mxu0 %v7751_v2  ;;  %5686 = vmatpush1.bf16.msra.mxu1 %v7752_v3  ;;  %v7755_v5 = vld [vmem:[%s9376_s12 + $0x2c] ss:$16 sps:$4 sm:$0xff]   ;;  %v7757_v6 = vld [vmem:[%s9376_s12 + $0x20] ss:$16 sps:$4 sm:$0xff]   ;;  %v7758_v7 = vld [vmem:[%s9376_s12 + $0x28] ss:$16 sps:$4 sm:$0xff]  }
  0x90   : > { %5154 = vmatprep.subr.bf16.mxu0 %v7753_v4  ;;  %5687 = vmatprep.subr.bf16.mxu1 %v7755_v5  ;;  %v7759_v8 = vld [vmem:[%s9376_s12 + $0x44] ss:$16 sps:$4 sm:$0xff]   ;;  %v7761_v9 = vld [vmem:[%s9376_s12 + $0x4c] ss:$16 sps:$4 sm:$0xff]   ;;  %v7763_v10 = vld [vmem:[%s9376_s12 + $0x40] ss:$16 sps:$4 sm:$0xff]  }
  0x91   : > { %v7764_v11 = vld [vmem:[%s9376_s12 + $0x48] ss:$16 sps:$4 sm:$0xff]   ;;  %v7765_v12 = vld [vmem:[%s9376_s12 + $0x64] ss:$16 sps:$4 sm:$0xff]   ;;  %v7767_v13 = vld [vmem:[%s9376_s12 + $0x6c] ss:$16 sps:$4 sm:$0xff]  }
  0x92   : > { %v7769_v14 = vld [vmem:[%s9376_s12 + $0x60] ss:$16 sps:$4 sm:$0xff]   ;;  %v7770_v15 = vld [vmem:[%s9376_s12 + $0x68] ss:$16 sps:$4 sm:$0xff]   ;;  %v7771_v16 = vld [vmem:[%s9376_s12 + $0x84] ss:$16 sps:$4 sm:$0xff]  }
  0x93   : > { %5155 = vmatpush1.bf16.msra.mxu0 %v7757_v6  ;;  %5688 = vmatpush1.bf16.msra.mxu1 %v7758_v7  ;;  %v7773_v17 = vld [vmem:[%s9376_s12 + $0x8c] ss:$16 sps:$4 sm:$0xff]   ;;  %v7775_v18 = vld [vmem:[%s9376_s12 + $0x80] ss:$16 sps:$4 sm:$0xff]   ;;  %v7776_v19 = vld [vmem:[%s9376_s12 + $0x88] ss:$16 sps:$4 sm:$0xff]  }
  0x94   : > { %5156 = vmatprep.subr.bf16.mxu0 %v7759_v8  ;;  %5689 = vmatprep.subr.bf16.mxu1 %v7761_v9  ;;  %v7777_v20 = vld [vmem:[%s9376_s12 + $0xa4] ss:$16 sps:$4 sm:$0xff]   ;;  %v7779_v21 = vld [vmem:[%s9376_s12 + $0xac] ss:$16 sps:$4 sm:$0xff]   ;;  %v7781_v22 = vld [vmem:[%s9376_s12 + $0xa0] ss:$16 sps:$4 sm:$0xff]  }
  0x95   : > { %v7782_v23 = vld [vmem:[%s9376_s12 + $0xa8] ss:$16 sps:$4 sm:$0xff]   ;;  %v7783_v24 = vld [vmem:[%s9376_s12 + $0xc4] ss:$16 sps:$4 sm:$0xff]   ;;  %v7785_v25 = vld [vmem:[%s9376_s12 + $0xcc] ss:$16 sps:$4 sm:$0xff]  }
  0x96   : > { %v7787_v26 = vld [vmem:[%s9376_s12 + $0xc0] ss:$16 sps:$4 sm:$0xff]   ;;  %v7788_v27 = vld [vmem:[%s9376_s12 + $0xc8] ss:$16 sps:$4 sm:$0xff]   ;;  %v7789_v28 = vld [vmem:[%s9376_s12 + $0xe4] ss:$16 sps:$4 sm:$0xff]  }
  0x97   : > { %5157 = vmatpush1.bf16.msra.mxu0 %v7763_v10  ;;  %5690 = vmatpush1.bf16.msra.mxu1 %v7764_v11  ;;  %v7791_v29 = vld [vmem:[%s9376_s12 + $0xec] ss:$16 sps:$4 sm:$0xff]   ;;  %v7793_v30 = vld [vmem:[%s9376_s12 + $0xe0] ss:$16 sps:$4 sm:$0xff]   ;;  %v7794_v31 = vld [vmem:[%s9376_s12 + $0xe8] ss:$16 sps:$4 sm:$0xff]  }
  0x98   : > { %5158 = vmatprep.subr.bf16.mxu0 %v7765_v12  ;;  %5691 = vmatprep.subr.bf16.mxu1 %v7767_v13  ;;  %v7795_v32 = vld [vmem:[%s9376_s12 + $0x104] ss:$16 sps:$4 sm:$0xff]   ;;  %v7797_v33 = vld [vmem:[%s9376_s12 + $0x10c] ss:$16 sps:$4 sm:$0xff]   ;;  %v7799_v34 = vld [vmem:[%s9376_s12 + $0x100] ss:$16 sps:$4 sm:$0xff]  }
  0x99   : > { %v7800_v35 = vld [vmem:[%s9376_s12 + $0x108] ss:$16 sps:$4 sm:$0xff]   ;;  %v7801_v36 = vld [vmem:[%s9376_s12 + $0x124] ss:$16 sps:$4 sm:$0xff]   ;;  %v7803_v37 = vld [vmem:[%s9376_s12 + $0x12c] ss:$16 sps:$4 sm:$0xff]  }
  0x9a   : > { %v7805_v38 = vld [vmem:[%s9376_s12 + $0x120] ss:$16 sps:$4 sm:$0xff]   ;;  %v7806_v39 = vld [vmem:[%s9376_s12 + $0x128] ss:$16 sps:$4 sm:$0xff]   ;;  %v7807_v40 = vld [vmem:[%s9376_s12 + $0x144] ss:$16 sps:$4 sm:$0xff]  }
  0x9b   : > { %5159 = vmatpush1.bf16.msra.mxu0 %v7769_v14  ;;  %5692 = vmatpush1.bf16.msra.mxu1 %v7770_v15  ;;  %v7809_v41 = vld [vmem:[%s9376_s12 + $0x14c] ss:$16 sps:$4 sm:$0xff]   ;;  %v7811_v42 = vld [vmem:[%s9376_s12 + $0x140] ss:$16 sps:$4 sm:$0xff]   ;;  %v7812_v43 = vld [vmem:[%s9376_s12 + $0x148] ss:$16 sps:$4 sm:$0xff]  }
  0x9c   : > { %5160 = vmatprep.subr.bf16.mxu0 %v7771_v16  ;;  %5693 = vmatprep.subr.bf16.mxu1 %v7773_v17  ;;  %v7813_v44 = vld [vmem:[%s9376_s12 + $0x164] ss:$16 sps:$4 sm:$0xff]   ;;  %v7815_v45 = vld [vmem:[%s9376_s12 + $0x16c] ss:$16 sps:$4 sm:$0xff]   ;;  %v7817_v47 = vld [vmem:[%s9376_s12 + $0x160] ss:$16 sps:$4 sm:$0xff]  }
  0x9d   : > { %v322_v46 = vld [vmem:[%s10341_s0] sm:$0xff]  ;;  %v7818_v49 = vld [vmem:[%s9376_s12 + $0x168] ss:$16 sps:$4 sm:$0xff]   ;;  %v7821_v51 = vld [vmem:[%s9376_s12 + $0x18c] ss:$16 sps:$4 sm:$0xff]   ;;  %vm5148_vm0 = vcmask 523264  }
  0x9e   : > { %v6686_v48 = vcombine.high %v322_v46, %v322_v46  ;;  %v7819_v50 = vld [vmem:[%s9376_s12 + $0x184] ss:$16 sps:$4 sm:$0xff]   ;;  %v7823_v52 = vld [vmem:[%s9376_s12 + $0x180] ss:$16 sps:$4 sm:$0xff]   ;;  %v7824_v53 = vld [vmem:[%s9376_s12 + $0x188] ss:$16 sps:$4 sm:$0xff]   ;;  %v6685_v4 = vcombine.low %v322_v46, %v322_v46 }
  0x9f   : > { %5161 = vmatpush1.bf16.msra.mxu0 %v7775_v18  ;;  %5694 = vmatpush1.bf16.msra.mxu1 %v7776_v19  ;;  %v7825_v54 = vld [vmem:[%s9376_s12 + $0x1a4] ss:$16 sps:$4 sm:$0xff]   ;;  %v7827_v55 = vld [vmem:[%s9376_s12 + $0x1ac] ss:$16 sps:$4 sm:$0xff]   ;;  %v7829_v56 = vld [vmem:[%s9376_s12 + $0x1a0] ss:$16 sps:$4 sm:$0xff]  }
  0xa0   : > { %5162 = vmatprep.subr.bf16.mxu0 %v7777_v20  ;;  %5695 = vmatprep.subr.bf16.mxu1 %v7779_v21  ;;  %v7830_v57 = vld [vmem:[%s9376_s12 + $0x1a8] ss:$16 sps:$4 sm:$0xff]   ;;  %v7831_v58 = vld [vmem:[%s9376_s12 + $0x1c4] ss:$16 sps:$4 sm:$0xff]   ;;  %v7833_v59 = vld [vmem:[%s9376_s12 + $0x1cc] ss:$16 sps:$4 sm:$0xff]  }
  0xa1   : > { %5184 = vmatprep.mubr.bf16.mxu0 %v6686_v48  ;;  %5717 = vmatprep.mubr.bf16.mxu1 %v6686_v48  ;;  %v7835_v60 = vld [vmem:[%s9376_s12 + $0x1c0] ss:$16 sps:$4 sm:$0xff]   ;;  %v7836_v61 = vld [vmem:[%s9376_s12 + $0x1c8] ss:$16 sps:$4 sm:$0xff]   ;;  %v7837_v62 = vld [vmem:[%s9376_s12 + $0x1e4] ss:$16 sps:$4 sm:$0xff]  }
  0xa2   : > { %v7839_v63 = vld [vmem:[%s9376_s12 + $0x1ec] ss:$16 sps:$4 sm:$0xff]   ;;  %v7841_v0 = vld [vmem:[%s9376_s12 + $0x1e0] ss:$16 sps:$4 sm:$0xff]   ;;  %v7842_v1 = vld [vmem:[%s9376_s12 + $0x1e8] ss:$16 sps:$4 sm:$0xff]  }
  0xa3   : > { %5163 = vmatpush1.bf16.msra.mxu0 %v7781_v22  ;;  %5696 = vmatpush1.bf16.msra.mxu1 %v7782_v23  ;;  %v7847_v2 = vld [vmem:[%s9376_s12 + $0x204] ss:$16 sps:$4 sm:$0xff]   ;;  %v7850_v3 = vld [vmem:[%s9376_s12 + $0x20c] ss:$16 sps:$4 sm:$0xff]   ;;  %v7845_v5 = vld [vmem:[%s9376_s12 + $0x200] ss:$16 sps:$4 sm:$0xff]  }
  0xa4   : > { %5164 = vmatprep.subr.bf16.mxu0 %v7783_v24  ;;  %5697 = vmatprep.subr.bf16.mxu1 %v7785_v25  ;;  %v7848_v6 = vld [vmem:[%s9376_s12 + $0x208] ss:$16 sps:$4 sm:$0xff]   ;;  %v7853_v7 = vld [vmem:[%s9376_s12 + $0x224] ss:$16 sps:$4 sm:$0xff]   ;;  %v7856_v8 = vld [vmem:[%s9376_s12 + $0x22c] ss:$16 sps:$4 sm:$0xff]  }
  0xa5   : > { %v7851_v9 = vld [vmem:[%s9376_s12 + $0x220] ss:$16 sps:$4 sm:$0xff]   ;;  %v7854_v10 = vld [vmem:[%s9376_s12 + $0x228] ss:$16 sps:$4 sm:$0xff]   ;;  %v7859_v11 = vld [vmem:[%s9376_s12 + $0x244] ss:$16 sps:$4 sm:$0xff]  }
  0xa6   : > { %v7862_v12 = vld [vmem:[%s9376_s12 + $0x24c] ss:$16 sps:$4 sm:$0xff]   ;;  %v7857_v13 = vld [vmem:[%s9376_s12 + $0x240] ss:$16 sps:$4 sm:$0xff]   ;;  %v7860_v14 = vld [vmem:[%s9376_s12 + $0x248] ss:$16 sps:$4 sm:$0xff]  }
  0xa7   : > { %5165 = vmatpush1.bf16.msra.mxu0 %v7787_v26  ;;  %5698 = vmatpush1.bf16.msra.mxu1 %v7788_v27  ;;  %v7865_v15 = vld [vmem:[%s9376_s12 + $0x264] ss:$16 sps:$4 sm:$0xff]   ;;  %v7868_v16 = vld [vmem:[%s9376_s12 + $0x26c] ss:$16 sps:$4 sm:$0xff]   ;;  %v7863_v17 = vld [vmem:[%s9376_s12 + $0x260] ss:$16 sps:$4 sm:$0xff]  }
  0xa8   : > { %5166 = vmatprep.subr.bf16.mxu0 %v7789_v28  ;;  %5699 = vmatprep.subr.bf16.mxu1 %v7791_v29  ;;  %v7866_v18 = vld [vmem:[%s9376_s12 + $0x268] ss:$16 sps:$4 sm:$0xff]   ;;  %v7871_v19 = vld [vmem:[%s9376_s12 + $0x284] ss:$16 sps:$4 sm:$0xff]   ;;  %v7874_v20 = vld [vmem:[%s9376_s12 + $0x28c] ss:$16 sps:$4 sm:$0xff]  }
  0xa9   : > { %v7869_v21 = vld [vmem:[%s9376_s12 + $0x280] ss:$16 sps:$4 sm:$0xff]   ;;  %v7872_v22 = vld [vmem:[%s9376_s12 + $0x288] ss:$16 sps:$4 sm:$0xff]   ;;  %v7877_v23 = vld [vmem:[%s9376_s12 + $0x2a4] ss:$16 sps:$4 sm:$0xff]  }
  0xaa   : > { %v7880_v24 = vld [vmem:[%s9376_s12 + $0x2ac] ss:$16 sps:$4 sm:$0xff]   ;;  %v7875_v25 = vld [vmem:[%s9376_s12 + $0x2a0] ss:$16 sps:$4 sm:$0xff]   ;;  %v7878_v26 = vld [vmem:[%s9376_s12 + $0x2a8] ss:$16 sps:$4 sm:$0xff]  }
  0xab   : > { %5167 = vmatpush1.bf16.msra.mxu0 %v7793_v30  ;;  %5700 = vmatpush1.bf16.msra.mxu1 %v7794_v31  ;;  %v7883_v27 = vld [vmem:[%s9376_s12 + $0x2c4] ss:$16 sps:$4 sm:$0xff]   ;;  %v7886_v28 = vld [vmem:[%s9376_s12 + $0x2cc] ss:$16 sps:$4 sm:$0xff]   ;;  %v7881_v31 = vld [vmem:[%s9376_s12 + $0x2c0] ss:$16 sps:$4 sm:$0xff]  }
  0xac   : > { %5168 = vmatprep.subr.bf16.mxu0 %v7795_v32  ;;  %5701 = vmatprep.subr.bf16.mxu1 %v7797_v33  ;;  %v9491_v29 = vld [vmem:[%s10341_s0 + $0x8] sm:$0xff]  ;;  %v7889_v33 = vld [vmem:[%s9376_s12 + $0x2e4] ss:$16 sps:$4 sm:$0xff]   ;;  %p10368_p13 = scmp.ne.s32.totalorder %s9265_s10, 0 }
  0xad   : > { %v6688_v30 = vcombine.high %v9491_v29, %v9491_v29  ;;  %v7884_v32 = vld [vmem:[%s9376_s12 + $0x2c8] ss:$16 sps:$4 sm:$0xff]   ;;  %v7910_v46 = vld [vmem:[%s9376_s12 + $0x34c] ss:$16 sps:$4 sm:$0xff]  }
  0xae   : > { %v7908_v48 = vld [vmem:[%s9376_s12 + $0x348] ss:$16 sps:$4 sm:$0xff]  }
  0xaf   : > { %5169 = vmatpush1.bf16.msra.mxu0 %v7799_v34  ;;  %5702 = vmatpush1.bf16.msra.mxu1 %v7800_v35  ;;  %v7892_v34 = vld [vmem:[%s9376_s12 + $0x2ec] ss:$16 sps:$4 sm:$0xff]   ;;  %v7887_v35 = vld [vmem:[%s9376_s12 + $0x2e0] ss:$16 sps:$4 sm:$0xff]  }
  0xb0   : > { %5170 = vmatprep.subr.bf16.mxu0 %v7801_v36  ;;  %5703 = vmatprep.subr.bf16.mxu1 %v7803_v37  ;;  %v7890_v36 = vld [vmem:[%s9376_s12 + $0x2e8] ss:$16 sps:$4 sm:$0xff]   ;;  %v7895_v37 = vld [vmem:[%s9376_s12 + $0x304] ss:$16 sps:$4 sm:$0xff]  }
  0xb3   : > { %5171 = vmatpush1.bf16.msra.mxu0 %v7805_v38  ;;  %5704 = vmatpush1.bf16.msra.mxu1 %v7806_v39  ;;  %v7898_v38 = vld [vmem:[%s9376_s12 + $0x30c] ss:$16 sps:$4 sm:$0xff]   ;;  %v7893_v39 = vld [vmem:[%s9376_s12 + $0x300] ss:$16 sps:$4 sm:$0xff]  }
  0xb4   : > { %5172 = vmatprep.subr.bf16.mxu0 %v7807_v40  ;;  %5705 = vmatprep.subr.bf16.mxu1 %v7809_v41  ;;  %v7896_v40 = vld [vmem:[%s9376_s12 + $0x308] ss:$16 sps:$4 sm:$0xff]   ;;  %v7901_v41 = vld [vmem:[%s9376_s12 + $0x324] ss:$16 sps:$4 sm:$0xff]  }
  0xb7   : > { %5173 = vmatpush1.bf16.msra.mxu0 %v7811_v42  ;;  %5706 = vmatpush1.bf16.msra.mxu1 %v7812_v43  ;;  %v7904_v42 = vld [vmem:[%s9376_s12 + $0x32c] ss:$16 sps:$4 sm:$0xff]   ;;  %v7899_v43 = vld [vmem:[%s9376_s12 + $0x320] ss:$16 sps:$4 sm:$0xff]  }
  0xb8   : > { %5174 = vmatprep.subr.bf16.mxu0 %v7813_v44  ;;  %5707 = vmatprep.subr.bf16.mxu1 %v7815_v45  ;;  %v7902_v44 = vld [vmem:[%s9376_s12 + $0x328] ss:$16 sps:$4 sm:$0xff]   ;;  %v7907_v45 = vld [vmem:[%s9376_s12 + $0x344] ss:$16 sps:$4 sm:$0xff]  }
  0xbb   : > { %5175 = vmatpush1.bf16.msra.mxu0 %v7817_v47  ;;  %5708 = vmatpush1.bf16.msra.mxu1 %v7818_v49  ;;  %v7905_v47 = vld [vmem:[%s9376_s12 + $0x340] ss:$16 sps:$4 sm:$0xff]   ;;  %v7913_v49 = vld [vmem:[%s9376_s12 + $0x364] ss:$16 sps:$4 sm:$0xff]  }
  0xbc   : > { %5176 = vmatprep.subr.bf16.mxu0 %v7819_v50  ;;  %5709 = vmatprep.subr.bf16.mxu1 %v7821_v51  ;;  %v7916_v50 = vld [vmem:[%s9376_s12 + $0x36c] ss:$16 sps:$4 sm:$0xff]   ;;  %v7911_v51 = vld [vmem:[%s9376_s12 + $0x360] ss:$16 sps:$4 sm:$0xff]  }
  0xbf   : > { %5177 = vmatpush1.bf16.msra.mxu0 %v7823_v52  ;;  %5710 = vmatpush1.bf16.msra.mxu1 %v7824_v53  ;;  %v7914_v52 = vld [vmem:[%s9376_s12 + $0x368] ss:$16 sps:$4 sm:$0xff]   ;;  %v7919_v53 = vld [vmem:[%s9376_s12 + $0x384] ss:$16 sps:$4 sm:$0xff]  }
  0xc0   : > { %5178 = vmatprep.subr.bf16.mxu0 %v7825_v54  ;;  %5711 = vmatprep.subr.bf16.mxu1 %v7827_v55  ;;  %v7922_v54 = vld [vmem:[%s9376_s12 + $0x38c] ss:$16 sps:$4 sm:$0xff]   ;;  %v7917_v55 = vld [vmem:[%s9376_s12 + $0x380] ss:$16 sps:$4 sm:$0xff]  }
  0xc3   : > { %5179 = vmatpush1.bf16.msra.mxu0 %v7829_v56  ;;  %5712 = vmatpush1.bf16.msra.mxu1 %v7830_v57  ;;  %v7920_v56 = vld [vmem:[%s9376_s12 + $0x388] ss:$16 sps:$4 sm:$0xff]   ;;  %v7925_v57 = vld [vmem:[%s9376_s12 + $0x3a4] ss:$16 sps:$4 sm:$0xff]  }
  0xc4   : > { %5180 = vmatprep.subr.bf16.mxu0 %v7831_v58  ;;  %5713 = vmatprep.subr.bf16.mxu1 %v7833_v59  ;;  %v7928_v58 = vld [vmem:[%s9376_s12 + $0x3ac] ss:$16 sps:$4 sm:$0xff]   ;;  %v7923_v59 = vld [vmem:[%s9376_s12 + $0x3a0] ss:$16 sps:$4 sm:$0xff]  }
  0xc7   : > { %5181 = vmatpush1.bf16.msra.mxu0 %v7835_v60  ;;  %5714 = vmatpush1.bf16.msra.mxu1 %v7836_v61  ;;  %v7926_v60 = vld [vmem:[%s9376_s12 + $0x3a8] ss:$16 sps:$4 sm:$0xff]   ;;  %v7931_v61 = vld [vmem:[%s9376_s12 + $0x3c4] ss:$16 sps:$4 sm:$0xff]  }
  0xc8   : > { %5182 = vmatprep.subr.bf16.mxu0 %v7837_v62  ;;  %5715 = vmatprep.subr.bf16.mxu1 %v7839_v63  ;;  %v7934_v62 = vld [vmem:[%s9376_s12 + $0x3cc] ss:$16 sps:$4 sm:$0xff]   ;;  %v7929_v63 = vld [vmem:[%s9376_s12 + $0x3c0] ss:$16 sps:$4 sm:$0xff]  }
  0xcb   : > { %5183 = vmatpush1.bf16.msra.mxu0 %v7841_v0  ;;  %5716 = vmatpush1.bf16.msra.mxu1 %v7842_v1  ;;  %v7932_v0 = vld [vmem:[%s9376_s12 + $0x3c8] ss:$16 sps:$4 sm:$0xff]   ;;  %v7937_v1 = vld [vmem:[%s9376_s12 + $0x3e4] ss:$16 sps:$4 sm:$0xff]  }
  0xcc   : > { %5193 = vmatprep.subr.bf16.mxu0 %v7847_v2  ;;  %5726 = vmatprep.subr.bf16.mxu1 %v7850_v3  ;;  %v7940_v2 = vld [vmem:[%s9376_s12 + $0x3ec] ss:$16 sps:$4 sm:$0xff]   ;;  %v7935_v3 = vld [vmem:[%s9376_s12 + $0x3e0] ss:$16 sps:$4 sm:$0xff]  }
  0xce   : > { %5185 = vmatmul.mubr.bf16.vlgmr.msra.gmra.mrb[0].mxu0 %v6685_v4  ;;  %5718 = vmatmul.mubr.bf16.vlgmr.msra.gmra.mrb[0].mxu1 %v6685_v4  ;;  %v7938_v4 = vld [vmem:[%s9376_s12 + $0x3e8] ss:$16 sps:$4 sm:$0xff]  }
  0xcf   : > { %5194 = vmatpush1.bf16.msra.mxu0 %v7845_v5  ;;  %5727 = vmatpush1.bf16.msra.mxu1 %v7848_v6  ;;  %v7945_v5 = vld [vmem:[%s9376_s12 + $0x404] ss:$16 sps:$4 sm:$0xff]   ;;  %v7948_v6 = vld [vmem:[%s9376_s12 + $0x40c] ss:$16 sps:$4 sm:$0xff]  }
  0xd0   : > { %5195 = vmatprep.subr.bf16.mxu0 %v7853_v7  ;;  %5728 = vmatprep.subr.bf16.mxu1 %v7856_v8  ;;  %v6687_v7 = vcombine.low %v9491_v29, %v9491_v29  ;;  %v7943_v8 = vld [vmem:[%s9376_s12 + $0x400] ss:$16 sps:$4 sm:$0xff]   ;;  %v7978_v29 = vld [vmem:[%s9376_s12 + $0x4ac] ss:$16 sps:$4 sm:$0xff]  }
  0xd1   : > { %5225 = vmatprep.mubr.bf16.mxu0 %v6688_v30  ;;  %5758 = vmatprep.mubr.bf16.mxu1 %v6688_v30  ;;  %v7973_v30 = vld [vmem:[%s9376_s12 + $0x4a0] ss:$16 sps:$4 sm:$0xff]  }
  0xd3   : > { %5196 = vmatpush1.bf16.msra.mxu0 %v7851_v9  ;;  %5729 = vmatpush1.bf16.msra.mxu1 %v7854_v10  ;;  %v7946_v9 = vld [vmem:[%s9376_s12 + $0x408] ss:$16 sps:$4 sm:$0xff]   ;;  %v7951_v10 = vld [vmem:[%s9376_s12 + $0x424] ss:$16 sps:$4 sm:$0xff]  }
  0xd4   : > { %5197 = vmatprep.subr.bf16.mxu0 %v7859_v11  ;;  %5730 = vmatprep.subr.bf16.mxu1 %v7862_v12  ;;  %v9543_v11 = vld [vmem:[%s10341_s0 + $0x10] sm:$0xff]  ;;  %v7954_v12 = vld [vmem:[%s9376_s12 + $0x42c] ss:$16 sps:$4 sm:$0xff]  }
  0xd7   : > { %5198 = vmatpush1.bf16.msra.mxu0 %v7857_v13  ;;  %5731 = vmatpush1.bf16.msra.mxu1 %v7860_v14  ;;  %v6690_v13 = vcombine.high %v9543_v11, %v9543_v11  ;;  %v7949_v14 = vld [vmem:[%s9376_s12 + $0x420] ss:$16 sps:$4 sm:$0xff]  }
  0xd8   : > { %5199 = vmatprep.subr.bf16.mxu0 %v7865_v15  ;;  %5732 = vmatprep.subr.bf16.mxu1 %v7868_v16  ;;  %v7952_v15 = vld [vmem:[%s9376_s12 + $0x428] ss:$16 sps:$4 sm:$0xff]   ;;  %v7957_v16 = vld [vmem:[%s9376_s12 + $0x444] ss:$16 sps:$4 sm:$0xff]  }
  0xdb   : > { %5200 = vmatpush1.bf16.msra.mxu0 %v7863_v17  ;;  %5733 = vmatpush1.bf16.msra.mxu1 %v7866_v18  ;;  %v7960_v17 = vld [vmem:[%s9376_s12 + $0x44c] ss:$16 sps:$4 sm:$0xff]   ;;  %v7955_v18 = vld [vmem:[%s9376_s12 + $0x440] ss:$16 sps:$4 sm:$0xff]  }
  0xdc   : > { %5201 = vmatprep.subr.bf16.mxu0 %v7871_v19  ;;  %5734 = vmatprep.subr.bf16.mxu1 %v7874_v20  ;;  %v7958_v19 = vld [vmem:[%s9376_s12 + $0x448] ss:$16 sps:$4 sm:$0xff]   ;;  %v7963_v20 = vld [vmem:[%s9376_s12 + $0x464] ss:$16 sps:$4 sm:$0xff]  }
  0xdf   : > { %5202 = vmatpush1.bf16.msra.mxu0 %v7869_v21  ;;  %5735 = vmatpush1.bf16.msra.mxu1 %v7872_v22  ;;  %v7966_v21 = vld [vmem:[%s9376_s12 + $0x46c] ss:$16 sps:$4 sm:$0xff]   ;;  %v7961_v22 = vld [vmem:[%s9376_s12 + $0x460] ss:$16 sps:$4 sm:$0xff]  }
  0xe0   : > { %5203 = vmatprep.subr.bf16.mxu0 %v7877_v23  ;;  %5736 = vmatprep.subr.bf16.mxu1 %v7880_v24  ;;  %v7964_v23 = vld [vmem:[%s9376_s12 + $0x468] ss:$16 sps:$4 sm:$0xff]   ;;  %v7969_v24 = vld [vmem:[%s9376_s12 + $0x484] ss:$16 sps:$4 sm:$0xff]  }
  0xe3   : > { %5204 = vmatpush1.bf16.msra.mxu0 %v7875_v25  ;;  %5737 = vmatpush1.bf16.msra.mxu1 %v7878_v26  ;;  %v7972_v25 = vld [vmem:[%s9376_s12 + $0x48c] ss:$16 sps:$4 sm:$0xff]   ;;  %v7967_v26 = vld [vmem:[%s9376_s12 + $0x480] ss:$16 sps:$4 sm:$0xff]  }
  0xe4   : > { %5205 = vmatprep.subr.bf16.mxu0 %v7883_v27  ;;  %5738 = vmatprep.subr.bf16.mxu1 %v7886_v28  ;;  %v7970_v27 = vld [vmem:[%s9376_s12 + $0x488] ss:$16 sps:$4 sm:$0xff]   ;;  %v7975_v28 = vld [vmem:[%s9376_s12 + $0x4a4] ss:$16 sps:$4 sm:$0xff]  }
  0xe7   : > { %5206 = vmatpush1.bf16.msra.mxu0 %v7881_v31  ;;  %5739 = vmatpush1.bf16.msra.mxu1 %v7884_v32  ;;  %v7976_v31 = vld [vmem:[%s9376_s12 + $0x4a8] ss:$16 sps:$4 sm:$0xff]   ;;  %v7981_v32 = vld [vmem:[%s9376_s12 + $0x4c4] ss:$16 sps:$4 sm:$0xff]  }
  0xe8   : > { %5207 = vmatprep.subr.bf16.mxu0 %v7889_v33  ;;  %5740 = vmatprep.subr.bf16.mxu1 %v7892_v34  ;;  %v7984_v33 = vld [vmem:[%s9376_s12 + $0x4cc] ss:$16 sps:$4 sm:$0xff]   ;;  %v7979_v34 = vld [vmem:[%s9376_s12 + $0x4c0] ss:$16 sps:$4 sm:$0xff]  }
  0xeb   : > { %5208 = vmatpush1.bf16.msra.mxu0 %v7887_v35  ;;  %5741 = vmatpush1.bf16.msra.mxu1 %v7890_v36  ;;  %v7982_v35 = vld [vmem:[%s9376_s12 + $0x4c8] ss:$16 sps:$4 sm:$0xff]   ;;  %v7987_v36 = vld [vmem:[%s9376_s12 + $0x4e4] ss:$16 sps:$4 sm:$0xff]  }
  0xec   : > { %5209 = vmatprep.subr.bf16.mxu0 %v7895_v37  ;;  %5742 = vmatprep.subr.bf16.mxu1 %v7898_v38  ;;  %v7990_v37 = vld [vmem:[%s9376_s12 + $0x4ec] ss:$16 sps:$4 sm:$0xff]   ;;  %v7985_v38 = vld [vmem:[%s9376_s12 + $0x4e0] ss:$16 sps:$4 sm:$0xff]  }
  0xef   : > { %5210 = vmatpush1.bf16.msra.mxu0 %v7893_v39  ;;  %5743 = vmatpush1.bf16.msra.mxu1 %v7896_v40  ;;  %v7988_v39 = vld [vmem:[%s9376_s12 + $0x4e8] ss:$16 sps:$4 sm:$0xff]   ;;  %v7993_v40 = vld [vmem:[%s9376_s12 + $0x504] ss:$16 sps:$4 sm:$0xff]  }
  0xf0   : > { %5211 = vmatprep.subr.bf16.mxu0 %v7901_v41  ;;  %5744 = vmatprep.subr.bf16.mxu1 %v7904_v42  ;;  %v7996_v41 = vld [vmem:[%s9376_s12 + $0x50c] ss:$16 sps:$4 sm:$0xff]   ;;  %v7991_v42 = vld [vmem:[%s9376_s12 + $0x500] ss:$16 sps:$4 sm:$0xff]  }
  0xf3   : > { %5212 = vmatpush1.bf16.msra.mxu0 %v7899_v43  ;;  %5745 = vmatpush1.bf16.msra.mxu1 %v7902_v44  ;;  %v7994_v43 = vld [vmem:[%s9376_s12 + $0x508] ss:$16 sps:$4 sm:$0xff]   ;;  %v7999_v44 = vld [vmem:[%s9376_s12 + $0x524] ss:$16 sps:$4 sm:$0xff]  }
  0xf4   : > { %5213 = vmatprep.subr.bf16.mxu0 %v7907_v45  ;;  %5746 = vmatprep.subr.bf16.mxu1 %v7910_v46  ;;  %v8002_v45 = vld [vmem:[%s9376_s12 + $0x52c] ss:$16 sps:$4 sm:$0xff]   ;;  %v7997_v46 = vld [vmem:[%s9376_s12 + $0x520] ss:$16 sps:$4 sm:$0xff]  }
  0xf7   : > { %5214 = vmatpush1.bf16.msra.mxu0 %v7905_v47  ;;  %5747 = vmatpush1.bf16.msra.mxu1 %v7908_v48  ;;  %v8000_v47 = vld [vmem:[%s9376_s12 + $0x528] ss:$16 sps:$4 sm:$0xff]   ;;  %v8005_v48 = vld [vmem:[%s9376_s12 + $0x544] ss:$16 sps:$4 sm:$0xff]  }
  0xf8   : > { %5215 = vmatprep.subr.bf16.mxu0 %v7913_v49  ;;  %5748 = vmatprep.subr.bf16.mxu1 %v7916_v50  ;;  %v8008_v49 = vld [vmem:[%s9376_s12 + $0x54c] ss:$16 sps:$4 sm:$0xff]   ;;  %v8003_v50 = vld [vmem:[%s9376_s12 + $0x540] ss:$16 sps:$4 sm:$0xff]  }
  0xfb   : > { %5216 = vmatpush1.bf16.msra.mxu0 %v7911_v51  ;;  %5749 = vmatpush1.bf16.msra.mxu1 %v7914_v52  ;;  %v8006_v51 = vld [vmem:[%s9376_s12 + $0x548] ss:$16 sps:$4 sm:$0xff]   ;;  %v8011_v52 = vld [vmem:[%s9376_s12 + $0x564] ss:$16 sps:$4 sm:$0xff]  }
  0xfc   : > { %5217 = vmatprep.subr.bf16.mxu0 %v7919_v53  ;;  %5750 = vmatprep.subr.bf16.mxu1 %v7922_v54  ;;  %v8014_v53 = vld [vmem:[%s9376_s12 + $0x56c] ss:$16 sps:$4 sm:$0xff]   ;;  %v8009_v54 = vld [vmem:[%s9376_s12 + $0x560] ss:$16 sps:$4 sm:$0xff]  }
  0xff   : > { %5218 = vmatpush1.bf16.msra.mxu0 %v7917_v55  ;;  %5751 = vmatpush1.bf16.msra.mxu1 %v7920_v56  ;;  %v8012_v55 = vld [vmem:[%s9376_s12 + $0x568] ss:$16 sps:$4 sm:$0xff]   ;;  %v8017_v56 = vld [vmem:[%s9376_s12 + $0x584] ss:$16 sps:$4 sm:$0xff]  }
 0x100   : > { %5219 = vmatprep.subr.bf16.mxu0 %v7925_v57  ;;  %5752 = vmatprep.subr.bf16.mxu1 %v7928_v58  ;;  %v8020_v57 = vld [vmem:[%s9376_s12 + $0x58c] ss:$16 sps:$4 sm:$0xff]   ;;  %v8015_v58 = vld [vmem:[%s9376_s12 + $0x580] ss:$16 sps:$4 sm:$0xff]  }
 0x103   : > { %5220 = vmatpush1.bf16.msra.mxu0 %v7923_v59  ;;  %5753 = vmatpush1.bf16.msra.mxu1 %v7926_v60  ;;  %v8018_v59 = vld [vmem:[%s9376_s12 + $0x588] ss:$16 sps:$4 sm:$0xff]   ;;  %v8023_v60 = vld [vmem:[%s9376_s12 + $0x5a4] ss:$16 sps:$4 sm:$0xff]  }
 0x104   : > { %5221 = vmatprep.subr.bf16.mxu0 %v7931_v61  ;;  %5754 = vmatprep.subr.bf16.mxu1 %v7934_v62  ;;  %v8026_v61 = vld [vmem:[%s9376_s12 + $0x5ac] ss:$16 sps:$4 sm:$0xff]   ;;  %v8021_v62 = vld [vmem:[%s9376_s12 + $0x5a0] ss:$16 sps:$4 sm:$0xff]  }
 0x107   : > { %5222 = vmatpush1.bf16.msra.mxu0 %v7929_v63  ;;  %5755 = vmatpush1.bf16.msra.mxu1 %v7932_v0  ;;  %v8024_v63 = vld [vmem:[%s9376_s12 + $0x5a8] ss:$16 sps:$4 sm:$0xff]   ;;  %v8029_v0 = vld [vmem:[%s9376_s12 + $0x5c4] ss:$16 sps:$4 sm:$0xff]  }
 0x108   : > { %5223 = vmatprep.subr.bf16.mxu0 %v7937_v1  ;;  %5756 = vmatprep.subr.bf16.mxu1 %v7940_v2  ;;  %v8032_v1 = vld [vmem:[%s9376_s12 + $0x5cc] ss:$16 sps:$4 sm:$0xff]   ;;  %v8027_v2 = vld [vmem:[%s9376_s12 + $0x5c0] ss:$16 sps:$4 sm:$0xff]  }
 0x10b   : > { %5224 = vmatpush1.bf16.msra.mxu0 %v7935_v3  ;;  %5757 = vmatpush1.bf16.msra.mxu1 %v7938_v4  ;;  %v8030_v3 = vld [vmem:[%s9376_s12 + $0x5c8] ss:$16 sps:$4 sm:$0xff]   ;;  %v8035_v4 = vld [vmem:[%s9376_s12 + $0x5e4] ss:$16 sps:$4 sm:$0xff]  }
 0x10c   : > { %5234 = vmatprep.subr.bf16.mxu0 %v7945_v5  ;;  %5767 = vmatprep.subr.bf16.mxu1 %v7948_v6  ;;  %v8038_v5 = vld [vmem:[%s9376_s12 + $0x5ec] ss:$16 sps:$4 sm:$0xff]   ;;  %v8033_v6 = vld [vmem:[%s9376_s12 + $0x5e0] ss:$16 sps:$4 sm:$0xff]  }
 0x10e   : > { %5226 = vmatmul.mubr.bf16.vlgmr.msra.gmra.mrb[0].mxu0 %v6687_v7  ;;  %5759 = vmatmul.mubr.bf16.vlgmr.msra.gmra.mrb[0].mxu1 %v6687_v7  ;;  %v8036_v7 = vld [vmem:[%s9376_s12 + $0x5e8] ss:$16 sps:$4 sm:$0xff]  }
 0x10f   : > { %5235 = vmatpush1.bf16.msra.mxu0 %v7943_v8  ;;  %5768 = vmatpush1.bf16.msra.mxu1 %v7946_v9  ;;  %v8043_v8 = vld [vmem:[%s9376_s12 + $0x604] ss:$16 sps:$4 sm:$0xff]   ;;  %v8046_v9 = vld [vmem:[%s9376_s12 + $0x60c] ss:$16 sps:$4 sm:$0xff]  }
 0x110   : > { %5236 = vmatprep.subr.bf16.mxu0 %v7951_v10  ;;  %5769 = vmatprep.subr.bf16.mxu1 %v7954_v12  ;;  %v8041_v10 = vld [vmem:[%s9376_s12 + $0x600] ss:$16 sps:$4 sm:$0xff]   ;;  %v6689_v12 = vcombine.low %v9543_v11, %v9543_v11 }
 0x111   : > { %5266 = vmatprep.mubr.bf16.mxu0 %v6690_v13  ;;  %5799 = vmatprep.mubr.bf16.mxu1 %v6690_v13  ;;  %v8044_v13 = vld [vmem:[%s9376_s12 + $0x608] ss:$16 sps:$4 sm:$0xff]   ;;  %v8047_v11 = vld [vmem:[%s9376_s12 + $0x620] ss:$16 sps:$4 sm:$0xff]  }
 0x113   : > { %5237 = vmatpush1.bf16.msra.mxu0 %v7949_v14  ;;  %5770 = vmatpush1.bf16.msra.mxu1 %v7952_v15  ;;  %v9615_v14 = vld [vmem:[%s10341_s0 + $0x18] sm:$0xff]  ;;  %v8049_v15 = vld [vmem:[%s9376_s12 + $0x624] ss:$16 sps:$4 sm:$0xff]  }
 0x114   : > { %5238 = vmatprep.subr.bf16.mxu0 %v7957_v16  ;;  %5771 = vmatprep.subr.bf16.mxu1 %v7960_v17  ;;  %v8052_v16 = vld [vmem:[%s9376_s12 + $0x62c] ss:$16 sps:$4 sm:$0xff]   ;;  %v6692_v17 = vcombine.high %v9615_v14, %v9615_v14 }
 0x117   : > { %5239 = vmatpush1.bf16.msra.mxu0 %v7955_v18  ;;  %5772 = vmatpush1.bf16.msra.mxu1 %v7958_v19  ;;  %v8050_v18 = vld [vmem:[%s9376_s12 + $0x628] ss:$16 sps:$4 sm:$0xff]   ;;  %v8055_v19 = vld [vmem:[%s9376_s12 + $0x644] ss:$16 sps:$4 sm:$0xff]  }
 0x118   : > { %5240 = vmatprep.subr.bf16.mxu0 %v7963_v20  ;;  %5773 = vmatprep.subr.bf16.mxu1 %v7966_v21  ;;  %v8058_v20 = vld [vmem:[%s9376_s12 + $0x64c] ss:$16 sps:$4 sm:$0xff]   ;;  %v8053_v21 = vld [vmem:[%s9376_s12 + $0x640] ss:$16 sps:$4 sm:$0xff]  }
 0x11b   : > { %5241 = vmatpush1.bf16.msra.mxu0 %v7961_v22  ;;  %5774 = vmatpush1.bf16.msra.mxu1 %v7964_v23  ;;  %v8056_v22 = vld [vmem:[%s9376_s12 + $0x648] ss:$16 sps:$4 sm:$0xff]   ;;  %v8061_v23 = vld [vmem:[%s9376_s12 + $0x664] ss:$16 sps:$4 sm:$0xff]  }
 0x11c   : > { %5242 = vmatprep.subr.bf16.mxu0 %v7969_v24  ;;  %5775 = vmatprep.subr.bf16.mxu1 %v7972_v25  ;;  %v8064_v24 = vld [vmem:[%s9376_s12 + $0x66c] ss:$16 sps:$4 sm:$0xff]   ;;  %v8059_v25 = vld [vmem:[%s9376_s12 + $0x660] ss:$16 sps:$4 sm:$0xff]  }
 0x11f   : > { %5243 = vmatpush1.bf16.msra.mxu0 %v7967_v26  ;;  %5776 = vmatpush1.bf16.msra.mxu1 %v7970_v27  ;;  %v8062_v26 = vld [vmem:[%s9376_s12 + $0x668] ss:$16 sps:$4 sm:$0xff]   ;;  %v8067_v27 = vld [vmem:[%s9376_s12 + $0x684] ss:$16 sps:$4 sm:$0xff]  }
 0x120   : > { %5244 = vmatprep.subr.bf16.mxu0 %v7975_v28  ;;  %5777 = vmatprep.subr.bf16.mxu1 %v7978_v29  ;;  %v8070_v28 = vld [vmem:[%s9376_s12 + $0x68c] ss:$16 sps:$4 sm:$0xff]   ;;  %v8065_v29 = vld [vmem:[%s9376_s12 + $0x680] ss:$16 sps:$4 sm:$0xff]  }
 0x123   : > { %5245 = vmatpush1.bf16.msra.mxu0 %v7973_v30  ;;  %5778 = vmatpush1.bf16.msra.mxu1 %v7976_v31  ;;  %v8068_v30 = vld [vmem:[%s9376_s12 + $0x688] ss:$16 sps:$4 sm:$0xff]   ;;  %v8073_v31 = vld [vmem:[%s9376_s12 + $0x6a4] ss:$16 sps:$4 sm:$0xff]  }
 0x124   : > { %5246 = vmatprep.subr.bf16.mxu0 %v7981_v32  ;;  %5779 = vmatprep.subr.bf16.mxu1 %v7984_v33  ;;  %v8076_v32 = vld [vmem:[%s9376_s12 + $0x6ac] ss:$16 sps:$4 sm:$0xff]   ;;  %v8071_v33 = vld [vmem:[%s9376_s12 + $0x6a0] ss:$16 sps:$4 sm:$0xff]  }
 0x127   : > { %5247 = vmatpush1.bf16.msra.mxu0 %v7979_v34  ;;  %5780 = vmatpush1.bf16.msra.mxu1 %v7982_v35  ;;  %v8074_v34 = vld [vmem:[%s9376_s12 + $0x6a8] ss:$16 sps:$4 sm:$0xff]   ;;  %v8079_v35 = vld [vmem:[%s9376_s12 + $0x6c4] ss:$16 sps:$4 sm:$0xff]  }
 0x128   : > { %5248 = vmatprep.subr.bf16.mxu0 %v7987_v36  ;;  %5781 = vmatprep.subr.bf16.mxu1 %v7990_v37  ;;  %v8082_v36 = vld [vmem:[%s9376_s12 + $0x6cc] ss:$16 sps:$4 sm:$0xff]   ;;  %v8077_v37 = vld [vmem:[%s9376_s12 + $0x6c0] ss:$16 sps:$4 sm:$0xff]  }
 0x12b   : > { %5249 = vmatpush1.bf16.msra.mxu0 %v7985_v38  ;;  %5782 = vmatpush1.bf16.msra.mxu1 %v7988_v39  ;;  %v8080_v38 = vld [vmem:[%s9376_s12 + $0x6c8] ss:$16 sps:$4 sm:$0xff]   ;;  %v8085_v39 = vld [vmem:[%s9376_s12 + $0x6e4] ss:$16 sps:$4 sm:$0xff]  }
 0x12c   : > { %5250 = vmatprep.subr.bf16.mxu0 %v7993_v40  ;;  %5783 = vmatprep.subr.bf16.mxu1 %v7996_v41  ;;  %v8088_v40 = vld [vmem:[%s9376_s12 + $0x6ec] ss:$16 sps:$4 sm:$0xff]   ;;  %v8083_v41 = vld [vmem:[%s9376_s12 + $0x6e0] ss:$16 sps:$4 sm:$0xff]  }
 0x12f   : > { %5251 = vmatpush1.bf16.msra.mxu0 %v7991_v42  ;;  %5784 = vmatpush1.bf16.msra.mxu1 %v7994_v43  ;;  %v8086_v42 = vld [vmem:[%s9376_s12 + $0x6e8] ss:$16 sps:$4 sm:$0xff]   ;;  %v8091_v43 = vld [vmem:[%s9376_s12 + $0x704] ss:$16 sps:$4 sm:$0xff]  }
 0x130   : > { %5252 = vmatprep.subr.bf16.mxu0 %v7999_v44  ;;  %5785 = vmatprep.subr.bf16.mxu1 %v8002_v45  ;;  %v8094_v44 = vld [vmem:[%s9376_s12 + $0x70c] ss:$16 sps:$4 sm:$0xff]   ;;  %v8089_v45 = vld [vmem:[%s9376_s12 + $0x700] ss:$16 sps:$4 sm:$0xff]  }
 0x133   : > { %5253 = vmatpush1.bf16.msra.mxu0 %v7997_v46  ;;  %5786 = vmatpush1.bf16.msra.mxu1 %v8000_v47  ;;  %v8092_v46 = vld [vmem:[%s9376_s12 + $0x708] ss:$16 sps:$4 sm:$0xff]   ;;  %v8097_v47 = vld [vmem:[%s9376_s12 + $0x724] ss:$16 sps:$4 sm:$0xff]  }
 0x134   : > { %5254 = vmatprep.subr.bf16.mxu0 %v8005_v48  ;;  %5787 = vmatprep.subr.bf16.mxu1 %v8008_v49  ;;  %v8100_v48 = vld [vmem:[%s9376_s12 + $0x72c] ss:$16 sps:$4 sm:$0xff]   ;;  %v8095_v49 = vld [vmem:[%s9376_s12 + $0x720] ss:$16 sps:$4 sm:$0xff]  }
 0x137   : > { %5255 = vmatpush1.bf16.msra.mxu0 %v8003_v50  ;;  %5788 = vmatpush1.bf16.msra.mxu1 %v8006_v51  ;;  %v8098_v50 = vld [vmem:[%s9376_s12 + $0x728] ss:$16 sps:$4 sm:$0xff]   ;;  %v8103_v51 = vld [vmem:[%s9376_s12 + $0x744] ss:$16 sps:$4 sm:$0xff]  }
 0x138   : > { %5256 = vmatprep.subr.bf16.mxu0 %v8011_v52  ;;  %5789 = vmatprep.subr.bf16.mxu1 %v8014_v53  ;;  %v8106_v52 = vld [vmem:[%s9376_s12 + $0x74c] ss:$16 sps:$4 sm:$0xff]   ;;  %v8101_v53 = vld [vmem:[%s9376_s12 + $0x740] ss:$16 sps:$4 sm:$0xff]  }
 0x13b   : > { %5257 = vmatpush1.bf16.msra.mxu0 %v8009_v54  ;;  %5790 = vmatpush1.bf16.msra.mxu1 %v8012_v55  ;;  %v8104_v54 = vld [vmem:[%s9376_s12 + $0x748] ss:$16 sps:$4 sm:$0xff]   ;;  %v8109_v55 = vld [vmem:[%s9376_s12 + $0x764] ss:$16 sps:$4 sm:$0xff]  }
 0x13c   : > { %5258 = vmatprep.subr.bf16.mxu0 %v8017_v56  ;;  %5791 = vmatprep.subr.bf16.mxu1 %v8020_v57  ;;  %v8112_v56 = vld [vmem:[%s9376_s12 + $0x76c] ss:$16 sps:$4 sm:$0xff]   ;;  %v8107_v57 = vld [vmem:[%s9376_s12 + $0x760] ss:$16 sps:$4 sm:$0xff]  }
 0x13f   : > { %5259 = vmatpush1.bf16.msra.mxu0 %v8015_v58  ;;  %5792 = vmatpush1.bf16.msra.mxu1 %v8018_v59  ;;  %v8110_v58 = vld [vmem:[%s9376_s12 + $0x768] ss:$16 sps:$4 sm:$0xff]   ;;  %v8115_v59 = vld [vmem:[%s9376_s12 + $0x784] ss:$16 sps:$4 sm:$0xff]  }
 0x140   : > { %5260 = vmatprep.subr.bf16.mxu0 %v8023_v60  ;;  %5793 = vmatprep.subr.bf16.mxu1 %v8026_v61  ;;  %v8118_v60 = vld [vmem:[%s9376_s12 + $0x78c] ss:$16 sps:$4 sm:$0xff]   ;;  %v8113_v61 = vld [vmem:[%s9376_s12 + $0x780] ss:$16 sps:$4 sm:$0xff]  }
 0x143   : > { %5261 = vmatpush1.bf16.msra.mxu0 %v8021_v62  ;;  %5794 = vmatpush1.bf16.msra.mxu1 %v8024_v63  ;;  %v8116_v62 = vld [vmem:[%s9376_s12 + $0x788] ss:$16 sps:$4 sm:$0xff]   ;;  %v8121_v63 = vld [vmem:[%s9376_s12 + $0x7a4] ss:$16 sps:$4 sm:$0xff]  }
 0x144   : > { %5262 = vmatprep.subr.bf16.mxu0 %v8029_v0  ;;  %5795 = vmatprep.subr.bf16.mxu1 %v8032_v1  ;;  %v8124_v0 = vld [vmem:[%s9376_s12 + $0x7ac] ss:$16 sps:$4 sm:$0xff]   ;;  %v8119_v1 = vld [vmem:[%s9376_s12 + $0x7a0] ss:$16 sps:$4 sm:$0xff]  }
 0x147   : > { %5263 = vmatpush1.bf16.msra.mxu0 %v8027_v2  ;;  %5796 = vmatpush1.bf16.msra.mxu1 %v8030_v3  ;;  %v8122_v2 = vld [vmem:[%s9376_s12 + $0x7a8] ss:$16 sps:$4 sm:$0xff]   ;;  %v8127_v3 = vld [vmem:[%s9376_s12 + $0x7c4] ss:$16 sps:$4 sm:$0xff]  }
 0x148   : > { %5264 = vmatprep.subr.bf16.mxu0 %v8035_v4  ;;  %5797 = vmatprep.subr.bf16.mxu1 %v8038_v5  ;;  %v8130_v4 = vld [vmem:[%s9376_s12 + $0x7cc] ss:$16 sps:$4 sm:$0xff]   ;;  %v8125_v5 = vld [vmem:[%s9376_s12 + $0x7c0] ss:$16 sps:$4 sm:$0xff]  }
 0x14b   : > { %5265 = vmatpush1.bf16.msra.mxu0 %v8033_v6  ;;  %5798 = vmatpush1.bf16.msra.mxu1 %v8036_v7  ;;  %v8128_v6 = vld [vmem:[%s9376_s12 + $0x7c8] ss:$16 sps:$4 sm:$0xff]   ;;  %v8133_v7 = vld [vmem:[%s9376_s12 + $0x7e4] ss:$16 sps:$4 sm:$0xff]  }
 0x14c   : > { %5275 = vmatprep.subr.bf16.mxu0 %v8043_v8  ;;  %5808 = vmatprep.subr.bf16.mxu1 %v8046_v9  ;;  %v8136_v8 = vld [vmem:[%s9376_s12 + $0x7ec] ss:$16 sps:$4 sm:$0xff]   ;;  %v8131_v9 = vld [vmem:[%s9376_s12 + $0x7e0] ss:$16 sps:$4 sm:$0xff]  }
 0x14e   : > { %5267 = vmatmul.mubr.bf16.vlgmr.msra.gmra.mrb[0].mxu0 %v6689_v12  ;;  %5800 = vmatmul.mubr.bf16.vlgmr.msra.gmra.mrb[0].mxu1 %v6689_v12  ;;  %v8141_v12 = vld [vmem:[%s9376_s12 + $0x804] ss:$16 sps:$4 sm:$0xff]  }
 0x14f   : > { %5276 = vmatpush1.bf16.msra.mxu0 %v8041_v10  ;;  %5809 = vmatpush1.bf16.msra.mxu1 %v8044_v13  ;;  %v8134_v10 = vld [vmem:[%s9376_s12 + $0x7e8] ss:$16 sps:$4 sm:$0xff]   ;;  %v8144_v13 = vld [vmem:[%s9376_s12 + $0x80c] ss:$16 sps:$4 sm:$0xff]  }
 0x150   : > { %5277 = vmatprep.subr.bf16.mxu0 %v8049_v15  ;;  %5810 = vmatprep.subr.bf16.mxu1 %v8052_v16  ;;  %v8139_v15 = vld [vmem:[%s9376_s12 + $0x800] ss:$16 sps:$4 sm:$0xff]   ;;  %v6691_v16 = vcombine.low %v9615_v14, %v9615_v14 }
 0x151   : > { %5307 = vmatprep.mubr.bf16.mxu0 %v6692_v17  ;;  %5840 = vmatprep.mubr.bf16.mxu1 %v6692_v17  ;;  %v9687_v17 = vld [vmem:[%s10341_s0 + $0x20] sm:$0xff] }
 0x152   : > { %v8145_v14 = vld [vmem:[%s9376_s12 + $0x820] ss:$16 sps:$4 sm:$0xff]  }
 0x153   : > { %5278 = vmatpush1.bf16.msra.mxu0 %v8047_v11  ;;  %5811 = vmatpush1.bf16.msra.mxu1 %v8050_v18  ;;  %v8142_v11 = vld [vmem:[%s9376_s12 + $0x808] ss:$16 sps:$4 sm:$0xff]   ;;  %v8147_v18 = vld [vmem:[%s9376_s12 + $0x824] ss:$16 sps:$4 sm:$0xff]  }
 0x154   : > { %5279 = vmatprep.subr.bf16.mxu0 %v8055_v19  ;;  %5812 = vmatprep.subr.bf16.mxu1 %v8058_v20  ;;  %v8150_v19 = vld [vmem:[%s9376_s12 + $0x82c] ss:$16 sps:$4 sm:$0xff]   ;;  %v6694_v20 = vcombine.high %v9687_v17, %v9687_v17 }
 0x157   : > { %5280 = vmatpush1.bf16.msra.mxu0 %v8053_v21  ;;  %5813 = vmatpush1.bf16.msra.mxu1 %v8056_v22  ;;  %v8148_v21 = vld [vmem:[%s9376_s12 + $0x828] ss:$16 sps:$4 sm:$0xff]   ;;  %v8153_v22 = vld [vmem:[%s9376_s12 + $0x844] ss:$16 sps:$4 sm:$0xff]  }
 0x158   : > { %5281 = vmatprep.subr.bf16.mxu0 %v8061_v23  ;;  %5814 = vmatprep.subr.bf16.mxu1 %v8064_v24  ;;  %v8156_v23 = vld [vmem:[%s9376_s12 + $0x84c] ss:$16 sps:$4 sm:$0xff]   ;;  %v8151_v24 = vld [vmem:[%s9376_s12 + $0x840] ss:$16 sps:$4 sm:$0xff]  }
 0x15b   : > { %5282 = vmatpush1.bf16.msra.mxu0 %v8059_v25  ;;  %5815 = vmatpush1.bf16.msra.mxu1 %v8062_v26  ;;  %v8154_v25 = vld [vmem:[%s9376_s12 + $0x848] ss:$16 sps:$4 sm:$0xff]   ;;  %v8159_v26 = vld [vmem:[%s9376_s12 + $0x864] ss:$16 sps:$4 sm:$0xff]  }
 0x15c   : > { %5283 = vmatprep.subr.bf16.mxu0 %v8067_v27  ;;  %5816 = vmatprep.subr.bf16.mxu1 %v8070_v28  ;;  %v8162_v27 = vld [vmem:[%s9376_s12 + $0x86c] ss:$16 sps:$4 sm:$0xff]   ;;  %v8157_v28 = vld [vmem:[%s9376_s12 + $0x860] ss:$16 sps:$4 sm:$0xff]  }
 0x15f   : > { %5284 = vmatpush1.bf16.msra.mxu0 %v8065_v29  ;;  %5817 = vmatpush1.bf16.msra.mxu1 %v8068_v30  ;;  %v8160_v29 = vld [vmem:[%s9376_s12 + $0x868] ss:$16 sps:$4 sm:$0xff]   ;;  %v8165_v30 = vld [vmem:[%s9376_s12 + $0x884] ss:$16 sps:$4 sm:$0xff]  }
 0x160   : > { %5285 = vmatprep.subr.bf16.mxu0 %v8073_v31  ;;  %5818 = vmatprep.subr.bf16.mxu1 %v8076_v32  ;;  %v8168_v31 = vld [vmem:[%s9376_s12 + $0x88c] ss:$16 sps:$4 sm:$0xff]   ;;  %v8163_v32 = vld [vmem:[%s9376_s12 + $0x880] ss:$16 sps:$4 sm:$0xff]  }
 0x163   : > { %5286 = vmatpush1.bf16.msra.mxu0 %v8071_v33  ;;  %5819 = vmatpush1.bf16.msra.mxu1 %v8074_v34  ;;  %v8166_v33 = vld [vmem:[%s9376_s12 + $0x888] ss:$16 sps:$4 sm:$0xff]   ;;  %v8171_v34 = vld [vmem:[%s9376_s12 + $0x8a4] ss:$16 sps:$4 sm:$0xff]  }
 0x164   : > { %5287 = vmatprep.subr.bf16.mxu0 %v8079_v35  ;;  %5820 = vmatprep.subr.bf16.mxu1 %v8082_v36  ;;  %v8174_v35 = vld [vmem:[%s9376_s12 + $0x8ac] ss:$16 sps:$4 sm:$0xff]   ;;  %v8169_v36 = vld [vmem:[%s9376_s12 + $0x8a0] ss:$16 sps:$4 sm:$0xff]  }
 0x167   : > { %5288 = vmatpush1.bf16.msra.mxu0 %v8077_v37  ;;  %5821 = vmatpush1.bf16.msra.mxu1 %v8080_v38  ;;  %v8172_v37 = vld [vmem:[%s9376_s12 + $0x8a8] ss:$16 sps:$4 sm:$0xff]   ;;  %v8177_v38 = vld [vmem:[%s9376_s12 + $0x8c4] ss:$16 sps:$4 sm:$0xff]  }
 0x168   : > { %5289 = vmatprep.subr.bf16.mxu0 %v8085_v39  ;;  %5822 = vmatprep.subr.bf16.mxu1 %v8088_v40  ;;  %v8180_v39 = vld [vmem:[%s9376_s12 + $0x8cc] ss:$16 sps:$4 sm:$0xff]   ;;  %v8175_v40 = vld [vmem:[%s9376_s12 + $0x8c0] ss:$16 sps:$4 sm:$0xff]  }
 0x16b   : > { %5290 = vmatpush1.bf16.msra.mxu0 %v8083_v41  ;;  %5823 = vmatpush1.bf16.msra.mxu1 %v8086_v42  ;;  %v8178_v41 = vld [vmem:[%s9376_s12 + $0x8c8] ss:$16 sps:$4 sm:$0xff]   ;;  %v8183_v42 = vld [vmem:[%s9376_s12 + $0x8e4] ss:$16 sps:$4 sm:$0xff]  }
 0x16c   : > { %5291 = vmatprep.subr.bf16.mxu0 %v8091_v43  ;;  %5824 = vmatprep.subr.bf16.mxu1 %v8094_v44  ;;  %v8186_v43 = vld [vmem:[%s9376_s12 + $0x8ec] ss:$16 sps:$4 sm:$0xff]   ;;  %v8181_v44 = vld [vmem:[%s9376_s12 + $0x8e0] ss:$16 sps:$4 sm:$0xff]  }
 0x16f   : > { %5292 = vmatpush1.bf16.msra.mxu0 %v8089_v45  ;;  %5825 = vmatpush1.bf16.msra.mxu1 %v8092_v46  ;;  %v8184_v45 = vld [vmem:[%s9376_s12 + $0x8e8] ss:$16 sps:$4 sm:$0xff]   ;;  %v8189_v46 = vld [vmem:[%s9376_s12 + $0x904] ss:$16 sps:$4 sm:$0xff]  }
 0x170   : > { %5293 = vmatprep.subr.bf16.mxu0 %v8097_v47  ;;  %5826 = vmatprep.subr.bf16.mxu1 %v8100_v48  ;;  %v8192_v47 = vld [vmem:[%s9376_s12 + $0x90c] ss:$16 sps:$4 sm:$0xff]   ;;  %v8187_v48 = vld [vmem:[%s9376_s12 + $0x900] ss:$16 sps:$4 sm:$0xff]  }
 0x173   : > { %5294 = vmatpush1.bf16.msra.mxu0 %v8095_v49  ;;  %5827 = vmatpush1.bf16.msra.mxu1 %v8098_v50  ;;  %v8190_v49 = vld [vmem:[%s9376_s12 + $0x908] ss:$16 sps:$4 sm:$0xff]   ;;  %v8195_v50 = vld [vmem:[%s9376_s12 + $0x924] ss:$16 sps:$4 sm:$0xff]  }
 0x174   : > { %5295 = vmatprep.subr.bf16.mxu0 %v8103_v51  ;;  %5828 = vmatprep.subr.bf16.mxu1 %v8106_v52  ;;  %v8198_v51 = vld [vmem:[%s9376_s12 + $0x92c] ss:$16 sps:$4 sm:$0xff]   ;;  %v8193_v52 = vld [vmem:[%s9376_s12 + $0x920] ss:$16 sps:$4 sm:$0xff]  }
 0x177   : > { %5296 = vmatpush1.bf16.msra.mxu0 %v8101_v53  ;;  %5829 = vmatpush1.bf16.msra.mxu1 %v8104_v54  ;;  %v8196_v53 = vld [vmem:[%s9376_s12 + $0x928] ss:$16 sps:$4 sm:$0xff]   ;;  %v8201_v54 = vld [vmem:[%s9376_s12 + $0x944] ss:$16 sps:$4 sm:$0xff]  }
 0x178   : > { %5297 = vmatprep.subr.bf16.mxu0 %v8109_v55  ;;  %5830 = vmatprep.subr.bf16.mxu1 %v8112_v56  ;;  %v8204_v55 = vld [vmem:[%s9376_s12 + $0x94c] ss:$16 sps:$4 sm:$0xff]   ;;  %v8199_v56 = vld [vmem:[%s9376_s12 + $0x940] ss:$16 sps:$4 sm:$0xff]  }
 0x17b   : > { %5298 = vmatpush1.bf16.msra.mxu0 %v8107_v57  ;;  %5831 = vmatpush1.bf16.msra.mxu1 %v8110_v58  ;;  %v8202_v57 = vld [vmem:[%s9376_s12 + $0x948] ss:$16 sps:$4 sm:$0xff]   ;;  %v8207_v58 = vld [vmem:[%s9376_s12 + $0x964] ss:$16 sps:$4 sm:$0xff]  }
 0x17c   : > { %5299 = vmatprep.subr.bf16.mxu0 %v8115_v59  ;;  %5832 = vmatprep.subr.bf16.mxu1 %v8118_v60  ;;  %v8210_v59 = vld [vmem:[%s9376_s12 + $0x96c] ss:$16 sps:$4 sm:$0xff]   ;;  %v8205_v60 = vld [vmem:[%s9376_s12 + $0x960] ss:$16 sps:$4 sm:$0xff]  }
 0x17f   : > { %5300 = vmatpush1.bf16.msra.mxu0 %v8113_v61  ;;  %5833 = vmatpush1.bf16.msra.mxu1 %v8116_v62  ;;  %v8208_v61 = vld [vmem:[%s9376_s12 + $0x968] ss:$16 sps:$4 sm:$0xff]   ;;  %v8213_v62 = vld [vmem:[%s9376_s12 + $0x984] ss:$16 sps:$4 sm:$0xff]  }
 0x180   : > { %5301 = vmatprep.subr.bf16.mxu0 %v8121_v63  ;;  %5834 = vmatprep.subr.bf16.mxu1 %v8124_v0  ;;  %v8216_v63 = vld [vmem:[%s9376_s12 + $0x98c] ss:$16 sps:$4 sm:$0xff]   ;;  %v8211_v0 = vld [vmem:[%s9376_s12 + $0x980] ss:$16 sps:$4 sm:$0xff]  }
 0x183   : > { %5302 = vmatpush1.bf16.msra.mxu0 %v8119_v1  ;;  %5835 = vmatpush1.bf16.msra.mxu1 %v8122_v2  ;;  %v8214_v1 = vld [vmem:[%s9376_s12 + $0x988] ss:$16 sps:$4 sm:$0xff]   ;;  %v8219_v2 = vld [vmem:[%s9376_s12 + $0x9a4] ss:$16 sps:$4 sm:$0xff]  }
 0x184   : > { %5303 = vmatprep.subr.bf16.mxu0 %v8127_v3  ;;  %5836 = vmatprep.subr.bf16.mxu1 %v8130_v4  ;;  %v8222_v3 = vld [vmem:[%s9376_s12 + $0x9ac] ss:$16 sps:$4 sm:$0xff]   ;;  %v8217_v4 = vld [vmem:[%s9376_s12 + $0x9a0] ss:$16 sps:$4 sm:$0xff]  }
 0x187   : > { %5304 = vmatpush1.bf16.msra.mxu0 %v8125_v5  ;;  %5837 = vmatpush1.bf16.msra.mxu1 %v8128_v6  ;;  %v8220_v5 = vld [vmem:[%s9376_s12 + $0x9a8] ss:$16 sps:$4 sm:$0xff]   ;;  %v8225_v6 = vld [vmem:[%s9376_s12 + $0x9c4] ss:$16 sps:$4 sm:$0xff]  }
 0x188   : > { %5305 = vmatprep.subr.bf16.mxu0 %v8133_v7  ;;  %5838 = vmatprep.subr.bf16.mxu1 %v8136_v8  ;;  %v8228_v7 = vld [vmem:[%s9376_s12 + $0x9cc] ss:$16 sps:$4 sm:$0xff]   ;;  %v8223_v8 = vld [vmem:[%s9376_s12 + $0x9c0] ss:$16 sps:$4 sm:$0xff]  }
 0x18b   : > { %5306 = vmatpush1.bf16.msra.mxu0 %v8131_v9  ;;  %5839 = vmatpush1.bf16.msra.mxu1 %v8134_v10  ;;  %v8226_v9 = vld [vmem:[%s9376_s12 + $0x9c8] ss:$16 sps:$4 sm:$0xff]   ;;  %v8231_v10 = vld [vmem:[%s9376_s12 + $0x9e4] ss:$16 sps:$4 sm:$0xff]  }
 0x18c   : > { %5316 = vmatprep.subr.bf16.mxu0 %v8141_v12  ;;  %5849 = vmatprep.subr.bf16.mxu1 %v8144_v13  ;;  %v8234_v12 = vld [vmem:[%s9376_s12 + $0x9ec] ss:$16 sps:$4 sm:$0xff]   ;;  %v8229_v13 = vld [vmem:[%s9376_s12 + $0x9e0] ss:$16 sps:$4 sm:$0xff]  }
 0x18e   : > { %5308 = vmatmul.mubr.bf16.vlgmr.msra.gmra.mrb[0].mxu0 %v6691_v16  ;;  %5841 = vmatmul.mubr.bf16.vlgmr.msra.gmra.mrb[0].mxu1 %v6691_v16  ;;  %v8239_v16 = vld [vmem:[%s9376_s12 + $0xa04] ss:$16 sps:$4 sm:$0xff]  }
 0x18f   : > { %5317 = vmatpush1.bf16.msra.mxu0 %v8139_v15  ;;  %5850 = vmatpush1.bf16.msra.mxu1 %v8142_v11  ;;  %v8232_v15 = vld [vmem:[%s9376_s12 + $0x9e8] ss:$16 sps:$4 sm:$0xff]   ;;  %v8242_v11 = vld [vmem:[%s9376_s12 + $0xa0c] ss:$16 sps:$4 sm:$0xff]  }
 0x190   : > { %5318 = vmatprep.subr.bf16.mxu0 %v8147_v18  ;;  %5851 = vmatprep.subr.bf16.mxu1 %v8150_v19  ;;  %v9757_v18 = vld [vmem:[%s10341_s0 + $0x28] sm:$0xff]  ;;  %v6693_v19 = vcombine.low %v9687_v17, %v9687_v17  ;;  %v8243_v17 = vld [vmem:[%s9376_s12 + $0xa20] ss:$16 sps:$4 sm:$0xff]  }
 0x191   : > { %5348 = vmatprep.mubr.bf16.mxu0 %v6694_v20  ;;  %5881 = vmatprep.mubr.bf16.mxu1 %v6694_v20  ;;  %v8237_v20 = vld [vmem:[%s9376_s12 + $0xa00] ss:$16 sps:$4 sm:$0xff]  }
 0x193   : > { %5319 = vmatpush1.bf16.msra.mxu0 %v8145_v14  ;;  %5852 = vmatpush1.bf16.msra.mxu1 %v8148_v21  ;;  %v8240_v14 = vld [vmem:[%s9376_s12 + $0xa08] ss:$16 sps:$4 sm:$0xff]   ;;  %v8245_v21 = vld [vmem:[%s9376_s12 + $0xa24] ss:$16 sps:$4 sm:$0xff]  }
 0x194   : > { %5320 = vmatprep.subr.bf16.mxu0 %v8153_v22  ;;  %5853 = vmatprep.subr.bf16.mxu1 %v8156_v23  ;;  %v8248_v22 = vld [vmem:[%s9376_s12 + $0xa2c] ss:$16 sps:$4 sm:$0xff]   ;;  %v6696_v23 = vcombine.high %v9757_v18, %v9757_v18 }
 0x197   : > { %5321 = vmatpush1.bf16.msra.mxu0 %v8151_v24  ;;  %5854 = vmatpush1.bf16.msra.mxu1 %v8154_v25  ;;  %v8246_v24 = vld [vmem:[%s9376_s12 + $0xa28] ss:$16 sps:$4 sm:$0xff]   ;;  %v8251_v25 = vld [vmem:[%s9376_s12 + $0xa44] ss:$16 sps:$4 sm:$0xff]  }
 0x198   : > { %5322 = vmatprep.subr.bf16.mxu0 %v8159_v26  ;;  %5855 = vmatprep.subr.bf16.mxu1 %v8162_v27  ;;  %v8254_v26 = vld [vmem:[%s9376_s12 + $0xa4c] ss:$16 sps:$4 sm:$0xff]   ;;  %v8249_v27 = vld [vmem:[%s9376_s12 + $0xa40] ss:$16 sps:$4 sm:$0xff]  }
 0x19b   : > { %5323 = vmatpush1.bf16.msra.mxu0 %v8157_v28  ;;  %5856 = vmatpush1.bf16.msra.mxu1 %v8160_v29  ;;  %v8252_v28 = vld [vmem:[%s9376_s12 + $0xa48] ss:$16 sps:$4 sm:$0xff]   ;;  %v8257_v29 = vld [vmem:[%s9376_s12 + $0xa64] ss:$16 sps:$4 sm:$0xff]  }
 0x19c   : > { %5324 = vmatprep.subr.bf16.mxu0 %v8165_v30  ;;  %5857 = vmatprep.subr.bf16.mxu1 %v8168_v31  ;;  %v8260_v30 = vld [vmem:[%s9376_s12 + $0xa6c] ss:$16 sps:$4 sm:$0xff]   ;;  %v8255_v31 = vld [vmem:[%s9376_s12 + $0xa60] ss:$16 sps:$4 sm:$0xff]  }
 0x19f   : > { %5325 = vmatpush1.bf16.msra.mxu0 %v8163_v32  ;;  %5858 = vmatpush1.bf16.msra.mxu1 %v8166_v33  ;;  %v8258_v32 = vld [vmem:[%s9376_s12 + $0xa68] ss:$16 sps:$4 sm:$0xff]   ;;  %v8263_v33 = vld [vmem:[%s9376_s12 + $0xa84] ss:$16 sps:$4 sm:$0xff]  }
 0x1a0   : > { %5326 = vmatprep.subr.bf16.mxu0 %v8171_v34  ;;  %5859 = vmatprep.subr.bf16.mxu1 %v8174_v35  ;;  %v8266_v34 = vld [vmem:[%s9376_s12 + $0xa8c] ss:$16 sps:$4 sm:$0xff]   ;;  %v8261_v35 = vld [vmem:[%s9376_s12 + $0xa80] ss:$16 sps:$4 sm:$0xff]  }
 0x1a3   : > { %5327 = vmatpush1.bf16.msra.mxu0 %v8169_v36  ;;  %5860 = vmatpush1.bf16.msra.mxu1 %v8172_v37  ;;  %v8264_v36 = vld [vmem:[%s9376_s12 + $0xa88] ss:$16 sps:$4 sm:$0xff]   ;;  %v8269_v37 = vld [vmem:[%s9376_s12 + $0xaa4] ss:$16 sps:$4 sm:$0xff]  }
 0x1a4   : > { %5328 = vmatprep.subr.bf16.mxu0 %v8177_v38  ;;  %5861 = vmatprep.subr.bf16.mxu1 %v8180_v39  ;;  %v8272_v38 = vld [vmem:[%s9376_s12 + $0xaac] ss:$16 sps:$4 sm:$0xff]   ;;  %v8267_v39 = vld [vmem:[%s9376_s12 + $0xaa0] ss:$16 sps:$4 sm:$0xff]  }
 0x1a7   : > { %5329 = vmatpush1.bf16.msra.mxu0 %v8175_v40  ;;  %5862 = vmatpush1.bf16.msra.mxu1 %v8178_v41  ;;  %v8270_v40 = vld [vmem:[%s9376_s12 + $0xaa8] ss:$16 sps:$4 sm:$0xff]   ;;  %v8275_v41 = vld [vmem:[%s9376_s12 + $0xac4] ss:$16 sps:$4 sm:$0xff]  }
 0x1a8   : > { %5330 = vmatprep.subr.bf16.mxu0 %v8183_v42  ;;  %5863 = vmatprep.subr.bf16.mxu1 %v8186_v43  ;;  %v8278_v42 = vld [vmem:[%s9376_s12 + $0xacc] ss:$16 sps:$4 sm:$0xff]   ;;  %v8273_v43 = vld [vmem:[%s9376_s12 + $0xac0] ss:$16 sps:$4 sm:$0xff]  }
 0x1ab   : > { %5331 = vmatpush1.bf16.msra.mxu0 %v8181_v44  ;;  %5864 = vmatpush1.bf16.msra.mxu1 %v8184_v45  ;;  %v8276_v44 = vld [vmem:[%s9376_s12 + $0xac8] ss:$16 sps:$4 sm:$0xff]   ;;  %v8281_v45 = vld [vmem:[%s9376_s12 + $0xae4] ss:$16 sps:$4 sm:$0xff]  }
 0x1ac   : > { %5332 = vmatprep.subr.bf16.mxu0 %v8189_v46  ;;  %5865 = vmatprep.subr.bf16.mxu1 %v8192_v47  ;;  %v8284_v46 = vld [vmem:[%s9376_s12 + $0xaec] ss:$16 sps:$4 sm:$0xff]   ;;  %v8279_v47 = vld [vmem:[%s9376_s12 + $0xae0] ss:$16 sps:$4 sm:$0xff]  }
 0x1af   : > { %5333 = vmatpush1.bf16.msra.mxu0 %v8187_v48  ;;  %5866 = vmatpush1.bf16.msra.mxu1 %v8190_v49  ;;  %v8282_v48 = vld [vmem:[%s9376_s12 + $0xae8] ss:$16 sps:$4 sm:$0xff]   ;;  %v8287_v49 = vld [vmem:[%s9376_s12 + $0xb04] ss:$16 sps:$4 sm:$0xff]  }
 0x1b0   : > { %5334 = vmatprep.subr.bf16.mxu0 %v8195_v50  ;;  %5867 = vmatprep.subr.bf16.mxu1 %v8198_v51  ;;  %v8290_v50 = vld [vmem:[%s9376_s12 + $0xb0c] ss:$16 sps:$4 sm:$0xff]   ;;  %v8285_v51 = vld [vmem:[%s9376_s12 + $0xb00] ss:$16 sps:$4 sm:$0xff]  }
 0x1b3   : > { %5335 = vmatpush1.bf16.msra.mxu0 %v8193_v52  ;;  %5868 = vmatpush1.bf16.msra.mxu1 %v8196_v53  ;;  %v8288_v52 = vld [vmem:[%s9376_s12 + $0xb08] ss:$16 sps:$4 sm:$0xff]   ;;  %v8293_v53 = vld [vmem:[%s9376_s12 + $0xb24] ss:$16 sps:$4 sm:$0xff]  }
 0x1b4   : > { %5336 = vmatprep.subr.bf16.mxu0 %v8201_v54  ;;  %5869 = vmatprep.subr.bf16.mxu1 %v8204_v55  ;;  %v8296_v54 = vld [vmem:[%s9376_s12 + $0xb2c] ss:$16 sps:$4 sm:$0xff]   ;;  %v8291_v55 = vld [vmem:[%s9376_s12 + $0xb20] ss:$16 sps:$4 sm:$0xff]  }
 0x1b7   : > { %5337 = vmatpush1.bf16.msra.mxu0 %v8199_v56  ;;  %5870 = vmatpush1.bf16.msra.mxu1 %v8202_v57  ;;  %v8294_v56 = vld [vmem:[%s9376_s12 + $0xb28] ss:$16 sps:$4 sm:$0xff]   ;;  %v8299_v57 = vld [vmem:[%s9376_s12 + $0xb44] ss:$16 sps:$4 sm:$0xff]  }
 0x1b8   : > { %5338 = vmatprep.subr.bf16.mxu0 %v8207_v58  ;;  %5871 = vmatprep.subr.bf16.mxu1 %v8210_v59  ;;  %v8302_v58 = vld [vmem:[%s9376_s12 + $0xb4c] ss:$16 sps:$4 sm:$0xff]   ;;  %v8297_v59 = vld [vmem:[%s9376_s12 + $0xb40] ss:$16 sps:$4 sm:$0xff]  }
 0x1bb   : > { %5339 = vmatpush1.bf16.msra.mxu0 %v8205_v60  ;;  %5872 = vmatpush1.bf16.msra.mxu1 %v8208_v61  ;;  %v8300_v60 = vld [vmem:[%s9376_s12 + $0xb48] ss:$16 sps:$4 sm:$0xff]   ;;  %v8305_v61 = vld [vmem:[%s9376_s12 + $0xb64] ss:$16 sps:$4 sm:$0xff]  }
 0x1bc   : > { %5340 = vmatprep.subr.bf16.mxu0 %v8213_v62  ;;  %5873 = vmatprep.subr.bf16.mxu1 %v8216_v63  ;;  %v8308_v62 = vld [vmem:[%s9376_s12 + $0xb6c] ss:$16 sps:$4 sm:$0xff]   ;;  %v8303_v63 = vld [vmem:[%s9376_s12 + $0xb60] ss:$16 sps:$4 sm:$0xff]  }
 0x1bf   : > { %5341 = vmatpush1.bf16.msra.mxu0 %v8211_v0  ;;  %5874 = vmatpush1.bf16.msra.mxu1 %v8214_v1  ;;  %v8306_v0 = vld [vmem:[%s9376_s12 + $0xb68] ss:$16 sps:$4 sm:$0xff]   ;;  %v8311_v1 = vld [vmem:[%s9376_s12 + $0xb84] ss:$16 sps:$4 sm:$0xff]  }
 0x1c0   : > { %5342 = vmatprep.subr.bf16.mxu0 %v8219_v2  ;;  %5875 = vmatprep.subr.bf16.mxu1 %v8222_v3  ;;  %v8314_v2 = vld [vmem:[%s9376_s12 + $0xb8c] ss:$16 sps:$4 sm:$0xff]   ;;  %v8309_v3 = vld [vmem:[%s9376_s12 + $0xb80] ss:$16 sps:$4 sm:$0xff]  }
 0x1c3   : > { %5343 = vmatpush1.bf16.msra.mxu0 %v8217_v4  ;;  %5876 = vmatpush1.bf16.msra.mxu1 %v8220_v5  ;;  %v8312_v4 = vld [vmem:[%s9376_s12 + $0xb88] ss:$16 sps:$4 sm:$0xff]   ;;  %v8317_v5 = vld [vmem:[%s9376_s12 + $0xba4] ss:$16 sps:$4 sm:$0xff]  }
 0x1c4   : > { %5344 = vmatprep.subr.bf16.mxu0 %v8225_v6  ;;  %5877 = vmatprep.subr.bf16.mxu1 %v8228_v7  ;;  %v8320_v6 = vld [vmem:[%s9376_s12 + $0xbac] ss:$16 sps:$4 sm:$0xff]   ;;  %v8315_v7 = vld [vmem:[%s9376_s12 + $0xba0] ss:$16 sps:$4 sm:$0xff]  }
 0x1c7   : > { %5345 = vmatpush1.bf16.msra.mxu0 %v8223_v8  ;;  %5878 = vmatpush1.bf16.msra.mxu1 %v8226_v9  ;;  %v8318_v8 = vld [vmem:[%s9376_s12 + $0xba8] ss:$16 sps:$4 sm:$0xff]   ;;  %v8323_v9 = vld [vmem:[%s9376_s12 + $0xbc4] ss:$16 sps:$4 sm:$0xff]  }
 0x1c8   : > { %5346 = vmatprep.subr.bf16.mxu0 %v8231_v10  ;;  %5879 = vmatprep.subr.bf16.mxu1 %v8234_v12  ;;  %v8326_v10 = vld [vmem:[%s9376_s12 + $0xbcc] ss:$16 sps:$4 sm:$0xff]   ;;  %v8321_v12 = vld [vmem:[%s9376_s12 + $0xbc0] ss:$16 sps:$4 sm:$0xff]  }
 0x1cb   : > { %5347 = vmatpush1.bf16.msra.mxu0 %v8229_v13  ;;  %5880 = vmatpush1.bf16.msra.mxu1 %v8232_v15  ;;  %v8324_v13 = vld [vmem:[%s9376_s12 + $0xbc8] ss:$16 sps:$4 sm:$0xff]   ;;  %v8329_v15 = vld [vmem:[%s9376_s12 + $0xbe4] ss:$16 sps:$4 sm:$0xff]  }
 0x1cc   : > { %5357 = vmatprep.subr.bf16.mxu0 %v8239_v16  ;;  %5890 = vmatprep.subr.bf16.mxu1 %v8242_v11  ;;  %v8332_v16 = vld [vmem:[%s9376_s12 + $0xbec] ss:$16 sps:$4 sm:$0xff]   ;;  %v8327_v11 = vld [vmem:[%s9376_s12 + $0xbe0] ss:$16 sps:$4 sm:$0xff]  }
 0x1ce   : > { %5349 = vmatmul.mubr.bf16.vlgmr.msra.gmra.mrb[0].mxu0 %v6693_v19  ;;  %5882 = vmatmul.mubr.bf16.vlgmr.msra.gmra.mrb[0].mxu1 %v6693_v19  ;;  %v8330_v19 = vld [vmem:[%s9376_s12 + $0xbe8] ss:$16 sps:$4 sm:$0xff]  }
 0x1cf   : > { %5358 = vmatpush1.bf16.msra.mxu0 %v8237_v20  ;;  %5891 = vmatpush1.bf16.msra.mxu1 %v8240_v14  ;;  %v8337_v20 = vld [vmem:[%s9376_s12 + $0xc04] ss:$16 sps:$4 sm:$0xff]   ;;  %v8340_v14 = vld [vmem:[%s9376_s12 + $0xc0c] ss:$16 sps:$4 sm:$0xff]  }
 0x1d0   : > { %5359 = vmatprep.subr.bf16.mxu0 %v8245_v21  ;;  %5892 = vmatprep.subr.bf16.mxu1 %v8248_v22  ;;  %v9830_v21 = vld [vmem:[%s10341_s0 + $0x30] sm:$0xff]  ;;  %v6695_v22 = vcombine.low %v9757_v18, %v9757_v18 }
 0x1d1   : > { %5389 = vmatprep.mubr.bf16.mxu0 %v6696_v23  ;;  %5922 = vmatprep.mubr.bf16.mxu1 %v6696_v23  ;;  %v8335_v23 = vld [vmem:[%s9376_s12 + $0xc00] ss:$16 sps:$4 sm:$0xff]  }
 0x1d2   : > { %v8341_v18 = vld [vmem:[%s9376_s12 + $0xc20] ss:$16 sps:$4 sm:$0xff]  }
 0x1d3   : > { %5360 = vmatpush1.bf16.msra.mxu0 %v8243_v17  ;;  %5893 = vmatpush1.bf16.msra.mxu1 %v8246_v24  ;;  %v8338_v17 = vld [vmem:[%s9376_s12 + $0xc08] ss:$16 sps:$4 sm:$0xff]   ;;  %v8343_v24 = vld [vmem:[%s9376_s12 + $0xc24] ss:$16 sps:$4 sm:$0xff]  }
 0x1d4   : > { %5361 = vmatprep.subr.bf16.mxu0 %v8251_v25  ;;  %5894 = vmatprep.subr.bf16.mxu1 %v8254_v26  ;;  %v8346_v25 = vld [vmem:[%s9376_s12 + $0xc2c] ss:$16 sps:$4 sm:$0xff]   ;;  %v6698_v26 = vcombine.high %v9830_v21, %v9830_v21 }
 0x1d7   : > { %5362 = vmatpush1.bf16.msra.mxu0 %v8249_v27  ;;  %5895 = vmatpush1.bf16.msra.mxu1 %v8252_v28  ;;  %v8344_v27 = vld [vmem:[%s9376_s12 + $0xc28] ss:$16 sps:$4 sm:$0xff]   ;;  %v8349_v28 = vld [vmem:[%s9376_s12 + $0xc44] ss:$16 sps:$4 sm:$0xff]  }
 0x1d8   : > { %5363 = vmatprep.subr.bf16.mxu0 %v8257_v29  ;;  %5896 = vmatprep.subr.bf16.mxu1 %v8260_v30  ;;  %v8352_v29 = vld [vmem:[%s9376_s12 + $0xc4c] ss:$16 sps:$4 sm:$0xff]   ;;  %v8347_v30 = vld [vmem:[%s9376_s12 + $0xc40] ss:$16 sps:$4 sm:$0xff]  }
 0x1db   : > { %5364 = vmatpush1.bf16.msra.mxu0 %v8255_v31  ;;  %5897 = vmatpush1.bf16.msra.mxu1 %v8258_v32  ;;  %v8350_v31 = vld [vmem:[%s9376_s12 + $0xc48] ss:$16 sps:$4 sm:$0xff]   ;;  %v8355_v32 = vld [vmem:[%s9376_s12 + $0xc64] ss:$16 sps:$4 sm:$0xff]  }
 0x1dc   : > { %5365 = vmatprep.subr.bf16.mxu0 %v8263_v33  ;;  %5898 = vmatprep.subr.bf16.mxu1 %v8266_v34  ;;  %v8358_v33 = vld [vmem:[%s9376_s12 + $0xc6c] ss:$16 sps:$4 sm:$0xff]   ;;  %v8353_v34 = vld [vmem:[%s9376_s12 + $0xc60] ss:$16 sps:$4 sm:$0xff]  }
 0x1df   : > { %5366 = vmatpush1.bf16.msra.mxu0 %v8261_v35  ;;  %5899 = vmatpush1.bf16.msra.mxu1 %v8264_v36  ;;  %v8356_v35 = vld [vmem:[%s9376_s12 + $0xc68] ss:$16 sps:$4 sm:$0xff]   ;;  %v8361_v36 = vld [vmem:[%s9376_s12 + $0xc84] ss:$16 sps:$4 sm:$0xff]  }
 0x1e0   : > { %5367 = vmatprep.subr.bf16.mxu0 %v8269_v37  ;;  %5900 = vmatprep.subr.bf16.mxu1 %v8272_v38  ;;  %v8364_v37 = vld [vmem:[%s9376_s12 + $0xc8c] ss:$16 sps:$4 sm:$0xff]   ;;  %v8359_v38 = vld [vmem:[%s9376_s12 + $0xc80] ss:$16 sps:$4 sm:$0xff]  }
 0x1e3   : > { %5368 = vmatpush1.bf16.msra.mxu0 %v8267_v39  ;;  %5901 = vmatpush1.bf16.msra.mxu1 %v8270_v40  ;;  %v8362_v39 = vld [vmem:[%s9376_s12 + $0xc88] ss:$16 sps:$4 sm:$0xff]   ;;  %v8367_v40 = vld [vmem:[%s9376_s12 + $0xca4] ss:$16 sps:$4 sm:$0xff]  }
 0x1e4   : > { %5369 = vmatprep.subr.bf16.mxu0 %v8275_v41  ;;  %5902 = vmatprep.subr.bf16.mxu1 %v8278_v42  ;;  %v8370_v41 = vld [vmem:[%s9376_s12 + $0xcac] ss:$16 sps:$4 sm:$0xff]   ;;  %v8365_v42 = vld [vmem:[%s9376_s12 + $0xca0] ss:$16 sps:$4 sm:$0xff]  }
 0x1e7   : > { %5370 = vmatpush1.bf16.msra.mxu0 %v8273_v43  ;;  %5903 = vmatpush1.bf16.msra.mxu1 %v8276_v44  ;;  %v8368_v43 = vld [vmem:[%s9376_s12 + $0xca8] ss:$16 sps:$4 sm:$0xff]   ;;  %v8373_v44 = vld [vmem:[%s9376_s12 + $0xcc4] ss:$16 sps:$4 sm:$0xff]  }
 0x1e8   : > { %5371 = vmatprep.subr.bf16.mxu0 %v8281_v45  ;;  %5904 = vmatprep.subr.bf16.mxu1 %v8284_v46  ;;  %v8376_v45 = vld [vmem:[%s9376_s12 + $0xccc] ss:$16 sps:$4 sm:$0xff]   ;;  %v8371_v46 = vld [vmem:[%s9376_s12 + $0xcc0] ss:$16 sps:$4 sm:$0xff]  }
 0x1eb   : > { %5372 = vmatpush1.bf16.msra.mxu0 %v8279_v47  ;;  %5905 = vmatpush1.bf16.msra.mxu1 %v8282_v48  ;;  %v8374_v47 = vld [vmem:[%s9376_s12 + $0xcc8] ss:$16 sps:$4 sm:$0xff]   ;;  %v8379_v48 = vld [vmem:[%s9376_s12 + $0xce4] ss:$16 sps:$4 sm:$0xff]  }
 0x1ec   : > { %5373 = vmatprep.subr.bf16.mxu0 %v8287_v49  ;;  %5906 = vmatprep.subr.bf16.mxu1 %v8290_v50  ;;  %v8382_v49 = vld [vmem:[%s9376_s12 + $0xcec] ss:$16 sps:$4 sm:$0xff]   ;;  %v8377_v50 = vld [vmem:[%s9376_s12 + $0xce0] ss:$16 sps:$4 sm:$0xff]  }
 0x1ef   : > { %5374 = vmatpush1.bf16.msra.mxu0 %v8285_v51  ;;  %5907 = vmatpush1.bf16.msra.mxu1 %v8288_v52  ;;  %v8380_v51 = vld [vmem:[%s9376_s12 + $0xce8] ss:$16 sps:$4 sm:$0xff]   ;;  %v8385_v52 = vld [vmem:[%s9376_s12 + $0xd04] ss:$16 sps:$4 sm:$0xff]  }
 0x1f0   : > { %5375 = vmatprep.subr.bf16.mxu0 %v8293_v53  ;;  %5908 = vmatprep.subr.bf16.mxu1 %v8296_v54  ;;  %v8388_v53 = vld [vmem:[%s9376_s12 + $0xd0c] ss:$16 sps:$4 sm:$0xff]   ;;  %v8383_v54 = vld [vmem:[%s9376_s12 + $0xd00] ss:$16 sps:$4 sm:$0xff]  }
 0x1f3   : > { %5376 = vmatpush1.bf16.msra.mxu0 %v8291_v55  ;;  %5909 = vmatpush1.bf16.msra.mxu1 %v8294_v56  ;;  %v8386_v55 = vld [vmem:[%s9376_s12 + $0xd08] ss:$16 sps:$4 sm:$0xff]   ;;  %v8391_v56 = vld [vmem:[%s9376_s12 + $0xd24] ss:$16 sps:$4 sm:$0xff]  }
 0x1f4   : > { %5377 = vmatprep.subr.bf16.mxu0 %v8299_v57  ;;  %5910 = vmatprep.subr.bf16.mxu1 %v8302_v58  ;;  %v8394_v57 = vld [vmem:[%s9376_s12 + $0xd2c] ss:$16 sps:$4 sm:$0xff]   ;;  %v8389_v58 = vld [vmem:[%s9376_s12 + $0xd20] ss:$16 sps:$4 sm:$0xff]  }
 0x1f7   : > { %5378 = vmatpush1.bf16.msra.mxu0 %v8297_v59  ;;  %5911 = vmatpush1.bf16.msra.mxu1 %v8300_v60  ;;  %v8392_v59 = vld [vmem:[%s9376_s12 + $0xd28] ss:$16 sps:$4 sm:$0xff]   ;;  %v8397_v60 = vld [vmem:[%s9376_s12 + $0xd44] ss:$16 sps:$4 sm:$0xff]  }
 0x1f8   : > { %5379 = vmatprep.subr.bf16.mxu0 %v8305_v61  ;;  %5912 = vmatprep.subr.bf16.mxu1 %v8308_v62  ;;  %v8400_v61 = vld [vmem:[%s9376_s12 + $0xd4c] ss:$16 sps:$4 sm:$0xff]   ;;  %v8395_v62 = vld [vmem:[%s9376_s12 + $0xd40] ss:$16 sps:$4 sm:$0xff]  }
 0x1fb   : > { %5380 = vmatpush1.bf16.msra.mxu0 %v8303_v63  ;;  %5913 = vmatpush1.bf16.msra.mxu1 %v8306_v0  ;;  %v8398_v63 = vld [vmem:[%s9376_s12 + $0xd48] ss:$16 sps:$4 sm:$0xff]   ;;  %v8403_v0 = vld [vmem:[%s9376_s12 + $0xd64] ss:$16 sps:$4 sm:$0xff]  }
 0x1fc   : > { %5381 = vmatprep.subr.bf16.mxu0 %v8311_v1  ;;  %5914 = vmatprep.subr.bf16.mxu1 %v8314_v2  ;;  %v8406_v1 = vld [vmem:[%s9376_s12 + $0xd6c] ss:$16 sps:$4 sm:$0xff]   ;;  %v8401_v2 = vld [vmem:[%s9376_s12 + $0xd60] ss:$16 sps:$4 sm:$0xff]  }
 0x1ff   : > { %5382 = vmatpush1.bf16.msra.mxu0 %v8309_v3  ;;  %5915 = vmatpush1.bf16.msra.mxu1 %v8312_v4  ;;  %v8404_v3 = vld [vmem:[%s9376_s12 + $0xd68] ss:$16 sps:$4 sm:$0xff]   ;;  %v8409_v4 = vld [vmem:[%s9376_s12 + $0xd84] ss:$16 sps:$4 sm:$0xff]  }
 0x200   : > { %5383 = vmatprep.subr.bf16.mxu0 %v8317_v5  ;;  %5916 = vmatprep.subr.bf16.mxu1 %v8320_v6  ;;  %v8412_v5 = vld [vmem:[%s9376_s12 + $0xd8c] ss:$16 sps:$4 sm:$0xff]   ;;  %v8407_v6 = vld [vmem:[%s9376_s12 + $0xd80] ss:$16 sps:$4 sm:$0xff]  }
 0x203   : > { %5384 = vmatpush1.bf16.msra.mxu0 %v8315_v7  ;;  %5917 = vmatpush1.bf16.msra.mxu1 %v8318_v8  ;;  %v8410_v7 = vld [vmem:[%s9376_s12 + $0xd88] ss:$16 sps:$4 sm:$0xff]   ;;  %v8415_v8 = vld [vmem:[%s9376_s12 + $0xda4] ss:$16 sps:$4 sm:$0xff]  }
 0x204   : > { %5385 = vmatprep.subr.bf16.mxu0 %v8323_v9  ;;  %5918 = vmatprep.subr.bf16.mxu1 %v8326_v10  ;;  %v8418_v9 = vld [vmem:[%s9376_s12 + $0xdac] ss:$16 sps:$4 sm:$0xff]   ;;  %v8413_v10 = vld [vmem:[%s9376_s12 + $0xda0] ss:$16 sps:$4 sm:$0xff]  }
 0x207   : > { %5386 = vmatpush1.bf16.msra.mxu0 %v8321_v12  ;;  %5919 = vmatpush1.bf16.msra.mxu1 %v8324_v13  ;;  %v8416_v12 = vld [vmem:[%s9376_s12 + $0xda8] ss:$16 sps:$4 sm:$0xff]   ;;  %v8421_v13 = vld [vmem:[%s9376_s12 + $0xdc4] ss:$16 sps:$4 sm:$0xff]  }
 0x208   : > { %5387 = vmatprep.subr.bf16.mxu0 %v8329_v15  ;;  %5920 = vmatprep.subr.bf16.mxu1 %v8332_v16  ;;  %v8424_v15 = vld [vmem:[%s9376_s12 + $0xdcc] ss:$16 sps:$4 sm:$0xff]   ;;  %v8419_v16 = vld [vmem:[%s9376_s12 + $0xdc0] ss:$16 sps:$4 sm:$0xff]  }
 0x20b   : > { %5388 = vmatpush1.bf16.msra.mxu0 %v8327_v11  ;;  %5921 = vmatpush1.bf16.msra.mxu1 %v8330_v19  ;;  %v8422_v11 = vld [vmem:[%s9376_s12 + $0xdc8] ss:$16 sps:$4 sm:$0xff]   ;;  %v8427_v19 = vld [vmem:[%s9376_s12 + $0xde4] ss:$16 sps:$4 sm:$0xff]  }
 0x20c   : > { %5398 = vmatprep.subr.bf16.mxu0 %v8337_v20  ;;  %5931 = vmatprep.subr.bf16.mxu1 %v8340_v14  ;;  %v8430_v20 = vld [vmem:[%s9376_s12 + $0xdec] ss:$16 sps:$4 sm:$0xff]   ;;  %v8425_v14 = vld [vmem:[%s9376_s12 + $0xde0] ss:$16 sps:$4 sm:$0xff]  }
 0x20e   : > { %5390 = vmatmul.mubr.bf16.vlgmr.msra.gmra.mrb[0].mxu0 %v6695_v22  ;;  %5923 = vmatmul.mubr.bf16.vlgmr.msra.gmra.mrb[0].mxu1 %v6695_v22  ;;  %v8428_v22 = vld [vmem:[%s9376_s12 + $0xde8] ss:$16 sps:$4 sm:$0xff]  }
 0x20f   : > { %5399 = vmatpush1.bf16.msra.mxu0 %v8335_v23  ;;  %5932 = vmatpush1.bf16.msra.mxu1 %v8338_v17  ;;  %v8435_v23 = vld [vmem:[%s9376_s12 + $0xe04] ss:$16 sps:$4 sm:$0xff]   ;;  %v8438_v17 = vld [vmem:[%s9376_s12 + $0xe0c] ss:$16 sps:$4 sm:$0xff]  }
 0x210   : > { %5400 = vmatprep.subr.bf16.mxu0 %v8343_v24  ;;  %5933 = vmatprep.subr.bf16.mxu1 %v8346_v25  ;;  %v9903_v24 = vld [vmem:[%s10341_s0 + $0x38] sm:$0xff]  ;;  %v6697_v25 = vcombine.low %v9830_v21, %v9830_v21  ;;  %v8439_v21 = vld [vmem:[%s9376_s12 + $0xe20] ss:$16 sps:$4 sm:$0xff]  }
 0x211   : > { %5430 = vmatprep.mubr.bf16.mxu0 %v6698_v26  ;;  %5963 = vmatprep.mubr.bf16.mxu1 %v6698_v26  ;;  %v8433_v26 = vld [vmem:[%s9376_s12 + $0xe00] ss:$16 sps:$4 sm:$0xff]  }
 0x213   : > { %5401 = vmatpush1.bf16.msra.mxu0 %v8341_v18  ;;  %5934 = vmatpush1.bf16.msra.mxu1 %v8344_v27  ;;  %v8436_v18 = vld [vmem:[%s9376_s12 + $0xe08] ss:$16 sps:$4 sm:$0xff]   ;;  %v8441_v27 = vld [vmem:[%s9376_s12 + $0xe24] ss:$16 sps:$4 sm:$0xff]  }
 0x214   : > { %5402 = vmatprep.subr.bf16.mxu0 %v8349_v28  ;;  %5935 = vmatprep.subr.bf16.mxu1 %v8352_v29  ;;  %v8444_v28 = vld [vmem:[%s9376_s12 + $0xe2c] ss:$16 sps:$4 sm:$0xff]   ;;  %v6700_v29 = vcombine.high %v9903_v24, %v9903_v24 }
 0x217   : > { %5403 = vmatpush1.bf16.msra.mxu0 %v8347_v30  ;;  %5936 = vmatpush1.bf16.msra.mxu1 %v8350_v31  ;;  %v8442_v30 = vld [vmem:[%s9376_s12 + $0xe28] ss:$16 sps:$4 sm:$0xff]   ;;  %v8447_v31 = vld [vmem:[%s9376_s12 + $0xe44] ss:$16 sps:$4 sm:$0xff]  }
 0x218   : > { %5404 = vmatprep.subr.bf16.mxu0 %v8355_v32  ;;  %5937 = vmatprep.subr.bf16.mxu1 %v8358_v33  ;;  %v8450_v32 = vld [vmem:[%s9376_s12 + $0xe4c] ss:$16 sps:$4 sm:$0xff]   ;;  %v8445_v33 = vld [vmem:[%s9376_s12 + $0xe40] ss:$16 sps:$4 sm:$0xff]  }
 0x21b   : > { %5405 = vmatpush1.bf16.msra.mxu0 %v8353_v34  ;;  %5938 = vmatpush1.bf16.msra.mxu1 %v8356_v35  ;;  %v8448_v34 = vld [vmem:[%s9376_s12 + $0xe48] ss:$16 sps:$4 sm:$0xff]   ;;  %v8453_v35 = vld [vmem:[%s9376_s12 + $0xe64] ss:$16 sps:$4 sm:$0xff]  }
 0x21c   : > { %5406 = vmatprep.subr.bf16.mxu0 %v8361_v36  ;;  %5939 = vmatprep.subr.bf16.mxu1 %v8364_v37  ;;  %v8456_v36 = vld [vmem:[%s9376_s12 + $0xe6c] ss:$16 sps:$4 sm:$0xff]   ;;  %v8451_v37 = vld [vmem:[%s9376_s12 + $0xe60] ss:$16 sps:$4 sm:$0xff]  }
 0x21f   : > { %5407 = vmatpush1.bf16.msra.mxu0 %v8359_v38  ;;  %5940 = vmatpush1.bf16.msra.mxu1 %v8362_v39  ;;  %v8454_v38 = vld [vmem:[%s9376_s12 + $0xe68] ss:$16 sps:$4 sm:$0xff]   ;;  %v8459_v39 = vld [vmem:[%s9376_s12 + $0xe84] ss:$16 sps:$4 sm:$0xff]  }
 0x220   : > { %5408 = vmatprep.subr.bf16.mxu0 %v8367_v40  ;;  %5941 = vmatprep.subr.bf16.mxu1 %v8370_v41  ;;  %v8462_v40 = vld [vmem:[%s9376_s12 + $0xe8c] ss:$16 sps:$4 sm:$0xff]   ;;  %v8457_v41 = vld [vmem:[%s9376_s12 + $0xe80] ss:$16 sps:$4 sm:$0xff]  }
 0x223   : > { %5409 = vmatpush1.bf16.msra.mxu0 %v8365_v42  ;;  %5942 = vmatpush1.bf16.msra.mxu1 %v8368_v43  ;;  %v8460_v42 = vld [vmem:[%s9376_s12 + $0xe88] ss:$16 sps:$4 sm:$0xff]   ;;  %v8465_v43 = vld [vmem:[%s9376_s12 + $0xea4] ss:$16 sps:$4 sm:$0xff]  }
 0x224   : > { %5410 = vmatprep.subr.bf16.mxu0 %v8373_v44  ;;  %5943 = vmatprep.subr.bf16.mxu1 %v8376_v45  ;;  %v8468_v44 = vld [vmem:[%s9376_s12 + $0xeac] ss:$16 sps:$4 sm:$0xff]   ;;  %v8463_v45 = vld [vmem:[%s9376_s12 + $0xea0] ss:$16 sps:$4 sm:$0xff]  }
 0x227   : > { %5411 = vmatpush1.bf16.msra.mxu0 %v8371_v46  ;;  %5944 = vmatpush1.bf16.msra.mxu1 %v8374_v47  ;;  %v8466_v46 = vld [vmem:[%s9376_s12 + $0xea8] ss:$16 sps:$4 sm:$0xff]   ;;  %v8471_v47 = vld [vmem:[%s9376_s12 + $0xec4] ss:$16 sps:$4 sm:$0xff]  }
 0x228   : > { %5412 = vmatprep.subr.bf16.mxu0 %v8379_v48  ;;  %5945 = vmatprep.subr.bf16.mxu1 %v8382_v49  ;;  %v8474_v48 = vld [vmem:[%s9376_s12 + $0xecc] ss:$16 sps:$4 sm:$0xff]   ;;  %v8469_v49 = vld [vmem:[%s9376_s12 + $0xec0] ss:$16 sps:$4 sm:$0xff]  }
 0x22b   : > { %5413 = vmatpush1.bf16.msra.mxu0 %v8377_v50  ;;  %5946 = vmatpush1.bf16.msra.mxu1 %v8380_v51  ;;  %v8472_v50 = vld [vmem:[%s9376_s12 + $0xec8] ss:$16 sps:$4 sm:$0xff]   ;;  %v8477_v51 = vld [vmem:[%s9376_s12 + $0xee4] ss:$16 sps:$4 sm:$0xff]  }
 0x22c   : > { %5414 = vmatprep.subr.bf16.mxu0 %v8385_v52  ;;  %5947 = vmatprep.subr.bf16.mxu1 %v8388_v53  ;;  %v8480_v52 = vld [vmem:[%s9376_s12 + $0xeec] ss:$16 sps:$4 sm:$0xff]   ;;  %v8475_v53 = vld [vmem:[%s9376_s12 + $0xee0] ss:$16 sps:$4 sm:$0xff]  }
 0x22f   : > { %5415 = vmatpush1.bf16.msra.mxu0 %v8383_v54  ;;  %5948 = vmatpush1.bf16.msra.mxu1 %v8386_v55  ;;  %v8478_v54 = vld [vmem:[%s9376_s12 + $0xee8] ss:$16 sps:$4 sm:$0xff]   ;;  %v8483_v55 = vld [vmem:[%s9376_s12 + $0xf04] ss:$16 sps:$4 sm:$0xff]  }
 0x230   : > { %5416 = vmatprep.subr.bf16.mxu0 %v8391_v56  ;;  %5949 = vmatprep.subr.bf16.mxu1 %v8394_v57  ;;  %v8486_v56 = vld [vmem:[%s9376_s12 + $0xf0c] ss:$16 sps:$4 sm:$0xff]   ;;  %v8481_v57 = vld [vmem:[%s9376_s12 + $0xf00] ss:$16 sps:$4 sm:$0xff]  }
 0x233   : > { %5417 = vmatpush1.bf16.msra.mxu0 %v8389_v58  ;;  %5950 = vmatpush1.bf16.msra.mxu1 %v8392_v59  ;;  %v8484_v58 = vld [vmem:[%s9376_s12 + $0xf08] ss:$16 sps:$4 sm:$0xff]   ;;  %v8489_v59 = vld [vmem:[%s9376_s12 + $0xf24] ss:$16 sps:$4 sm:$0xff]  }
 0x234   : > { %5418 = vmatprep.subr.bf16.mxu0 %v8397_v60  ;;  %5951 = vmatprep.subr.bf16.mxu1 %v8400_v61  ;;  %v8492_v60 = vld [vmem:[%s9376_s12 + $0xf2c] ss:$16 sps:$4 sm:$0xff]   ;;  %v8487_v61 = vld [vmem:[%s9376_s12 + $0xf20] ss:$16 sps:$4 sm:$0xff]  }
 0x237   : > { %5419 = vmatpush1.bf16.msra.mxu0 %v8395_v62  ;;  %5952 = vmatpush1.bf16.msra.mxu1 %v8398_v63  ;;  %v8490_v62 = vld [vmem:[%s9376_s12 + $0xf28] ss:$16 sps:$4 sm:$0xff]   ;;  %v8495_v63 = vld [vmem:[%s9376_s12 + $0xf44] ss:$16 sps:$4 sm:$0xff]  }
 0x238   : > { %5420 = vmatprep.subr.bf16.mxu0 %v8403_v0  ;;  %5953 = vmatprep.subr.bf16.mxu1 %v8406_v1  ;;  %v8498_v0 = vld [vmem:[%s9376_s12 + $0xf4c] ss:$16 sps:$4 sm:$0xff]   ;;  %v8493_v1 = vld [vmem:[%s9376_s12 + $0xf40] ss:$16 sps:$4 sm:$0xff]  }
 0x23b   : > { %5421 = vmatpush1.bf16.msra.mxu0 %v8401_v2  ;;  %5954 = vmatpush1.bf16.msra.mxu1 %v8404_v3  ;;  %v8496_v2 = vld [vmem:[%s9376_s12 + $0xf48] ss:$16 sps:$4 sm:$0xff]   ;;  %v8501_v3 = vld [vmem:[%s9376_s12 + $0xf64] ss:$16 sps:$4 sm:$0xff]  }
 0x23c   : > { %5422 = vmatprep.subr.bf16.mxu0 %v8409_v4  ;;  %5955 = vmatprep.subr.bf16.mxu1 %v8412_v5  ;;  %v8504_v4 = vld [vmem:[%s9376_s12 + $0xf6c] ss:$16 sps:$4 sm:$0xff]   ;;  %v8499_v5 = vld [vmem:[%s9376_s12 + $0xf60] ss:$16 sps:$4 sm:$0xff]  }
 0x23f   : > { %5423 = vmatpush1.bf16.msra.mxu0 %v8407_v6  ;;  %5956 = vmatpush1.bf16.msra.mxu1 %v8410_v7  ;;  %v8502_v6 = vld [vmem:[%s9376_s12 + $0xf68] ss:$16 sps:$4 sm:$0xff]   ;;  %v8507_v7 = vld [vmem:[%s9376_s12 + $0xf84] ss:$16 sps:$4 sm:$0xff]  }
 0x240   : > { %5424 = vmatprep.subr.bf16.mxu0 %v8415_v8  ;;  %5957 = vmatprep.subr.bf16.mxu1 %v8418_v9  ;;  %v8510_v8 = vld [vmem:[%s9376_s12 + $0xf8c] ss:$16 sps:$4 sm:$0xff]   ;;  %v8505_v9 = vld [vmem:[%s9376_s12 + $0xf80] ss:$16 sps:$4 sm:$0xff]  }
 0x243   : > { %5425 = vmatpush1.bf16.msra.mxu0 %v8413_v10  ;;  %5958 = vmatpush1.bf16.msra.mxu1 %v8416_v12  ;;  %v8508_v10 = vld [vmem:[%s9376_s12 + $0xf88] ss:$16 sps:$4 sm:$0xff]   ;;  %v8513_v12 = vld [vmem:[%s9376_s12 + $0xfa4] ss:$16 sps:$4 sm:$0xff]  }
 0x244   : > { %5426 = vmatprep.subr.bf16.mxu0 %v8421_v13  ;;  %5959 = vmatprep.subr.bf16.mxu1 %v8424_v15  ;;  %v8516_v13 = vld [vmem:[%s9376_s12 + $0xfac] ss:$16 sps:$4 sm:$0xff]   ;;  %v8511_v15 = vld [vmem:[%s9376_s12 + $0xfa0] ss:$16 sps:$4 sm:$0xff]  }
 0x247   : > { %5427 = vmatpush1.bf16.msra.mxu0 %v8419_v16  ;;  %5960 = vmatpush1.bf16.msra.mxu1 %v8422_v11  ;;  %v8514_v16 = vld [vmem:[%s9376_s12 + $0xfa8] ss:$16 sps:$4 sm:$0xff]   ;;  %v8519_v11 = vld [vmem:[%s9376_s12 + $0xfc4] ss:$16 sps:$4 sm:$0xff]  }
 0x248   : > { %5428 = vmatprep.subr.bf16.mxu0 %v8427_v19  ;;  %5961 = vmatprep.subr.bf16.mxu1 %v8430_v20  ;;  %v8522_v19 = vld [vmem:[%s9376_s12 + $0xfcc] ss:$16 sps:$4 sm:$0xff]   ;;  %v8517_v20 = vld [vmem:[%s9376_s12 + $0xfc0] ss:$16 sps:$4 sm:$0xff]  }
 0x24b   : > { %5429 = vmatpush1.bf16.msra.mxu0 %v8425_v14  ;;  %5962 = vmatpush1.bf16.msra.mxu1 %v8428_v22  ;;  %v8520_v14 = vld [vmem:[%s9376_s12 + $0xfc8] ss:$16 sps:$4 sm:$0xff]   ;;  %v8525_v22 = vld [vmem:[%s9376_s12 + $0xfe4] ss:$16 sps:$4 sm:$0xff]  }
 0x24c   : > { %5439 = vmatprep.subr.bf16.mxu0 %v8435_v23  ;;  %5972 = vmatprep.subr.bf16.mxu1 %v8438_v17  ;;  %v8528_v23 = vld [vmem:[%s9376_s12 + $0xfec] ss:$16 sps:$4 sm:$0xff]   ;;  %v8523_v17 = vld [vmem:[%s9376_s12 + $0xfe0] ss:$16 sps:$4 sm:$0xff]  }
 0x24e   : > { %5431 = vmatmul.mubr.bf16.vlgmr.msra.gmra.mrb[0].mxu0 %v6697_v25  ;;  %5964 = vmatmul.mubr.bf16.vlgmr.msra.gmra.mrb[0].mxu1 %v6697_v25  ;;  %v8526_v25 = vld [vmem:[%s9376_s12 + $0xfe8] ss:$16 sps:$4 sm:$0xff]  }
 0x24f   : > { %5440 = vmatpush1.bf16.msra.mxu0 %v8433_v26  ;;  %5973 = vmatpush1.bf16.msra.mxu1 %v8436_v18  ;;  %v8533_v26 = vld [vmem:[%s9376_s12 + $0x1004] ss:$16 sps:$4 sm:$0xff]   ;;  %v8536_v18 = vld [vmem:[%s9376_s12 + $0x100c] ss:$16 sps:$4 sm:$0xff]  }
 0x250   : > { %5441 = vmatprep.subr.bf16.mxu0 %v8441_v27  ;;  %5974 = vmatprep.subr.bf16.mxu1 %v8444_v28  ;;  %v6699_v27 = vcombine.low %v9903_v24, %v9903_v24  ;;  %v9978_v28 = vld [vmem:[%s10341_s0 + $0x40] sm:$0xff] }
 0x251   : > { %5471 = vmatprep.mubr.bf16.mxu0 %v6700_v29  ;;  %6004 = vmatprep.mubr.bf16.mxu1 %v6700_v29  ;;  %v8531_v29 = vld [vmem:[%s9376_s12 + $0x1000] ss:$16 sps:$4 sm:$0xff]   ;;  %v6702_v24 = vcombine.high %v9978_v28, %v9978_v28 }
 0x253   : > { %5442 = vmatpush1.bf16.msra.mxu0 %v8439_v21  ;;  %5975 = vmatpush1.bf16.msra.mxu1 %v8442_v30  ;;  %v8534_v21 = vld [vmem:[%s9376_s12 + $0x1008] ss:$16 sps:$4 sm:$0xff]   ;;  %v8539_v30 = vld [vmem:[%s9376_s12 + $0x1024] ss:$16 sps:$4 sm:$0xff]  }
 0x254   : > { %5443 = vmatprep.subr.bf16.mxu0 %v8447_v31  ;;  %5976 = vmatprep.subr.bf16.mxu1 %v8450_v32  ;;  %v8542_v31 = vld [vmem:[%s9376_s12 + $0x102c] ss:$16 sps:$4 sm:$0xff]   ;;  %v8537_v32 = vld [vmem:[%s9376_s12 + $0x1020] ss:$16 sps:$4 sm:$0xff]  }
 0x257   : > { %5444 = vmatpush1.bf16.msra.mxu0 %v8445_v33  ;;  %5977 = vmatpush1.bf16.msra.mxu1 %v8448_v34  ;;  %v8540_v33 = vld [vmem:[%s9376_s12 + $0x1028] ss:$16 sps:$4 sm:$0xff]   ;;  %v8545_v34 = vld [vmem:[%s9376_s12 + $0x1044] ss:$16 sps:$4 sm:$0xff]  }
 0x258   : > { %5445 = vmatprep.subr.bf16.mxu0 %v8453_v35  ;;  %5978 = vmatprep.subr.bf16.mxu1 %v8456_v36  ;;  %v8548_v35 = vld [vmem:[%s9376_s12 + $0x104c] ss:$16 sps:$4 sm:$0xff]   ;;  %v8543_v36 = vld [vmem:[%s9376_s12 + $0x1040] ss:$16 sps:$4 sm:$0xff]  }
 0x25b   : > { %5446 = vmatpush1.bf16.msra.mxu0 %v8451_v37  ;;  %5979 = vmatpush1.bf16.msra.mxu1 %v8454_v38  ;;  %v8546_v37 = vld [vmem:[%s9376_s12 + $0x1048] ss:$16 sps:$4 sm:$0xff]   ;;  %v8551_v38 = vld [vmem:[%s9376_s12 + $0x1064] ss:$16 sps:$4 sm:$0xff]  }
 0x25c   : > { %5447 = vmatprep.subr.bf16.mxu0 %v8459_v39  ;;  %5980 = vmatprep.subr.bf16.mxu1 %v8462_v40  ;;  %v8554_v39 = vld [vmem:[%s9376_s12 + $0x106c] ss:$16 sps:$4 sm:$0xff]   ;;  %v8549_v40 = vld [vmem:[%s9376_s12 + $0x1060] ss:$16 sps:$4 sm:$0xff]  }
 0x25f   : > { %5448 = vmatpush1.bf16.msra.mxu0 %v8457_v41  ;;  %5981 = vmatpush1.bf16.msra.mxu1 %v8460_v42  ;;  %v8552_v41 = vld [vmem:[%s9376_s12 + $0x1068] ss:$16 sps:$4 sm:$0xff]   ;;  %v8557_v42 = vld [vmem:[%s9376_s12 + $0x1084] ss:$16 sps:$4 sm:$0xff]  }
 0x260   : > { %5449 = vmatprep.subr.bf16.mxu0 %v8465_v43  ;;  %5982 = vmatprep.subr.bf16.mxu1 %v8468_v44  ;;  %v8560_v43 = vld [vmem:[%s9376_s12 + $0x108c] ss:$16 sps:$4 sm:$0xff]   ;;  %v8555_v44 = vld [vmem:[%s9376_s12 + $0x1080] ss:$16 sps:$4 sm:$0xff]  }
 0x263   : > { %5450 = vmatpush1.bf16.msra.mxu0 %v8463_v45  ;;  %5983 = vmatpush1.bf16.msra.mxu1 %v8466_v46  ;;  %v8558_v45 = vld [vmem:[%s9376_s12 + $0x1088] ss:$16 sps:$4 sm:$0xff]   ;;  %v8563_v46 = vld [vmem:[%s9376_s12 + $0x10a4] ss:$16 sps:$4 sm:$0xff]  }
 0x264   : > { %5451 = vmatprep.subr.bf16.mxu0 %v8471_v47  ;;  %5984 = vmatprep.subr.bf16.mxu1 %v8474_v48  ;;  %v8566_v47 = vld [vmem:[%s9376_s12 + $0x10ac] ss:$16 sps:$4 sm:$0xff]   ;;  %v8561_v48 = vld [vmem:[%s9376_s12 + $0x10a0] ss:$16 sps:$4 sm:$0xff]  }
 0x267   : > { %5452 = vmatpush1.bf16.msra.mxu0 %v8469_v49  ;;  %5985 = vmatpush1.bf16.msra.mxu1 %v8472_v50  ;;  %v8564_v49 = vld [vmem:[%s9376_s12 + $0x10a8] ss:$16 sps:$4 sm:$0xff]   ;;  %v8569_v50 = vld [vmem:[%s9376_s12 + $0x10c4] ss:$16 sps:$4 sm:$0xff]  }
 0x268   : > { %5453 = vmatprep.subr.bf16.mxu0 %v8477_v51  ;;  %5986 = vmatprep.subr.bf16.mxu1 %v8480_v52  ;;  %v8572_v51 = vld [vmem:[%s9376_s12 + $0x10cc] ss:$16 sps:$4 sm:$0xff]   ;;  %v8567_v52 = vld [vmem:[%s9376_s12 + $0x10c0] ss:$16 sps:$4 sm:$0xff]  }
 0x26b   : > { %5454 = vmatpush1.bf16.msra.mxu0 %v8475_v53  ;;  %5987 = vmatpush1.bf16.msra.mxu1 %v8478_v54  ;;  %v8570_v53 = vld [vmem:[%s9376_s12 + $0x10c8] ss:$16 sps:$4 sm:$0xff]   ;;  %v8575_v54 = vld [vmem:[%s9376_s12 + $0x10e4] ss:$16 sps:$4 sm:$0xff]  }
 0x26c   : > { %5455 = vmatprep.subr.bf16.mxu0 %v8483_v55  ;;  %5988 = vmatprep.subr.bf16.mxu1 %v8486_v56  ;;  %v8578_v55 = vld [vmem:[%s9376_s12 + $0x10ec] ss:$16 sps:$4 sm:$0xff]   ;;  %v8573_v56 = vld [vmem:[%s9376_s12 + $0x10e0] ss:$16 sps:$4 sm:$0xff]  }
 0x26f   : > { %5456 = vmatpush1.bf16.msra.mxu0 %v8481_v57  ;;  %5989 = vmatpush1.bf16.msra.mxu1 %v8484_v58  ;;  %v8576_v57 = vld [vmem:[%s9376_s12 + $0x10e8] ss:$16 sps:$4 sm:$0xff]   ;;  %v8581_v58 = vld [vmem:[%s9376_s12 + $0x1104] ss:$16 sps:$4 sm:$0xff]  }
 0x270   : > { %5457 = vmatprep.subr.bf16.mxu0 %v8489_v59  ;;  %5990 = vmatprep.subr.bf16.mxu1 %v8492_v60  ;;  %v8584_v59 = vld [vmem:[%s9376_s12 + $0x110c] ss:$16 sps:$4 sm:$0xff]   ;;  %v8579_v60 = vld [vmem:[%s9376_s12 + $0x1100] ss:$16 sps:$4 sm:$0xff]  }
 0x273   : > { %5458 = vmatpush1.bf16.msra.mxu0 %v8487_v61  ;;  %5991 = vmatpush1.bf16.msra.mxu1 %v8490_v62  ;;  %v8582_v61 = vld [vmem:[%s9376_s12 + $0x1108] ss:$16 sps:$4 sm:$0xff]   ;;  %v8587_v62 = vld [vmem:[%s9376_s12 + $0x1124] ss:$16 sps:$4 sm:$0xff]  }
 0x274   : > { %5459 = vmatprep.subr.bf16.mxu0 %v8495_v63  ;;  %5992 = vmatprep.subr.bf16.mxu1 %v8498_v0  ;;  %v8590_v63 = vld [vmem:[%s9376_s12 + $0x112c] ss:$16 sps:$4 sm:$0xff]   ;;  %v8585_v0 = vld [vmem:[%s9376_s12 + $0x1120] ss:$16 sps:$4 sm:$0xff]  }
 0x277   : > { %5460 = vmatpush1.bf16.msra.mxu0 %v8493_v1  ;;  %5993 = vmatpush1.bf16.msra.mxu1 %v8496_v2  ;;  %v8588_v1 = vld [vmem:[%s9376_s12 + $0x1128] ss:$16 sps:$4 sm:$0xff]   ;;  %v8593_v2 = vld [vmem:[%s9376_s12 + $0x1144] ss:$16 sps:$4 sm:$0xff]  }
 0x278   : > { %5461 = vmatprep.subr.bf16.mxu0 %v8501_v3  ;;  %5994 = vmatprep.subr.bf16.mxu1 %v8504_v4  ;;  %v8596_v3 = vld [vmem:[%s9376_s12 + $0x114c] ss:$16 sps:$4 sm:$0xff]   ;;  %v8591_v4 = vld [vmem:[%s9376_s12 + $0x1140] ss:$16 sps:$4 sm:$0xff]  }
 0x27b   : > { %5462 = vmatpush1.bf16.msra.mxu0 %v8499_v5  ;;  %5995 = vmatpush1.bf16.msra.mxu1 %v8502_v6  ;;  %v8594_v5 = vld [vmem:[%s9376_s12 + $0x1148] ss:$16 sps:$4 sm:$0xff]   ;;  %v8599_v6 = vld [vmem:[%s9376_s12 + $0x1164] ss:$16 sps:$4 sm:$0xff]  }
 0x27c   : > { %5463 = vmatprep.subr.bf16.mxu0 %v8507_v7  ;;  %5996 = vmatprep.subr.bf16.mxu1 %v8510_v8  ;;  %v8602_v7 = vld [vmem:[%s9376_s12 + $0x116c] ss:$16 sps:$4 sm:$0xff]   ;;  %v8597_v8 = vld [vmem:[%s9376_s12 + $0x1160] ss:$16 sps:$4 sm:$0xff]  }
 0x27f   : > { %5464 = vmatpush1.bf16.msra.mxu0 %v8505_v9  ;;  %5997 = vmatpush1.bf16.msra.mxu1 %v8508_v10  ;;  %v8600_v9 = vld [vmem:[%s9376_s12 + $0x1168] ss:$16 sps:$4 sm:$0xff]   ;;  %v8605_v10 = vld [vmem:[%s9376_s12 + $0x1184] ss:$16 sps:$4 sm:$0xff]  }
 0x280   : > { %5465 = vmatprep.subr.bf16.mxu0 %v8513_v12  ;;  %5998 = vmatprep.subr.bf16.mxu1 %v8516_v13  ;;  %v8608_v12 = vld [vmem:[%s9376_s12 + $0x118c] ss:$16 sps:$4 sm:$0xff]   ;;  %v8603_v13 = vld [vmem:[%s9376_s12 + $0x1180] ss:$16 sps:$4 sm:$0xff]  }
 0x283   : > { %5466 = vmatpush1.bf16.msra.mxu0 %v8511_v15  ;;  %5999 = vmatpush1.bf16.msra.mxu1 %v8514_v16  ;;  %v8606_v15 = vld [vmem:[%s9376_s12 + $0x1188] ss:$16 sps:$4 sm:$0xff]   ;;  %v8611_v16 = vld [vmem:[%s9376_s12 + $0x11a4] ss:$16 sps:$4 sm:$0xff]  }
 0x284   : > { %5467 = vmatprep.subr.bf16.mxu0 %v8519_v11  ;;  %6000 = vmatprep.subr.bf16.mxu1 %v8522_v19  ;;  %v8614_v11 = vld [vmem:[%s9376_s12 + $0x11ac] ss:$16 sps:$4 sm:$0xff]   ;;  %v8609_v19 = vld [vmem:[%s9376_s12 + $0x11a0] ss:$16 sps:$4 sm:$0xff]  }
 0x287   : > { %5468 = vmatpush1.bf16.msra.mxu0 %v8517_v20  ;;  %6001 = vmatpush1.bf16.msra.mxu1 %v8520_v14  ;;  %v8612_v20 = vld [vmem:[%s9376_s12 + $0x11a8] ss:$16 sps:$4 sm:$0xff]   ;;  %v8617_v14 = vld [vmem:[%s9376_s12 + $0x11c4] ss:$16 sps:$4 sm:$0xff]  }
 0x288   : > { %5469 = vmatprep.subr.bf16.mxu0 %v8525_v22  ;;  %6002 = vmatprep.subr.bf16.mxu1 %v8528_v23  ;;  %v8620_v22 = vld [vmem:[%s9376_s12 + $0x11cc] ss:$16 sps:$4 sm:$0xff]   ;;  %v8615_v23 = vld [vmem:[%s9376_s12 + $0x11c0] ss:$16 sps:$4 sm:$0xff]  }
 0x28b   : > { %5470 = vmatpush1.bf16.msra.mxu0 %v8523_v17  ;;  %6003 = vmatpush1.bf16.msra.mxu1 %v8526_v25  ;;  %v8618_v17 = vld [vmem:[%s9376_s12 + $0x11c8] ss:$16 sps:$4 sm:$0xff]   ;;  %v8623_v25 = vld [vmem:[%s9376_s12 + $0x11e4] ss:$16 sps:$4 sm:$0xff]  }
 0x28c   : > { %5480 = vmatprep.subr.bf16.mxu0 %v8533_v26  ;;  %6013 = vmatprep.subr.bf16.mxu1 %v8536_v18  ;;  %v8626_v26 = vld [vmem:[%s9376_s12 + $0x11ec] ss:$16 sps:$4 sm:$0xff]   ;;  %v8621_v18 = vld [vmem:[%s9376_s12 + $0x11e0] ss:$16 sps:$4 sm:$0xff]  }
 0x28e   : > { %5472 = vmatmul.mubr.bf16.vlgmr.msra.gmra.mrb[0].mxu0 %v6699_v27  ;;  %6005 = vmatmul.mubr.bf16.vlgmr.msra.gmra.mrb[0].mxu1 %v6699_v27  ;;  %v8624_v27 = vld [vmem:[%s9376_s12 + $0x11e8] ss:$16 sps:$4 sm:$0xff]  }
 0x28f   : > { %5481 = vmatpush1.bf16.msra.mxu0 %v8531_v29  ;;  %6014 = vmatpush1.bf16.msra.mxu1 %v8534_v21  ;;  %v8631_v29 = vld [vmem:[%s9376_s12 + $0x1204] ss:$16 sps:$4 sm:$0xff]   ;;  %v8634_v21 = vld [vmem:[%s9376_s12 + $0x120c] ss:$16 sps:$4 sm:$0xff]  }
 0x290   : > { %5482 = vmatprep.subr.bf16.mxu0 %v8539_v30  ;;  %6015 = vmatprep.subr.bf16.mxu1 %v8542_v31  ;;  %v6701_v30 = vcombine.low %v9978_v28, %v9978_v28  ;;  %v10051_v31 = vld [vmem:[%s10341_s0 + $0x48] sm:$0xff] }
 0x291   : > { %5512 = vmatprep.mubr.bf16.mxu0 %v6702_v24  ;;  %6045 = vmatprep.mubr.bf16.mxu1 %v6702_v24  ;;  %v8629_v24 = vld [vmem:[%s9376_s12 + $0x1200] ss:$16 sps:$4 sm:$0xff]   ;;  %v6704_v28 = vcombine.high %v10051_v31, %v10051_v31 }
 0x293   : > { %5483 = vmatpush1.bf16.msra.mxu0 %v8537_v32  ;;  %6016 = vmatpush1.bf16.msra.mxu1 %v8540_v33  ;;  %v8632_v32 = vld [vmem:[%s9376_s12 + $0x1208] ss:$16 sps:$4 sm:$0xff]   ;;  %v8637_v33 = vld [vmem:[%s9376_s12 + $0x1224] ss:$16 sps:$4 sm:$0xff]  }
 0x294   : > { %5484 = vmatprep.subr.bf16.mxu0 %v8545_v34  ;;  %6017 = vmatprep.subr.bf16.mxu1 %v8548_v35  ;;  %v8640_v34 = vld [vmem:[%s9376_s12 + $0x122c] ss:$16 sps:$4 sm:$0xff]   ;;  %v8635_v35 = vld [vmem:[%s9376_s12 + $0x1220] ss:$16 sps:$4 sm:$0xff]  }
 0x297   : > { %5485 = vmatpush1.bf16.msra.mxu0 %v8543_v36  ;;  %6018 = vmatpush1.bf16.msra.mxu1 %v8546_v37  ;;  %v8638_v36 = vld [vmem:[%s9376_s12 + $0x1228] ss:$16 sps:$4 sm:$0xff]   ;;  %v8643_v37 = vld [vmem:[%s9376_s12 + $0x1244] ss:$16 sps:$4 sm:$0xff]  }
 0x298   : > { %5486 = vmatprep.subr.bf16.mxu0 %v8551_v38  ;;  %6019 = vmatprep.subr.bf16.mxu1 %v8554_v39  ;;  %v8646_v38 = vld [vmem:[%s9376_s12 + $0x124c] ss:$16 sps:$4 sm:$0xff]   ;;  %v8641_v39 = vld [vmem:[%s9376_s12 + $0x1240] ss:$16 sps:$4 sm:$0xff]  }
 0x29b   : > { %5487 = vmatpush1.bf16.msra.mxu0 %v8549_v40  ;;  %6020 = vmatpush1.bf16.msra.mxu1 %v8552_v41  ;;  %v8644_v40 = vld [vmem:[%s9376_s12 + $0x1248] ss:$16 sps:$4 sm:$0xff]   ;;  %v8649_v41 = vld [vmem:[%s9376_s12 + $0x1264] ss:$16 sps:$4 sm:$0xff]  }
 0x29c   : > { %5488 = vmatprep.subr.bf16.mxu0 %v8557_v42  ;;  %6021 = vmatprep.subr.bf16.mxu1 %v8560_v43  ;;  %v8652_v42 = vld [vmem:[%s9376_s12 + $0x126c] ss:$16 sps:$4 sm:$0xff]   ;;  %v8647_v43 = vld [vmem:[%s9376_s12 + $0x1260] ss:$16 sps:$4 sm:$0xff]  }
 0x29f   : > { %5489 = vmatpush1.bf16.msra.mxu0 %v8555_v44  ;;  %6022 = vmatpush1.bf16.msra.mxu1 %v8558_v45  ;;  %v8650_v44 = vld [vmem:[%s9376_s12 + $0x1268] ss:$16 sps:$4 sm:$0xff]   ;;  %v8655_v45 = vld [vmem:[%s9376_s12 + $0x1284] ss:$16 sps:$4 sm:$0xff]  }
 0x2a0   : > { %5490 = vmatprep.subr.bf16.mxu0 %v8563_v46  ;;  %6023 = vmatprep.subr.bf16.mxu1 %v8566_v47  ;;  %v8658_v46 = vld [vmem:[%s9376_s12 + $0x128c] ss:$16 sps:$4 sm:$0xff]   ;;  %v8653_v47 = vld [vmem:[%s9376_s12 + $0x1280] ss:$16 sps:$4 sm:$0xff]  }
 0x2a3   : > { %5491 = vmatpush1.bf16.msra.mxu0 %v8561_v48  ;;  %6024 = vmatpush1.bf16.msra.mxu1 %v8564_v49  ;;  %v8656_v48 = vld [vmem:[%s9376_s12 + $0x1288] ss:$16 sps:$4 sm:$0xff]   ;;  %v8661_v49 = vld [vmem:[%s9376_s12 + $0x12a4] ss:$16 sps:$4 sm:$0xff]  }
 0x2a4   : > { %5492 = vmatprep.subr.bf16.mxu0 %v8569_v50  ;;  %6025 = vmatprep.subr.bf16.mxu1 %v8572_v51  ;;  %v8664_v50 = vld [vmem:[%s9376_s12 + $0x12ac] ss:$16 sps:$4 sm:$0xff]   ;;  %v8659_v51 = vld [vmem:[%s9376_s12 + $0x12a0] ss:$16 sps:$4 sm:$0xff]  }
 0x2a7   : > { %5493 = vmatpush1.bf16.msra.mxu0 %v8567_v52  ;;  %6026 = vmatpush1.bf16.msra.mxu1 %v8570_v53  ;;  %v8662_v52 = vld [vmem:[%s9376_s12 + $0x12a8] ss:$16 sps:$4 sm:$0xff]   ;;  %v8667_v53 = vld [vmem:[%s9376_s12 + $0x12c4] ss:$16 sps:$4 sm:$0xff]  }
 0x2a8   : > { %5494 = vmatprep.subr.bf16.mxu0 %v8575_v54  ;;  %6027 = vmatprep.subr.bf16.mxu1 %v8578_v55  ;;  %v8670_v54 = vld [vmem:[%s9376_s12 + $0x12cc] ss:$16 sps:$4 sm:$0xff]   ;;  %v8665_v55 = vld [vmem:[%s9376_s12 + $0x12c0] ss:$16 sps:$4 sm:$0xff]  }
 0x2ab   : > { %5495 = vmatpush1.bf16.msra.mxu0 %v8573_v56  ;;  %6028 = vmatpush1.bf16.msra.mxu1 %v8576_v57  ;;  %v8668_v56 = vld [vmem:[%s9376_s12 + $0x12c8] ss:$16 sps:$4 sm:$0xff]   ;;  %v8673_v57 = vld [vmem:[%s9376_s12 + $0x12e4] ss:$16 sps:$4 sm:$0xff]  }
 0x2ac   : > { %5496 = vmatprep.subr.bf16.mxu0 %v8581_v58  ;;  %6029 = vmatprep.subr.bf16.mxu1 %v8584_v59  ;;  %v8676_v58 = vld [vmem:[%s9376_s12 + $0x12ec] ss:$16 sps:$4 sm:$0xff]   ;;  %v8671_v59 = vld [vmem:[%s9376_s12 + $0x12e0] ss:$16 sps:$4 sm:$0xff]  }
 0x2af   : > { %5497 = vmatpush1.bf16.msra.mxu0 %v8579_v60  ;;  %6030 = vmatpush1.bf16.msra.mxu1 %v8582_v61  ;;  %v8674_v60 = vld [vmem:[%s9376_s12 + $0x12e8] ss:$16 sps:$4 sm:$0xff]   ;;  %v8679_v61 = vld [vmem:[%s9376_s12 + $0x1304] ss:$16 sps:$4 sm:$0xff]  }
 0x2b0   : > { %5498 = vmatprep.subr.bf16.mxu0 %v8587_v62  ;;  %6031 = vmatprep.subr.bf16.mxu1 %v8590_v63  ;;  %v8682_v62 = vld [vmem:[%s9376_s12 + $0x130c] ss:$16 sps:$4 sm:$0xff]   ;;  %v8677_v63 = vld [vmem:[%s9376_s12 + $0x1300] ss:$16 sps:$4 sm:$0xff]  }
 0x2b3   : > { %5499 = vmatpush1.bf16.msra.mxu0 %v8585_v0  ;;  %6032 = vmatpush1.bf16.msra.mxu1 %v8588_v1  ;;  %v8680_v0 = vld [vmem:[%s9376_s12 + $0x1308] ss:$16 sps:$4 sm:$0xff]   ;;  %v8685_v1 = vld [vmem:[%s9376_s12 + $0x1324] ss:$16 sps:$4 sm:$0xff]  }
 0x2b4   : > { %5500 = vmatprep.subr.bf16.mxu0 %v8593_v2  ;;  %6033 = vmatprep.subr.bf16.mxu1 %v8596_v3  ;;  %v8688_v2 = vld [vmem:[%s9376_s12 + $0x132c] ss:$16 sps:$4 sm:$0xff]   ;;  %v8683_v3 = vld [vmem:[%s9376_s12 + $0x1320] ss:$16 sps:$4 sm:$0xff]  }
 0x2b7   : > { %5501 = vmatpush1.bf16.msra.mxu0 %v8591_v4  ;;  %6034 = vmatpush1.bf16.msra.mxu1 %v8594_v5  ;;  %v8686_v4 = vld [vmem:[%s9376_s12 + $0x1328] ss:$16 sps:$4 sm:$0xff]   ;;  %v8691_v5 = vld [vmem:[%s9376_s12 + $0x1344] ss:$16 sps:$4 sm:$0xff]  }
 0x2b8   : > { %5502 = vmatprep.subr.bf16.mxu0 %v8599_v6  ;;  %6035 = vmatprep.subr.bf16.mxu1 %v8602_v7  ;;  %v8694_v6 = vld [vmem:[%s9376_s12 + $0x134c] ss:$16 sps:$4 sm:$0xff]   ;;  %v8689_v7 = vld [vmem:[%s9376_s12 + $0x1340] ss:$16 sps:$4 sm:$0xff]  }
 0x2bb   : > { %5503 = vmatpush1.bf16.msra.mxu0 %v8597_v8  ;;  %6036 = vmatpush1.bf16.msra.mxu1 %v8600_v9  ;;  %v8692_v8 = vld [vmem:[%s9376_s12 + $0x1348] ss:$16 sps:$4 sm:$0xff]   ;;  %v8697_v9 = vld [vmem:[%s9376_s12 + $0x1364] ss:$16 sps:$4 sm:$0xff]  }
 0x2bc   : > { %5504 = vmatprep.subr.bf16.mxu0 %v8605_v10  ;;  %6037 = vmatprep.subr.bf16.mxu1 %v8608_v12  ;;  %v8700_v10 = vld [vmem:[%s9376_s12 + $0x136c] ss:$16 sps:$4 sm:$0xff]   ;;  %v8695_v12 = vld [vmem:[%s9376_s12 + $0x1360] ss:$16 sps:$4 sm:$0xff]  }
 0x2bf   : > { %5505 = vmatpush1.bf16.msra.mxu0 %v8603_v13  ;;  %6038 = vmatpush1.bf16.msra.mxu1 %v8606_v15  ;;  %v8698_v13 = vld [vmem:[%s9376_s12 + $0x1368] ss:$16 sps:$4 sm:$0xff]   ;;  %v8703_v15 = vld [vmem:[%s9376_s12 + $0x1384] ss:$16 sps:$4 sm:$0xff]  }
 0x2c0   : > { %5506 = vmatprep.subr.bf16.mxu0 %v8611_v16  ;;  %6039 = vmatprep.subr.bf16.mxu1 %v8614_v11  ;;  %v8706_v16 = vld [vmem:[%s9376_s12 + $0x138c] ss:$16 sps:$4 sm:$0xff]   ;;  %v8701_v11 = vld [vmem:[%s9376_s12 + $0x1380] ss:$16 sps:$4 sm:$0xff]  }
 0x2c3   : > { %5507 = vmatpush1.bf16.msra.mxu0 %v8609_v19  ;;  %6040 = vmatpush1.bf16.msra.mxu1 %v8612_v20  ;;  %v8704_v19 = vld [vmem:[%s9376_s12 + $0x1388] ss:$16 sps:$4 sm:$0xff]   ;;  %v8709_v20 = vld [vmem:[%s9376_s12 + $0x13a4] ss:$16 sps:$4 sm:$0xff]  }
 0x2c4   : > { %5508 = vmatprep.subr.bf16.mxu0 %v8617_v14  ;;  %6041 = vmatprep.subr.bf16.mxu1 %v8620_v22  ;;  %v8712_v14 = vld [vmem:[%s9376_s12 + $0x13ac] ss:$16 sps:$4 sm:$0xff]   ;;  %v8707_v22 = vld [vmem:[%s9376_s12 + $0x13a0] ss:$16 sps:$4 sm:$0xff]  }
 0x2c7   : > { %5509 = vmatpush1.bf16.msra.mxu0 %v8615_v23  ;;  %6042 = vmatpush1.bf16.msra.mxu1 %v8618_v17  ;;  %v8710_v23 = vld [vmem:[%s9376_s12 + $0x13a8] ss:$16 sps:$4 sm:$0xff]   ;;  %v8715_v17 = vld [vmem:[%s9376_s12 + $0x13c4] ss:$16 sps:$4 sm:$0xff]  }
 0x2c8   : > { %5510 = vmatprep.subr.bf16.mxu0 %v8623_v25  ;;  %6043 = vmatprep.subr.bf16.mxu1 %v8626_v26  ;;  %v8718_v25 = vld [vmem:[%s9376_s12 + $0x13cc] ss:$16 sps:$4 sm:$0xff]   ;;  %v8713_v26 = vld [vmem:[%s9376_s12 + $0x13c0] ss:$16 sps:$4 sm:$0xff]  }
 0x2cb   : > { %5511 = vmatpush1.bf16.msra.mxu0 %v8621_v18  ;;  %6044 = vmatpush1.bf16.msra.mxu1 %v8624_v27  ;;  %v8716_v18 = vld [vmem:[%s9376_s12 + $0x13c8] ss:$16 sps:$4 sm:$0xff]   ;;  %v8721_v27 = vld [vmem:[%s9376_s12 + $0x13e4] ss:$16 sps:$4 sm:$0xff]  }
 0x2cc   : > { %5521 = vmatprep.subr.bf16.mxu0 %v8631_v29  ;;  %6054 = vmatprep.subr.bf16.mxu1 %v8634_v21  ;;  %v8724_v29 = vld [vmem:[%s9376_s12 + $0x13ec] ss:$16 sps:$4 sm:$0xff]   ;;  %v8719_v21 = vld [vmem:[%s9376_s12 + $0x13e0] ss:$16 sps:$4 sm:$0xff]  }
 0x2ce   : > { %5513 = vmatmul.mubr.bf16.vlgmr.msra.gmra.mrb[0].mxu0 %v6701_v30  ;;  %6046 = vmatmul.mubr.bf16.vlgmr.msra.gmra.mrb[0].mxu1 %v6701_v30  ;;  %v8722_v30 = vld [vmem:[%s9376_s12 + $0x13e8] ss:$16 sps:$4 sm:$0xff]  }
 0x2cf   : > { %5522 = vmatpush1.bf16.msra.mxu0 %v8629_v24  ;;  %6055 = vmatpush1.bf16.msra.mxu1 %v8632_v32  ;;  %v8729_v24 = vld [vmem:[%s9376_s12 + $0x1404] ss:$16 sps:$4 sm:$0xff]   ;;  %v8732_v32 = vld [vmem:[%s9376_s12 + $0x140c] ss:$16 sps:$4 sm:$0xff]  }
 0x2d0   : > { %5523 = vmatprep.subr.bf16.mxu0 %v8637_v33  ;;  %6056 = vmatprep.subr.bf16.mxu1 %v8640_v34  ;;  %v6703_v33 = vcombine.low %v10051_v31, %v10051_v31  ;;  %v10124_v34 = vld [vmem:[%s10341_s0 + $0x50] sm:$0xff] }
 0x2d1   : > { %5553 = vmatprep.mubr.bf16.mxu0 %v6704_v28  ;;  %6086 = vmatprep.mubr.bf16.mxu1 %v6704_v28  ;;  %v8727_v28 = vld [vmem:[%s9376_s12 + $0x1400] ss:$16 sps:$4 sm:$0xff]   ;;  %v6706_v31 = vcombine.high %v10124_v34, %v10124_v34 }
 0x2d3   : > { %5524 = vmatpush1.bf16.msra.mxu0 %v8635_v35  ;;  %6057 = vmatpush1.bf16.msra.mxu1 %v8638_v36  ;;  %v8730_v35 = vld [vmem:[%s9376_s12 + $0x1408] ss:$16 sps:$4 sm:$0xff]   ;;  %v8735_v36 = vld [vmem:[%s9376_s12 + $0x1424] ss:$16 sps:$4 sm:$0xff]  }
 0x2d4   : > { %5525 = vmatprep.subr.bf16.mxu0 %v8643_v37  ;;  %6058 = vmatprep.subr.bf16.mxu1 %v8646_v38  ;;  %v8738_v37 = vld [vmem:[%s9376_s12 + $0x142c] ss:$16 sps:$4 sm:$0xff]   ;;  %v8733_v38 = vld [vmem:[%s9376_s12 + $0x1420] ss:$16 sps:$4 sm:$0xff]  }
 0x2d7   : > { %5526 = vmatpush1.bf16.msra.mxu0 %v8641_v39  ;;  %6059 = vmatpush1.bf16.msra.mxu1 %v8644_v40  ;;  %v8736_v39 = vld [vmem:[%s9376_s12 + $0x1428] ss:$16 sps:$4 sm:$0xff]   ;;  %v8741_v40 = vld [vmem:[%s9376_s12 + $0x1444] ss:$16 sps:$4 sm:$0xff]  }
 0x2d8   : > { %5527 = vmatprep.subr.bf16.mxu0 %v8649_v41  ;;  %6060 = vmatprep.subr.bf16.mxu1 %v8652_v42  ;;  %v8744_v41 = vld [vmem:[%s9376_s12 + $0x144c] ss:$16 sps:$4 sm:$0xff]   ;;  %v8739_v42 = vld [vmem:[%s9376_s12 + $0x1440] ss:$16 sps:$4 sm:$0xff]  }
 0x2db   : > { %5528 = vmatpush1.bf16.msra.mxu0 %v8647_v43  ;;  %6061 = vmatpush1.bf16.msra.mxu1 %v8650_v44  ;;  %v8742_v43 = vld [vmem:[%s9376_s12 + $0x1448] ss:$16 sps:$4 sm:$0xff]   ;;  %v8747_v44 = vld [vmem:[%s9376_s12 + $0x1464] ss:$16 sps:$4 sm:$0xff]  }
 0x2dc   : > { %5529 = vmatprep.subr.bf16.mxu0 %v8655_v45  ;;  %6062 = vmatprep.subr.bf16.mxu1 %v8658_v46  ;;  %v8750_v45 = vld [vmem:[%s9376_s12 + $0x146c] ss:$16 sps:$4 sm:$0xff]   ;;  %v8745_v46 = vld [vmem:[%s9376_s12 + $0x1460] ss:$16 sps:$4 sm:$0xff]  }
 0x2df   : > { %5530 = vmatpush1.bf16.msra.mxu0 %v8653_v47  ;;  %6063 = vmatpush1.bf16.msra.mxu1 %v8656_v48  ;;  %v8748_v47 = vld [vmem:[%s9376_s12 + $0x1468] ss:$16 sps:$4 sm:$0xff]   ;;  %v8753_v48 = vld [vmem:[%s9376_s12 + $0x1484] ss:$16 sps:$4 sm:$0xff]  }
 0x2e0   : > { %5531 = vmatprep.subr.bf16.mxu0 %v8661_v49  ;;  %6064 = vmatprep.subr.bf16.mxu1 %v8664_v50  ;;  %v8756_v49 = vld [vmem:[%s9376_s12 + $0x148c] ss:$16 sps:$4 sm:$0xff]   ;;  %v8751_v50 = vld [vmem:[%s9376_s12 + $0x1480] ss:$16 sps:$4 sm:$0xff]  }
 0x2e3   : > { %5532 = vmatpush1.bf16.msra.mxu0 %v8659_v51  ;;  %6065 = vmatpush1.bf16.msra.mxu1 %v8662_v52  ;;  %v8754_v51 = vld [vmem:[%s9376_s12 + $0x1488] ss:$16 sps:$4 sm:$0xff]   ;;  %v8759_v52 = vld [vmem:[%s9376_s12 + $0x14a4] ss:$16 sps:$4 sm:$0xff]  }
 0x2e4   : > { %5533 = vmatprep.subr.bf16.mxu0 %v8667_v53  ;;  %6066 = vmatprep.subr.bf16.mxu1 %v8670_v54  ;;  %v8762_v53 = vld [vmem:[%s9376_s12 + $0x14ac] ss:$16 sps:$4 sm:$0xff]   ;;  %v8757_v54 = vld [vmem:[%s9376_s12 + $0x14a0] ss:$16 sps:$4 sm:$0xff]  }
 0x2e7   : > { %5534 = vmatpush1.bf16.msra.mxu0 %v8665_v55  ;;  %6067 = vmatpush1.bf16.msra.mxu1 %v8668_v56  ;;  %v8760_v55 = vld [vmem:[%s9376_s12 + $0x14a8] ss:$16 sps:$4 sm:$0xff]   ;;  %v8765_v56 = vld [vmem:[%s9376_s12 + $0x14c4] ss:$16 sps:$4 sm:$0xff]  }
 0x2e8   : > { %5535 = vmatprep.subr.bf16.mxu0 %v8673_v57  ;;  %6068 = vmatprep.subr.bf16.mxu1 %v8676_v58  ;;  %v8768_v57 = vld [vmem:[%s9376_s12 + $0x14cc] ss:$16 sps:$4 sm:$0xff]   ;;  %v8763_v58 = vld [vmem:[%s9376_s12 + $0x14c0] ss:$16 sps:$4 sm:$0xff]  }
 0x2eb   : > { %5536 = vmatpush1.bf16.msra.mxu0 %v8671_v59  ;;  %6069 = vmatpush1.bf16.msra.mxu1 %v8674_v60  ;;  %v8766_v59 = vld [vmem:[%s9376_s12 + $0x14c8] ss:$16 sps:$4 sm:$0xff]   ;;  %v8771_v60 = vld [vmem:[%s9376_s12 + $0x14e4] ss:$16 sps:$4 sm:$0xff]  }
 0x2ec   : > { %5537 = vmatprep.subr.bf16.mxu0 %v8679_v61  ;;  %6070 = vmatprep.subr.bf16.mxu1 %v8682_v62  ;;  %v8774_v61 = vld [vmem:[%s9376_s12 + $0x14ec] ss:$16 sps:$4 sm:$0xff]   ;;  %v8769_v62 = vld [vmem:[%s9376_s12 + $0x14e0] ss:$16 sps:$4 sm:$0xff]  }
 0x2ef   : > { %5538 = vmatpush1.bf16.msra.mxu0 %v8677_v63  ;;  %6071 = vmatpush1.bf16.msra.mxu1 %v8680_v0  ;;  %v8772_v63 = vld [vmem:[%s9376_s12 + $0x14e8] ss:$16 sps:$4 sm:$0xff]   ;;  %v8777_v0 = vld [vmem:[%s9376_s12 + $0x1504] ss:$16 sps:$4 sm:$0xff]  }
 0x2f0   : > { %5539 = vmatprep.subr.bf16.mxu0 %v8685_v1  ;;  %6072 = vmatprep.subr.bf16.mxu1 %v8688_v2  ;;  %v8780_v1 = vld [vmem:[%s9376_s12 + $0x150c] ss:$16 sps:$4 sm:$0xff]   ;;  %v8775_v2 = vld [vmem:[%s9376_s12 + $0x1500] ss:$16 sps:$4 sm:$0xff]  }
 0x2f3   : > { %5540 = vmatpush1.bf16.msra.mxu0 %v8683_v3  ;;  %6073 = vmatpush1.bf16.msra.mxu1 %v8686_v4  ;;  %v8778_v3 = vld [vmem:[%s9376_s12 + $0x1508] ss:$16 sps:$4 sm:$0xff]   ;;  %v8783_v4 = vld [vmem:[%s9376_s12 + $0x1524] ss:$16 sps:$4 sm:$0xff]  }
 0x2f4   : > { %5541 = vmatprep.subr.bf16.mxu0 %v8691_v5  ;;  %6074 = vmatprep.subr.bf16.mxu1 %v8694_v6  ;;  %v8786_v5 = vld [vmem:[%s9376_s12 + $0x152c] ss:$16 sps:$4 sm:$0xff]   ;;  %v8781_v6 = vld [vmem:[%s9376_s12 + $0x1520] ss:$16 sps:$4 sm:$0xff]  }
 0x2f7   : > { %5542 = vmatpush1.bf16.msra.mxu0 %v8689_v7  ;;  %6075 = vmatpush1.bf16.msra.mxu1 %v8692_v8  ;;  %v8784_v7 = vld [vmem:[%s9376_s12 + $0x1528] ss:$16 sps:$4 sm:$0xff]   ;;  %v8789_v8 = vld [vmem:[%s9376_s12 + $0x1544] ss:$16 sps:$4 sm:$0xff]  }
 0x2f8   : > { %5543 = vmatprep.subr.bf16.mxu0 %v8697_v9  ;;  %6076 = vmatprep.subr.bf16.mxu1 %v8700_v10  ;;  %v8792_v9 = vld [vmem:[%s9376_s12 + $0x154c] ss:$16 sps:$4 sm:$0xff]   ;;  %v8787_v10 = vld [vmem:[%s9376_s12 + $0x1540] ss:$16 sps:$4 sm:$0xff]  }
 0x2fb   : > { %5544 = vmatpush1.bf16.msra.mxu0 %v8695_v12  ;;  %6077 = vmatpush1.bf16.msra.mxu1 %v8698_v13  ;;  %v8790_v12 = vld [vmem:[%s9376_s12 + $0x1548] ss:$16 sps:$4 sm:$0xff]   ;;  %v8795_v13 = vld [vmem:[%s9376_s12 + $0x1564] ss:$16 sps:$4 sm:$0xff]  }
 0x2fc   : > { %5545 = vmatprep.subr.bf16.mxu0 %v8703_v15  ;;  %6078 = vmatprep.subr.bf16.mxu1 %v8706_v16  ;;  %v8798_v15 = vld [vmem:[%s9376_s12 + $0x156c] ss:$16 sps:$4 sm:$0xff]   ;;  %v8793_v16 = vld [vmem:[%s9376_s12 + $0x1560] ss:$16 sps:$4 sm:$0xff]  }
 0x2ff   : > { %5546 = vmatpush1.bf16.msra.mxu0 %v8701_v11  ;;  %6079 = vmatpush1.bf16.msra.mxu1 %v8704_v19  ;;  %v8796_v11 = vld [vmem:[%s9376_s12 + $0x1568] ss:$16 sps:$4 sm:$0xff]   ;;  %v8801_v19 = vld [vmem:[%s9376_s12 + $0x1584] ss:$16 sps:$4 sm:$0xff]  }
 0x300   : > { %5547 = vmatprep.subr.bf16.mxu0 %v8709_v20  ;;  %6080 = vmatprep.subr.bf16.mxu1 %v8712_v14  ;;  %v8804_v20 = vld [vmem:[%s9376_s12 + $0x158c] ss:$16 sps:$4 sm:$0xff]   ;;  %v8799_v14 = vld [vmem:[%s9376_s12 + $0x1580] ss:$16 sps:$4 sm:$0xff]  }
 0x303   : > { %5548 = vmatpush1.bf16.msra.mxu0 %v8707_v22  ;;  %6081 = vmatpush1.bf16.msra.mxu1 %v8710_v23  ;;  %v8802_v22 = vld [vmem:[%s9376_s12 + $0x1588] ss:$16 sps:$4 sm:$0xff]   ;;  %v8807_v23 = vld [vmem:[%s9376_s12 + $0x15a4] ss:$16 sps:$4 sm:$0xff]  }
 0x304   : > { %5549 = vmatprep.subr.bf16.mxu0 %v8715_v17  ;;  %6082 = vmatprep.subr.bf16.mxu1 %v8718_v25  ;;  %v8810_v17 = vld [vmem:[%s9376_s12 + $0x15ac] ss:$16 sps:$4 sm:$0xff]   ;;  %v8805_v25 = vld [vmem:[%s9376_s12 + $0x15a0] ss:$16 sps:$4 sm:$0xff]  }
 0x307   : > { %5550 = vmatpush1.bf16.msra.mxu0 %v8713_v26  ;;  %6083 = vmatpush1.bf16.msra.mxu1 %v8716_v18  ;;  %v8808_v26 = vld [vmem:[%s9376_s12 + $0x15a8] ss:$16 sps:$4 sm:$0xff]   ;;  %v8813_v18 = vld [vmem:[%s9376_s12 + $0x15c4] ss:$16 sps:$4 sm:$0xff]  }
 0x308   : > { %5551 = vmatprep.subr.bf16.mxu0 %v8721_v27  ;;  %6084 = vmatprep.subr.bf16.mxu1 %v8724_v29  ;;  %v8816_v27 = vld [vmem:[%s9376_s12 + $0x15cc] ss:$16 sps:$4 sm:$0xff]   ;;  %v8811_v29 = vld [vmem:[%s9376_s12 + $0x15c0] ss:$16 sps:$4 sm:$0xff]  }
 0x30b   : > { %5552 = vmatpush1.bf16.msra.mxu0 %v8719_v21  ;;  %6085 = vmatpush1.bf16.msra.mxu1 %v8722_v30  ;;  %v8814_v21 = vld [vmem:[%s9376_s12 + $0x15c8] ss:$16 sps:$4 sm:$0xff]   ;;  %v8819_v30 = vld [vmem:[%s9376_s12 + $0x15e4] ss:$16 sps:$4 sm:$0xff]  }
 0x30c   : > { %5562 = vmatprep.subr.bf16.mxu0 %v8729_v24  ;;  %6095 = vmatprep.subr.bf16.mxu1 %v8732_v32  ;;  %v8822_v24 = vld [vmem:[%s9376_s12 + $0x15ec] ss:$16 sps:$4 sm:$0xff]   ;;  %v8817_v32 = vld [vmem:[%s9376_s12 + $0x15e0] ss:$16 sps:$4 sm:$0xff]  }
 0x30e   : > { %5554 = vmatmul.mubr.bf16.vlgmr.msra.gmra.mrb[0].mxu0 %v6703_v33  ;;  %6087 = vmatmul.mubr.bf16.vlgmr.msra.gmra.mrb[0].mxu1 %v6703_v33  ;;  %v8820_v33 = vld [vmem:[%s9376_s12 + $0x15e8] ss:$16 sps:$4 sm:$0xff]  }
 0x30f   : > { %5563 = vmatpush1.bf16.msra.mxu0 %v8727_v28  ;;  %6096 = vmatpush1.bf16.msra.mxu1 %v8730_v35  ;;  %v8827_v28 = vld [vmem:[%s9376_s12 + $0x1604] ss:$16 sps:$4 sm:$0xff]   ;;  %v8830_v35 = vld [vmem:[%s9376_s12 + $0x160c] ss:$16 sps:$4 sm:$0xff]  }
 0x310   : > { %5564 = vmatprep.subr.bf16.mxu0 %v8735_v36  ;;  %6097 = vmatprep.subr.bf16.mxu1 %v8738_v37  ;;  %v6705_v36 = vcombine.low %v10124_v34, %v10124_v34  ;;  %v10197_v37 = vld [vmem:[%s10341_s0 + $0x58] sm:$0xff] }
 0x311   : > { %5594 = vmatprep.mubr.bf16.mxu0 %v6706_v31  ;;  %6127 = vmatprep.mubr.bf16.mxu1 %v6706_v31  ;;  %v8825_v31 = vld [vmem:[%s9376_s12 + $0x1600] ss:$16 sps:$4 sm:$0xff]   ;;  %v6708_v34 = vcombine.high %v10197_v37, %v10197_v37 }
 0x313   : > { %5565 = vmatpush1.bf16.msra.mxu0 %v8733_v38  ;;  %6098 = vmatpush1.bf16.msra.mxu1 %v8736_v39  ;;  %v8828_v38 = vld [vmem:[%s9376_s12 + $0x1608] ss:$16 sps:$4 sm:$0xff]   ;;  %v8833_v39 = vld [vmem:[%s9376_s12 + $0x1624] ss:$16 sps:$4 sm:$0xff]  }
 0x314   : > { %5566 = vmatprep.subr.bf16.mxu0 %v8741_v40  ;;  %6099 = vmatprep.subr.bf16.mxu1 %v8744_v41  ;;  %v8836_v40 = vld [vmem:[%s9376_s12 + $0x162c] ss:$16 sps:$4 sm:$0xff]   ;;  %v8831_v41 = vld [vmem:[%s9376_s12 + $0x1620] ss:$16 sps:$4 sm:$0xff]  }
 0x317   : > { %5567 = vmatpush1.bf16.msra.mxu0 %v8739_v42  ;;  %6100 = vmatpush1.bf16.msra.mxu1 %v8742_v43  ;;  %v8834_v42 = vld [vmem:[%s9376_s12 + $0x1628] ss:$16 sps:$4 sm:$0xff]   ;;  %v8839_v43 = vld [vmem:[%s9376_s12 + $0x1644] ss:$16 sps:$4 sm:$0xff]  }
 0x318   : > { %5568 = vmatprep.subr.bf16.mxu0 %v8747_v44  ;;  %6101 = vmatprep.subr.bf16.mxu1 %v8750_v45  ;;  %v8842_v44 = vld [vmem:[%s9376_s12 + $0x164c] ss:$16 sps:$4 sm:$0xff]   ;;  %v8837_v45 = vld [vmem:[%s9376_s12 + $0x1640] ss:$16 sps:$4 sm:$0xff]  }
 0x31b   : > { %5569 = vmatpush1.bf16.msra.mxu0 %v8745_v46  ;;  %6102 = vmatpush1.bf16.msra.mxu1 %v8748_v47  ;;  %v8840_v46 = vld [vmem:[%s9376_s12 + $0x1648] ss:$16 sps:$4 sm:$0xff]   ;;  %v8845_v47 = vld [vmem:[%s9376_s12 + $0x1664] ss:$16 sps:$4 sm:$0xff]  }
 0x31c   : > { %5570 = vmatprep.subr.bf16.mxu0 %v8753_v48  ;;  %6103 = vmatprep.subr.bf16.mxu1 %v8756_v49  ;;  %v8848_v48 = vld [vmem:[%s9376_s12 + $0x166c] ss:$16 sps:$4 sm:$0xff]   ;;  %v8843_v49 = vld [vmem:[%s9376_s12 + $0x1660] ss:$16 sps:$4 sm:$0xff]  }
 0x31f   : > { %5571 = vmatpush1.bf16.msra.mxu0 %v8751_v50  ;;  %6104 = vmatpush1.bf16.msra.mxu1 %v8754_v51  ;;  %v8846_v50 = vld [vmem:[%s9376_s12 + $0x1668] ss:$16 sps:$4 sm:$0xff]   ;;  %v8851_v51 = vld [vmem:[%s9376_s12 + $0x1684] ss:$16 sps:$4 sm:$0xff]  }
 0x320   : > { %5572 = vmatprep.subr.bf16.mxu0 %v8759_v52  ;;  %6105 = vmatprep.subr.bf16.mxu1 %v8762_v53  ;;  %v8854_v52 = vld [vmem:[%s9376_s12 + $0x168c] ss:$16 sps:$4 sm:$0xff]   ;;  %v8849_v53 = vld [vmem:[%s9376_s12 + $0x1680] ss:$16 sps:$4 sm:$0xff]  }
 0x323   : > { %5573 = vmatpush1.bf16.msra.mxu0 %v8757_v54  ;;  %6106 = vmatpush1.bf16.msra.mxu1 %v8760_v55  ;;  %v8852_v54 = vld [vmem:[%s9376_s12 + $0x1688] ss:$16 sps:$4 sm:$0xff]   ;;  %v8857_v55 = vld [vmem:[%s9376_s12 + $0x16a4] ss:$16 sps:$4 sm:$0xff]  }
 0x324   : > { %5574 = vmatprep.subr.bf16.mxu0 %v8765_v56  ;;  %6107 = vmatprep.subr.bf16.mxu1 %v8768_v57  ;;  %v8860_v56 = vld [vmem:[%s9376_s12 + $0x16ac] ss:$16 sps:$4 sm:$0xff]   ;;  %v8855_v57 = vld [vmem:[%s9376_s12 + $0x16a0] ss:$16 sps:$4 sm:$0xff]  }
 0x327   : > { %5575 = vmatpush1.bf16.msra.mxu0 %v8763_v58  ;;  %6108 = vmatpush1.bf16.msra.mxu1 %v8766_v59  ;;  %v8858_v58 = vld [vmem:[%s9376_s12 + $0x16a8] ss:$16 sps:$4 sm:$0xff]   ;;  %v8863_v59 = vld [vmem:[%s9376_s12 + $0x16c4] ss:$16 sps:$4 sm:$0xff]  }
 0x328   : > { %5576 = vmatprep.subr.bf16.mxu0 %v8771_v60  ;;  %6109 = vmatprep.subr.bf16.mxu1 %v8774_v61  ;;  %v8866_v60 = vld [vmem:[%s9376_s12 + $0x16cc] ss:$16 sps:$4 sm:$0xff]   ;;  %v8861_v61 = vld [vmem:[%s9376_s12 + $0x16c0] ss:$16 sps:$4 sm:$0xff]  }
 0x32b   : > { %5577 = vmatpush1.bf16.msra.mxu0 %v8769_v62  ;;  %6110 = vmatpush1.bf16.msra.mxu1 %v8772_v63  ;;  %v8864_v62 = vld [vmem:[%s9376_s12 + $0x16c8] ss:$16 sps:$4 sm:$0xff]   ;;  %v8869_v63 = vld [vmem:[%s9376_s12 + $0x16e4] ss:$16 sps:$4 sm:$0xff]  }
 0x32c   : > { %5578 = vmatprep.subr.bf16.mxu0 %v8777_v0  ;;  %6111 = vmatprep.subr.bf16.mxu1 %v8780_v1  ;;  %v8872_v0 = vld [vmem:[%s9376_s12 + $0x16ec] ss:$16 sps:$4 sm:$0xff]   ;;  %v8867_v1 = vld [vmem:[%s9376_s12 + $0x16e0] ss:$16 sps:$4 sm:$0xff]  }
 0x32f   : > { %5579 = vmatpush1.bf16.msra.mxu0 %v8775_v2  ;;  %6112 = vmatpush1.bf16.msra.mxu1 %v8778_v3  ;;  %v8870_v2 = vld [vmem:[%s9376_s12 + $0x16e8] ss:$16 sps:$4 sm:$0xff]   ;;  %v8875_v3 = vld [vmem:[%s9376_s12 + $0x1704] ss:$16 sps:$4 sm:$0xff]  }
 0x330   : > { %5580 = vmatprep.subr.bf16.mxu0 %v8783_v4  ;;  %6113 = vmatprep.subr.bf16.mxu1 %v8786_v5  ;;  %v8878_v4 = vld [vmem:[%s9376_s12 + $0x170c] ss:$16 sps:$4 sm:$0xff]   ;;  %v8873_v5 = vld [vmem:[%s9376_s12 + $0x1700] ss:$16 sps:$4 sm:$0xff]  }
 0x333   : > { %5581 = vmatpush1.bf16.msra.mxu0 %v8781_v6  ;;  %6114 = vmatpush1.bf16.msra.mxu1 %v8784_v7  ;;  %v8876_v6 = vld [vmem:[%s9376_s12 + $0x1708] ss:$16 sps:$4 sm:$0xff]   ;;  %v8881_v7 = vld [vmem:[%s9376_s12 + $0x1724] ss:$16 sps:$4 sm:$0xff]  }
 0x334   : > { %5582 = vmatprep.subr.bf16.mxu0 %v8789_v8  ;;  %6115 = vmatprep.subr.bf16.mxu1 %v8792_v9  ;;  %v8884_v8 = vld [vmem:[%s9376_s12 + $0x172c] ss:$16 sps:$4 sm:$0xff]   ;;  %v8879_v9 = vld [vmem:[%s9376_s12 + $0x1720] ss:$16 sps:$4 sm:$0xff]  }
 0x337   : > { %5583 = vmatpush1.bf16.msra.mxu0 %v8787_v10  ;;  %6116 = vmatpush1.bf16.msra.mxu1 %v8790_v12  ;;  %v8882_v10 = vld [vmem:[%s9376_s12 + $0x1728] ss:$16 sps:$4 sm:$0xff]   ;;  %v8887_v12 = vld [vmem:[%s9376_s12 + $0x1744] ss:$16 sps:$4 sm:$0xff]  }
 0x338   : > { %5584 = vmatprep.subr.bf16.mxu0 %v8795_v13  ;;  %6117 = vmatprep.subr.bf16.mxu1 %v8798_v15  ;;  %v8890_v13 = vld [vmem:[%s9376_s12 + $0x174c] ss:$16 sps:$4 sm:$0xff]   ;;  %v8885_v15 = vld [vmem:[%s9376_s12 + $0x1740] ss:$16 sps:$4 sm:$0xff]  }
 0x33b   : > { %5585 = vmatpush1.bf16.msra.mxu0 %v8793_v16  ;;  %6118 = vmatpush1.bf16.msra.mxu1 %v8796_v11  ;;  %v8888_v16 = vld [vmem:[%s9376_s12 + $0x1748] ss:$16 sps:$4 sm:$0xff]   ;;  %v8893_v11 = vld [vmem:[%s9376_s12 + $0x1764] ss:$16 sps:$4 sm:$0xff]  }
 0x33c   : > { %5586 = vmatprep.subr.bf16.mxu0 %v8801_v19  ;;  %6119 = vmatprep.subr.bf16.mxu1 %v8804_v20  ;;  %v8896_v19 = vld [vmem:[%s9376_s12 + $0x176c] ss:$16 sps:$4 sm:$0xff]   ;;  %v8891_v20 = vld [vmem:[%s9376_s12 + $0x1760] ss:$16 sps:$4 sm:$0xff]  }
 0x33f   : > { %5587 = vmatpush1.bf16.msra.mxu0 %v8799_v14  ;;  %6120 = vmatpush1.bf16.msra.mxu1 %v8802_v22  ;;  %v8894_v14 = vld [vmem:[%s9376_s12 + $0x1768] ss:$16 sps:$4 sm:$0xff]   ;;  %v8899_v22 = vld [vmem:[%s9376_s12 + $0x1784] ss:$16 sps:$4 sm:$0xff]  }
 0x340   : > { %5588 = vmatprep.subr.bf16.mxu0 %v8807_v23  ;;  %6121 = vmatprep.subr.bf16.mxu1 %v8810_v17  ;;  %v8902_v23 = vld [vmem:[%s9376_s12 + $0x178c] ss:$16 sps:$4 sm:$0xff]   ;;  %v8897_v17 = vld [vmem:[%s9376_s12 + $0x1780] ss:$16 sps:$4 sm:$0xff]  }
 0x343   : > { %5589 = vmatpush1.bf16.msra.mxu0 %v8805_v25  ;;  %6122 = vmatpush1.bf16.msra.mxu1 %v8808_v26  ;;  %v8900_v25 = vld [vmem:[%s9376_s12 + $0x1788] ss:$16 sps:$4 sm:$0xff]   ;;  %v8905_v26 = vld [vmem:[%s9376_s12 + $0x17a4] ss:$16 sps:$4 sm:$0xff]  }
 0x344   : > { %5590 = vmatprep.subr.bf16.mxu0 %v8813_v18  ;;  %6123 = vmatprep.subr.bf16.mxu1 %v8816_v27  ;;  %v8908_v18 = vld [vmem:[%s9376_s12 + $0x17ac] ss:$16 sps:$4 sm:$0xff]   ;;  %v8903_v27 = vld [vmem:[%s9376_s12 + $0x17a0] ss:$16 sps:$4 sm:$0xff]  }
 0x347   : > { %5591 = vmatpush1.bf16.msra.mxu0 %v8811_v29  ;;  %6124 = vmatpush1.bf16.msra.mxu1 %v8814_v21  ;;  %v8906_v29 = vld [vmem:[%s9376_s12 + $0x17a8] ss:$16 sps:$4 sm:$0xff]   ;;  %v8911_v21 = vld [vmem:[%s9376_s12 + $0x17c4] ss:$16 sps:$4 sm:$0xff]  }
 0x348   : > { %5592 = vmatprep.subr.bf16.mxu0 %v8819_v30  ;;  %6125 = vmatprep.subr.bf16.mxu1 %v8822_v24  ;;  %v8914_v30 = vld [vmem:[%s9376_s12 + $0x17cc] ss:$16 sps:$4 sm:$0xff]   ;;  %v8909_v24 = vld [vmem:[%s9376_s12 + $0x17c0] ss:$16 sps:$4 sm:$0xff]  }
 0x34b   : > { %5593 = vmatpush1.bf16.msra.mxu0 %v8817_v32  ;;  %6126 = vmatpush1.bf16.msra.mxu1 %v8820_v33  ;;  %v8912_v32 = vld [vmem:[%s9376_s12 + $0x17c8] ss:$16 sps:$4 sm:$0xff]   ;;  %v8917_v33 = vld [vmem:[%s9376_s12 + $0x17e4] ss:$16 sps:$4 sm:$0xff]  }
 0x34c   : > { %5603 = vmatprep.subr.bf16.mxu0 %v8827_v28  ;;  %6136 = vmatprep.subr.bf16.mxu1 %v8830_v35  ;;  %v8920_v28 = vld [vmem:[%s9376_s12 + $0x17ec] ss:$16 sps:$4 sm:$0xff]   ;;  %v8915_v35 = vld [vmem:[%s9376_s12 + $0x17e0] ss:$16 sps:$4 sm:$0xff]  }
 0x34e   : > { %5595 = vmatmul.mubr.bf16.vlgmr.msra.gmra.mrb[0].mxu0 %v6705_v36  ;;  %6128 = vmatmul.mubr.bf16.vlgmr.msra.gmra.mrb[0].mxu1 %v6705_v36  ;;  %v8918_v36 = vld [vmem:[%s9376_s12 + $0x17e8] ss:$16 sps:$4 sm:$0xff]  }
 0x34f   : > { %5604 = vmatpush1.bf16.msra.mxu0 %v8825_v31  ;;  %6137 = vmatpush1.bf16.msra.mxu1 %v8828_v38  ;;  %v8925_v31 = vld [vmem:[%s9376_s12 + $0x1804] ss:$16 sps:$4 sm:$0xff]   ;;  %v8928_v38 = vld [vmem:[%s9376_s12 + $0x180c] ss:$16 sps:$4 sm:$0xff]  }
 0x350   : > { %5605 = vmatprep.subr.bf16.mxu0 %v8833_v39  ;;  %6138 = vmatprep.subr.bf16.mxu1 %v8836_v40  ;;  %v6707_v39 = vcombine.low %v10197_v37, %v10197_v37  ;;  %v8923_v40 = vld [vmem:[%s9376_s12 + $0x1800] ss:$16 sps:$4 sm:$0xff]   ;;  %v8932_v37 = vld [vmem:[%s9376_s12 + $0x1828] ss:$16 sps:$4 sm:$0xff]  }
 0x351   : > { %5635 = vmatprep.mubr.bf16.mxu0 %v6708_v34  ;;  %6168 = vmatprep.mubr.bf16.mxu1 %v6708_v34  ;;  %v8926_v34 = vld [vmem:[%s9376_s12 + $0x1808] ss:$16 sps:$4 sm:$0xff]  }
 0x353   : > { %5606 = vmatpush1.bf16.msra.mxu0 %v8831_v41  ;;  %6139 = vmatpush1.bf16.msra.mxu1 %v8834_v42  ;;  %v8931_v41 = vld [vmem:[%s9376_s12 + $0x1824] ss:$16 sps:$4 sm:$0xff]   ;;  %v8934_v42 = vld [vmem:[%s9376_s12 + $0x182c] ss:$16 sps:$4 sm:$0xff]  }
 0x354   : > { %5607 = vmatprep.subr.bf16.mxu0 %v8839_v43  ;;  %6140 = vmatprep.subr.bf16.mxu1 %v8842_v44  ;;  %v8929_v43 = vld [vmem:[%s9376_s12 + $0x1820] ss:$16 sps:$4 sm:$0xff]   ;;  %v8937_v44 = vld [vmem:[%s9376_s12 + $0x1844] ss:$16 sps:$4 sm:$0xff]  }
 0x357   : > { %5608 = vmatpush1.bf16.msra.mxu0 %v8837_v45  ;;  %6141 = vmatpush1.bf16.msra.mxu1 %v8840_v46  ;;  %v8940_v45 = vld [vmem:[%s9376_s12 + $0x184c] ss:$16 sps:$4 sm:$0xff]   ;;  %v9151_v46 = vmov 0  }
 0x358   : > { %5609 = vmatprep.subr.bf16.mxu0 %v8845_v47  ;;  %6142 = vmatprep.subr.bf16.mxu1 %v8848_v48  ;;  %v8935_v47 = vld [vmem:[%s9376_s12 + $0x1840] ss:$16 sps:$4 sm:$0xff]   ;;  %v8938_v48 = vld [vmem:[%s9376_s12 + $0x1848] ss:$16 sps:$4 sm:$0xff]  }
 0x35b   : > { %5610 = vmatpush1.bf16.msra.mxu0 %v8843_v49  ;;  %6143 = vmatpush1.bf16.msra.mxu1 %v8846_v50  ;;  %v8943_v49 = vld [vmem:[%s9376_s12 + $0x1864] ss:$16 sps:$4 sm:$0xff]   ;;  %v8946_v50 = vld [vmem:[%s9376_s12 + $0x186c] ss:$16 sps:$4 sm:$0xff]  }
 0x35c   : > { %5611 = vmatprep.subr.bf16.mxu0 %v8851_v51  ;;  %6144 = vmatprep.subr.bf16.mxu1 %v8854_v52  ;;  %v8941_v51 = vld [vmem:[%s9376_s12 + $0x1860] ss:$16 sps:$4 sm:$0xff]   ;;  %v8944_v52 = vld [vmem:[%s9376_s12 + $0x1868] ss:$16 sps:$4 sm:$0xff]  }
 0x35f   : > { %5612 = vmatpush1.bf16.msra.mxu0 %v8849_v53  ;;  %6145 = vmatpush1.bf16.msra.mxu1 %v8852_v54  ;;  %v8948_v53 = vld [vmem:[%s9389_s30 + $0x40] sm:$0xff]  }
 0x360   : > { %5613 = vmatprep.subr.bf16.mxu0 %v8857_v55  ;;  %6146 = vmatprep.subr.bf16.mxu1 %v8860_v56  ;;  %v8949_v54 = vld [vmem:[%s9389_s30 + $0xc0] sm:$0xff]   ;;  %v8947_v55 = vld [vmem:[%s10341_s0 + $0x60] ss:$0 sps:$4 sm:$0xff]  }
 0x361   : > { %v8950_v56 = vld [vmem:[%s9389_s30] sm:$0xff]  }
 0x363   : > { %5614 = vmatpush1.bf16.msra.mxu0 %v8855_v57  ;;  %6147 = vmatpush1.bf16.msra.mxu1 %v8858_v58  ;;  %v8951_v57 = vld [vmem:[%s9389_s30 + $0x80] sm:$0xff]   ;;  %v8952_v58 = vld [vmem:[%s9389_s30 + $0x48] sm:$0xff]  }
 0x364   : > { %5615 = vmatprep.subr.bf16.mxu0 %v8863_v59  ;;  %6148 = vmatprep.subr.bf16.mxu1 %v8866_v60  ;;  %v8953_v59 = vld [vmem:[%s9389_s30 + $0xc8] sm:$0xff]  }
 0x365   : > { %v8954_v60 = vld [vmem:[%s9389_s30 + $0x8] sm:$0xff]  }
 0x367   : > { %5616 = vmatpush1.bf16.msra.mxu0 %v8861_v61  ;;  %6149 = vmatpush1.bf16.msra.mxu1 %v8864_v62  ;;  %v8955_v61 = vld [vmem:[%s9389_s30 + $0x88] sm:$0xff]   ;;  %v8956_v62 = vld [vmem:[%s9389_s30 + $0x50] sm:$0xff]  }
 0x368   : > { %5617 = vmatprep.subr.bf16.mxu0 %v8869_v63  ;;  %6150 = vmatprep.subr.bf16.mxu1 %v8872_v0  ;;  %v8957_v63 = vld [vmem:[%s9389_s30 + $0xd0] sm:$0xff]  }
 0x369   : > { %v8958_v0 = vld [vmem:[%s9389_s30 + $0x10] sm:$0xff]  }
 0x36b   : > { %5618 = vmatpush1.bf16.msra.mxu0 %v8867_v1  ;;  %6151 = vmatpush1.bf16.msra.mxu1 %v8870_v2  ;;  %v8959_v1 = vld [vmem:[%s9389_s30 + $0x90] sm:$0xff]   ;;  %v8960_v2 = vld [vmem:[%s9389_s30 + $0x58] sm:$0xff]  }
 0x36c   : > { %5619 = vmatprep.subr.bf16.mxu0 %v8875_v3  ;;  %6152 = vmatprep.subr.bf16.mxu1 %v8878_v4  ;;  %v8961_v3 = vld [vmem:[%s9389_s30 + $0xd8] sm:$0xff]  }
 0x36d   : > { %v8962_v4 = vld [vmem:[%s9389_s30 + $0x18] sm:$0xff]  }
 0x36f   : > { %5620 = vmatpush1.bf16.msra.mxu0 %v8873_v5  ;;  %6153 = vmatpush1.bf16.msra.mxu1 %v8876_v6  ;;  %v8963_v5 = vld [vmem:[%s9389_s30 + $0x98] sm:$0xff]   ;;  %v8964_v6 = vld [vmem:[%s9389_s30 + $0x60] sm:$0xff]  }
 0x370   : > { %5621 = vmatprep.subr.bf16.mxu0 %v8881_v7  ;;  %6154 = vmatprep.subr.bf16.mxu1 %v8884_v8  ;;  %v8965_v7 = vld [vmem:[%s9389_s30 + $0xe0] sm:$0xff]  }
 0x371   : > { %v8966_v8 = vld [vmem:[%s9389_s30 + $0x20] sm:$0xff]  }
 0x373   : > { %5622 = vmatpush1.bf16.msra.mxu0 %v8879_v9  ;;  %6155 = vmatpush1.bf16.msra.mxu1 %v8882_v10  ;;  %v8967_v9 = vld [vmem:[%s9389_s30 + $0xa0] sm:$0xff]   ;;  %v8968_v10 = vld [vmem:[%s9389_s30 + $0x68] sm:$0xff]  }
 0x374   : > { %5623 = vmatprep.subr.bf16.mxu0 %v8887_v12  ;;  %6156 = vmatprep.subr.bf16.mxu1 %v8890_v13  ;;  %v8969_v12 = vld [vmem:[%s9389_s30 + $0xe8] sm:$0xff]  }
 0x375   : > { %v8970_v13 = vld [vmem:[%s9389_s30 + $0x28] sm:$0xff]  }
 0x377   : > { %5624 = vmatpush1.bf16.msra.mxu0 %v8885_v15  ;;  %6157 = vmatpush1.bf16.msra.mxu1 %v8888_v16  ;;  %v8971_v15 = vld [vmem:[%s9389_s30 + $0xa8] sm:$0xff]   ;;  %v8972_v16 = vld [vmem:[%s9389_s30 + $0x70] sm:$0xff]  }
 0x378   : > { %5625 = vmatprep.subr.bf16.mxu0 %v8893_v11  ;;  %6158 = vmatprep.subr.bf16.mxu1 %v8896_v19  ;;  %v8973_v11 = vld [vmem:[%s9389_s30 + $0xf0] sm:$0xff]  }
 0x379   : > { %v8974_v19 = vld [vmem:[%s9389_s30 + $0x30] sm:$0xff]  }
 0x37b   : > { %5626 = vmatpush1.bf16.msra.mxu0 %v8891_v20  ;;  %6159 = vmatpush1.bf16.msra.mxu1 %v8894_v14  ;;  %v8975_v20 = vld [vmem:[%s9389_s30 + $0xb0] sm:$0xff]   ;;  %v8976_v14 = vld [vmem:[%s9389_s30 + $0x78] sm:$0xff]  }
 0x37c   : > { %5627 = vmatprep.subr.bf16.mxu0 %v8899_v22  ;;  %6160 = vmatprep.subr.bf16.mxu1 %v8902_v23  ;;  %v8977_v22 = vld [vmem:[%s9389_s30 + $0xf8] sm:$0xff]  }
 0x37d   : > { %v8978_v23 = vld [vmem:[%s9389_s30 + $0x38] sm:$0xff]  }
 0x37f   : > { %5628 = vmatpush1.bf16.msra.mxu0 %v8897_v17  ;;  %6161 = vmatpush1.bf16.msra.mxu1 %v8900_v25  ;;  %v8979_v17 = vld [vmem:[%s9389_s30 + $0xb8] sm:$0xff]   ;;  %v1121_v25 = vlaneseq }
 0x380   : > { %5629 = vmatprep.subr.bf16.mxu0 %v8905_v26  ;;  %6162 = vmatprep.subr.bf16.mxu1 %v8908_v18 }
 0x381   : > { %v1122_v26 = vshrl.u32 %v1121_v25, 7 }
 0x383   : > { %5630 = vmatpush1.bf16.msra.mxu0 %v8903_v27  ;;  %6163 = vmatpush1.bf16.msra.mxu1 %v8906_v29  ;;  %v1123_v18 = vsub.s32 0, %v1122_v26  ;;  %v1131_v27 = vsub.s32 2, %v1122_v26  ;;  %v1119_v29 = vld [vmem:[%s9383_s18] sm:$0xf] }
 0x384   : > { %5631 = vmatprep.subr.bf16.mxu0 %v8911_v21  ;;  %6164 = vmatprep.subr.bf16.mxu1 %v8914_v30  ;;  %v1127_v21 = vsub.s32 1, %v1122_v26  ;;  %v1135_v30 = vsub.s32 3, %v1122_v26 }
 0x387   : > { %5632 = vmatpush1.bf16.msra.mxu0 %v8909_v24  ;;  %6165 = vmatpush1.bf16.msra.mxu1 %v8912_v32  ;;  %v1124_v24 = vrot.slane %v1119_v29, %v1123_v18  ;;  %v1132_v32 = vrot.slane %v1119_v29, %v1131_v27 }
 0x388   : > { %5633 = vmatprep.subr.bf16.mxu0 %v8917_v33  ;;  %6166 = vmatprep.subr.bf16.mxu1 %v8920_v28  ;;  %v1128_v33 = vrot.slane %v1119_v29, %v1127_v21  ;;  %v1136_v28 = vrot.slane %v1119_v29, %v1135_v30 }
 0x38b   : > { %5634 = vmatpush1.bf16.msra.mxu0 %v8915_v35  ;;  %6167 = vmatpush1.bf16.msra.mxu1 %v8918_v36 }
 0x38c   : > { %5644 = vmatprep.subr.bf16.mxu0 %v8925_v31  ;;  %6177 = vmatprep.subr.bf16.mxu1 %v8928_v38 }
 0x38e   : > { %5636 = vmatmul.mubr.bf16.vlgmr.msra.gmra.mrb[0].mxu0 %v6707_v39  ;;  %6169 = vmatmul.mubr.bf16.vlgmr.msra.gmra.mrb[0].mxu1 %v6707_v39 }
 0x38f   : > { %5645 = vmatpush1.bf16.msra.mxu0 %v8923_v40  ;;  %6178 = vmatpush1.bf16.msra.mxu1 %v8926_v34 }
 0x390   : > { %5646 = vmatprep.subr.bf16.mxu0 %v8931_v41  ;;  %6179 = vmatprep.subr.bf16.mxu1 %v8934_v42 }
 0x391   : > { %5676 = vmatprep.mubr.bf16.mxu0 %v9151_v46  ;;  %6209 = vmatprep.mubr.bf16.mxu1 %v9151_v46 }
 0x393   : > { %5647 = vmatpush1.bf16.msra.mxu0 %v8929_v43  ;;  %6180 = vmatpush1.bf16.msra.mxu1 %v8932_v37 }
 0x394   : > { %5648 = vmatprep.subr.bf16.mxu0 %v8937_v44  ;;  %6181 = vmatprep.subr.bf16.mxu1 %v8940_v45 }
 0x397   : > { %5649 = vmatpush1.bf16.msra.mxu0 %v8935_v47  ;;  %6182 = vmatpush1.bf16.msra.mxu1 %v8938_v48 }
 0x398   : > { %5650 = vmatprep.subr.bf16.mxu0 %v8943_v49  ;;  %6183 = vmatprep.subr.bf16.mxu1 %v8946_v50 }
 0x39b   : > { %5651 = vmatpush1.bf16.msra.mxu0 %v8941_v51  ;;  %6184 = vmatpush1.bf16.msra.mxu1 %v8944_v52 }
 0x39c   : > { %7535 = vmatprep.subr.bf16.mxu0 %v8948_v53  ;;  %7557 = vmatprep.subr.bf16.mxu1 %v8949_v54 }
 0x39e   : > { %7494 = vmatmul.mubr.msk.bf16.vlgmr.msra.gmra.mrb[0].mxu0 %vm5148_vm0, %v8947_v55  ;;  %7495 = vmatmul.mubr.msk.bf16.vlgmr.msra.gmra.mrb[0].mxu1 %vm5148_vm0, %v8947_v55 }
 0x39f   : > { %7536 = vmatpush3.bf16.msra.mxu0 %v8950_v56  ;;  %7558 = vmatpush3.bf16.msra.mxu1 %v8951_v57 }
 0x3a0   : > { %7537 = vmatprep.subr.bf16.mxu0 %v8952_v58  ;;  %7559 = vmatprep.subr.bf16.mxu1 %v8953_v59 }
 0x3a3   : > { %7538 = vmatpush3.bf16.msra.mxu0 %v8954_v60  ;;  %7560 = vmatpush3.bf16.msra.mxu1 %v8955_v61 }
 0x3a4   : > { %7539 = vmatprep.subr.bf16.mxu0 %v8956_v62  ;;  %7561 = vmatprep.subr.bf16.mxu1 %v8957_v63 }
 0x3a7   : > { %7540 = vmatpush3.bf16.msra.mxu0 %v8958_v0  ;;  %7562 = vmatpush3.bf16.msra.mxu1 %v8959_v1  ;;  %v7529_v0 = vld [vmem:[#allocation7] ss:$0 sm:$0xff] (!%p10368_p13) }
 0x3a8   : > { %7541 = vmatprep.subr.bf16.mxu0 %v8960_v2  ;;  %7563 = vmatprep.subr.bf16.mxu1 %v8961_v3  ;;  %6573 = vst [vmem:[%s10346_s5] sm:$0xff] (!%p10368_p13), %v7529_v0 }
 0x3ab   : > { %7542 = vmatpush3.bf16.msra.mxu0 %v8962_v4  ;;  %7564 = vmatpush3.bf16.msra.mxu1 %v8963_v5 }
 0x3ac   : > { %7543 = vmatprep.subr.bf16.mxu0 %v8964_v6  ;;  %7565 = vmatprep.subr.bf16.mxu1 %v8965_v7 }
 0x3af   : > { %7544 = vmatpush3.bf16.msra.mxu0 %v8966_v8  ;;  %7566 = vmatpush3.bf16.msra.mxu1 %v8967_v9 }
 0x3b0   : > { %7545 = vmatprep.subr.bf16.mxu0 %v8968_v10  ;;  %7567 = vmatprep.subr.bf16.mxu1 %v8969_v12 }
 0x3b3   : > { %7546 = vmatpush3.bf16.msra.mxu0 %v8970_v13  ;;  %7568 = vmatpush3.bf16.msra.mxu1 %v8971_v15 }
 0x3b4   : > { %7547 = vmatprep.subr.bf16.mxu0 %v8972_v16  ;;  %7569 = vmatprep.subr.bf16.mxu1 %v8973_v11 }
 0x3b7   : > { %7548 = vmatpush3.bf16.msra.mxu0 %v8974_v19  ;;  %7570 = vmatpush3.bf16.msra.mxu1 %v8975_v20 }
 0x3b8   : > { %7549 = vmatprep.subr.bf16.mxu0 %v8976_v14  ;;  %7571 = vmatprep.subr.bf16.mxu1 %v8977_v22 }
 0x3bb   : > { %7550 = vmatpush3.bf16.msra.mxu0 %v8978_v23  ;;  %7572 = vmatpush3.bf16.msra.mxu1 %v8979_v17 }
 0x471   : > { %v5678_v35 = vpop.f32.mrb[0].mxu0  ;;  %v6211_v36 = vpop.f32.mrb[0].mxu1 }
 0x472   : > { %v7579_v31 = vadd.f32 %v5678_v35, %v1124_v24  ;;  %v7581_v38 = vadd.f32 %v6211_v36, %v1132_v32  ;;  %v5680_v39 = vpop.f32.mrb[1].mxu0  ;;  %v6213_v40 = vpop.f32.mrb[1].mxu1 }
 0x473   : > { %v7580_v34 = vadd.f32 %v5680_v39, %v1128_v33  ;;  %v7582_v41 = vadd.f32 %v6213_v40, %v1136_v28  ;;  %v5682_v42 = vpop.f32.mrb[2].mxu0  ;;  %v6215_v43 = vpop.f32.mrb[2].mxu1 }
 0x474   : > { %v6218_v37 = vmax.f32 %v7579_v31, 0.0  ;;  %v6220_v44 = vmax.f32 %v7581_v38, 0.0  ;;  %v5683_v45 = vpop.f32.mrb[3].mxu0  ;;  %v6216_v46 = vpop.f32.mrb[3].mxu1 }
 0x475   : > { %v6219_v47 = vmax.f32 %v7580_v34, 0.0  ;;  %v6221_v48 = vmax.f32 %v7582_v41, 0.0 }
 0x476   : > { %v6222_v51 = vpack.c.bf16 %v6218_v37, %v6218_v37  ;;  %v6224_v52 = vpack.c.bf16 %v6220_v44, %v6220_v44 }
 0x477   : > { %v6223_v49 = vpack.c.bf16 %v6219_v47, %v6219_v47  ;;  %v6225_v50 = vpack.c.bf16 %v6221_v48, %v6221_v48 }
 0x479   : > { %6514 = vmatprep.mubr.bf16.mxu0 %v6223_v49  ;;  %6554 = vmatprep.mubr.bf16.mxu1 %v6225_v50 }
 0x47a   : > { %6515 = vmatmul.mubr.bf16.vlgmr.msra.gmra.mrb[4].mxu0 %v6222_v51  ;;  %6555 = vmatmul.mubr.bf16.vlgmr.msra.gmra.mrb[4].mxu1 %v6224_v52 }
 0x54b   : > { %6565 = sbr.rel (%p10368_p13) target bundleno = 1362 (0x552), region = 60 }
 0x54d   : > { %v7551_v53 = vpop.f32.mrb[4].mxu0  ;;  %v7573_v54 = vpop.f32.mrb[4].mxu1 }
 0x54e   : > { %v7552_v55 = vpop.f32.mrb[5].mxu0  ;;  %v7574_v56 = vpop.f32.mrb[5].mxu1 }
 0x54f   : > { %v7553_v57 = vadd.f32 %v7552_v55, %v7551_v53  ;;  %v7575_v58 = vadd.f32 %v7574_v56, %v7573_v54  ;;  %v7554_v59 = vpop.f32.mrb[6].mxu0  ;;  %v7576_v60 = vpop.f32.mrb[6].mxu1 }
 0x550   : > { %v7555_v61 = vpop.f32.mrb[7].mxu0  ;;  %v7577_v62 = vpop.f32.mrb[7].mxu1 }
 0x551   : > { %v6557_v63 = vadd.f32 %v7575_v58, %v7553_v57 }
 0x552 PF: > { %v6574_v1 = vld [vmem:[%s10346_s5] sm:$0xff] }
 0x553   : > { %v6575_v2 = vadd.f32 %v6574_v1, %v6557_v63 }
 0x555   : > { %6576 = vst [vmem:[%s10346_s5] sm:$0xff] %v6575_v2 }
 0x556 PF: > { %p19_p0 = scmp.ge.s32.totalorder %s9203_s22, 4   ;;  %s10369_s18 = smov %s9132_s19 }
 0x557   : > { %s10370_s19 = smov %s9136_s20  ;;  %s10371_s20 = smov %s9213_s25 }
 0x558   : > { %s10372_s21 = smov %s9203_s22  ;;  %21 = sbr.rel (!%p19_p0) target bundleno = 8 (0x8), region = 108 }
 0x55f   :  { %6588 = vsyncpa [#allocation3], 1 }
 0x560   :  { %6590 = vsyncpa [#allocation3 + $0x1], 1 }
 0x561   :  { %6591 = vsyncpa [#allocation5], 1 }
 0x562   :  { %6593 = vsyncpa [#allocation5 + $0x1], 1 }
 0x563   :  { %6594 = vsyncpa [#allocation8], 1 }

</bundles_post_ra>
